<compile_context>
chip_gen: v5e
topology: v5e:2x2
jax: 0.10.0
libtpu: 0.0.40
codegen_flags: <defaults>
</compile_context>

<pallas_src>
import jax
import jax.numpy as jnp
from jax.experimental import pallas as pl
from jax.experimental.pallas import tpu as pltpu


# ----------------------------------------------------------------------------
# Pallas kernels
# ----------------------------------------------------------------------------

def _conv_relu_pool_kernel(a00_ref, a01_ref, a10_ref, a11_ref, w_ref, b_ref,
                           o_ref):
    """Fused conv-as-matmul + bias + ReLU + 2x2 max-pool.

    a{j}{v}_ref : (tm, K) im2col patches for conv output position
                  (2p + j, 2u + v) of pooled pixel (row p, col u).
    w_ref : (K, outc)   b_ref : (1, outc)   o_ref : (tm, outc)
    """
    w = w_ref[...]
    b = b_ref[...]

    def branch(a_ref):
        acc = jnp.dot(a_ref[...], w, preferred_element_type=jnp.float32)
        return jnp.maximum(acc + b, 0.0)

    pooled = jnp.maximum(jnp.maximum(branch(a00_ref), branch(a01_ref)),
                         jnp.maximum(branch(a10_ref), branch(a11_ref)))
    o_ref[...] = pooled.astype(o_ref.dtype)


def _mlp_head_kernel(x_ref, w1_ref, b1_ref, w2_ref, b2_ref, o_ref):
    """Fused Linear + ReLU + Linear; both weights resident in VMEM."""
    h = jnp.dot(x_ref[...], w1_ref[...], preferred_element_type=jnp.float32)
    h = jnp.maximum(h + b1_ref[...], 0.0)
    o = jnp.dot(h, w2_ref[...], preferred_element_type=jnp.float32)
    o_ref[...] = (o + b2_ref[...]).astype(o_ref.dtype)


# ----------------------------------------------------------------------------
# Host-side glue (pure pad / static slice / reshape) + pallas_call wrappers
# ----------------------------------------------------------------------------

def _pooled_im2col_quadrants(x, k, pad):
    """NHWC im2col, one patch matrix per 2x2-pool position.

    Returns 4 arrays A[j*2+v] of shape (N*(H//2)*(W//2), k*k*C) where row
    (n, p, u) of A[j*2+v] is the conv patch for output position (2p+j, 2u+v);
    feature order is (ky, kx, c).
    """
    N, H, W, C = x.shape
    xp = jnp.pad(x, ((0, 0), (pad, pad), (pad, pad), (0, 0)))
    H2, W2 = H // 2, W // 2
    quads = []
    for j in range(2):          # conv-row parity inside the pool window
        for v in range(2):      # conv-col parity inside the pool window
            cols = [xp[:, j + ky: j + ky + H: 2, v + kx: v + kx + W: 2, :]
                    for ky in range(k) for kx in range(k)]
            q = jnp.concatenate(cols, axis=-1)        # (N, H2, W2, k*k*C)
            quads.append(q.reshape(N * H2 * W2, k * k * C))
    return quads


def conv_relu_pool(x_nhwc, w, b):
    """Conv2d('same', stride 1) + ReLU + MaxPool2d(2) on NHWC activations.

    x_nhwc : (N, H, W, C) f32,  w : (O, C, k, k) f32 (PyTorch layout),  b : (O,)
    returns (N, H//2, W//2, O) f32
    """
    N, H, W, C = x_nhwc.shape
    O, _, k, _ = w.shape
    pad = k // 2
    H2, W2 = H // 2, W // 2
    K = k * k * C
    M2 = N * H2 * W2                           # number of pooled output pixels

    quads = _pooled_im2col_quadrants(x_nhwc, k, pad)
    w2 = w.transpose(2, 3, 1, 0).reshape(K, O)     # feature order (ky, kx, c)

    # Large row tiles, grid >= 2 (megacore): 4 / 2 / 2 steps for the 3 stages.
    n_steps = 4 if M2 >= 2048 else 2
    tm = M2 // n_steps
    assert M2 % n_steps == 0 and tm % 8 == 0

    patch_spec = pl.BlockSpec((tm, K), lambda i: (i, 0))
    out = pl.pallas_call(
        _conv_relu_pool_kernel,
        out_shape=jax.ShapeDtypeStruct((M2, O), jnp.float32),
        grid=(n_steps,),
        in_specs=[patch_spec, patch_spec, patch_spec, patch_spec,
                  pl.BlockSpec((K, O), lambda i: (0, 0)),
                  pl.BlockSpec((1, O), lambda i: (0, 0))],
        out_specs=pl.BlockSpec((tm, O), lambda i: (i, 0)),
        compiler_params=pltpu.CompilerParams(
            dimension_semantics=("parallel",)),
    )(*quads, w2, b.reshape(1, O))
    return out.reshape(N, H2, W2, O)


def mlp_head(x, w1, b1, w2, b2):
    """relu(x @ w1 + b1) @ w2 + b2 as a single Pallas call (weights in VMEM)."""
    N = x.shape[0]
    return pl.pallas_call(
        _mlp_head_kernel,
        out_shape=jax.ShapeDtypeStruct((N, w2.shape[1]), jnp.float32),
    )(x, w1, b1.reshape(1, -1), w2, b2.reshape(1, -1))


def lenet_relu_forward(x_nchw, params):
    x = jnp.transpose(x_nchw, (0, 2, 3, 1))                    # NCHW -> NHWC once
    y = conv_relu_pool(x, params["w_c1"], params["b_c1"])      # (N, 32, 32, 6)
    y = conv_relu_pool(y, params["w_c2"], params["b_c2"])      # (N, 16, 16, 12)
    y = conv_relu_pool(y, params["w_c3"], params["b_c3"])      # (N,  8,  8, 24)
    N, H2, W2, C = y.shape
    flat = y.reshape(N, H2 * W2 * C)                           # NHWC flatten
    # Permute Linear-1 rows from PyTorch NCHW-flatten order (c, h, w) to the
    # NHWC-flatten order (h, w, c) used above -> numerically identical module.
    w1 = params["w_l1"].reshape(C, H2, W2, -1).transpose(1, 2, 0, 3)
    w1 = w1.reshape(C * H2 * W2, -1)
    return mlp_head(flat, w1, params["b_l1"], params["w_l2"], params["b_l2"])


# ----------------------------------------------------------------------------
# Parameter init (matches the PyTorch module's initialization scheme)
# ----------------------------------------------------------------------------

def init_params(key):
    ks = jax.random.split(key, 8)

    def conv_init(kw, kb, shape):
        fan_in = shape[1] * shape[2] * shape[3]
        bound = 1.0 / jnp.sqrt(jnp.float32(fan_in))
        w = jax.random.uniform(kw, shape, jnp.float32, -bound, bound)
        b = jax.random.uniform(kb, (shape[0],), jnp.float32, -bound, bound)
        return w, b

    def xavier_normal(k, fan_in, fan_out):
        std = jnp.sqrt(2.0 / jnp.float32(fan_in + fan_out))
        # stored as (in, out) so forward is x @ w
        return std * jax.random.normal(k, (fan_in, fan_out), jnp.float32)

    w_c1, b_c1 = conv_init(ks[0], ks[1], (6, 3, 7, 7))
    w_c2, b_c2 = conv_init(ks[2], ks[3], (12, 6, 5, 5))
    w_c3, b_c3 = conv_init(ks[4], ks[5], (24, 12, 3, 3))
    w_l1 = xavier_normal(ks[6], 8 * 8 * 24, 4 * 4 * 24)
    b_l1 = jnp.zeros((4 * 4 * 24,), jnp.float32)
    w_l2 = xavier_normal(ks[7], 4 * 4 * 24, 23)
    b_l2 = jnp.zeros((23,), jnp.float32)
    return dict(w_c1=w_c1, b_c1=b_c1, w_c2=w_c2, b_c2=b_c2,
                w_c3=w_c3, b_c3=b_c3, w_l1=w_l1, b_l1=b_l1,
                w_l2=w_l2, b_l2=b_l2)


if __name__ == "__main__":
    key = jax.random.PRNGKey(0)
    pkey, xkey = jax.random.split(key)
    params = init_params(pkey)
    # Architecture requires 64x64 spatial (3 pools of 2 -> 8x8 into the
    # 1536-wide Linear).  Batch kept small.
    x = jax.random.normal(xkey, (2, 3, 64, 64), jnp.float32)
    fwd = jax.jit(lenet_relu_forward)
    out = jax.block_until_ready(fwd(x, params))
    assert out.shape == (2, 23) and out.dtype == jnp.float32
    print("KERNEL_OK")
</pallas_src>

<mosaic_0001>
module attributes {stable_mosaic.version = 11 : i64} {
  func.func @_conv_relu_pool_kernel(%arg0: i32, %arg1: memref<512x147xf32, #tpu.memory_space<vmem>>, %arg2: memref<512x147xf32, #tpu.memory_space<vmem>>, %arg3: memref<512x147xf32, #tpu.memory_space<vmem>>, %arg4: memref<512x147xf32, #tpu.memory_space<vmem>>, %arg5: memref<147x6xf32, #tpu.memory_space<vmem>>, %arg6: memref<1x6xf32, #tpu.memory_space<vmem>>, %arg7: memref<512x6xf32, #tpu.memory_space<vmem>>) attributes {dimension_semantics = [#tpu.dimension_semantics<parallel>], iteration_bounds = array<i64: 4>, scalar_prefetch = 0 : i64, scratch_operands = 0 : i64, tpu.core_type = #tpu.core_type<tc>, window_params = [{transform_indices = @transform_0, window_bounds = array<i64: 512, 147>}, {transform_indices = @transform_1, window_bounds = array<i64: 512, 147>}, {transform_indices = @transform_2, window_bounds = array<i64: 512, 147>}, {transform_indices = @transform_3, window_bounds = array<i64: 512, 147>}, {pipeline_mode = #tpu.pipeline_mode<synchronous>, transform_indices = @transform_4, window_bounds = array<i64: 147, 6>}, {pipeline_mode = #tpu.pipeline_mode<synchronous>, transform_indices = @transform_5, window_bounds = array<i64: 1, 6>}, {transform_indices = @transform_6, window_bounds = array<i64: 512, 6>}]} {
    %c0 = arith.constant 0 : index
    %c0_0 = arith.constant 0 : index
    %0 = vector.load %arg5[%c0, %c0_0] : memref<147x6xf32, #tpu.memory_space<vmem>>, vector<147x6xf32>
    %c0_1 = arith.constant 0 : index
    %c0_2 = arith.constant 0 : index
    %1 = vector.load %arg6[%c0_1, %c0_2] : memref<1x6xf32, #tpu.memory_space<vmem>>, vector<1x6xf32>
    %c0_3 = arith.constant 0 : index
    %c0_4 = arith.constant 0 : index
    %2 = vector.load %arg1[%c0_3, %c0_4] : memref<512x147xf32, #tpu.memory_space<vmem>>, vector<512x147xf32>
    %cst = arith.constant dense<0.000000e+00> : vector<512x6xf32>
    %3 = tpu.matmul %2, %0, %cst {dimension_numbers = #tpu.dot_dimension_numbers<[1], [0], [0], [1], [0, 0, 1, 1], [], []>} : vector<512x147xf32>, vector<147x6xf32>, vector<512x6xf32> -> vector<512x6xf32>
    %4 = vector.broadcast %1 : vector<1x6xf32> to vector<512x6xf32>
    %5 = arith.addf %3, %4 : vector<512x6xf32>
    %cst_5 = arith.constant 0.000000e+00 : f32
    %6 = vector.broadcast %cst_5 : f32 to vector<512x6xf32>
    %7 = arith.maximumf %5, %6 : vector<512x6xf32>
    %c0_6 = arith.constant 0 : index
    %c0_7 = arith.constant 0 : index
    %8 = vector.load %arg2[%c0_6, %c0_7] : memref<512x147xf32, #tpu.memory_space<vmem>>, vector<512x147xf32>
    %cst_8 = arith.constant dense<0.000000e+00> : vector<512x6xf32>
    %9 = tpu.matmul %8, %0, %cst_8 {dimension_numbers = #tpu.dot_dimension_numbers<[1], [0], [0], [1], [0, 0, 1, 1], [], []>} : vector<512x147xf32>, vector<147x6xf32>, vector<512x6xf32> -> vector<512x6xf32>
    %10 = vector.broadcast %1 : vector<1x6xf32> to vector<512x6xf32>
    %11 = arith.addf %9, %10 : vector<512x6xf32>
    %cst_9 = arith.constant 0.000000e+00 : f32
    %12 = vector.broadcast %cst_9 : f32 to vector<512x6xf32>
    %13 = arith.maximumf %11, %12 : vector<512x6xf32>
    %14 = arith.maximumf %7, %13 : vector<512x6xf32>
    %c0_10 = arith.constant 0 : index
    %c0_11 = arith.constant 0 : index
    %15 = vector.load %arg3[%c0_10, %c0_11] : memref<512x147xf32, #tpu.memory_space<vmem>>, vector<512x147xf32>
    %cst_12 = arith.constant dense<0.000000e+00> : vector<512x6xf32>
    %16 = tpu.matmul %15, %0, %cst_12 {dimension_numbers = #tpu.dot_dimension_numbers<[1], [0], [0], [1], [0, 0, 1, 1], [], []>} : vector<512x147xf32>, vector<147x6xf32>, vector<512x6xf32> -> vector<512x6xf32>
    %17 = vector.broadcast %1 : vector<1x6xf32> to vector<512x6xf32>
    %18 = arith.addf %16, %17 : vector<512x6xf32>
    %cst_13 = arith.constant 0.000000e+00 : f32
    %19 = vector.broadcast %cst_13 : f32 to vector<512x6xf32>
    %20 = arith.maximumf %18, %19 : vector<512x6xf32>
    %c0_14 = arith.constant 0 : index
    %c0_15 = arith.constant 0 : index
    %21 = vector.load %arg4[%c0_14, %c0_15] : memref<512x147xf32, #tpu.memory_space<vmem>>, vector<512x147xf32>
    %cst_16 = arith.constant dense<0.000000e+00> : vector<512x6xf32>
    %22 = tpu.matmul %21, %0, %cst_16 {dimension_numbers = #tpu.dot_dimension_numbers<[1], [0], [0], [1], [0, 0, 1, 1], [], []>} : vector<512x147xf32>, vector<147x6xf32>, vector<512x6xf32> -> vector<512x6xf32>
    %23 = vector.broadcast %1 : vector<1x6xf32> to vector<512x6xf32>
    %24 = arith.addf %22, %23 : vector<512x6xf32>
    %cst_17 = arith.constant 0.000000e+00 : f32
    %25 = vector.broadcast %cst_17 : f32 to vector<512x6xf32>
    %26 = arith.maximumf %24, %25 : vector<512x6xf32>
    %27 = arith.maximumf %20, %26 : vector<512x6xf32>
    %28 = arith.maximumf %14, %27 : vector<512x6xf32>
    %c0_18 = arith.constant 0 : index
    %c0_19 = arith.constant 0 : index
    %29 = vector.load %arg7[%c0_18, %c0_19] : memref<512x6xf32, #tpu.memory_space<vmem>>, vector<512x6xf32>
    tpu.vector_store %arg7[%c0_18, %c0_19], %28 {strides = array<i32>} : memref<512x6xf32, #tpu.memory_space<vmem>>, vector<512x6xf32>,
    return
  }
  func.func @transform_0(%arg0: i32) -> (i32, i32) {
    %c0_i32 = arith.constant 0 : i32
    %c0_i32_0 = arith.constant 0 : i32
    return %arg0, %c0_i32 : i32, i32
  }
  func.func @transform_1(%arg0: i32) -> (i32, i32) {
    %c0_i32 = arith.constant 0 : i32
    %c0_i32_0 = arith.constant 0 : i32
    return %arg0, %c0_i32 : i32, i32
  }
  func.func @transform_2(%arg0: i32) -> (i32, i32) {
    %c0_i32 = arith.constant 0 : i32
    %c0_i32_0 = arith.constant 0 : i32
    return %arg0, %c0_i32 : i32, i32
  }
  func.func @transform_3(%arg0: i32) -> (i32, i32) {
    %c0_i32 = arith.constant 0 : i32
    %c0_i32_0 = arith.constant 0 : i32
    return %arg0, %c0_i32 : i32, i32
  }
  func.func @transform_4(%arg0: i32) -> (i32, i32) {
    %c0_i32 = arith.constant 0 : i32
    %c0_i32_0 = arith.constant 0 : i32
    %c0_i32_1 = arith.constant 0 : i32
    return %c0_i32, %c0_i32_0 : i32, i32
  }
  func.func @transform_5(%arg0: i32) -> (i32, i32) {
    %c0_i32 = arith.constant 0 : i32
    %c0_i32_0 = arith.constant 0 : i32
    %c0_i32_1 = arith.constant 0 : i32
    return %c0_i32, %c0_i32_0 : i32, i32
  }
  func.func @transform_6(%arg0: i32) -> (i32, i32) {
    %c0_i32 = arith.constant 0 : i32
    %c0_i32_0 = arith.constant 0 : i32
    return %arg0, %c0_i32 : i32, i32
  }
}

module attributes {stable_mosaic.version = 11 : i64} {
  func.func @_conv_relu_pool_kernel(%arg0: i32, %arg1: memref<256x150xf32, #tpu.memory_space<vmem>>, %arg2: memref<256x150xf32, #tpu.memory_space<vmem>>, %arg3: memref<256x150xf32, #tpu.memory_space<vmem>>, %arg4: memref<256x150xf32, #tpu.memory_space<vmem>>, %arg5: memref<150x12xf32, #tpu.memory_space<vmem>>, %arg6: memref<1x12xf32, #tpu.memory_space<vmem>>, %arg7: memref<256x12xf32, #tpu.memory_space<vmem>>) attributes {dimension_semantics = [#tpu.dimension_semantics<parallel>], iteration_bounds = array<i64: 2>, scalar_prefetch = 0 : i64, scratch_operands = 0 : i64, tpu.core_type = #tpu.core_type<tc>, window_params = [{transform_indices = @transform_0, window_bounds = array<i64: 256, 150>}, {transform_indices = @transform_1, window_bounds = array<i64: 256, 150>}, {transform_indices = @transform_2, window_bounds = array<i64: 256, 150>}, {transform_indices = @transform_3, window_bounds = array<i64: 256, 150>}, {pipeline_mode = #tpu.pipeline_mode<synchronous>, transform_indices = @transform_4, window_bounds = array<i64: 150, 12>}, {pipeline_mode = #tpu.pipeline_mode<synchronous>, transform_indices = @transform_5, window_bounds = array<i64: 1, 12>}, {transform_indices = @transform_6, window_bounds = array<i64: 256, 12>}]} {
    %c0 = arith.constant 0 : index
    %c0_0 = arith.constant 0 : index
    %0 = vector.load %arg5[%c0, %c0_0] : memref<150x12xf32, #tpu.memory_space<vmem>>, vector<150x12xf32>
    %c0_1 = arith.constant 0 : index
    %c0_2 = arith.constant 0 : index
    %1 = vector.load %arg6[%c0_1, %c0_2] : memref<1x12xf32, #tpu.memory_space<vmem>>, vector<1x12xf32>
    %c0_3 = arith.constant 0 : index
    %c0_4 = arith.constant 0 : index
    %2 = vector.load %arg1[%c0_3, %c0_4] : memref<256x150xf32, #tpu.memory_space<vmem>>, vector<256x150xf32>
    %cst = arith.constant dense<0.000000e+00> : vector<256x12xf32>
    %3 = tpu.matmul %2, %0, %cst {dimension_numbers = #tpu.dot_dimension_numbers<[1], [0], [0], [1], [0, 0, 1, 1], [], []>} : vector<256x150xf32>, vector<150x12xf32>, vector<256x12xf32> -> vector<256x12xf32>
    %4 = vector.broadcast %1 : vector<1x12xf32> to vector<256x12xf32>
    %5 = arith.addf %3, %4 : vector<256x12xf32>
    %cst_5 = arith.constant 0.000000e+00 : f32
    %6 = vector.broadcast %cst_5 : f32 to vector<256x12xf32>
    %7 = arith.maximumf %5, %6 : vector<256x12xf32>
    %c0_6 = arith.constant 0 : index
    %c0_7 = arith.constant 0 : index
    %8 = vector.load %arg2[%c0_6, %c0_7] : memref<256x150xf32, #tpu.memory_space<vmem>>, vector<256x150xf32>
    %cst_8 = arith.constant dense<0.000000e+00> : vector<256x12xf32>
    %9 = tpu.matmul %8, %0, %cst_8 {dimension_numbers = #tpu.dot_dimension_numbers<[1], [0], [0], [1], [0, 0, 1, 1], [], []>} : vector<256x150xf32>, vector<150x12xf32>, vector<256x12xf32> -> vector<256x12xf32>
    %10 = vector.broadcast %1 : vector<1x12xf32> to vector<256x12xf32>
    %11 = arith.addf %9, %10 : vector<256x12xf32>
    %cst_9 = arith.constant 0.000000e+00 : f32
    %12 = vector.broadcast %cst_9 : f32 to vector<256x12xf32>
    %13 = arith.maximumf %11, %12 : vector<256x12xf32>
    %14 = arith.maximumf %7, %13 : vector<256x12xf32>
    %c0_10 = arith.constant 0 : index
    %c0_11 = arith.constant 0 : index
    %15 = vector.load %arg3[%c0_10, %c0_11] : memref<256x150xf32, #tpu.memory_space<vmem>>, vector<256x150xf32>
    %cst_12 = arith.constant dense<0.000000e+00> : vector<256x12xf32>
    %16 = tpu.matmul %15, %0, %cst_12 {dimension_numbers = #tpu.dot_dimension_numbers<[1], [0], [0], [1], [0, 0, 1, 1], [], []>} : vector<256x150xf32>, vector<150x12xf32>, vector<256x12xf32> -> vector<256x12xf32>
    %17 = vector.broadcast %1 : vector<1x12xf32> to vector<256x12xf32>
    %18 = arith.addf %16, %17 : vector<256x12xf32>
    %cst_13 = arith.constant 0.000000e+00 : f32
    %19 = vector.broadcast %cst_13 : f32 to vector<256x12xf32>
    %20 = arith.maximumf %18, %19 : vector<256x12xf32>
    %c0_14 = arith.constant 0 : index
    %c0_15 = arith.constant 0 : index
    %21 = vector.load %arg4[%c0_14, %c0_15] : memref<256x150xf32, #tpu.memory_space<vmem>>, vector<256x150xf32>
    %cst_16 = arith.constant dense<0.000000e+00> : vector<256x12xf32>
    %22 = tpu.matmul %21, %0, %cst_16 {dimension_numbers = #tpu.dot_dimension_numbers<[1], [0], [0], [1], [0, 0, 1, 1], [], []>} : vector<256x150xf32>, vector<150x12xf32>, vector<256x12xf32> -> vector<256x12xf32>
    %23 = vector.broadcast %1 : vector<1x12xf32> to vector<256x12xf32>
    %24 = arith.addf %22, %23 : vector<256x12xf32>
    %cst_17 = arith.constant 0.000000e+00 : f32
    %25 = vector.broadcast %cst_17 : f32 to vector<256x12xf32>
    %26 = arith.maximumf %24, %25 : vector<256x12xf32>
    %27 = arith.maximumf %20, %26 : vector<256x12xf32>
    %28 = arith.maximumf %14, %27 : vector<256x12xf32>
    %c0_18 = arith.constant 0 : index
    %c0_19 = arith.constant 0 : index
    %29 = vector.load %arg7[%c0_18, %c0_19] : memref<256x12xf32, #tpu.memory_space<vmem>>, vector<256x12xf32>
    tpu.vector_store %arg7[%c0_18, %c0_19], %28 {strides = array<i32>} : memref<256x12xf32, #tpu.memory_space<vmem>>, vector<256x12xf32>,
    return
  }
  func.func @transform_0(%arg0: i32) -> (i32, i32) {
    %c0_i32 = arith.constant 0 : i32
    %c0_i32_0 = arith.constant 0 : i32
    return %arg0, %c0_i32 : i32, i32
  }
  func.func @transform_1(%arg0: i32) -> (i32, i32) {
    %c0_i32 = arith.constant 0 : i32
    %c0_i32_0 = arith.constant 0 : i32
    return %arg0, %c0_i32 : i32, i32
  }
  func.func @transform_2(%arg0: i32) -> (i32, i32) {
    %c0_i32 = arith.constant 0 : i32
    %c0_i32_0 = arith.constant 0 : i32
    return %arg0, %c0_i32 : i32, i32
  }
  func.func @transform_3(%arg0: i32) -> (i32, i32) {
    %c0_i32 = arith.constant 0 : i32
    %c0_i32_0 = arith.constant 0 : i32
    return %arg0, %c0_i32 : i32, i32
  }
  func.func @transform_4(%arg0: i32) -> (i32, i32) {
    %c0_i32 = arith.constant 0 : i32
    %c0_i32_0 = arith.constant 0 : i32
    %c0_i32_1 = arith.constant 0 : i32
    return %c0_i32, %c0_i32_0 : i32, i32
  }
  func.func @transform_5(%arg0: i32) -> (i32, i32) {
    %c0_i32 = arith.constant 0 : i32
    %c0_i32_0 = arith.constant 0 : i32
    %c0_i32_1 = arith.constant 0 : i32
    return %c0_i32, %c0_i32_0 : i32, i32
  }
  func.func @transform_6(%arg0: i32) -> (i32, i32) {
    %c0_i32 = arith.constant 0 : i32
    %c0_i32_0 = arith.constant 0 : i32
    return %arg0, %c0_i32 : i32, i32
  }
}

module attributes {stable_mosaic.version = 11 : i64} {
  func.func @_conv_relu_pool_kernel(%arg0: i32, %arg1: memref<64x108xf32, #tpu.memory_space<vmem>>, %arg2: memref<64x108xf32, #tpu.memory_space<vmem>>, %arg3: memref<64x108xf32, #tpu.memory_space<vmem>>, %arg4: memref<64x108xf32, #tpu.memory_space<vmem>>, %arg5: memref<108x24xf32, #tpu.memory_space<vmem>>, %arg6: memref<1x24xf32, #tpu.memory_space<vmem>>, %arg7: memref<64x24xf32, #tpu.memory_space<vmem>>) attributes {dimension_semantics = [#tpu.dimension_semantics<parallel>], iteration_bounds = array<i64: 2>, scalar_prefetch = 0 : i64, scratch_operands = 0 : i64, tpu.core_type = #tpu.core_type<tc>, window_params = [{transform_indices = @transform_0, window_bounds = array<i64: 64, 108>}, {transform_indices = @transform_1, window_bounds = array<i64: 64, 108>}, {transform_indices = @transform_2, window_bounds = array<i64: 64, 108>}, {transform_indices = @transform_3, window_bounds = array<i64: 64, 108>}, {pipeline_mode = #tpu.pipeline_mode<synchronous>, transform_indices = @transform_4, window_bounds = array<i64: 108, 24>}, {pipeline_mode = #tpu.pipeline_mode<synchronous>, transform_indices = @transform_5, window_bounds = array<i64: 1, 24>}, {transform_indices = @transform_6, window_bounds = array<i64: 64, 24>}]} {
    %c0 = arith.constant 0 : index
    %c0_0 = arith.constant 0 : index
    %0 = vector.load %arg5[%c0, %c0_0] : memref<108x24xf32, #tpu.memory_space<vmem>>, vector<108x24xf32>
    %c0_1 = arith.constant 0 : index
    %c0_2 = arith.constant 0 : index
    %1 = vector.load %arg6[%c0_1, %c0_2] : memref<1x24xf32, #tpu.memory_space<vmem>>, vector<1x24xf32>
    %c0_3 = arith.constant 0 : index
    %c0_4 = arith.constant 0 : index
    %2 = vector.load %arg1[%c0_3, %c0_4] : memref<64x108xf32, #tpu.memory_space<vmem>>, vector<64x108xf32>
    %cst = arith.constant dense<0.000000e+00> : vector<64x24xf32>
    %3 = tpu.matmul %2, %0, %cst {dimension_numbers = #tpu.dot_dimension_numbers<[1], [0], [0], [1], [0, 0, 1, 1], [], []>} : vector<64x108xf32>, vector<108x24xf32>, vector<64x24xf32> -> vector<64x24xf32>
    %4 = vector.broadcast %1 : vector<1x24xf32> to vector<64x24xf32>
    %5 = arith.addf %3, %4 : vector<64x24xf32>
    %cst_5 = arith.constant 0.000000e+00 : f32
    %6 = vector.broadcast %cst_5 : f32 to vector<64x24xf32>
    %7 = arith.maximumf %5, %6 : vector<64x24xf32>
    %c0_6 = arith.constant 0 : index
    %c0_7 = arith.constant 0 : index
    %8 = vector.load %arg2[%c0_6, %c0_7] : memref<64x108xf32, #tpu.memory_space<vmem>>, vector<64x108xf32>
    %cst_8 = arith.constant dense<0.000000e+00> : vector<64x24xf32>
    %9 = tpu.matmul %8, %0, %cst_8 {dimension_numbers = #tpu.dot_dimension_numbers<[1], [0], [0], [1], [0, 0, 1, 1], [], []>} : vector<64x108xf32>, vector<108x24xf32>, vector<64x24xf32> -> vector<64x24xf32>
    %10 = vector.broadcast %1 : vector<1x24xf32> to vector<64x24xf32>
    %11 = arith.addf %9, %10 : vector<64x24xf32>
    %cst_9 = arith.constant 0.000000e+00 : f32
    %12 = vector.broadcast %cst_9 : f32 to vector<64x24xf32>
    %13 = arith.maximumf %11, %12 : vector<64x24xf32>
    %14 = arith.maximumf %7, %13 : vector<64x24xf32>
    %c0_10 = arith.constant 0 : index
    %c0_11 = arith.constant 0 : index
    %15 = vector.load %arg3[%c0_10, %c0_11] : memref<64x108xf32, #tpu.memory_space<vmem>>, vector<64x108xf32>
    %cst_12 = arith.constant dense<0.000000e+00> : vector<64x24xf32>
    %16 = tpu.matmul %15, %0, %cst_12 {dimension_numbers = #tpu.dot_dimension_numbers<[1], [0], [0], [1], [0, 0, 1, 1], [], []>} : vector<64x108xf32>, vector<108x24xf32>, vector<64x24xf32> -> vector<64x24xf32>
    %17 = vector.broadcast %1 : vector<1x24xf32> to vector<64x24xf32>
    %18 = arith.addf %16, %17 : vector<64x24xf32>
    %cst_13 = arith.constant 0.000000e+00 : f32
    %19 = vector.broadcast %cst_13 : f32 to vector<64x24xf32>
    %20 = arith.maximumf %18, %19 : vector<64x24xf32>
    %c0_14 = arith.constant 0 : index
    %c0_15 = arith.constant 0 : index
    %21 = vector.load %arg4[%c0_14, %c0_15] : memref<64x108xf32, #tpu.memory_space<vmem>>, vector<64x108xf32>
    %cst_16 = arith.constant dense<0.000000e+00> : vector<64x24xf32>
    %22 = tpu.matmul %21, %0, %cst_16 {dimension_numbers = #tpu.dot_dimension_numbers<[1], [0], [0], [1], [0, 0, 1, 1], [], []>} : vector<64x108xf32>, vector<108x24xf32>, vector<64x24xf32> -> vector<64x24xf32>
    %23 = vector.broadcast %1 : vector<1x24xf32> to vector<64x24xf32>
    %24 = arith.addf %22, %23 : vector<64x24xf32>
    %cst_17 = arith.constant 0.000000e+00 : f32
    %25 = vector.broadcast %cst_17 : f32 to vector<64x24xf32>
    %26 = arith.maximumf %24, %25 : vector<64x24xf32>
    %27 = arith.maximumf %20, %26 : vector<64x24xf32>
    %28 = arith.maximumf %14, %27 : vector<64x24xf32>
    %c0_18 = arith.constant 0 : index
    %c0_19 = arith.constant 0 : index
    %29 = vector.load %arg7[%c0_18, %c0_19] : memref<64x24xf32, #tpu.memory_space<vmem>>, vector<64x24xf32>
    tpu.vector_store %arg7[%c0_18, %c0_19], %28 {strides = array<i32>} : memref<64x24xf32, #tpu.memory_space<vmem>>, vector<64x24xf32>,
    return
  }
  func.func @transform_0(%arg0: i32) -> (i32, i32) {
    %c0_i32 = arith.constant 0 : i32
    %c0_i32_0 = arith.constant 0 : i32
    return %arg0, %c0_i32 : i32, i32
  }
  func.func @transform_1(%arg0: i32) -> (i32, i32) {
    %c0_i32 = arith.constant 0 : i32
    %c0_i32_0 = arith.constant 0 : i32
    return %arg0, %c0_i32 : i32, i32
  }
  func.func @transform_2(%arg0: i32) -> (i32, i32) {
    %c0_i32 = arith.constant 0 : i32
    %c0_i32_0 = arith.constant 0 : i32
    return %arg0, %c0_i32 : i32, i32
  }
  func.func @transform_3(%arg0: i32) -> (i32, i32) {
    %c0_i32 = arith.constant 0 : i32
    %c0_i32_0 = arith.constant 0 : i32
    return %arg0, %c0_i32 : i32, i32
  }
  func.func @transform_4(%arg0: i32) -> (i32, i32) {
    %c0_i32 = arith.constant 0 : i32
    %c0_i32_0 = arith.constant 0 : i32
    %c0_i32_1 = arith.constant 0 : i32
    return %c0_i32, %c0_i32_0 : i32, i32
  }
  func.func @transform_5(%arg0: i32) -> (i32, i32) {
    %c0_i32 = arith.constant 0 : i32
    %c0_i32_0 = arith.constant 0 : i32
    %c0_i32_1 = arith.constant 0 : i32
    return %c0_i32, %c0_i32_0 : i32, i32
  }
  func.func @transform_6(%arg0: i32) -> (i32, i32) {
    %c0_i32 = arith.constant 0 : i32
    %c0_i32_0 = arith.constant 0 : i32
    return %arg0, %c0_i32 : i32, i32
  }
}

module attributes {stable_mosaic.version = 11 : i64} {
  func.func @_mlp_head_kernel(%arg0: memref<2x1536xf32, #tpu.memory_space<vmem>>, %arg1: memref<1536x384xf32, #tpu.memory_space<vmem>>, %arg2: memref<1x384xf32, #tpu.memory_space<vmem>>, %arg3: memref<384x23xf32, #tpu.memory_space<vmem>>, %arg4: memref<1x23xf32, #tpu.memory_space<vmem>>, %arg5: memref<2x23xf32, #tpu.memory_space<vmem>>) attributes {dimension_semantics = [], scalar_prefetch = 0 : i64, scratch_operands = 0 : i64, tpu.core_type = #tpu.core_type<tc>} {
    %c0 = arith.constant 0 : index
    %c0_0 = arith.constant 0 : index
    %0 = vector.load %arg0[%c0, %c0_0] : memref<2x1536xf32, #tpu.memory_space<vmem>>, vector<2x1536xf32>
    %c0_1 = arith.constant 0 : index
    %c0_2 = arith.constant 0 : index
    %1 = vector.load %arg1[%c0_1, %c0_2] : memref<1536x384xf32, #tpu.memory_space<vmem>>, vector<1536x384xf32>
    %cst = arith.constant dense<0.000000e+00> : vector<2x384xf32>
    %2 = tpu.matmul %0, %1, %cst {dimension_numbers = #tpu.dot_dimension_numbers<[1], [0], [0], [1], [0, 0, 1, 1], [], []>} : vector<2x1536xf32>, vector<1536x384xf32>, vector<2x384xf32> -> vector<2x384xf32>
    %c0_3 = arith.constant 0 : index
    %c0_4 = arith.constant 0 : index
    %3 = vector.load %arg2[%c0_3, %c0_4] : memref<1x384xf32, #tpu.memory_space<vmem>>, vector<1x384xf32>
    %4 = vector.broadcast %3 : vector<1x384xf32> to vector<2x384xf32>
    %5 = arith.addf %2, %4 : vector<2x384xf32>
    %cst_5 = arith.constant 0.000000e+00 : f32
    %6 = vector.broadcast %cst_5 : f32 to vector<2x384xf32>
    %7 = arith.maximumf %5, %6 : vector<2x384xf32>
    %c0_6 = arith.constant 0 : index
    %c0_7 = arith.constant 0 : index
    %8 = vector.load %arg3[%c0_6, %c0_7] : memref<384x23xf32, #tpu.memory_space<vmem>>, vector<384x23xf32>
    %cst_8 = arith.constant dense<0.000000e+00> : vector<2x23xf32>
    %9 = tpu.matmul %7, %8, %cst_8 {dimension_numbers = #tpu.dot_dimension_numbers<[1], [0], [0], [1], [0, 0, 1, 1], [], []>} : vector<2x384xf32>, vector<384x23xf32>, vector<2x23xf32> -> vector<2x23xf32>
    %c0_9 = arith.constant 0 : index
    %c0_10 = arith.constant 0 : index
    %10 = vector.load %arg4[%c0_9, %c0_10] : memref<1x23xf32, #tpu.memory_space<vmem>>, vector<1x23xf32>
    %11 = vector.broadcast %10 : vector<1x23xf32> to vector<2x23xf32>
    %12 = arith.addf %9, %11 : vector<2x23xf32>
    %c0_11 = arith.constant 0 : index
    %c0_12 = arith.constant 0 : index
    %13 = vector.load %arg5[%c0_11, %c0_12] : memref<2x23xf32, #tpu.memory_space<vmem>>, vector<2x23xf32>
    tpu.vector_store %arg5[%c0_11, %c0_12], %12 {strides = array<i32>} : memref<2x23xf32, #tpu.memory_space<vmem>>, vector<2x23xf32>,
    return
  }
}

</mosaic_0001>

<bundles_post_ra>
// kernel: lenet_relu_forward.4
= control target key start
LH: loop header
LB: loop body
LE: loop exit
PB: predicated region body
PF: predicated region fallthrough
CT: control target
= control target key end

     0   :  { %s4278_s21 = smov 0   ;;  %s6074_s0 = inlined_call_operand.vmem [shape: f32[2048,147], index: 0, kind: input, shape index: {}]   ;;  %s6075_s1 = inlined_call_operand.vmem [shape: f32[2048,147], index: 1, kind: input, shape index: {}]   ;;  %s6076_s2 = inlined_call_operand.vmem [shape: f32[2048,147], index: 2, kind: input, shape index: {}]   ;;  %s6077_s3 = inlined_call_operand.vmem [shape: f32[2048,147], index: 3, kind: input, shape index: {}]   ;;  %s6078_s4 = inlined_call_operand.vmem [shape: f32[147,6], index: 4, kind: input, shape index: {}]   ;;  %s6079_s5 = inlined_call_operand.vmem [shape: f32[1,6], index: 5, kind: input, shape index: {}]   ;;  %s6080_s6 = inlined_call_operand.vmem [shape: f32[2048,6], index: 6, kind: output, shape index: {}]  }
   0x1 LB: > { %s3918_s22 = sadd.s32 4294967295, %s4241_s21   ;;  %p3922_p0 = scmp.ge.s32.totalorder %s4241_s21, 1  ;;  %s4241_s21 = sphi %s4278_s21, %s16_s21  }
   0x2   : > { %p250_p1 = scmp.lt.s32.totalorder %s4241_s21, 5 }
   0x4   : > { %p251_p2 = pnand %p3922_p0, %p250_p1 }
   0x6   : > { %254 = sbr.rel (%p251_p2) target bundleno = 1192 (0x4a8), region = 44 }
   0xb   : > { %v4289_v0 = vld [vmem:[%s6078_s4 + $0x78] sm:$0xff]  ;;  %v4294_v1 = vld [vmem:[%s6078_s4 + $0x70] sm:$0xff]  ;;  %vm677_vm0 = vcmask 1042432   ;;  %s3923_s29 = sshll.u32 %s3918_s22, 6  ;;  %v4306_v3 = vld [vmem:[%s6078_s4 + $0x88] sm:$0xff]  ;;  %vm484_vm1 = vcmask 154624  }
   0xc   : > { %v4299_v2 = vld [vmem:[%s6078_s4 + $0x90] sm:$0x7]  ;;  %681 = vmatpush.msra.mxu0 %v4289_v0  ;;  %1483 = vmatpush.msra.mxu2 %v4289_v0  ;;  %p300_p3 = scmp.lt.s32.totalorder %s3923_s29, 255  ;;  %v4313_v4 = vld [vmem:[%s6078_s4 + $0x68] sm:$0xff]  ;;  %v4322_v5 = vld [vmem:[%s6078_s4 + $0x80] sm:$0xff]  ;;  %vm3761_vm2 = vcmask 48128  }
   0xd   : > { %4002 = vmatpush.msk.msra.mxu3 %vm677_vm0, %v4299_v2  ;;  %3937 = vmatpush.msk.msra.mxu1 %vm677_vm0, %v4299_v2  ;;  %v4330_v6 = vld [vmem:[%s6078_s4 + $0x60] sm:$0xff]  ;;  %v4348_v7 = vld [vmem:[%s6078_s4 + $0x58] sm:$0xff]  ;;  %v4365_v10 = vld [vmem:[%s6078_s4 + $0x50] sm:$0xff] }
   0xe   : > { %682 = vmatpush.msra.mxu0 %v4294_v1  ;;  %1484 = vmatpush.msra.mxu2 %v4294_v1  ;;  %s6134_s29 = smov (!%p300_p3, %s3923_s29), 255  ;;  %v4373_v11 = vld [vmem:[%s6078_s4 + $0x48] sm:$0xff]  ;;  %v4383_v12 = vld [vmem:[%s6078_s4 + $0x40] sm:$0xff]  ;;  %v4394_v15 = vld [vmem:[%s6078_s4 + $0x38] sm:$0xff] }
   0xf   : > { %1706 = vmatpush.msra.mxu3 %v4306_v3  ;;  %904 = vmatpush.msra.mxu1 %v4306_v3  ;;  %s4336_s14 = sshll.u32 %s6134_s29, 4  ;;  %v4404_v16 = vld [vmem:[%s6078_s4 + $0x30] sm:$0xff]  ;;  %v4412_v17 = vld [vmem:[%s6078_s4 + $0x28] sm:$0xff]  ;;  %v4422_v18 = vld [vmem:[%s6078_s4 + $0x20] sm:$0xff]  ;;  %s3936_s13 = sshll.u32 %s6134_s29, 3 }
  0x10   : > { %683 = vmatpush.msra.mxu0 %v4313_v4  ;;  %1485 = vmatpush.msra.mxu2 %v4313_v4  ;;  %s4343_s17 = scalar_lea.vmem %s6075_s1, %s4336_s14  ;;  %s4355_s23 = scalar_lea.vmem %s6074_s0, %s4336_s14  ;;  %v4433_v21 = vld [vmem:[%s6078_s4 + $0x18] sm:$0xff]  ;;  %v4443_v22 = vld [vmem:[%s6078_s4 + $0x10] sm:$0xff]  ;;  %v4451_v23 = vld [vmem:[%s6078_s4 + $0x8] sm:$0xff] }
  0x11   : > { %1707 = vmatpush.msra.mxu3 %v4322_v5  ;;  %905 = vmatpush.msra.mxu1 %v4322_v5  ;;  %v1164_v8 = vld [vmem:[%s4343_s17 + $0x8] sm:$0xff]  ;;  %v1166_v13 = vld [vmem:[%s4343_s17 + $0x18] sm:$0xff]  ;;  %v4459_v24 = vld [vmem:[%s6078_s4] sm:$0xff]  ;;  %s5198_s10 = scalar_lea.vmem %s6076_s2, %s4336_s14  ;;  %s5240_s11 = scalar_lea.vmem %s6077_s3, %s4336_s14 }
  0x12   : > { %684 = vmatpush.msra.mxu0 %v4330_v6  ;;  %1486 = vmatpush.msra.mxu2 %v4330_v6  ;;  %v354_v9 = vld [vmem:[%s4355_s23 + $0x8] sm:$0xff]  ;;  %v356_v14 = vld [vmem:[%s4355_s23 + $0x18] sm:$0xff]  ;;  %v353_v25 = vld [vmem:[%s4355_s23] sm:$0xff]  ;;  %s5474_s18 = scalar_lea.vmem %s6080_s6, %s3936_s13 }
  0x13   : > { %4003 = vmatmul.msk.f32.vlgmr.msra.gmra.mxu3 %vm484_vm1, %v1164_v8  ;;  %3938 = vmatmul.msk.f32.vlgmr.msra.gmra.mxu1 %vm484_vm1, %v354_v9  ;;  %v1168_v19 = vld [vmem:[%s4343_s17 + $0x28] sm:$0xff]  ;;  %v1163_v26 = vld [vmem:[%s4343_s17] sm:$0xff]  ;;  %v1170_v27 = vld [vmem:[%s4343_s17 + $0x38] sm:$0xff] }
  0x14   : > { %685 = vmatpush.msra.mxu0 %v4348_v7  ;;  %1487 = vmatpush.msra.mxu2 %v4348_v7  ;;  %v358_v20 = vld [vmem:[%s4355_s23 + $0x28] sm:$0xff]  ;;  %v360_v28 = vld [vmem:[%s4355_s23 + $0x38] sm:$0xff]  ;;  %v355_v29 = vld [vmem:[%s4355_s23 + $0x10] sm:$0xff] }
  0x15   : > { %4067 = vmatpush.msk.msrb.mxu3 %vm677_vm0, %v4299_v2  ;;  %2349 = vmatpush.msrb.mxu1 %v4289_v0  ;;  %v1165_v30 = vld [vmem:[%s4343_s17 + $0x10] sm:$0xff]  ;;  %v1172_v31 = vld [vmem:[%s4343_s17 + $0x48] sm:$0xff]  ;;  %v357_v33 = vld [vmem:[%s4355_s23 + $0x20] sm:$0xff] }
  0x16   : > { %686 = vmatpush.msra.mxu0 %v4365_v10  ;;  %1488 = vmatpush.msra.mxu2 %v4365_v10  ;;  %v362_v32 = vld [vmem:[%s4355_s23 + $0x48] sm:$0xff]  ;;  %v1167_v34 = vld [vmem:[%s4343_s17 + $0x20] sm:$0xff]  ;;  %v1174_v35 = vld [vmem:[%s4343_s17 + $0x58] sm:$0xff] }
  0x17   : > { %2350 = vmatpush.msrb.mxu1 %v4294_v1  ;;  %2572 = vmatpush.msrb.mxu3 %v4306_v3  ;;  %v364_v36 = vld [vmem:[%s4355_s23 + $0x58] sm:$0xff]  ;;  %v359_v37 = vld [vmem:[%s4355_s23 + $0x30] sm:$0xff]  ;;  %v1176_v39 = vld [vmem:[%s4343_s17 + $0x68] sm:$0xff] }
  0x18   : > { %687 = vmatpush.msra.mxu0 %v4373_v11  ;;  %1489 = vmatpush.msra.mxu2 %v4373_v11  ;;  %v1169_v38 = vld [vmem:[%s4343_s17 + $0x30] sm:$0xff]  ;;  %v366_v40 = vld [vmem:[%s4355_s23 + $0x68] sm:$0xff]  ;;  %v361_v41 = vld [vmem:[%s4355_s23 + $0x40] sm:$0xff] }
  0x19   : > { %2351 = vmatpush.msrb.mxu1 %v4313_v4  ;;  %2573 = vmatpush.msrb.mxu3 %v4322_v5  ;;  %v1171_v42 = vld [vmem:[%s4343_s17 + $0x40] sm:$0xff]  ;;  %v1178_v43 = vld [vmem:[%s4343_s17 + $0x78] sm:$0xff]  ;;  %v363_v45 = vld [vmem:[%s4355_s23 + $0x50] sm:$0xff] }
  0x1a   : > { %688 = vmatpush.msra.mxu0 %v4383_v12  ;;  %1490 = vmatpush.msra.mxu2 %v4383_v12  ;;  %v368_v44 = vld [vmem:[%s4355_s23 + $0x78] sm:$0xff]  ;;  %v1173_v46 = vld [vmem:[%s4343_s17 + $0x50] sm:$0xff]  ;;  %v1180_v47 = vld [vmem:[%s4343_s17 + $0x88] sm:$0xff] }
  0x1b   : > { %4004 = vmatmul.msk.f32.gmra.mxu3 %vm484_vm1, %v1166_v13  ;;  %3939 = vmatmul.msk.f32.gmra.mxu1 %vm484_vm1, %v356_v14  ;;  %v370_v48 = vld [vmem:[%s4355_s23 + $0x88] sm:$0xff]  ;;  %v365_v49 = vld [vmem:[%s4355_s23 + $0x60] sm:$0xff]  ;;  %v1182_v51 = vld [vmem:[%s4343_s17 + $0x98] sm:$0xff] }
  0x1c   : > { %689 = vmatpush.msra.mxu0 %v4394_v15  ;;  %1491 = vmatpush.msra.mxu2 %v4394_v15  ;;  %v1175_v50 = vld [vmem:[%s4343_s17 + $0x60] sm:$0xff]  ;;  %v372_v52 = vld [vmem:[%s4355_s23 + $0x98] sm:$0xff]  ;;  %v367_v53 = vld [vmem:[%s4355_s23 + $0x70] sm:$0xff] }
  0x1d   : > { %2352 = vmatpush.msrb.mxu1 %v4330_v6  ;;  %4219 = vmatpush.msk.msra.mxu3 %vm677_vm0, %v4299_v2  ;;  %v1177_v54 = vld [vmem:[%s4343_s17 + $0x70] sm:$0xff]  ;;  %v1184_v55 = vld [vmem:[%s4343_s17 + $0xa8] sm:$0xff]  ;;  %v369_v57 = vld [vmem:[%s4355_s23 + $0x80] sm:$0xff] }
  0x1e   : > { %690 = vmatpush.msra.mxu0 %v4404_v16  ;;  %1492 = vmatpush.msra.mxu2 %v4404_v16  ;;  %v374_v56 = vld [vmem:[%s4355_s23 + $0xa8] sm:$0xff]  ;;  %v1179_v58 = vld [vmem:[%s4343_s17 + $0x80] sm:$0xff]  ;;  %v1186_v59 = vld [vmem:[%s4343_s17 + $0xb8] sm:$0xff] }
  0x1f   : > { %2353 = vmatpush.msrb.mxu1 %v4348_v7  ;;  %4220 = vmatpush.msra.mxu3 %v4306_v3  ;;  %v376_v60 = vld [vmem:[%s4355_s23 + $0xb8] sm:$0xff]  ;;  %v371_v61 = vld [vmem:[%s4355_s23 + $0x90] sm:$0xff]  ;;  %v1188_v63 = vld [vmem:[%s4343_s17 + $0xc8] sm:$0xff] }
  0x20   : > { %691 = vmatpush.msra.mxu0 %v4412_v17  ;;  %1493 = vmatpush.msra.mxu2 %v4412_v17  ;;  %v1181_v62 = vld [vmem:[%s4343_s17 + $0x90] sm:$0xff]  ;;  %v382_v8 = vld [vmem:[%s4355_s23 + $0xe8] sm:$0xff]  ;;  %v377_v9 = vld [vmem:[%s4355_s23 + $0xc0] sm:$0xff] }
  0x21   : > { %2354 = vmatpush.msrb.mxu1 %v4365_v10  ;;  %4221 = vmatpush.msra.mxu3 %v4322_v5  ;;  %v379_v13 = vld [vmem:[%s4355_s23 + $0xd0] sm:$0xff] }
  0x22   : > { %692 = vmatpush.msra.mxu0 %v4422_v18  ;;  %1494 = vmatpush.msra.mxu2 %v4422_v18  ;;  %v1189_v14 = vld [vmem:[%s4343_s17 + $0xd0] sm:$0xff] }
  0x23   : > { %4005 = vmatmul.msk.f32.gmra.mxu3 %vm484_vm1, %v1168_v19  ;;  %3940 = vmatmul.msk.f32.gmra.mxu1 %vm484_vm1, %v358_v20  ;;  %v381_v19 = vld [vmem:[%s4355_s23 + $0xe0] sm:$0xff] }
  0x24   : > { %693 = vmatpush.msra.mxu0 %v4433_v21  ;;  %1495 = vmatpush.msra.mxu2 %v4433_v21  ;;  %v1191_v20 = vld [vmem:[%s4343_s17 + $0xe0] sm:$0xff] }
  0x25   : > { %2355 = vmatpush.msrb.mxu1 %v4373_v11 }
  0x26   : > { %694 = vmatpush.msra.mxu0 %v4443_v22  ;;  %1496 = vmatpush.msra.mxu2 %v4443_v22 }
  0x27   : > { %2356 = vmatpush.msrb.mxu1 %v4383_v12 }
  0x28   : > { %695 = vmatpush.msra.mxu0 %v4451_v23  ;;  %1497 = vmatpush.msra.mxu2 %v4451_v23 }
  0x29   : > { %2357 = vmatpush.msrb.mxu1 %v4394_v15 }
  0x2a   : > { %696 = vmatpush.msra.mxu0 %v4459_v24  ;;  %1498 = vmatpush.msra.mxu2 %v4459_v24 }
  0x2b   : > { %697 = vmatmul.f32.vlgmr.msra.gmra.mxu0 %v353_v25  ;;  %1499 = vmatmul.f32.vlgmr.msra.gmra.mxu2 %v1163_v26  ;;  %v383_v25 = vld [vmem:[%s4355_s23 + $0xf0] sm:$0xff] }
  0x2c   : > { %4006 = vmatmul.msk.f32.gmra.mxu3 %vm484_vm1, %v1170_v27  ;;  %4132 = vmatpush.msk.msrb.mxu2 %vm677_vm0, %v4299_v2  ;;  %v1183_v2 = vld [vmem:[%s4343_s17 + $0xa0] sm:$0xff]  ;;  %v1193_v26 = vld [vmem:[%s4343_s17 + $0xf0] sm:$0xff] }
  0x2d   : > { %3941 = vmatmul.msk.f32.gmra.mxu1 %vm484_vm1, %v360_v28  ;;  %3151 = vmatpush.msrb.mxu0 %v4289_v0  ;;  %v1200_v28 = vld [vmem:[%s4343_s17 + $0x128] sm:$0xff] }
  0x2e   : > { %3374 = vmatpush.msrb.mxu2 %v4306_v3  ;;  %2358 = vmatpush.msrb.mxu1 %v4404_v16  ;;  %v1190_v3 = vld [vmem:[%s4343_s17 + $0xd8] sm:$0xff] }
  0x2f   : > { %3152 = vmatpush.msrb.mxu0 %v4294_v1 }
  0x30   : > { %2359 = vmatpush.msrb.mxu1 %v4412_v17  ;;  %3375 = vmatpush.msrb.mxu2 %v4322_v5  ;;  %v375_v5 = vld [vmem:[%s4355_s23 + $0xb0] sm:$0xff] }
  0x31   : > { %3153 = vmatpush.msrb.mxu0 %v4313_v4 }
  0x32   : > { %2360 = vmatpush.msrb.mxu1 %v4422_v18 }
  0x33   : > { %700 = vmatmul.f32.gmra.mxu0 %v355_v29  ;;  %1502 = vmatmul.f32.gmra.mxu2 %v1165_v30  ;;  %v390_v29 = vld [vmem:[%s4355_s23 + $0x128] sm:$0xff] }
  0x34   : > { %4007 = vmatmul.msk.f32.gmra.mxu3 %vm484_vm1, %v1172_v31  ;;  %3154 = vmatpush.msrb.mxu0 %v4330_v6  ;;  %v4609_v31 = vld [vmem:[%s6079_s5] ss:$0 sm:$0xff] }
  0x35   : > { %3942 = vmatmul.msk.f32.gmra.mxu1 %vm484_vm1, %v362_v32 }
  0x36   : > { %3155 = vmatpush.msrb.mxu0 %v4348_v7  ;;  %2361 = vmatpush.msrb.mxu1 %v4433_v21 }
  0x38   : > { %3156 = vmatpush.msrb.mxu0 %v4365_v10  ;;  %2362 = vmatpush.msrb.mxu1 %v4443_v22 }
  0x3a   : > { %3157 = vmatpush.msrb.mxu0 %v4373_v11  ;;  %2363 = vmatpush.msrb.mxu1 %v4451_v23 }
  0x3b   : > { %703 = vmatmul.f32.gmra.mxu0 %v357_v33  ;;  %1505 = vmatmul.f32.gmra.mxu2 %v1167_v34  ;;  %v385_v33 = vld [vmem:[%s4355_s23 + $0x100] sm:$0xff] }
  0x3c   : > { %4008 = vmatmul.msk.f32.gmra.mxu3 %vm484_vm1, %v1174_v35  ;;  %3158 = vmatpush.msrb.mxu0 %v4383_v12  ;;  %v1195_v34 = vld [vmem:[%s4343_s17 + $0x100] sm:$0xff]  ;;  %v1202_v35 = vld [vmem:[%s4343_s17 + $0x138] sm:$0xff] }
  0x3d   : > { %3943 = vmatmul.msk.f32.gmra.mxu1 %vm484_vm1, %v364_v36 }
  0x3e   : > { %3159 = vmatpush.msrb.mxu0 %v4394_v15  ;;  %2364 = vmatpush.msrb.mxu1 %v4459_v24 }
  0x40   : > { %4203 = vmatpush.msra.mxu1 %v4289_v0  ;;  %3160 = vmatpush.msrb.mxu0 %v4404_v16  ;;  %v378_v0 = vld [vmem:[%s4355_s23 + $0xc8] sm:$0xff] }
  0x42   : > { %4204 = vmatpush.msra.mxu1 %v4294_v1  ;;  %3161 = vmatpush.msrb.mxu0 %v4412_v17  ;;  %v373_v1 = vld [vmem:[%s4355_s23 + $0xa0] sm:$0xff] }
  0x43   : > { %706 = vmatmul.f32.gmra.mxu0 %v359_v37  ;;  %1508 = vmatmul.f32.gmra.mxu2 %v1169_v38  ;;  %v392_v37 = vld [vmem:[%s4355_s23 + $0x138] sm:$0xff] }
  0x44   : > { %4009 = vmatmul.msk.f32.gmra.mxu3 %vm484_vm1, %v1176_v39  ;;  %3162 = vmatpush.msrb.mxu0 %v4422_v18 }
  0x45   : > { %3944 = vmatmul.msk.f32.gmra.mxu1 %vm484_vm1, %v366_v40 }
  0x46   : > { %3163 = vmatpush.msrb.mxu0 %v4433_v21  ;;  %4205 = vmatpush.msra.mxu1 %v4313_v4  ;;  %v380_v4 = vld [vmem:[%s4355_s23 + $0xd8] sm:$0xff] }
  0x48   : > { %3164 = vmatpush.msrb.mxu0 %v4443_v22  ;;  %4206 = vmatpush.msra.mxu1 %v4330_v6  ;;  %v1185_v6 = vld [vmem:[%s4343_s17 + $0xb0] sm:$0xff] }
  0x4a   : > { %3165 = vmatpush.msrb.mxu0 %v4451_v23  ;;  %4207 = vmatpush.msra.mxu1 %v4348_v7  ;;  %v1192_v7 = vld [vmem:[%s4343_s17 + $0xe8] sm:$0xff] }
  0x4b   : > { %709 = vmatmul.f32.gmra.mxu0 %v361_v41  ;;  %1511 = vmatmul.f32.gmra.mxu2 %v1171_v42 }
  0x4c   : > { %4010 = vmatmul.msk.f32.gmra.mxu3 %vm484_vm1, %v1178_v43  ;;  %3166 = vmatpush.msrb.mxu0 %v4459_v24 }
  0x4d   : > { %3945 = vmatmul.msk.f32.gmra.mxu1 %vm484_vm1, %v368_v44  ;;  %v387_v44 = vld [vmem:[%s4355_s23 + $0x110] sm:$0xff] }
  0x4e   : > { %4208 = vmatpush.msra.mxu1 %v4365_v10  ;;  %v1187_v10 = vld [vmem:[%s4343_s17 + $0xc0] sm:$0xff] }
  0x50   : > { %4209 = vmatpush.msra.mxu1 %v4373_v11  ;;  %v1194_v11 = vld [vmem:[%s4343_s17 + $0xf8] sm:$0xff] }
  0x52   : > { %4210 = vmatpush.msra.mxu1 %v4383_v12  ;;  %v384_v12 = vld [vmem:[%s4355_s23 + $0xf8] sm:$0xff] }
  0x53   : > { %712 = vmatmul.f32.gmra.mxu0 %v363_v45  ;;  %1514 = vmatmul.f32.gmra.mxu2 %v1173_v46  ;;  %v1197_v45 = vld [vmem:[%s4343_s17 + $0x110] sm:$0xff] }
  0x54   : > { %4011 = vmatmul.msk.f32.gmra.mxu3 %vm484_vm1, %v1180_v47  ;;  %4211 = vmatpush.msra.mxu1 %v4394_v15  ;;  %v1204_v47 = vld [vmem:[%s4343_s17 + $0x148] sm:$0xff] }
  0x55   : > { %3946 = vmatmul.msk.f32.gmra.mxu1 %vm484_vm1, %v370_v48 }
  0x56   : > { %4212 = vmatpush.msra.mxu1 %v4404_v16  ;;  %v1196_v16 = vld [vmem:[%s4343_s17 + $0x108] sm:$0xff] }
  0x58   : > { %4213 = vmatpush.msra.mxu1 %v4412_v17  ;;  %v386_v17 = vld [vmem:[%s4355_s23 + $0x108] sm:$0xff] }
  0x5a   : > { %4214 = vmatpush.msra.mxu1 %v4422_v18 }
  0x5b   : > { %715 = vmatmul.f32.gmra.mxu0 %v365_v49  ;;  %1517 = vmatmul.f32.gmra.mxu2 %v1175_v50  ;;  %v394_v49 = vld [vmem:[%s4355_s23 + $0x148] sm:$0xff] }
  0x5c   : > { %4012 = vmatmul.msk.f32.gmra.mxu3 %vm484_vm1, %v1182_v51  ;;  %4215 = vmatpush.msra.mxu1 %v4433_v21 }
  0x5d   : > { %3947 = vmatmul.msk.f32.gmra.mxu1 %vm484_vm1, %v372_v52 }
  0x5e   : > { %4216 = vmatpush.msra.mxu1 %v4443_v22  ;;  %v1198_v22 = vld [vmem:[%s4343_s17 + $0x118] sm:$0xff] }
  0x60   : > { %4217 = vmatpush.msra.mxu1 %v4451_v23  ;;  %v388_v23 = vld [vmem:[%s4355_s23 + $0x118] sm:$0xff] }
  0x62   : > { %4218 = vmatpush.msra.mxu1 %v4459_v24 }
  0x63   : > { %718 = vmatmul.f32.gmra.mxu0 %v367_v53  ;;  %1520 = vmatmul.f32.gmra.mxu2 %v1177_v54 }
  0x64   : > { %4013 = vmatmul.msk.f32.gmra.mxu3 %vm484_vm1, %v1184_v55 }
  0x65   : > { %3948 = vmatmul.msk.f32.gmra.mxu1 %vm484_vm1, %v374_v56 }
  0x6b   : > { %721 = vmatmul.f32.gmra.mxu0 %v369_v57  ;;  %1523 = vmatmul.f32.gmra.mxu2 %v1179_v58 }
  0x6c   : > { %4014 = vmatmul.msk.f32.gmra.mxu3 %vm484_vm1, %v1186_v59  ;;  %v389_v59 = vld [vmem:[%s4355_s23 + $0x120] sm:$0xff] }
  0x6d   : > { %3949 = vmatmul.msk.f32.gmra.mxu1 %vm484_vm1, %v376_v60  ;;  %v1199_v60 = vld [vmem:[%s4343_s17 + $0x120] sm:$0xff] }
  0x73   : > { %724 = vmatmul.f32.gmra.mxu0 %v371_v61  ;;  %1526 = vmatmul.f32.gmra.mxu2 %v1181_v62  ;;  %v1206_v62 = vld [vmem:[%s4343_s17 + $0x158] sm:$0xff] }
  0x74   : > { %4015 = vmatmul.msk.f32.gmra.mxu3 %vm484_vm1, %v1188_v63 }
  0x75   : > { %3950 = vmatmul.msk.f32.gmra.mxu1 %vm484_vm1, %v378_v0  ;;  %v396_v0 = vld [vmem:[%s4355_s23 + $0x158] sm:$0xff] }
  0x7b   : > { %727 = vmatmul.f32.gmra.mxu0 %v373_v1  ;;  %1529 = vmatmul.f32.gmra.mxu2 %v1183_v2 }
  0x7c   : > { %4016 = vmatmul.msk.f32.gmra.mxu3 %vm484_vm1, %v1190_v3 }
  0x7d   : > { %3951 = vmatmul.msk.f32.gmra.mxu1 %vm484_vm1, %v380_v4 }
  0x83   : > { %730 = vmatmul.f32.gmra.mxu0 %v375_v5  ;;  %1532 = vmatmul.f32.gmra.mxu2 %v1185_v6 }
  0x84   : > { %4017 = vmatmul.msk.f32.gmra.mxu3 %vm484_vm1, %v1192_v7 }
  0x85   : > { %3952 = vmatmul.msk.f32.gmra.mxu1 %vm484_vm1, %v382_v8 }
  0x8b   : > { %733 = vmatmul.f32.gmra.mxu0 %v377_v9  ;;  %1535 = vmatmul.f32.gmra.mxu2 %v1187_v10  ;;  %v391_v10 = vld [vmem:[%s4355_s23 + $0x130] sm:$0xff] }
  0x8c   : > { %4018 = vmatmul.msk.f32.gmra.mxu3 %vm484_vm1, %v1194_v11  ;;  %v1201_v11 = vld [vmem:[%s4343_s17 + $0x130] sm:$0xff] }
  0x8d   : > { %3953 = vmatmul.msk.f32.gmra.mxu1 %vm484_vm1, %v384_v12 }
  0x90   : > { %v907_v15 = vpop.f32.mrf.mxu1 }
  0x93   : > { %736 = vmatmul.f32.gmra.mxu0 %v379_v13  ;;  %1538 = vmatmul.f32.gmra.mxu2 %v1189_v14  ;;  %v1208_v13 = vld [vmem:[%s4343_s17 + $0x168] sm:$0xff] }
  0x94   : > { %4019 = vmatmul.msk.f32.gmra.mxu3 %vm484_vm1, %v1196_v16 }
  0x95   : > { %3954 = vmatmul.msk.f32.gmra.mxu1 %vm484_vm1, %v386_v17 }
  0x96   : > { %v1709_v18 = vpop.f32.mrf.mxu3 }
  0x98   : > { %v910_v21 = vpop.f32.mrf.mxu1 }
  0x9b   : > { %739 = vmatmul.f32.gmra.mxu0 %v381_v19  ;;  %1541 = vmatmul.f32.gmra.mxu2 %v1191_v20 }
  0x9c   : > { %4020 = vmatmul.msk.f32.gmra.mxu3 %vm484_vm1, %v1198_v22 }
  0x9d   : > { %3955 = vmatmul.msk.f32.gmra.mxu1 %vm484_vm1, %v388_v23 }
  0x9e   : > { %v1712_v24 = vpop.f32.mrf.mxu3 }
  0xa0   : > { %v913_v27 = vpop.f32.mrf.mxu1 }
  0xa3   : > { %742 = vmatmul.f32.gmra.mxu0 %v383_v25  ;;  %1544 = vmatmul.f32.gmra.mxu2 %v1193_v26  ;;  %v393_v25 = vld [vmem:[%s4355_s23 + $0x140] sm:$0xff] }
  0xa4   : > { %4021 = vmatmul.msk.f32.gmra.mxu3 %vm484_vm1, %v1200_v28  ;;  %v1203_v26 = vld [vmem:[%s4343_s17 + $0x140] sm:$0xff]  ;;  %v1210_v28 = vld [vmem:[%s4343_s17 + $0x178] sm:$0xff] }
  0xa5   : > { %3956 = vmatmul.msk.f32.gmra.mxu1 %vm484_vm1, %v390_v29 }
  0xa6   : > { %v1715_v30 = vpop.f32.mrf.mxu3 }
  0xa8   : > { %v698_v32 = vpop.f32.mrf.mxu0 }
  0xa9   : > { %v699_v38 = vadd.f32 %v4609_v31, %v698_v32 }
  0xaa   : > { %v4614_v36 = vpop.f32.mrf.mxu1 }
  0xab   : > { %745 = vmatmul.f32.gmra.mxu0 %v385_v33  ;;  %1547 = vmatmul.f32.gmra.mxu2 %v1195_v34  ;;  %v908_v40 = vadd.f32 %v907_v15, %v699_v38  ;;  %v398_v15 = vld [vmem:[%s4355_s23 + $0x168] sm:$0xff] }
  0xac   : > { %4022 = vmatmul.msk.f32.gmra.mxu3 %vm484_vm1, %v1202_v35 }
  0xad   : > { %3957 = vmatmul.msk.f32.gmra.mxu1 %vm484_vm1, %v392_v37  ;;  %v1099_v50 = vmax.f32 %v908_v40, 0.0 }
  0xae   : > { %v1500_v39 = vpop.f32.mrf.mxu2 }
  0xaf   : > { %v1501_v41 = vadd.f32 %v4609_v31, %v1500_v39  ;;  %v1718_v42 = vpop.f32.mrf.mxu3 }
  0xb0   : > { %v701_v43 = vpop.f32.mrf.mxu0 }
  0xb1   : > { %v1710_v46 = vadd.f32 %v1709_v18, %v1501_v41  ;;  %v702_v52 = vadd.f32 %v4609_v31, %v701_v43  ;;  %v395_v41 = vld [vmem:[%s4355_s23 + $0x150] sm:$0xff] }
  0xb2   : > { %v4624_v48 = vpop.f32.mrf.mxu1 }
  0xb3   : > { %v1901_v51 = vmax.f32 %v1710_v46, 0.0  ;;  %748 = vmatmul.f32.gmra.mxu0 %v387_v44  ;;  %1550 = vmatmul.f32.gmra.mxu2 %v1197_v45  ;;  %v911_v55 = vadd.f32 %v910_v21, %v702_v52  ;;  %v1212_v44 = vld [vmem:[%s4343_s17 + $0x188] sm:$0xff] }
  0xb4   : > { %4023 = vmatmul.msk.f32.gmra.mxu3 %vm484_vm1, %v1204_v47  ;;  %v402_v46 = vld [vmem:[%s4355_s23 + $0x188] sm:$0xff] }
  0xb5   : > { %v4629_v53 = vmax.f32 %v1099_v50, %v1901_v51  ;;  %3958 = vmatmul.msk.f32.gmra.mxu1 %vm484_vm1, %v394_v49  ;;  %v1100_v1 = vmax.f32 %v911_v55, 0.0 }
  0xb6   : > { %v1503_v54 = vpop.f32.mrf.mxu2 }
  0xb7   : > { %v1504_v56 = vadd.f32 %v4609_v31, %v1503_v54  ;;  %v1721_v57 = vpop.f32.mrf.mxu3 }
  0xb8   : > { %v704_v58 = vpop.f32.mrf.mxu0 }
  0xb9   : > { %v1713_v61 = vadd.f32 %v1712_v24, %v1504_v56  ;;  %v705_v3 = vadd.f32 %v4609_v31, %v704_v58  ;;  %v1207_v58 = vld [vmem:[%s4343_s17 + $0x160] sm:$0xff] }
  0xba   : > { %v4636_v63 = vpop.f32.mrf.mxu1 }
  0xbb   : > { %v1902_v2 = vmax.f32 %v1713_v61, 0.0  ;;  %751 = vmatmul.f32.gmra.mxu0 %v389_v59  ;;  %1553 = vmatmul.f32.gmra.mxu2 %v1199_v60  ;;  %v914_v6 = vadd.f32 %v913_v27, %v705_v3  ;;  %v1214_v60 = vld [vmem:[%s4343_s17 + $0x198] sm:$0xff] }
  0xbc   : > { %4024 = vmatmul.msk.f32.gmra.mxu3 %vm484_vm1, %v1206_v62  ;;  %v404_v62 = vld [vmem:[%s4355_s23 + $0x198] sm:$0xff] }
  0xbd   : > { %v4641_v4 = vmax.f32 %v1100_v1, %v1902_v2  ;;  %3959 = vmatmul.msk.f32.gmra.mxu1 %vm484_vm1, %v396_v0  ;;  %v1101_v16 = vmax.f32 %v914_v6, 0.0 }
  0xbe   : > { %v1506_v5 = vpop.f32.mrf.mxu2 }
  0xbf   : > { %v1507_v7 = vadd.f32 %v4609_v31, %v1506_v5  ;;  %v1724_v8 = vpop.f32.mrf.mxu3 }
  0xc0   : > { %v707_v9 = vpop.f32.mrf.mxu0 }
  0xc1   : > { %v1716_v12 = vadd.f32 %v1715_v30, %v1507_v7  ;;  %v708_v18 = vadd.f32 %v4609_v31, %v707_v9  ;;  %v400_v30 = vld [vmem:[%s4355_s23 + $0x178] sm:$0xff]  ;;  %v399_v9 = vld [vmem:[%s4355_s23 + $0x170] sm:$0xff] }
  0xc2   : > { %v4648_v14 = vpop.f32.mrf.mxu1 }
  0xc3   : > { %v1903_v17 = vmax.f32 %v1716_v12, 0.0  ;;  %754 = vmatmul.f32.gmra.mxu0 %v391_v10  ;;  %1556 = vmatmul.f32.gmra.mxu2 %v1201_v11  ;;  %v917_v21 = vadd.f32 %v4614_v36, %v708_v18  ;;  %v1209_v10 = vld [vmem:[%s4343_s17 + $0x170] sm:$0xff]  ;;  %v1216_v12 = vld [vmem:[%s4343_s17 + $0x1a8] sm:$0xff] }
  0xc4   : > { %4025 = vmatmul.msk.f32.gmra.mxu3 %vm484_vm1, %v1208_v13 }
  0xc5   : > { %v4653_v19 = vmax.f32 %v1101_v16, %v1903_v17  ;;  %3960 = vmatmul.msk.f32.gmra.mxu1 %vm484_vm1, %v398_v15  ;;  %v1102_v32 = vmax.f32 %v917_v21, 0.0  ;;  %v406_v15 = vld [vmem:[%s4355_s23 + $0x1a8] sm:$0xff] }
  0xc6   : > { %v1509_v20 = vpop.f32.mrf.mxu2 }
  0xc7   : > { %v1510_v22 = vadd.f32 %v4609_v31, %v1509_v20  ;;  %v1727_v23 = vpop.f32.mrf.mxu3 }
  0xc8   : > { %v710_v24 = vpop.f32.mrf.mxu0 }
  0xc9   : > { %v1719_v27 = vadd.f32 %v1718_v42, %v1510_v22  ;;  %v711_v34 = vadd.f32 %v4609_v31, %v710_v24  ;;  %v1205_v42 = vld [vmem:[%s4343_s17 + $0x150] sm:$0xff] }
  0xca   : > { %v4661_v29 = vpop.f32.mrf.mxu1 }
  0xcb   : > { %v1904_v33 = vmax.f32 %v1719_v27, 0.0  ;;  %757 = vmatmul.f32.gmra.mxu0 %v393_v25  ;;  %1559 = vmatmul.f32.gmra.mxu2 %v1203_v26  ;;  %v920_v37 = vadd.f32 %v4624_v48, %v711_v34  ;;  %v401_v25 = vld [vmem:[%s4355_s23 + $0x180] sm:$0xff] }
  0xcc   : > { %4026 = vmatmul.msk.f32.gmra.mxu3 %vm484_vm1, %v1210_v28  ;;  %v1211_v26 = vld [vmem:[%s4343_s17 + $0x180] sm:$0xff]  ;;  %v1218_v28 = vld [vmem:[%s4343_s17 + $0x1b8] sm:$0xff] }
  0xcd   : > { %v4666_v35 = vmax.f32 %v1102_v32, %v1904_v33  ;;  %3961 = vmatmul.msk.f32.gmra.mxu1 %vm484_vm1, %v400_v30  ;;  %v1103_v47 = vmax.f32 %v920_v37, 0.0  ;;  %v408_v32 = vld [vmem:[%s4355_s23 + $0x1b8] sm:$0xff] }
  0xce   : > { %v1512_v36 = vpop.f32.mrf.mxu2 }
  0xcf   : > { %v1513_v38 = vadd.f32 %v4609_v31, %v1512_v36  ;;  %v1730_v39 = vpop.f32.mrf.mxu3 }
  0xd0   : > { %v713_v40 = vpop.f32.mrf.mxu0 }
  0xd1   : > { %v1722_v43 = vadd.f32 %v1721_v57, %v1513_v38  ;;  %v714_v50 = vadd.f32 %v4609_v31, %v713_v40  ;;  %v397_v57 = vld [vmem:[%s4355_s23 + $0x160] sm:$0xff] }
  0xd2   : > { %v4674_v45 = vpop.f32.mrf.mxu1 }
  0xd3   : > { %v1905_v49 = vmax.f32 %v1722_v43, 0.0  ;;  %760 = vmatmul.f32.gmra.mxu0 %v395_v41  ;;  %1562 = vmatmul.f32.gmra.mxu2 %v1205_v42  ;;  %v923_v52 = vadd.f32 %v4636_v63, %v714_v50  ;;  %v403_v42 = vld [vmem:[%s4355_s23 + $0x190] sm:$0xff] }
  0xd4   : > { %4027 = vmatmul.msk.f32.gmra.mxu3 %vm484_vm1, %v1212_v44  ;;  %v1213_v43 = vld [vmem:[%s4343_s17 + $0x190] sm:$0xff] }
  0xd5   : > { %v4679_v48 = vmax.f32 %v1103_v47, %v1905_v49  ;;  %3962 = vmatmul.msk.f32.gmra.mxu1 %vm484_vm1, %v402_v46  ;;  %v1104_v0 = vmax.f32 %v923_v52, 0.0  ;;  %v1220_v46 = vld [vmem:[%s4343_s17 + $0x1c8] sm:$0xff] }
  0xd6   : > { %v1515_v51 = vpop.f32.mrf.mxu2  ;;  %v410_v49 = vld [vmem:[%s4355_s23 + $0x1c8] sm:$0xff] }
  0xd7   : > { %v1516_v54 = vadd.f32 %v4609_v31, %v1515_v51  ;;  %v1733_v55 = vpop.f32.mrf.mxu3 }
  0xd8   : > { %v716_v56 = vpop.f32.mrf.mxu0 }
  0xd9   : > { %v1725_v59 = vadd.f32 %v1724_v8, %v1516_v54  ;;  %v717_v2 = vadd.f32 %v4609_v31, %v716_v56 }
  0xda   : > { %v4687_v61 = vpop.f32.mrf.mxu1 }
  0xdb   : > { %v1906_v1 = vmax.f32 %v1725_v59, 0.0  ;;  %763 = vmatmul.f32.gmra.mxu0 %v397_v57  ;;  %1565 = vmatmul.f32.gmra.mxu2 %v1207_v58  ;;  %v926_v5 = vadd.f32 %v4648_v14, %v717_v2  ;;  %v405_v59 = vld [vmem:[%s4355_s23 + $0x1a0] sm:$0xff]  ;;  %v412_v2 = vld [vmem:[%s4355_s23 + $0x1d8] sm:$0xff] }
  0xdc   : > { %4028 = vmatmul.msk.f32.gmra.mxu3 %vm484_vm1, %v1214_v60  ;;  %v1215_v60 = vld [vmem:[%s4343_s17 + $0x1a0] sm:$0xff] }
  0xdd   : > { %v4692_v63 = vmax.f32 %v1104_v0, %v1906_v1  ;;  %3963 = vmatmul.msk.f32.gmra.mxu1 %vm484_vm1, %v404_v62  ;;  %v1105_v16 = vmax.f32 %v926_v5, 0.0  ;;  %v1222_v0 = vld [vmem:[%s4343_s17 + $0x1d8] sm:$0xff] }
  0xde   : > { %v1518_v3 = vpop.f32.mrf.mxu2 }
  0xdf   : > { %v1519_v6 = vadd.f32 %v4609_v31, %v1518_v3  ;;  %v1736_v7 = vpop.f32.mrf.mxu3 }
  0xe0   : > { %v719_v8 = vpop.f32.mrf.mxu0 }
  0xe1   : > { %v1728_v11 = vadd.f32 %v1727_v23, %v1519_v6  ;;  %v720_v18 = vadd.f32 %v4609_v31, %v719_v8 }
  0xe2   : > { %v4700_v13 = vpop.f32.mrf.mxu1 }
  0xe3   : > { %v1907_v17 = vmax.f32 %v1728_v11, 0.0  ;;  %766 = vmatmul.f32.gmra.mxu0 %v399_v9  ;;  %1568 = vmatmul.f32.gmra.mxu2 %v1209_v10  ;;  %v929_v21 = vadd.f32 %v4661_v29, %v720_v18 }
  0xe4   : > { %4029 = vmatmul.msk.f32.gmra.mxu3 %vm484_vm1, %v1216_v12  ;;  %v407_v12 = vld [vmem:[%s4355_s23 + $0x1b0] sm:$0xff] }
  0xe5   : > { %v4705_v14 = vmax.f32 %v1105_v16, %v1907_v17  ;;  %3964 = vmatmul.msk.f32.gmra.mxu1 %vm484_vm1, %v406_v15  ;;  %v1106_v33 = vmax.f32 %v929_v21, 0.0  ;;  %v1217_v15 = vld [vmem:[%s4343_s17 + $0x1b0] sm:$0xff]  ;;  %v1224_v17 = vld [vmem:[%s4343_s17 + $0x1e8] sm:$0xff] }
  0xe6   : > { %v1521_v20 = vpop.f32.mrf.mxu2 }
  0xe7   : > { %v1522_v22 = vadd.f32 %v4609_v31, %v1521_v20  ;;  %v1739_v23 = vpop.f32.mrf.mxu3  ;;  %v414_v20 = vld [vmem:[%s4355_s23 + $0x1e8] sm:$0xff] }
  0xe8   : > { %v722_v24 = vpop.f32.mrf.mxu0 }
  0xe9   : > { %v1731_v27 = vadd.f32 %v1730_v39, %v1522_v22  ;;  %v723_v36 = vadd.f32 %v4609_v31, %v722_v24 }
  0xea   : > { %v4713_v30 = vpop.f32.mrf.mxu1 }
  0xeb   : > { %v1908_v34 = vmax.f32 %v1731_v27, 0.0  ;;  %769 = vmatmul.f32.gmra.mxu0 %v401_v25  ;;  %1571 = vmatmul.f32.gmra.mxu2 %v1211_v26  ;;  %v932_v38 = vadd.f32 %v4674_v45, %v723_v36  ;;  %v1226_v36 = vld [vmem:[%s4343_s17 + $0x1f8] sm:$0xff] }
  0xec   : > { %4030 = vmatmul.msk.f32.gmra.mxu3 %vm484_vm1, %v1218_v28 }
  0xed   : > { %v4718_v29 = vmax.f32 %v1106_v33, %v1908_v34  ;;  %3965 = vmatmul.msk.f32.gmra.mxu1 %vm484_vm1, %v408_v32  ;;  %v1107_v50 = vmax.f32 %v932_v38, 0.0  ;;  %v409_v32 = vld [vmem:[%s4355_s23 + $0x1c0] sm:$0xff]  ;;  %v416_v38 = vld [vmem:[%s4355_s23 + $0x1f8] sm:$0xff] }
  0xee   : > { %v1524_v37 = vpop.f32.mrf.mxu2  ;;  %v1219_v33 = vld [vmem:[%s4343_s17 + $0x1c0] sm:$0xff] }
  0xef   : > { %v1525_v39 = vadd.f32 %v4609_v31, %v1524_v37  ;;  %v1742_v40 = vpop.f32.mrf.mxu3 }
  0xf0   : > { %v725_v41 = vpop.f32.mrf.mxu0 }
  0xf1   : > { %v1734_v44 = vadd.f32 %v1733_v55, %v1525_v39  ;;  %v726_v52 = vadd.f32 %v4609_v31, %v725_v41 }
  0xf2   : > { %v4726_v47 = vpop.f32.mrf.mxu1 }
  0xf3   : > { %v1909_v51 = vmax.f32 %v1734_v44, 0.0  ;;  %772 = vmatmul.f32.gmra.mxu0 %v403_v42  ;;  %1574 = vmatmul.f32.gmra.mxu2 %v1213_v43  ;;  %v935_v55 = vadd.f32 %v4687_v61, %v726_v52 }
  0xf4   : > { %4031 = vmatmul.msk.f32.gmra.mxu3 %vm484_vm1, %v1220_v46 }
  0xf5   : > { %v4731_v45 = vmax.f32 %v1107_v50, %v1909_v51  ;;  %3966 = vmatmul.msk.f32.gmra.mxu1 %vm484_vm1, %v410_v49  ;;  %v1108_v3 = vmax.f32 %v935_v55, 0.0  ;;  %v411_v50 = vld [vmem:[%s4355_s23 + $0x1d0] sm:$0xff] }
  0xf6   : > { %v1527_v54 = vpop.f32.mrf.mxu2  ;;  %v1221_v51 = vld [vmem:[%s4343_s17 + $0x1d0] sm:$0xff] }
  0xf7   : > { %v1528_v56 = vadd.f32 %v4609_v31, %v1527_v54  ;;  %v1745_v57 = vpop.f32.mrf.mxu3  ;;  %v1228_v54 = vld [vmem:[%s4343_s17 + $0x208] sm:$0xff] }
  0xf8   : > { %v728_v58 = vpop.f32.mrf.mxu0 }
  0xf9   : > { %v1737_v62 = vadd.f32 %v1736_v7, %v1528_v56  ;;  %v729_v6 = vadd.f32 %v4609_v31, %v728_v58  ;;  %v418_v56 = vld [vmem:[%s4355_s23 + $0x208] sm:$0xff] }
  0xfa   : > { %v4739_v1 = vpop.f32.mrf.mxu1 }
  0xfb   : > { %v1910_v5 = vmax.f32 %v1737_v62, 0.0  ;;  %775 = vmatmul.f32.gmra.mxu0 %v405_v59  ;;  %1577 = vmatmul.f32.gmra.mxu2 %v1215_v60  ;;  %v938_v8 = vadd.f32 %v4700_v13, %v729_v6  ;;  %v1223_v6 = vld [vmem:[%s4343_s17 + $0x1e0] sm:$0xff] }
  0xfc   : > { %4032 = vmatmul.msk.f32.gmra.mxu3 %vm484_vm1, %v1222_v0 }
  0xfd   : > { %v4744_v61 = vmax.f32 %v1108_v3, %v1910_v5  ;;  %3967 = vmatmul.msk.f32.gmra.mxu1 %vm484_vm1, %v412_v2  ;;  %v1109_v21 = vmax.f32 %v938_v8, 0.0  ;;  %v413_v5 = vld [vmem:[%s4355_s23 + $0x1e0] sm:$0xff]  ;;  %v1230_v8 = vld [vmem:[%s4343_s17 + $0x218] sm:$0xff] }
  0xfe   : > { %v1530_v7 = vpop.f32.mrf.mxu2 }
  0xff   : > { %v1531_v9 = vadd.f32 %v4609_v31, %v1530_v7  ;;  %v1748_v10 = vpop.f32.mrf.mxu3 }
 0x100   : > { %v731_v11 = vpop.f32.mrf.mxu0 }
 0x101   : > { %v1740_v16 = vadd.f32 %v1739_v23, %v1531_v9  ;;  %v732_v24 = vadd.f32 %v4609_v31, %v731_v11  ;;  %v420_v11 = vld [vmem:[%s4355_s23 + $0x218] sm:$0xff] }
 0x102   : > { %v4752_v18 = vpop.f32.mrf.mxu1 }
 0x103   : > { %v1911_v22 = vmax.f32 %v1740_v16, 0.0  ;;  %778 = vmatmul.f32.gmra.mxu0 %v407_v12  ;;  %1580 = vmatmul.f32.gmra.mxu2 %v1217_v15  ;;  %v941_v25 = vadd.f32 %v4713_v30, %v732_v24  ;;  %v415_v24 = vld [vmem:[%s4355_s23 + $0x1f0] sm:$0xff] }
 0x104   : > { %4033 = vmatmul.msk.f32.gmra.mxu3 %vm484_vm1, %v1224_v17 }
 0x105   : > { %v4757_v13 = vmax.f32 %v1109_v21, %v1911_v22  ;;  %3968 = vmatmul.msk.f32.gmra.mxu1 %vm484_vm1, %v414_v20  ;;  %v1110_v39 = vmax.f32 %v941_v25, 0.0 }
 0x106   : > { %v1533_v23 = vpop.f32.mrf.mxu2 }
 0x107   : > { %v1534_v26 = vadd.f32 %v4609_v31, %v1533_v23  ;;  %v1751_v27 = vpop.f32.mrf.mxu3  ;;  %v1225_v23 = vld [vmem:[%s4343_s17 + $0x1f0] sm:$0xff] }
 0x108   : > { %v734_v28 = vpop.f32.mrf.mxu0 }
 0x109   : > { %v1743_v34 = vadd.f32 %v1742_v40, %v1534_v26  ;;  %v735_v42 = vadd.f32 %v4609_v31, %v734_v28  ;;  %v1232_v26 = vld [vmem:[%s4343_s17 + $0x228] sm:$0xff] }
 0x10a   : > { %v4765_v37 = vpop.f32.mrf.mxu1 }
 0x10b   : > { %v1912_v41 = vmax.f32 %v1743_v34, 0.0  ;;  %781 = vmatmul.f32.gmra.mxu0 %v409_v32  ;;  %1583 = vmatmul.f32.gmra.mxu2 %v1219_v33  ;;  %v944_v43 = vadd.f32 %v4726_v47, %v735_v42  ;;  %v422_v32 = vld [vmem:[%s4355_s23 + $0x228] sm:$0xff] }
 0x10c   : > { %4034 = vmatmul.msk.f32.gmra.mxu3 %vm484_vm1, %v1226_v36 }
 0x10d   : > { %v4770_v30 = vmax.f32 %v1110_v39, %v1912_v41  ;;  %3969 = vmatmul.msk.f32.gmra.mxu1 %vm484_vm1, %v416_v38  ;;  %v1111_v58 = vmax.f32 %v944_v43, 0.0  ;;  %v1227_v43 = vld [vmem:[%s4343_s17 + $0x200] sm:$0xff] }
 0x10e   : > { %v1536_v40 = vpop.f32.mrf.mxu2 }
 0x10f   : > { %v1537_v44 = vadd.f32 %v4609_v31, %v1536_v40  ;;  %v1754_v46 = vpop.f32.mrf.mxu3  ;;  %v417_v40 = vld [vmem:[%s4355_s23 + $0x200] sm:$0xff] }
 0x110   : > { %v737_v49 = vpop.f32.mrf.mxu0 }
 0x111   : > { %v1746_v52 = vadd.f32 %v1745_v57, %v1537_v44  ;;  %v738_v60 = vadd.f32 %v4609_v31, %v737_v49  ;;  %v1234_v49 = vld [vmem:[%s4343_s17 + $0x238] sm:$0xff] }
 0x112   : > { %v4778_v55 = vpop.f32.mrf.mxu1 }
 0x113   : > { %v1913_v59 = vmax.f32 %v1746_v52, 0.0  ;;  %784 = vmatmul.f32.gmra.mxu0 %v411_v50  ;;  %1586 = vmatmul.f32.gmra.mxu2 %v1221_v51  ;;  %v947_v62 = vadd.f32 %v4739_v1, %v738_v60  ;;  %v424_v51 = vld [vmem:[%s4355_s23 + $0x238] sm:$0xff] }
 0x114   : > { %4035 = vmatmul.msk.f32.gmra.mxu3 %vm484_vm1, %v1228_v54 }
 0x115   : > { %v4783_v47 = vmax.f32 %v1111_v58, %v1913_v59  ;;  %3970 = vmatmul.msk.f32.gmra.mxu1 %vm484_vm1, %v418_v56  ;;  %v1112_v12 = vmax.f32 %v947_v62, 0.0  ;;  %v419_v62 = vld [vmem:[%s4355_s23 + $0x210] sm:$0xff] }
 0x116   : > { %v1539_v57 = vpop.f32.mrf.mxu2 }
 0x117   : > { %v1540_v0 = vadd.f32 %v4609_v31, %v1539_v57  ;;  %v1757_v2 = vpop.f32.mrf.mxu3 }
 0x118   : > { %v740_v3 = vpop.f32.mrf.mxu0 }
 0x119   : > { %v1749_v7 = vadd.f32 %v1748_v10, %v1540_v0  ;;  %v741_v16 = vadd.f32 %v4609_v31, %v740_v3  ;;  %v1229_v0 = vld [vmem:[%s4343_s17 + $0x210] sm:$0xff] }
 0x11a   : > { %v4791_v9 = vpop.f32.mrf.mxu1 }
 0x11b   : > { %v1914_v15 = vmax.f32 %v1749_v7, 0.0  ;;  %787 = vmatmul.f32.gmra.mxu0 %v413_v5  ;;  %1589 = vmatmul.f32.gmra.mxu2 %v1223_v6  ;;  %v950_v17 = vadd.f32 %v4752_v18, %v741_v16  ;;  %v1236_v5 = vld [vmem:[%s4343_s17 + $0x248] sm:$0xff] }
 0x11c   : > { %4036 = vmatmul.msk.f32.gmra.mxu3 %vm484_vm1, %v1230_v8  ;;  %v426_v7 = vld [vmem:[%s4355_s23 + $0x248] sm:$0xff] }
 0x11d   : > { %v4796_v1 = vmax.f32 %v1112_v12, %v1914_v15  ;;  %3971 = vmatmul.msk.f32.gmra.mxu1 %vm484_vm1, %v420_v11  ;;  %v1113_v33 = vmax.f32 %v950_v17, 0.0 }
 0x11e   : > { %v1542_v10 = vpop.f32.mrf.mxu2 }
 0x11f   : > { %v1543_v20 = vadd.f32 %v4609_v31, %v1542_v10  ;;  %v1760_v21 = vpop.f32.mrf.mxu3 }
 0x120   : > { %v743_v22 = vpop.f32.mrf.mxu0 }
 0x121   : > { %v1752_v25 = vadd.f32 %v1751_v27, %v1543_v20  ;;  %v744_v36 = vadd.f32 %v4609_v31, %v743_v22  ;;  %v421_v20 = vld [vmem:[%s4355_s23 + $0x220] sm:$0xff] }
 0x122   : > { %v4804_v28 = vpop.f32.mrf.mxu1  ;;  %v1231_v22 = vld [vmem:[%s4343_s17 + $0x220] sm:$0xff] }
 0x123   : > { %v1915_v34 = vmax.f32 %v1752_v25, 0.0  ;;  %790 = vmatmul.f32.gmra.mxu0 %v415_v24  ;;  %1592 = vmatmul.f32.gmra.mxu2 %v1225_v23  ;;  %v953_v38 = vadd.f32 %v4765_v37, %v744_v36  ;;  %v1238_v23 = vld [vmem:[%s4343_s17 + $0x258] sm:$0xff] }
 0x124   : > { %4037 = vmatmul.msk.f32.gmra.mxu3 %vm484_vm1, %v1232_v26  ;;  %v428_v26 = vld [vmem:[%s4355_s23 + $0x258] sm:$0xff] }
 0x125   : > { %v4809_v18 = vmax.f32 %v1113_v33, %v1915_v34  ;;  %3972 = vmatmul.msk.f32.gmra.mxu1 %vm484_vm1, %v422_v32  ;;  %v1114_v52 = vmax.f32 %v953_v38, 0.0 }
 0x126   : > { %v1545_v27 = vpop.f32.mrf.mxu2 }
 0x127   : > { %v1546_v39 = vadd.f32 %v4609_v31, %v1545_v27  ;;  %v1763_v41 = vpop.f32.mrf.mxu3 }
 0x128   : > { %v746_v42 = vpop.f32.mrf.mxu0 }
 0x129   : > { %v1755_v44 = vadd.f32 %v1754_v46, %v1546_v39  ;;  %v747_v56 = vadd.f32 %v4609_v31, %v746_v42  ;;  %v423_v42 = vld [vmem:[%s4355_s23 + $0x230] sm:$0xff] }
 0x12a   : > { %v4817_v50 = vpop.f32.mrf.mxu1 }
 0x12b   : > { %v1916_v54 = vmax.f32 %v1755_v44, 0.0  ;;  %793 = vmatmul.f32.gmra.mxu0 %v417_v40  ;;  %1595 = vmatmul.f32.gmra.mxu2 %v1227_v43  ;;  %v956_v58 = vadd.f32 %v4778_v55, %v747_v56  ;;  %v1233_v40 = vld [vmem:[%s4343_s17 + $0x230] sm:$0xff]  ;;  %v1240_v44 = vld [vmem:[%s4343_s17 + $0x268] sm:$0xff] }
 0x12c   : > { %4038 = vmatmul.msk.f32.gmra.mxu3 %vm484_vm1, %v1234_v49 }
 0x12d   : > { %v4822_v37 = vmax.f32 %v1114_v52, %v1916_v54  ;;  %3973 = vmatmul.msk.f32.gmra.mxu1 %vm484_vm1, %v424_v51  ;;  %v1115_v8 = vmax.f32 %v956_v58, 0.0  ;;  %v430_v51 = vld [vmem:[%s4355_s23 + $0x268] sm:$0xff] }
 0x12e   : > { %v1548_v46 = vpop.f32.mrf.mxu2 }
 0x12f   : > { %v1549_v59 = vadd.f32 %v4609_v31, %v1548_v46  ;;  %v1766_v60 = vpop.f32.mrf.mxu3 }
 0x130   : > { %v749_v57 = vpop.f32.mrf.mxu0 }
 0x131   : > { %v1758_v3 = vadd.f32 %v1757_v2, %v1549_v59  ;;  %v750_v12 = vadd.f32 %v4609_v31, %v749_v57 }
 0x132   : > { %v4830_v6 = vpop.f32.mrf.mxu1 }
 0x133   : > { %v1917_v11 = vmax.f32 %v1758_v3, 0.0  ;;  %796 = vmatmul.f32.gmra.mxu0 %v419_v62  ;;  %1598 = vmatmul.f32.gmra.mxu2 %v1229_v0  ;;  %v959_v15 = vadd.f32 %v4791_v9, %v750_v12  ;;  %v425_v62 = vld [vmem:[%s4355_s23 + $0x240] sm:$0xff] }
 0x134   : > { %4039 = vmatmul.msk.f32.gmra.mxu3 %vm484_vm1, %v1236_v5  ;;  %v1235_v0 = vld [vmem:[%s4343_s17 + $0x240] sm:$0xff]  ;;  %v1242_v5 = vld [vmem:[%s4343_s17 + $0x278] sm:$0xff] }
 0x135   : > { %v4835_v55 = vmax.f32 %v1115_v8, %v1917_v11  ;;  %3974 = vmatmul.msk.f32.gmra.mxu1 %vm484_vm1, %v426_v7  ;;  %v1116_v32 = vmax.f32 %v959_v15, 0.0  ;;  %v432_v8 = vld [vmem:[%s4355_s23 + $0x278] sm:$0xff] }
 0x136   : > { %v1551_v2 = vpop.f32.mrf.mxu2 }
 0x137   : > { %v1552_v16 = vadd.f32 %v4609_v31, %v1551_v2  ;;  %v1769_v10 = vpop.f32.mrf.mxu3 }
 0x138   : > { %v752_v17 = vpop.f32.mrf.mxu0 }
 0x139   : > { %v1761_v24 = vadd.f32 %v1760_v21, %v1552_v16  ;;  %v753_v34 = vadd.f32 %v4609_v31, %v752_v17 }
 0x13a   : > { %v4843_v25 = vpop.f32.mrf.mxu1 }
 0x13b   : > { %v1918_v33 = vmax.f32 %v1761_v24, 0.0  ;;  %799 = vmatmul.f32.gmra.mxu0 %v421_v20  ;;  %1601 = vmatmul.f32.gmra.mxu2 %v1231_v22  ;;  %v962_v36 = vadd.f32 %v4804_v28, %v753_v34  ;;  %v427_v22 = vld [vmem:[%s4355_s23 + $0x250] sm:$0xff] }
 0x13c   : > { %4040 = vmatmul.msk.f32.gmra.mxu3 %vm484_vm1, %v1238_v23  ;;  %v1237_v24 = vld [vmem:[%s4343_s17 + $0x250] sm:$0xff] }
 0x13d   : > { %v4848_v9 = vmax.f32 %v1116_v32, %v1918_v33  ;;  %3975 = vmatmul.msk.f32.gmra.mxu1 %vm484_vm1, %v428_v26  ;;  %v1117_v52 = vmax.f32 %v962_v36, 0.0  ;;  %v1244_v26 = vld [vmem:[%s4343_s17 + $0x288] sm:$0xff] }
 0x13e   : > { %v1554_v21 = vpop.f32.mrf.mxu2  ;;  %v434_v33 = vld [vmem:[%s4355_s23 + $0x288] sm:$0xff] }
 0x13f   : > { %v1555_v27 = vadd.f32 %v4609_v31, %v1554_v21  ;;  %v1772_v38 = vpop.f32.mrf.mxu3 }
 0x140   : > { %v755_v39 = vpop.f32.mrf.mxu0 }
 0x141   : > { %v1764_v43 = vadd.f32 %v1763_v41, %v1555_v27  ;;  %v756_v56 = vadd.f32 %v4609_v31, %v755_v39 }
 0x142   : > { %v4856_v49 = vpop.f32.mrf.mxu1 }
 0x143   : > { %v1919_v54 = vmax.f32 %v1764_v43, 0.0  ;;  %802 = vmatmul.f32.gmra.mxu0 %v423_v42  ;;  %1604 = vmatmul.f32.gmra.mxu2 %v1233_v40  ;;  %v965_v46 = vadd.f32 %v4817_v50, %v756_v56  ;;  %v429_v43 = vld [vmem:[%s4355_s23 + $0x260] sm:$0xff]  ;;  %v436_v56 = vld [vmem:[%s4355_s23 + $0x298] sm:$0xff] }
 0x144   : > { %4041 = vmatmul.msk.f32.gmra.mxu3 %vm484_vm1, %v1240_v44  ;;  %v1239_v44 = vld [vmem:[%s4343_s17 + $0x260] sm:$0xff] }
 0x145   : > { %v4861_v28 = vmax.f32 %v1117_v52, %v1919_v54  ;;  %3976 = vmatmul.msk.f32.gmra.mxu1 %vm484_vm1, %v430_v51  ;;  %v1118_v11 = vmax.f32 %v965_v46, 0.0  ;;  %v1246_v52 = vld [vmem:[%s4343_s17 + $0x298] sm:$0xff] }
 0x146   : > { %v1557_v41 = vpop.f32.mrf.mxu2 }
 0x147   : > { %v1558_v58 = vadd.f32 %v4609_v31, %v1557_v41  ;;  %v1775_v59 = vpop.f32.mrf.mxu3 }
 0x148   : > { %v758_v57 = vpop.f32.mrf.mxu0 }
 0x149   : > { %v1767_v3 = vadd.f32 %v1766_v60, %v1558_v58  ;;  %v759_v2 = vadd.f32 %v4609_v31, %v758_v57 }
 0x14a   : > { %v4869_v7 = vpop.f32.mrf.mxu1 }
 0x14b   : > { %v1920_v12 = vmax.f32 %v1767_v3, 0.0  ;;  %805 = vmatmul.f32.gmra.mxu0 %v425_v62  ;;  %1607 = vmatmul.f32.gmra.mxu2 %v1235_v0  ;;  %v968_v15 = vadd.f32 %v4830_v6, %v759_v2 }
 0x14c   : > { %4042 = vmatmul.msk.f32.gmra.mxu3 %vm484_vm1, %v1242_v5  ;;  %v431_v5 = vld [vmem:[%s4355_s23 + $0x270] sm:$0xff] }
 0x14d   : > { %v4874_v50 = vmax.f32 %v1118_v11, %v1920_v12  ;;  %3977 = vmatmul.msk.f32.gmra.mxu1 %vm484_vm1, %v432_v8  ;;  %v1119_v34 = vmax.f32 %v968_v15, 0.0  ;;  %v1241_v8 = vld [vmem:[%s4343_s17 + $0x270] sm:$0xff]  ;;  %v1248_v12 = vld [vmem:[%s4343_s17 + $0x2a8] sm:$0xff] }
 0x14e   : > { %v1560_v60 = vpop.f32.mrf.mxu2 }
 0x14f   : > { %v1561_v16 = vadd.f32 %v4609_v31, %v1560_v60  ;;  %v1778_v17 = vpop.f32.mrf.mxu3  ;;  %v438_v60 = vld [vmem:[%s4355_s23 + $0x2a8] sm:$0xff] }
 0x150   : > { %v761_v20 = vpop.f32.mrf.mxu0 }
 0x151   : > { %v1770_v23 = vadd.f32 %v1769_v10, %v1561_v16  ;;  %v762_v36 = vadd.f32 %v4609_v31, %v761_v20 }
 0x152   : > { %v4882_v32 = vpop.f32.mrf.mxu1 }
 0x153   : > { %v1921_v21 = vmax.f32 %v1770_v23, 0.0  ;;  %808 = vmatmul.f32.gmra.mxu0 %v427_v22  ;;  %1610 = vmatmul.f32.gmra.mxu2 %v1237_v24  ;;  %v971_v27 = vadd.f32 %v4843_v25, %v762_v36  ;;  %v1250_v36 = vld [vmem:[%s4343_s17 + $0x2b8] sm:$0xff] }
 0x154   : > { %4043 = vmatmul.msk.f32.gmra.mxu3 %vm484_vm1, %v1244_v26 }
 0x155   : > { %v4887_v6 = vmax.f32 %v1119_v34, %v1921_v21  ;;  %3978 = vmatmul.msk.f32.gmra.mxu1 %vm484_vm1, %v434_v33  ;;  %v1120_v41 = vmax.f32 %v971_v27, 0.0  ;;  %v433_v33 = vld [vmem:[%s4355_s23 + $0x280] sm:$0xff]  ;;  %v440_v27 = vld [vmem:[%s4355_s23 + $0x2b8] sm:$0xff] }
 0x156   : > { %v1563_v10 = vpop.f32.mrf.mxu2  ;;  %v1243_v34 = vld [vmem:[%s4343_s17 + $0x280] sm:$0xff] }
 0x157   : > { %v1564_v39 = vadd.f32 %v4609_v31, %v1563_v10  ;;  %v1781_v42 = vpop.f32.mrf.mxu3 }
 0x158   : > { %v764_v40 = vpop.f32.mrf.mxu0 }
 0x159   : > { %v1773_v51 = vadd.f32 %v1772_v38, %v1564_v39  ;;  %v765_v58 = vadd.f32 %v4609_v31, %v764_v40 }
 0x15a   : > { %v4895_v54 = vpop.f32.mrf.mxu1 }
 0x15b   : > { %v1922_v46 = vmax.f32 %v1773_v51, 0.0  ;;  %811 = vmatmul.f32.gmra.mxu0 %v429_v43  ;;  %1613 = vmatmul.f32.gmra.mxu2 %v1239_v44  ;;  %v974_v57 = vadd.f32 %v4856_v49, %v765_v58 }
 0x15c   : > { %4044 = vmatmul.msk.f32.gmra.mxu3 %vm484_vm1, %v1246_v52 }
 0x15d   : > { %v4900_v25 = vmax.f32 %v1120_v41, %v1922_v46  ;;  %3979 = vmatmul.msk.f32.gmra.mxu1 %vm484_vm1, %v436_v56  ;;  %v1121_v15 = vmax.f32 %v974_v57, 0.0  ;;  %v435_v41 = vld [vmem:[%s4355_s23 + $0x290] sm:$0xff] }
 0x15e   : > { %v1566_v38 = vpop.f32.mrf.mxu2  ;;  %v1245_v46 = vld [vmem:[%s4343_s17 + $0x290] sm:$0xff] }
 0x15f   : > { %v1567_v62 = vadd.f32 %v4609_v31, %v1566_v38  ;;  %v1784_v0 = vpop.f32.mrf.mxu3  ;;  %v1252_v38 = vld [vmem:[%s4343_s17 + $0x2c8] sm:$0xff] }
 0x160   : > { %v767_v3 = vpop.f32.mrf.mxu0 }
 0x161   : > { %v1776_v11 = vadd.f32 %v1775_v59, %v1567_v62  ;;  %v768_v20 = vadd.f32 %v4609_v31, %v767_v3  ;;  %v442_v62 = vld [vmem:[%s4355_s23 + $0x2c8] sm:$0xff] }
 0x162   : > { %v4908_v2 = vpop.f32.mrf.mxu1 }
 0x163   : > { %v1923_v16 = vmax.f32 %v1776_v11, 0.0  ;;  %814 = vmatmul.f32.gmra.mxu0 %v431_v5  ;;  %1616 = vmatmul.f32.gmra.mxu2 %v1241_v8  ;;  %v977_v22 = vadd.f32 %v4869_v7, %v768_v20  ;;  %v1247_v20 = vld [vmem:[%s4343_s17 + $0x2a0] sm:$0xff] }
 0x164   : > { %4045 = vmatmul.msk.f32.gmra.mxu3 %vm484_vm1, %v1248_v12 }
 0x165   : > { %v4913_v49 = vmax.f32 %v1121_v15, %v1923_v16  ;;  %3980 = vmatmul.msk.f32.gmra.mxu1 %vm484_vm1, %v438_v60  ;;  %v1122_v39 = vmax.f32 %v977_v22, 0.0  ;;  %v437_v16 = vld [vmem:[%s4355_s23 + $0x2a0] sm:$0xff]  ;;  %v1254_v22 = vld [vmem:[%s4343_s17 + $0x2d8] sm:$0xff] }
 0x166   : > { %v1569_v59 = vpop.f32.mrf.mxu2 }
 0x167   : > { %v1570_v24 = vadd.f32 %v4609_v31, %v1569_v59  ;;  %v1787_v23 = vpop.f32.mrf.mxu3 }
 0x168   : > { %v770_v26 = vpop.f32.mrf.mxu0 }
 0x169   : > { %v1779_v21 = vadd.f32 %v1778_v17, %v1570_v24  ;;  %v771_v43 = vadd.f32 %v4609_v31, %v770_v26  ;;  %v444_v26 = vld [vmem:[%s4355_s23 + $0x2d8] sm:$0xff] }
 0x16a   : > { %v4921_v10 = vpop.f32.mrf.mxu1 }
 0x16b   : > { %v1924_v40 = vmax.f32 %v1779_v21, 0.0  ;;  %817 = vmatmul.f32.gmra.mxu0 %v433_v33  ;;  %1619 = vmatmul.f32.gmra.mxu2 %v1243_v34  ;;  %v980_v44 = vadd.f32 %v4882_v32, %v771_v43  ;;  %v439_v43 = vld [vmem:[%s4355_s23 + $0x2b0] sm:$0xff] }
 0x16c   : > { %4046 = vmatmul.msk.f32.gmra.mxu3 %vm484_vm1, %v1250_v36 }
 0x16d   : > { %v4926_v7 = vmax.f32 %v1122_v39, %v1924_v40  ;;  %3981 = vmatmul.msk.f32.gmra.mxu1 %vm484_vm1, %v440_v27  ;;  %v1123_v3 = vmax.f32 %v980_v44, 0.0 }
 0x16e   : > { %v1572_v17 = vpop.f32.mrf.mxu2 }
 0x16f   : > { %v1573_v51 = vadd.f32 %v4609_v31, %v1572_v17  ;;  %v1790_v52 = vpop.f32.mrf.mxu3  ;;  %v1249_v17 = vld [vmem:[%s4343_s17 + $0x2b0] sm:$0xff] }
 0x170   : > { %v773_v56 = vpop.f32.mrf.mxu0 }
 0x171   : > { %v1782_v58 = vadd.f32 %v1781_v42, %v1573_v51  ;;  %v774_v8 = vadd.f32 %v4609_v31, %v773_v56  ;;  %v1256_v51 = vld [vmem:[%s4343_s17 + $0x2e8] sm:$0xff] }
 0x172   : > { %v4934_v57 = vpop.f32.mrf.mxu1 }
 0x173   : > { %v1925_v5 = vmax.f32 %v1782_v58, 0.0  ;;  %820 = vmatmul.f32.gmra.mxu0 %v435_v41  ;;  %1622 = vmatmul.f32.gmra.mxu2 %v1245_v46  ;;  %v983_v11 = vadd.f32 %v4895_v54, %v774_v8  ;;  %v446_v41 = vld [vmem:[%s4355_s23 + $0x2e8] sm:$0xff] }
 0x174   : > { %4047 = vmatmul.msk.f32.gmra.mxu3 %vm484_vm1, %v1252_v38 }
 0x175   : > { %v4939_v32 = vmax.f32 %v1123_v3, %v1925_v5  ;;  %3982 = vmatmul.msk.f32.gmra.mxu1 %vm484_vm1, %v442_v62  ;;  %v1124_v33 = vmax.f32 %v983_v11, 0.0  ;;  %v1251_v11 = vld [vmem:[%s4343_s17 + $0x2c0] sm:$0xff] }
 0x176   : > { %v1575_v42 = vpop.f32.mrf.mxu2 }
 0x177   : > { %v1576_v12 = vadd.f32 %v4609_v31, %v1575_v42  ;;  %v1793_v60 = vpop.f32.mrf.mxu3  ;;  %v441_v42 = vld [vmem:[%s4355_s23 + $0x2c0] sm:$0xff] }
 0x178   : > { %v776_v15 = vpop.f32.mrf.mxu0 }
 0x179   : > { %v1785_v59 = vadd.f32 %v1784_v0, %v1576_v12  ;;  %v777_v21 = vadd.f32 %v4609_v31, %v776_v15  ;;  %v1258_v15 = vld [vmem:[%s4343_s17 + $0x2f8] sm:$0xff] }
 0x17a   : > { %v4947_v24 = vpop.f32.mrf.mxu1 }
 0x17b   : > { %v1926_v34 = vmax.f32 %v1785_v59, 0.0  ;;  %823 = vmatmul.f32.gmra.mxu0 %v437_v16  ;;  %1625 = vmatmul.f32.gmra.mxu2 %v1247_v20  ;;  %v986_v36 = vadd.f32 %v4908_v2, %v777_v21  ;;  %v4966_v2 = vld [vmem:[%s6079_s5] ss:$0 sm:$0xff]  ;;  %v448_v20 = vld [vmem:[%s4355_s23 + $0x2f8] sm:$0xff] }
 0x17c   : > { %4048 = vmatmul.msk.f32.gmra.mxu3 %vm484_vm1, %v1254_v22 }
 0x17d   : > { %v4952_v54 = vmax.f32 %v1124_v33, %v1926_v34  ;;  %3983 = vmatmul.msk.f32.gmra.mxu1 %vm484_vm1, %v444_v26  ;;  %v1125_v46 = vmax.f32 %v986_v36, 0.0  ;;  %v443_v36 = vld [vmem:[%s4355_s23 + $0x2d0] sm:$0xff] }
 0x17e   : > { %v1578_v0 = vpop.f32.mrf.mxu2 }
 0x17f   : > { %v1579_v27 = vadd.f32 %v4609_v31, %v1578_v0  ;;  %v1796_v39 = vpop.f32.mrf.mxu3 }
 0x180   : > { %v779_v40 = vpop.f32.mrf.mxu0 }
 0x181   : > { %v1788_v44 = vadd.f32 %v1787_v23, %v1579_v27  ;;  %v780_v31 = vadd.f32 %v4966_v2, %v779_v40  ;;  %v1253_v27 = vld [vmem:[%s4343_s17 + $0x2d0] sm:$0xff] }
 0x182   : > { %v4960_v56 = vpop.f32.mrf.mxu1 }
 0x183   : > { %v1927_v58 = vmax.f32 %v1788_v44, 0.0  ;;  %826 = vmatmul.f32.gmra.mxu0 %v439_v43  ;;  %1628 = vmatmul.f32.gmra.mxu2 %v1249_v17  ;;  %v989_v62 = vadd.f32 %v4921_v10, %v780_v31  ;;  %v1260_v43 = vld [vmem:[%s4343_s17 + $0x308] sm:$0xff] }
 0x184   : > { %4049 = vmatmul.msk.f32.gmra.mxu3 %vm484_vm1, %v1256_v51  ;;  %v450_v44 = vld [vmem:[%s4355_s23 + $0x308] sm:$0xff] }
 0x185   : > { %v4970_v23 = vmax.f32 %v1125_v46, %v1927_v58  ;;  %3984 = vmatmul.msk.f32.gmra.mxu1 %vm484_vm1, %v446_v41  ;;  %v1126_v59 = vmax.f32 %v989_v62, 0.0 }
 0x186   : > { %v1581_v38 = vpop.f32.mrf.mxu2 }
 0x187   : > { %v1582_v3 = vadd.f32 %v4966_v2, %v1581_v38  ;;  %v1799_v5 = vpop.f32.mrf.mxu3 }
 0x188   : > { %v782_v8 = vpop.f32.mrf.mxu0 }
 0x189   : > { %v1791_v12 = vadd.f32 %v1790_v52, %v1582_v3  ;;  %v783_v26 = vadd.f32 %v4966_v2, %v782_v8  ;;  %v445_v3 = vld [vmem:[%s4355_s23 + $0x2e0] sm:$0xff] }
 0x18a   : > { %v4978_v16 = vpop.f32.mrf.mxu1  ;;  %v1255_v8 = vld [vmem:[%s4343_s17 + $0x2e0] sm:$0xff] }
 0x18b   : > { %v1928_v22 = vmax.f32 %v1791_v12, 0.0  ;;  %829 = vmatmul.f32.gmra.mxu0 %v441_v42  ;;  %1631 = vmatmul.f32.gmra.mxu2 %v1251_v11  ;;  %v992_v33 = vadd.f32 %v4934_v57, %v783_v26  ;;  %v1262_v11 = vld [vmem:[%s4343_s17 + $0x318] sm:$0xff] }
 0x18c   : > { %4050 = vmatmul.msk.f32.gmra.mxu3 %vm484_vm1, %v1258_v15  ;;  %v452_v15 = vld [vmem:[%s4355_s23 + $0x318] sm:$0xff] }
 0x18d   : > { %v4983_v10 = vmax.f32 %v1126_v59, %v1928_v22  ;;  %3985 = vmatmul.msk.f32.gmra.mxu1 %vm484_vm1, %v448_v20  ;;  %v1127_v51 = vmax.f32 %v992_v33, 0.0 }
 0x18e   : > { %v1584_v52 = vpop.f32.mrf.mxu2 }
 0x18f   : > { %v1585_v34 = vadd.f32 %v4966_v2, %v1584_v52  ;;  %v1802_v21 = vpop.f32.mrf.mxu3 }
 0x190   : > { %v785_v0 = vpop.f32.mrf.mxu0 }
 0x191   : > { %v1794_v40 = vadd.f32 %v1793_v60, %v1585_v34  ;;  %v786_v46 = vadd.f32 %v4966_v2, %v785_v0  ;;  %v447_v0 = vld [vmem:[%s4355_s23 + $0x2f0] sm:$0xff] }
 0x192   : > { %v4991_v17 = vpop.f32.mrf.mxu1 }
 0x193   : > { %v1929_v41 = vmax.f32 %v1794_v40, 0.0  ;;  %832 = vmatmul.f32.gmra.mxu0 %v443_v36  ;;  %1634 = vmatmul.f32.gmra.mxu2 %v1253_v27  ;;  %v995_v58 = vadd.f32 %v4947_v24, %v786_v46  ;;  %v1257_v36 = vld [vmem:[%s4343_s17 + $0x2f0] sm:$0xff]  ;;  %v1264_v40 = vld [vmem:[%s4343_s17 + $0x328] sm:$0xff] }
 0x194   : > { %4051 = vmatmul.msk.f32.gmra.mxu3 %vm484_vm1, %v1260_v43 }
 0x195   : > { %v4996_v57 = vmax.f32 %v1127_v51, %v1929_v41  ;;  %3986 = vmatmul.msk.f32.gmra.mxu1 %vm484_vm1, %v450_v44  ;;  %v1128_v20 = vmax.f32 %v995_v58, 0.0  ;;  %v454_v44 = vld [vmem:[%s4355_s23 + $0x328] sm:$0xff] }
 0x196   : > { %v1587_v60 = vpop.f32.mrf.mxu2 }
 0x197   : > { %v1588_v31 = vadd.f32 %v4966_v2, %v1587_v60  ;;  %v1805_v38 = vpop.f32.mrf.mxu3 }
 0x198   : > { %v788_v62 = vpop.f32.mrf.mxu0 }
 0x199   : > { %v1797_v42 = vadd.f32 %v1796_v39, %v1588_v31  ;;  %v789_v22 = vadd.f32 %v4966_v2, %v788_v62 }
 0x19a   : > { %v5004_v12 = vpop.f32.mrf.mxu1 }
 0x19b   : > { %v1930_v59 = vmax.f32 %v1797_v42, 0.0  ;;  %835 = vmatmul.f32.gmra.mxu0 %v445_v3  ;;  %1637 = vmatmul.f32.gmra.mxu2 %v1255_v8  ;;  %v998_v26 = vadd.f32 %v4960_v56, %v789_v22  ;;  %v449_v3 = vld [vmem:[%s4355_s23 + $0x300] sm:$0xff] }
 0x19c   : > { %4052 = vmatmul.msk.f32.gmra.mxu3 %vm484_vm1, %v1262_v11  ;;  %v1259_v8 = vld [vmem:[%s4343_s17 + $0x300] sm:$0xff]  ;;  %v1266_v11 = vld [vmem:[%s4343_s17 + $0x338] sm:$0xff] }
 0x19d   : > { %v5009_v24 = vmax.f32 %v1128_v20, %v1930_v59  ;;  %3987 = vmatmul.msk.f32.gmra.mxu1 %vm484_vm1, %v452_v15  ;;  %v1129_v51 = vmax.f32 %v998_v26, 0.0  ;;  %v456_v20 = vld [vmem:[%s4355_s23 + $0x338] sm:$0xff] }
 0x19e   : > { %v1590_v39 = vpop.f32.mrf.mxu2 }
 0x19f   : > { %v1591_v52 = vadd.f32 %v4966_v2, %v1590_v39  ;;  %v1808_v33 = vpop.f32.mrf.mxu3 }
 0x1a0   : > { %v791_v34 = vpop.f32.mrf.mxu0 }
 0x1a1   : > { %v1800_v27 = vadd.f32 %v1799_v5, %v1591_v52  ;;  %v792_v46 = vadd.f32 %v4966_v2, %v791_v34 }
 0x1a2   : > { %v5017_v43 = vpop.f32.mrf.mxu1 }
 0x1a3   : > { %v1931_v41 = vmax.f32 %v1800_v27, 0.0  ;;  %838 = vmatmul.f32.gmra.mxu0 %v447_v0  ;;  %1640 = vmatmul.f32.gmra.mxu2 %v1257_v36  ;;  %v1001_v60 = vadd.f32 %v4978_v16, %v792_v46  ;;  %v451_v36 = vld [vmem:[%s4355_s23 + $0x310] sm:$0xff] }
 0x1a4   : > { %4053 = vmatmul.msk.f32.gmra.mxu3 %vm484_vm1, %v1264_v40  ;;  %v1261_v27 = vld [vmem:[%s4343_s17 + $0x310] sm:$0xff] }
 0x1a5   : > { %v5022_v56 = vmax.f32 %v1129_v51, %v1931_v41  ;;  %3988 = vmatmul.msk.f32.gmra.mxu1 %vm484_vm1, %v454_v44  ;;  %v1130_v59 = vmax.f32 %v1001_v60, 0.0  ;;  %v1268_v44 = vld [vmem:[%s4343_s17 + $0x348] sm:$0xff] }
 0x1a6   : > { %v1593_v5 = vpop.f32.mrf.mxu2  ;;  %v458_v41 = vld [vmem:[%s4355_s23 + $0x348] sm:$0xff] }
 0x1a7   : > { %v1594_v58 = vadd.f32 %v4966_v2, %v1593_v5  ;;  %v1811_v31 = vpop.f32.mrf.mxu3 }
 0x1a8   : > { %v794_v62 = vpop.f32.mrf.mxu0 }
 0x1a9   : > { %v1803_v42 = vadd.f32 %v1802_v21, %v1594_v58  ;;  %v795_v39 = vadd.f32 %v4966_v2, %v794_v62 }
 0x1aa   : > { %v5030_v15 = vpop.f32.mrf.mxu1 }
 0x1ab   : > { %v1932_v22 = vmax.f32 %v1803_v42, 0.0  ;;  %841 = vmatmul.f32.gmra.mxu0 %v449_v3  ;;  %1643 = vmatmul.f32.gmra.mxu2 %v1259_v8  ;;  %v1004_v26 = vadd.f32 %v4991_v17, %v795_v39  ;;  %v453_v42 = vld [vmem:[%s4355_s23 + $0x320] sm:$0xff]  ;;  %v460_v39 = vld [vmem:[%s4355_s23 + $0x358] sm:$0xff] }
 0x1ac   : > { %4054 = vmatmul.msk.f32.gmra.mxu3 %vm484_vm1, %v1266_v11  ;;  %v1263_v11 = vld [vmem:[%s4343_s17 + $0x320] sm:$0xff] }
 0x1ad   : > { %v5035_v16 = vmax.f32 %v1130_v59, %v1932_v22  ;;  %3989 = vmatmul.msk.f32.gmra.mxu1 %vm484_vm1, %v456_v20  ;;  %v1131_v46 = vmax.f32 %v1004_v26, 0.0  ;;  %v1270_v59 = vld [vmem:[%s4343_s17 + $0x358] sm:$0xff] }
 0x1ae   : > { %v1596_v21 = vpop.f32.mrf.mxu2 }
 0x1af   : > { %v1597_v52 = vadd.f32 %v4966_v2, %v1596_v21  ;;  %v1814_v34 = vpop.f32.mrf.mxu3 }
 0x1b0   : > { %v797_v0 = vpop.f32.mrf.mxu0 }
 0x1b1   : > { %v1806_v40 = vadd.f32 %v1805_v38, %v1597_v52  ;;  %v798_v60 = vadd.f32 %v4966_v2, %v797_v0 }
 0x1b2   : > { %v5043_v51 = vpop.f32.mrf.mxu1 }
 0x1b3   : > { %v1933_v5 = vmax.f32 %v1806_v40, 0.0  ;;  %844 = vmatmul.f32.gmra.mxu0 %v451_v36  ;;  %1646 = vmatmul.f32.gmra.mxu2 %v1261_v27  ;;  %v1007_v58 = vadd.f32 %v5004_v12, %v798_v60 }
 0x1b4   : > { %4055 = vmatmul.msk.f32.gmra.mxu3 %vm484_vm1, %v1268_v44  ;;  %v455_v44 = vld [vmem:[%s4355_s23 + $0x330] sm:$0xff] }
 0x1b5   : > { %v5048_v17 = vmax.f32 %v1131_v46, %v1933_v5  ;;  %3990 = vmatmul.msk.f32.gmra.mxu1 %vm484_vm1, %v458_v41  ;;  %v1132_v21 = vmax.f32 %v1007_v58, 0.0  ;;  %v1265_v41 = vld [vmem:[%s4343_s17 + $0x330] sm:$0xff]  ;;  %v1272_v5 = vld [vmem:[%s4343_s17 + $0x368] sm:$0xff] }
 0x1b6   : > { %v1599_v38 = vpop.f32.mrf.mxu2 }
 0x1b7   : > { %v1600_v62 = vadd.f32 %v4966_v2, %v1599_v38  ;;  %v1817_v3 = vpop.f32.mrf.mxu3  ;;  %v462_v38 = vld [vmem:[%s4355_s23 + $0x368] sm:$0xff] }
 0x1b8   : > { %v800_v8 = vpop.f32.mrf.mxu0 }
 0x1b9   : > { %v1809_v20 = vadd.f32 %v1808_v33, %v1600_v62  ;;  %v801_v52 = vadd.f32 %v4966_v2, %v800_v8 }
 0x1ba   : > { %v5056_v22 = vpop.f32.mrf.mxu1 }
 0x1bb   : > { %v1934_v26 = vmax.f32 %v1809_v20, 0.0  ;;  %847 = vmatmul.f32.gmra.mxu0 %v453_v42  ;;  %1649 = vmatmul.f32.gmra.mxu2 %v1263_v11  ;;  %v1010_v0 = vadd.f32 %v5017_v43, %v801_v52  ;;  %v1274_v52 = vld [vmem:[%s4343_s17 + $0x378] sm:$0xff] }
 0x1bc   : > { %4056 = vmatmul.msk.f32.gmra.mxu3 %vm484_vm1, %v1270_v59 }
 0x1bd   : > { %v5061_v12 = vmax.f32 %v1132_v21, %v1934_v26  ;;  %3991 = vmatmul.msk.f32.gmra.mxu1 %vm484_vm1, %v460_v39  ;;  %v1133_v58 = vmax.f32 %v1010_v0, 0.0  ;;  %v457_v39 = vld [vmem:[%s4355_s23 + $0x340] sm:$0xff]  ;;  %v464_v0 = vld [vmem:[%s4355_s23 + $0x378] sm:$0xff] }
 0x1be   : > { %v1602_v33 = vpop.f32.mrf.mxu2  ;;  %v1267_v21 = vld [vmem:[%s4343_s17 + $0x340] sm:$0xff] }
 0x1bf   : > { %v1603_v36 = vadd.f32 %v4966_v2, %v1602_v33  ;;  %v1820_v27 = vpop.f32.mrf.mxu3 }
 0x1c0   : > { %v803_v40 = vpop.f32.mrf.mxu0 }
 0x1c1   : > { %v1812_v46 = vadd.f32 %v1811_v31, %v1603_v36  ;;  %v804_v8 = vadd.f32 %v4966_v2, %v803_v40 }
 0x1c2   : > { %v5069_v60 = vpop.f32.mrf.mxu1 }
 0x1c3   : > { %v1935_v62 = vmax.f32 %v1812_v46, 0.0  ;;  %850 = vmatmul.f32.gmra.mxu0 %v455_v44  ;;  %1652 = vmatmul.f32.gmra.mxu2 %v1265_v41  ;;  %v1013_v42 = vadd.f32 %v5030_v15, %v804_v8 }
 0x1c4   : > { %4057 = vmatmul.msk.f32.gmra.mxu3 %vm484_vm1, %v1272_v5 }
 0x1c5   : > { %v5074_v43 = vmax.f32 %v1133_v58, %v1935_v62  ;;  %3992 = vmatmul.msk.f32.gmra.mxu1 %vm484_vm1, %v462_v38  ;;  %v1134_v36 = vmax.f32 %v1013_v42, 0.0  ;;  %v459_v58 = vld [vmem:[%s4355_s23 + $0x350] sm:$0xff] }
 0x1c6   : > { %v1605_v31 = vpop.f32.mrf.mxu2  ;;  %v1269_v62 = vld [vmem:[%s4343_s17 + $0x350] sm:$0xff] }
 0x1c7   : > { %v1606_v11 = vadd.f32 %v4966_v2, %v1605_v31  ;;  %v1823_v20 = vpop.f32.mrf.mxu3  ;;  %v1276_v31 = vld [vmem:[%s4343_s17 + $0x388] sm:$0xff] }
 0x1c8   : > { %v806_v59 = vpop.f32.mrf.mxu0 }
 0x1c9   : > { %v1815_v26 = vadd.f32 %v1814_v34, %v1606_v11  ;;  %v807_v44 = vadd.f32 %v4966_v2, %v806_v59  ;;  %v466_v11 = vld [vmem:[%s4355_s23 + $0x388] sm:$0xff] }
 0x1ca   : > { %v5082_v33 = vpop.f32.mrf.mxu1 }
 0x1cb   : > { %v1936_v40 = vmax.f32 %v1815_v26, 0.0  ;;  %853 = vmatmul.f32.gmra.mxu0 %v457_v39  ;;  %1655 = vmatmul.f32.gmra.mxu2 %v1267_v21  ;;  %v1016_v41 = vadd.f32 %v5043_v51, %v807_v44  ;;  %v1271_v44 = vld [vmem:[%s4343_s17 + $0x360] sm:$0xff] }
 0x1cc   : > { %4058 = vmatmul.msk.f32.gmra.mxu3 %vm484_vm1, %v1274_v52 }
 0x1cd   : > { %v5087_v15 = vmax.f32 %v1134_v36, %v1936_v40  ;;  %3993 = vmatmul.msk.f32.gmra.mxu1 %vm484_vm1, %v464_v0  ;;  %v1135_v59 = vmax.f32 %v1016_v41, 0.0  ;;  %v461_v40 = vld [vmem:[%s4355_s23 + $0x360] sm:$0xff]  ;;  %v1278_v41 = vld [vmem:[%s4343_s17 + $0x398] sm:$0xff] }
 0x1ce   : > { %v1608_v34 = vpop.f32.mrf.mxu2 }
 0x1cf   : > { %v1609_v46 = vadd.f32 %v4966_v2, %v1608_v34  ;;  %v1826_v5 = vpop.f32.mrf.mxu3 }
 0x1d0   : > { %v809_v38 = vpop.f32.mrf.mxu0 }
 0x1d1   : > { %v1818_v8 = vadd.f32 %v1817_v3, %v1609_v46  ;;  %v810_v21 = vadd.f32 %v4966_v2, %v809_v38  ;;  %v468_v38 = vld [vmem:[%s4355_s23 + $0x398] sm:$0xff] }
 0x1d2   : > { %v5095_v42 = vpop.f32.mrf.mxu1 }
 0x1d3   : > { %v1937_v39 = vmax.f32 %v1818_v8, 0.0  ;;  %856 = vmatmul.f32.gmra.mxu0 %v459_v58  ;;  %1658 = vmatmul.f32.gmra.mxu2 %v1269_v62  ;;  %v1019_v26 = vadd.f32 %v5056_v22, %v810_v21  ;;  %v463_v21 = vld [vmem:[%s4355_s23 + $0x370] sm:$0xff] }
 0x1d4   : > { %4059 = vmatmul.msk.f32.gmra.mxu3 %vm484_vm1, %v1276_v31 }
 0x1d5   : > { %v5100_v51 = vmax.f32 %v1135_v59, %v1937_v39  ;;  %3994 = vmatmul.msk.f32.gmra.mxu1 %vm484_vm1, %v466_v11  ;;  %v1136_v58 = vmax.f32 %v1019_v26, 0.0 }
 0x1d6   : > { %v1611_v3 = vpop.f32.mrf.mxu2 }
 0x1d7   : > { %v1612_v52 = vadd.f32 %v4966_v2, %v1611_v3  ;;  %v1829_v0 = vpop.f32.mrf.mxu3  ;;  %v1273_v3 = vld [vmem:[%s4343_s17 + $0x370] sm:$0xff] }
 0x1d8   : > { %v812_v36 = vpop.f32.mrf.mxu0 }
 0x1d9   : > { %v1821_v34 = vadd.f32 %v1820_v27, %v1612_v52  ;;  %v813_v8 = vadd.f32 %v4966_v2, %v812_v36  ;;  %v1280_v52 = vld [vmem:[%s4343_s17 + $0x3a8] sm:$0xff] }
 0x1da   : > { %v5108_v46 = vpop.f32.mrf.mxu1 }
 0x1db   : > { %v1938_v62 = vmax.f32 %v1821_v34, 0.0  ;;  %859 = vmatmul.f32.gmra.mxu0 %v461_v40  ;;  %1661 = vmatmul.f32.gmra.mxu2 %v1271_v44  ;;  %v1022_v31 = vadd.f32 %v5069_v60, %v813_v8  ;;  %v470_v40 = vld [vmem:[%s4355_s23 + $0x3a8] sm:$0xff] }
 0x1dc   : > { %4060 = vmatmul.msk.f32.gmra.mxu3 %vm484_vm1, %v1278_v41 }
 0x1dd   : > { %v5113_v22 = vmax.f32 %v1136_v58, %v1938_v62  ;;  %3995 = vmatmul.msk.f32.gmra.mxu1 %vm484_vm1, %v468_v38  ;;  %v1137_v44 = vmax.f32 %v1022_v31, 0.0  ;;  %v1275_v31 = vld [vmem:[%s4343_s17 + $0x380] sm:$0xff] }
 0x1de   : > { %v1614_v27 = vpop.f32.mrf.mxu2 }
 0x1df   : > { %6081 = vst [vmem:[#allocation2_spill] sm:$0xff] %v5113_v22  ;;  %v1615_v11 = vadd.f32 %v4966_v2, %v1614_v27  ;;  %v1832_v59 = vpop.f32.mrf.mxu3  ;;  %v465_v27 = vld [vmem:[%s4355_s23 + $0x380] sm:$0xff] }
 0x1e0   : > { %v815_v39 = vpop.f32.mrf.mxu0 }
 0x1e1   : > { %v1824_v26 = vadd.f32 %v1823_v20, %v1615_v11  ;;  %v816_v41 = vadd.f32 %v4966_v2, %v815_v39  ;;  %v1282_v39 = vld [vmem:[%s4343_s17 + $0x3b8] sm:$0xff] }
 0x1e2   : > { %v5121_v36 = vpop.f32.mrf.mxu1 }
 0x1e3   : > { %v1939_v34 = vmax.f32 %v1824_v26, 0.0  ;;  %862 = vmatmul.f32.gmra.mxu0 %v463_v21  ;;  %1664 = vmatmul.f32.gmra.mxu2 %v1273_v3  ;;  %v1025_v38 = vadd.f32 %v5082_v33, %v816_v41  ;;  %v472_v3 = vld [vmem:[%s4355_s23 + $0x3b8] sm:$0xff] }
 0x1e4   : > { %4061 = vmatmul.msk.f32.gmra.mxu3 %vm484_vm1, %v1280_v52 }
 0x1e5   : > { %v5126_v60 = vmax.f32 %v1137_v44, %v1939_v34  ;;  %3996 = vmatmul.msk.f32.gmra.mxu1 %vm484_vm1, %v470_v40  ;;  %v1138_v26 = vmax.f32 %v1025_v38, 0.0  ;;  %v467_v38 = vld [vmem:[%s4355_s23 + $0x390] sm:$0xff] }
 0x1e6   : > { %v1617_v20 = vpop.f32.mrf.mxu2 }
 0x1e7   : > { %6082 = vst [vmem:[#allocation3_spill] sm:$0xff] %v5126_v60  ;;  %v1618_v58 = vadd.f32 %v4966_v2, %v1617_v20  ;;  %v1835_v62 = vpop.f32.mrf.mxu3  ;;  %v2032_v60 = vld [vmem:[%s5198_s10 + $0x18] sm:$0xff] }
 0x1e8   : > { %v818_v8 = vpop.f32.mrf.mxu0 }
 0x1e9   : > { %v1827_v11 = vadd.f32 %v1826_v5, %v1618_v58  ;;  %v819_v40 = vadd.f32 %v4966_v2, %v818_v8  ;;  %v1277_v58 = vld [vmem:[%s4343_s17 + $0x390] sm:$0xff]  ;;  %v1284_v8 = vld [vmem:[%s4343_s17 + $0x3c8] sm:$0xff] }
 0x1ea   : > { %v5134_v21 = vpop.f32.mrf.mxu1 }
 0x1eb   : > { %v1940_v52 = vmax.f32 %v1827_v11, 0.0  ;;  %865 = vmatmul.f32.gmra.mxu0 %v465_v27  ;;  %1667 = vmatmul.f32.gmra.mxu2 %v1275_v31  ;;  %v1028_v44 = vadd.f32 %v5095_v42, %v819_v40  ;;  %v474_v31 = vld [vmem:[%s4355_s23 + $0x3c8] sm:$0xff] }
 0x1ec   : > { %4062 = vmatmul.msk.f32.gmra.mxu3 %vm484_vm1, %v1282_v39 }
 0x1ed   : > { %v5139_v33 = vmax.f32 %v1138_v26, %v1940_v52  ;;  %3997 = vmatmul.msk.f32.gmra.mxu1 %vm484_vm1, %v472_v3  ;;  %v1139_v39 = vmax.f32 %v1028_v44, 0.0 }
 0x1ee   : > { %v1620_v5 = vpop.f32.mrf.mxu2 }
 0x1ef   : > { %6083 = vst [vmem:[#allocation4_spill] sm:$0xff] %v5139_v33  ;;  %v1621_v34 = vadd.f32 %v4966_v2, %v1620_v5  ;;  %v1838_v41 = vpop.f32.mrf.mxu3 }
 0x1f0   : > { %v821_v20 = vpop.f32.mrf.mxu0 }
 0x1f1   : > { %v1830_v11 = vadd.f32 %v1829_v0, %v1621_v34  ;;  %v822_v3 = vadd.f32 %v4966_v2, %v821_v20  ;;  %v469_v34 = vld [vmem:[%s4355_s23 + $0x3a0] sm:$0xff]  ;;  %v1286_v20 = vld [vmem:[%s4343_s17 + $0x3d8] sm:$0xff] }
 0x1f2   : > { %v5147_v27 = vpop.f32.mrf.mxu1 }
 0x1f3   : > { %v1941_v26 = vmax.f32 %v1830_v11, 0.0  ;;  %868 = vmatmul.f32.gmra.mxu0 %v467_v38  ;;  %1670 = vmatmul.f32.gmra.mxu2 %v1277_v58  ;;  %v1031_v52 = vadd.f32 %v5108_v46, %v822_v3  ;;  %v1279_v11 = vld [vmem:[%s4343_s17 + $0x3a0] sm:$0xff]  ;;  %v476_v58 = vld [vmem:[%s4355_s23 + $0x3d8] sm:$0xff] }
 0x1f4   : > { %4063 = vmatmul.msk.f32.gmra.mxu3 %vm484_vm1, %v1284_v8 }
 0x1f5   : > { %v5152_v42 = vmax.f32 %v1139_v39, %v1941_v26  ;;  %3998 = vmatmul.msk.f32.gmra.mxu1 %vm484_vm1, %v474_v31  ;;  %v1140_v8 = vmax.f32 %v1031_v52, 0.0 }
 0x1f6   : > { %v1623_v0 = vpop.f32.mrf.mxu2 }
 0x1f7   : > { %6084 = vst [vmem:[#allocation5_spill] sm:$0xff] %v5152_v42  ;;  %v1624_v40 = vadd.f32 %v4966_v2, %v1623_v0  ;;  %v1841_v5 = vpop.f32.mrf.mxu3 }
 0x1f8   : > { %v824_v44 = vpop.f32.mrf.mxu0 }
 0x1f9   : > { %v1833_v33 = vadd.f32 %v1832_v59, %v1624_v40  ;;  %v825_v31 = vadd.f32 %v4966_v2, %v824_v44  ;;  %v471_v40 = vld [vmem:[%s4355_s23 + $0x3b0] sm:$0xff]  ;;  %v1288_v44 = vld [vmem:[%s4343_s17 + $0x3e8] sm:$0xff] }
 0x1fa   : > { %v5160_v38 = vpop.f32.mrf.mxu1 }
 0x1fb   : > { %v1942_v39 = vmax.f32 %v1833_v33, 0.0  ;;  %871 = vmatmul.f32.gmra.mxu0 %v469_v34  ;;  %1673 = vmatmul.f32.gmra.mxu2 %v1279_v11  ;;  %v1034_v26 = vadd.f32 %v5121_v36, %v825_v31  ;;  %v1281_v33 = vld [vmem:[%s4343_s17 + $0x3b0] sm:$0xff]  ;;  %v478_v11 = vld [vmem:[%s4355_s23 + $0x3e8] sm:$0xff] }
 0x1fc   : > { %4064 = vmatmul.msk.f32.gmra.mxu3 %vm484_vm1, %v1286_v20 }
 0x1fd   : > { %v5165_v46 = vmax.f32 %v1140_v8, %v1942_v39  ;;  %3999 = vmatmul.msk.f32.gmra.mxu1 %vm484_vm1, %v476_v58  ;;  %v1141_v20 = vmax.f32 %v1034_v26, 0.0 }
 0x1fe   : > { %v1626_v59 = vpop.f32.mrf.mxu2 }
 0x1ff   : > { %6085 = vst [vmem:[#allocation6_spill] sm:$0xff] %v5165_v46  ;;  %v1627_v3 = vadd.f32 %v4966_v2, %v1626_v59  ;;  %v1844_v0 = vpop.f32.mrf.mxu3  ;;  %v1290_v46 = vld [vmem:[%s4343_s17 + $0x3f8] sm:$0xff] }
 0x200   : > { %v827_v52 = vpop.f32.mrf.mxu0 }
 0x201   : > { %v1836_v42 = vadd.f32 %v1835_v62, %v1627_v3  ;;  %v828_v58 = vadd.f32 %v4966_v2, %v827_v52  ;;  %v1283_v3 = vld [vmem:[%s4343_s17 + $0x3c0] sm:$0xff] }
 0x202   : > { %v5173_v34 = vpop.f32.mrf.mxu1 }
 0x203   : > { %v1943_v8 = vmax.f32 %v1836_v42, 0.0  ;;  %874 = vmatmul.f32.gmra.mxu0 %v471_v40  ;;  %1676 = vmatmul.f32.gmra.mxu2 %v1281_v33  ;;  %v1037_v39 = vadd.f32 %v5134_v21, %v828_v58  ;;  %v473_v42 = vld [vmem:[%s4355_s23 + $0x3c0] sm:$0xff]  ;;  %v480_v33 = vld [vmem:[%s4355_s23 + $0x3f8] sm:$0xff] }
 0x204   : > { %4065 = vmatmul.msk.f32.gmra.mxu3 %vm484_vm1, %v1288_v44 }
 0x205   : > { %v5178_v36 = vmax.f32 %v1141_v20, %v1943_v8  ;;  %4000 = vmatmul.msk.f32.gmra.mxu1 %vm484_vm1, %v478_v11  ;;  %v1142_v44 = vmax.f32 %v1037_v39, 0.0 }
 0x206   : > { %v1629_v62 = vpop.f32.mrf.mxu2 }
 0x207   : > { %6086 = vst [vmem:[#allocation7_spill] sm:$0xff] %v5178_v36  ;;  %v1630_v31 = vadd.f32 %v4966_v2, %v1629_v62  ;;  %v1847_v59 = vpop.f32.mrf.mxu3  ;;  %v1287_v36 = vld [vmem:[%s4343_s17 + $0x3e0] sm:$0xff] }
 0x208   : > { %v830_v26 = vpop.f32.mrf.mxu0 }
 0x209   : > { %v1839_v52 = vadd.f32 %v1838_v41, %v1630_v31  ;;  %v831_v11 = vadd.f32 %v4966_v2, %v830_v26  ;;  %v475_v31 = vld [vmem:[%s4355_s23 + $0x3d0] sm:$0xff] }
 0x20a   : > { %v5186_v40 = vpop.f32.mrf.mxu1 }
 0x20b   : > { %v1944_v20 = vmax.f32 %v1839_v52, 0.0  ;;  %877 = vmatmul.f32.gmra.mxu0 %v473_v42  ;;  %1679 = vmatmul.f32.gmra.mxu2 %v1283_v3  ;;  %v1040_v41 = vadd.f32 %v5147_v27, %v831_v11  ;;  %v2030_v42 = vld [vmem:[%s5198_s10 + $0x8] sm:$0xff]  ;;  %v2029_v52 = vld [vmem:[%s5198_s10] sm:$0xff] }
 0x20c   : > { %4066 = vmatmul.msk.f32.gmra.mxu3 %vm484_vm1, %v1290_v46  ;;  %v1285_v46 = vld [vmem:[%s4343_s17 + $0x3d0] sm:$0xff] }
 0x20d   : > { %v5191_v21 = vmax.f32 %v1142_v44, %v1944_v20  ;;  %4001 = vmatmul.msk.f32.gmra.mxu1 %vm484_vm1, %v480_v33  ;;  %v1143_v33 = vmax.f32 %v1040_v41, 0.0  ;;  %v477_v41 = vld [vmem:[%s4355_s23 + $0x3e0] sm:$0xff] }
 0x20e   : > { %v1632_v8 = vpop.f32.mrf.mxu2 }
 0x20f   : > { %6087 = vst [vmem:[#allocation8_spill] sm:$0xff] %v5191_v21  ;;  %v1633_v58 = vadd.f32 %v4966_v2, %v1632_v8  ;;  %v1850_v62 = vpop.f32.mrf.mxu3 }
 0x210   : > { %v833_v39 = vpop.f32.mrf.mxu0 }
 0x211   : > { %v1842_v26 = vadd.f32 %v1841_v5, %v1633_v58  ;;  %v834_v20 = vadd.f32 %v4966_v2, %v833_v39 }
 0x212   : > { %v5205_v3 = vpop.f32.mrf.mxu1 }
 0x213   : > { %v1945_v44 = vmax.f32 %v1842_v26, 0.0  ;;  %880 = vmatmul.f32.gmra.mxu0 %v475_v31  ;;  %1682 = vmatmul.f32.gmra.mxu2 %v1285_v46  ;;  %v1043_v11 = vadd.f32 %v5160_v38, %v834_v20  ;;  %v2031_v31 = vld [vmem:[%s5198_s10 + $0x10] sm:$0xff] }
 0x214   : > { %4068 = vmatmul.msk.f32.vlgmr.msrb.gmra.mxu3 %vm484_vm1, %v2030_v42 }
 0x215   : > { %v5210_v27 = vmax.f32 %v1143_v33, %v1945_v44  ;;  %2365 = vmatmul.f32.vlgmr.msrb.gmra.mxu1 %v2029_v52  ;;  %v1144_v46 = vmax.f32 %v1043_v11, 0.0  ;;  %v479_v11 = vld [vmem:[%s4355_s23 + $0x3f0] sm:$0xff] }
 0x216   : > { %v1635_v5 = vpop.f32.mrf.mxu2 }
 0x217   : > { %6088 = vst [vmem:[#allocation9_spill] sm:$0xff] %v5210_v27  ;;  %v1636_v8 = vadd.f32 %v4966_v2, %v1635_v5  ;;  %v1853_v58 = vpop.f32.mrf.mxu3 }
 0x218   : > { %v836_v21 = vpop.f32.mrf.mxu0 }
 0x219   : > { %v1845_v26 = vadd.f32 %v1844_v0, %v1636_v8  ;;  %v837_v52 = vadd.f32 %v4966_v2, %v836_v21  ;;  %v1289_v8 = vld [vmem:[%s4343_s17 + $0x3f0] sm:$0xff]  ;;  %v2034_v21 = vld [vmem:[%s5198_s10 + $0x28] sm:$0xff] }
 0x21a   : > { %v5217_v39 = vpop.f32.mrf.mxu1 }
 0x21b   : > { %v1946_v42 = vmax.f32 %v1845_v26, 0.0  ;;  %883 = vmatmul.f32.gmra.mxu0 %v477_v41  ;;  %1685 = vmatmul.f32.gmra.mxu2 %v1287_v36  ;;  %v1046_v33 = vadd.f32 %v5173_v34, %v837_v52  ;;  %v2033_v36 = vld [vmem:[%s5198_s10 + $0x20] sm:$0xff] }
 0x21c   : > { %4069 = vmatmul.msk.f32.gmra.mxu3 %vm484_vm1, %v2032_v60 }
 0x21d   : > { %v5222_v38 = vmax.f32 %v1144_v46, %v1946_v42  ;;  %2368 = vmatmul.f32.gmra.mxu1 %v2031_v31  ;;  %v1145_v41 = vmax.f32 %v1046_v33, 0.0  ;;  %v2832_v33 = vld [vmem:[%s5240_s11 + $0x8] sm:$0xff] }
 0x21e   : > { %v1638_v0 = vpop.f32.mrf.mxu2 }
 0x21f   : > { %6089 = vst [vmem:[#allocation10_spill] sm:$0xff] %v5222_v38  ;;  %v1639_v44 = vadd.f32 %v4966_v2, %v1638_v0  ;;  %v1856_v20 = vpop.f32.mrf.mxu3 }
 0x220   : > { %v839_v5 = vpop.f32.mrf.mxu0 }
 0x221   : > { %v1848_v26 = vadd.f32 %v1847_v59, %v1639_v44  ;;  %v840_v31 = vadd.f32 %v4966_v2, %v839_v5  ;;  %v2831_v44 = vld [vmem:[%s5240_s11] sm:$0xff] }
 0x222   : > { %v5229_v27 = vpop.f32.mrf.mxu1 }
 0x223   : > { %v1947_v60 = vmax.f32 %v1848_v26, 0.0  ;;  %886 = vmatmul.f32.gmra.mxu0 %v479_v11  ;;  %1688 = vmatmul.f32.gmra.mxu2 %v1289_v8  ;;  %v1049_v46 = vadd.f32 %v5186_v40, %v840_v31  ;;  %v2036_v11 = vld [vmem:[%s5198_s10 + $0x38] sm:$0xff]  ;;  %v2035_v26 = vld [vmem:[%s5198_s10 + $0x30] sm:$0xff] }
 0x224   : > { %4070 = vmatmul.msk.f32.gmra.mxu3 %vm484_vm1, %v2034_v21 }
 0x225   : > { %v5234_v34 = vmax.f32 %v1145_v41, %v1947_v60  ;;  %2371 = vmatmul.f32.gmra.mxu1 %v2033_v36  ;;  %v1146_v21 = vmax.f32 %v1049_v46, 0.0 }
 0x226   : > { %v1641_v59 = vpop.f32.mrf.mxu2 }
 0x227   : > { %6090 = vst [vmem:[#allocation11_spill] sm:$0xff] %v5234_v34  ;;  %v1642_v42 = vadd.f32 %v4966_v2, %v1641_v59  ;;  %v1859_v52 = vpop.f32.mrf.mxu3 }
 0x228   : > { %v842_v0 = vpop.f32.mrf.mxu0 }
 0x229   : > { %v1851_v5 = vadd.f32 %v1850_v62, %v1642_v42  ;;  %v843_v41 = vadd.f32 %v4966_v2, %v842_v0  ;;  %v2834_v42 = vld [vmem:[%s5240_s11 + $0x18] sm:$0xff]  ;;  %v2038_v0 = vld [vmem:[%s5198_s10 + $0x48] sm:$0xff] }
 0x22a   : > { %v5247_v8 = vpop.f32.mrf.mxu1 }
 0x22b   : > { %v1948_v36 = vmax.f32 %v1851_v5, 0.0  ;;  %4133 = vmatmul.msk.f32.vlgmr.msrb.gmra.mxu2 %vm484_vm1, %v2832_v33  ;;  %3167 = vmatmul.f32.vlgmr.msrb.gmra.mxu0 %v2831_v44  ;;  %v1052_v60 = vadd.f32 %v5205_v3, %v843_v41  ;;  %v2833_v5 = vld [vmem:[%s5240_s11 + $0x10] sm:$0xff]  ;;  %v2037_v33 = vld [vmem:[%s5198_s10 + $0x40] sm:$0xff] }
 0x22c   : > { %4071 = vmatmul.msk.f32.gmra.mxu3 %vm484_vm1, %v2036_v11 }
 0x22d   : > { %v5253_v40 = vmax.f32 %v1146_v21, %v1948_v36  ;;  %2374 = vmatmul.f32.gmra.mxu1 %v2035_v26  ;;  %v1147_v44 = vmax.f32 %v1052_v60, 0.0  ;;  %v2836_v60 = vld [vmem:[%s5240_s11 + $0x28] sm:$0xff] }
 0x22e   : > { %v1644_v62 = vpop.f32.mrf.mxu2 }
 0x22f   : > { %6091 = vst [vmem:[#allocation12_spill] sm:$0xff] %v5253_v40  ;;  %v1645_v31 = vadd.f32 %v4966_v2, %v1644_v62  ;;  %v1862_v59 = vpop.f32.mrf.mxu3 }
 0x230   : > { %v845_v46 = vpop.f32.mrf.mxu0 }
 0x231   : > { %v1854_v34 = vadd.f32 %v1853_v58, %v1645_v31  ;;  %v846_v26 = vadd.f32 %v4966_v2, %v845_v46  ;;  %v2040_v46 = vld [vmem:[%s5198_s10 + $0x58] sm:$0xff] }
 0x232   : > { %v5260_v38 = vpop.f32.mrf.mxu1 }
 0x233   : > { %v1949_v11 = vmax.f32 %v1854_v34, 0.0  ;;  %4134 = vmatmul.msk.f32.gmra.mxu2 %vm484_vm1, %v2834_v42  ;;  %3170 = vmatmul.f32.gmra.mxu0 %v2833_v5  ;;  %v1055_v21 = vadd.f32 %v5217_v39, %v846_v26  ;;  %v2835_v34 = vld [vmem:[%s5240_s11 + $0x20] sm:$0xff]  ;;  %v2039_v42 = vld [vmem:[%s5198_s10 + $0x50] sm:$0xff] }
 0x234   : > { %4072 = vmatmul.msk.f32.gmra.mxu3 %vm484_vm1, %v2038_v0 }
 0x235   : > { %v5266_v3 = vmax.f32 %v1147_v44, %v1949_v11  ;;  %2377 = vmatmul.f32.gmra.mxu1 %v2037_v33  ;;  %v1148_v5 = vmax.f32 %v1055_v21, 0.0  ;;  %v2838_v21 = vld [vmem:[%s5240_s11 + $0x38] sm:$0xff] }
 0x236   : > { %v1647_v58 = vpop.f32.mrf.mxu2 }
 0x237   : > { %6092 = vst [vmem:[#allocation13_spill] sm:$0xff] %v5266_v3  ;;  %v1648_v36 = vadd.f32 %v4966_v2, %v1647_v58  ;;  %v1865_v41 = vpop.f32.mrf.mxu3 }
 0x238   : > { %v848_v62 = vpop.f32.mrf.mxu0 }
 0x239   : > { %v1857_v31 = vadd.f32 %v1856_v20, %v1648_v36  ;;  %v849_v33 = vadd.f32 %v4966_v2, %v848_v62  ;;  %v2837_v36 = vld [vmem:[%s5240_s11 + $0x30] sm:$0xff]  ;;  %v2042_v62 = vld [vmem:[%s5198_s10 + $0x68] sm:$0xff] }
 0x23a   : > { %v5273_v40 = vpop.f32.mrf.mxu1 }
 0x23b   : > { %v1950_v0 = vmax.f32 %v1857_v31, 0.0  ;;  %4135 = vmatmul.msk.f32.gmra.mxu2 %vm484_vm1, %v2836_v60  ;;  %3173 = vmatmul.f32.gmra.mxu0 %v2835_v34  ;;  %v1058_v44 = vadd.f32 %v5229_v27, %v849_v33  ;;  %v2041_v60 = vld [vmem:[%s5198_s10 + $0x60] sm:$0xff] }
 0x23c   : > { %4073 = vmatmul.msk.f32.gmra.mxu3 %vm484_vm1, %v2040_v46 }
 0x23d   : > { %v5279_v39 = vmax.f32 %v1148_v5, %v1950_v0  ;;  %2380 = vmatmul.f32.gmra.mxu1 %v2039_v42  ;;  %v1149_v34 = vmax.f32 %v1058_v44, 0.0  ;;  %v2840_v44 = vld [vmem:[%s5240_s11 + $0x48] sm:$0xff] }
 0x23e   : > { %v1650_v20 = vpop.f32.mrf.mxu2 }
 0x23f   : > { %6093 = vst [vmem:[#allocation14_spill] sm:$0xff] %v5279_v39  ;;  %v1651_v11 = vadd.f32 %v4966_v2, %v1650_v20  ;;  %v1868_v26 = vpop.f32.mrf.mxu3 }
 0x240   : > { %v851_v58 = vpop.f32.mrf.mxu0 }
 0x241   : > { %v1860_v31 = vadd.f32 %v1859_v52, %v1651_v11  ;;  %v852_v42 = vadd.f32 %v4966_v2, %v851_v58  ;;  %v2839_v11 = vld [vmem:[%s5240_s11 + $0x40] sm:$0xff]  ;;  %v2044_v58 = vld [vmem:[%s5198_s10 + $0x78] sm:$0xff] }
 0x242   : > { %v5286_v3 = vpop.f32.mrf.mxu1 }
 0x243   : > { %v1951_v46 = vmax.f32 %v1860_v31, 0.0  ;;  %4136 = vmatmul.msk.f32.gmra.mxu2 %vm484_vm1, %v2838_v21  ;;  %3176 = vmatmul.f32.gmra.mxu0 %v2837_v36  ;;  %v1061_v5 = vadd.f32 %v5247_v8, %v852_v42  ;;  %v2043_v21 = vld [vmem:[%s5198_s10 + $0x70] sm:$0xff] }
 0x244   : > { %4074 = vmatmul.msk.f32.gmra.mxu3 %vm484_vm1, %v2042_v62 }
 0x245   : > { %v5292_v27 = vmax.f32 %v1149_v34, %v1951_v46  ;;  %2383 = vmatmul.f32.gmra.mxu1 %v2041_v60  ;;  %v1150_v36 = vmax.f32 %v1061_v5, 0.0  ;;  %v2842_v5 = vld [vmem:[%s5240_s11 + $0x58] sm:$0xff] }
 0x246   : > { %v1653_v52 = vpop.f32.mrf.mxu2 }
 0x247   : > { %6094 = vst [vmem:[#allocation15_spill] sm:$0xff] %v5292_v27  ;;  %v1654_v0 = vadd.f32 %v4966_v2, %v1653_v52  ;;  %v1871_v33 = vpop.f32.mrf.mxu3 }
 0x248   : > { %v854_v20 = vpop.f32.mrf.mxu0 }
 0x249   : > { %v1863_v31 = vadd.f32 %v1862_v59, %v1654_v0  ;;  %v855_v60 = vadd.f32 %v4966_v2, %v854_v20  ;;  %v2841_v0 = vld [vmem:[%s5240_s11 + $0x50] sm:$0xff]  ;;  %v2046_v20 = vld [vmem:[%s5198_s10 + $0x88] sm:$0xff] }
 0x24a   : > { %v5299_v39 = vpop.f32.mrf.mxu1 }
 0x24b   : > { %v1952_v62 = vmax.f32 %v1863_v31, 0.0  ;;  %4137 = vmatmul.msk.f32.gmra.mxu2 %vm484_vm1, %v2840_v44  ;;  %3179 = vmatmul.f32.gmra.mxu0 %v2839_v11  ;;  %v1064_v34 = vadd.f32 %v5260_v38, %v855_v60  ;;  %v2045_v44 = vld [vmem:[%s5198_s10 + $0x80] sm:$0xff] }
 0x24c   : > { %4075 = vmatmul.msk.f32.gmra.mxu3 %vm484_vm1, %v2044_v58 }
 0x24d   : > { %v5305_v8 = vmax.f32 %v1150_v36, %v1952_v62  ;;  %2386 = vmatmul.f32.gmra.mxu1 %v2043_v21  ;;  %v1151_v11 = vmax.f32 %v1064_v34, 0.0  ;;  %v2844_v34 = vld [vmem:[%s5240_s11 + $0x68] sm:$0xff] }
 0x24e   : > { %v1656_v59 = vpop.f32.mrf.mxu2 }
 0x24f   : > { %6095 = vst [vmem:[#allocation16_spill] sm:$0xff] %v5305_v8  ;;  %v1657_v46 = vadd.f32 %v4966_v2, %v1656_v59  ;;  %v1874_v42 = vpop.f32.mrf.mxu3 }
 0x250   : > { %v857_v52 = vpop.f32.mrf.mxu0 }
 0x251   : > { %v1866_v31 = vadd.f32 %v1865_v41, %v1657_v46  ;;  %v858_v21 = vadd.f32 %v4966_v2, %v857_v52  ;;  %v2843_v46 = vld [vmem:[%s5240_s11 + $0x60] sm:$0xff]  ;;  %v2048_v52 = vld [vmem:[%s5198_s10 + $0x98] sm:$0xff] }
 0x252   : > { %v5312_v27 = vpop.f32.mrf.mxu1 }
 0x253   : > { %v1953_v58 = vmax.f32 %v1866_v31, 0.0  ;;  %4138 = vmatmul.msk.f32.gmra.mxu2 %vm484_vm1, %v2842_v5  ;;  %3182 = vmatmul.f32.gmra.mxu0 %v2841_v0  ;;  %v1067_v36 = vadd.f32 %v5273_v40, %v858_v21  ;;  %v2047_v5 = vld [vmem:[%s5198_s10 + $0x90] sm:$0xff]  ;;  %v5331_v40 = vld [vmem:[%s6079_s5] ss:$0 sm:$0xff] }
 0x254   : > { %4076 = vmatmul.msk.f32.gmra.mxu3 %vm484_vm1, %v2046_v20 }
 0x255   : > { %v5318_v38 = vmax.f32 %v1151_v11, %v1953_v58  ;;  %2389 = vmatmul.f32.gmra.mxu1 %v2045_v44  ;;  %v1152_v0 = vmax.f32 %v1067_v36, 0.0  ;;  %v2846_v36 = vld [vmem:[%s5240_s11 + $0x78] sm:$0xff] }
 0x256   : > { %v1659_v41 = vpop.f32.mrf.mxu2 }
 0x257   : > { %6096 = vst [vmem:[#allocation17_spill] sm:$0xff] %v5318_v38  ;;  %v1660_v62 = vadd.f32 %v4966_v2, %v1659_v41  ;;  %v1877_v60 = vpop.f32.mrf.mxu3 }
 0x258   : > { %v860_v59 = vpop.f32.mrf.mxu0 }
 0x259   : > { %v1869_v31 = vadd.f32 %v1868_v26, %v1660_v62  ;;  %v861_v2 = vadd.f32 %v5331_v40, %v860_v59  ;;  %v2845_v62 = vld [vmem:[%s5240_s11 + $0x70] sm:$0xff]  ;;  %v2050_v59 = vld [vmem:[%s5198_s10 + $0xa8] sm:$0xff] }
 0x25a   : > { %v5325_v8 = vpop.f32.mrf.mxu1 }
 0x25b   : > { %v1954_v20 = vmax.f32 %v1869_v31, 0.0  ;;  %4139 = vmatmul.msk.f32.gmra.mxu2 %vm484_vm1, %v2844_v34  ;;  %3185 = vmatmul.f32.gmra.mxu0 %v2843_v46  ;;  %v1070_v11 = vadd.f32 %v5286_v3, %v861_v2  ;;  %v2049_v34 = vld [vmem:[%s5198_s10 + $0xa0] sm:$0xff] }
 0x25c   : > { %4077 = vmatmul.msk.f32.gmra.mxu3 %vm484_vm1, %v2048_v52 }
 0x25d   : > { %v5336_v26 = vmax.f32 %v1152_v0, %v1954_v20  ;;  %2392 = vmatmul.f32.gmra.mxu1 %v2047_v5  ;;  %v1153_v46 = vmax.f32 %v1070_v11, 0.0  ;;  %v2848_v11 = vld [vmem:[%s5240_s11 + $0x88] sm:$0xff] }
 0x25e   : > { %v1662_v44 = vpop.f32.mrf.mxu2 }
 0x25f   : > { %6097 = vst [vmem:[#allocation18_spill] sm:$0xff] %v5336_v26  ;;  %v1663_v58 = vadd.f32 %v5331_v40, %v1662_v44  ;;  %v1880_v21 = vpop.f32.mrf.mxu3 }
 0x260   : > { %v863_v41 = vpop.f32.mrf.mxu0 }
 0x261   : > { %v1872_v31 = vadd.f32 %v1871_v33, %v1663_v58  ;;  %v864_v5 = vadd.f32 %v5331_v40, %v863_v41  ;;  %v2847_v58 = vld [vmem:[%s5240_s11 + $0x80] sm:$0xff]  ;;  %v2052_v41 = vld [vmem:[%s5198_s10 + $0xb8] sm:$0xff] }
 0x262   : > { %v5343_v38 = vpop.f32.mrf.mxu1 }
 0x263   : > { %v1955_v52 = vmax.f32 %v1872_v31, 0.0  ;;  %4140 = vmatmul.msk.f32.gmra.mxu2 %vm484_vm1, %v2846_v36  ;;  %3188 = vmatmul.f32.gmra.mxu0 %v2845_v62  ;;  %v1073_v0 = vadd.f32 %v5299_v39, %v864_v5  ;;  %v2051_v36 = vld [vmem:[%s5198_s10 + $0xb0] sm:$0xff] }
 0x264   : > { %4078 = vmatmul.msk.f32.gmra.mxu3 %vm484_vm1, %v2050_v59 }
 0x265   : > { %v5349_v3 = vmax.f32 %v1153_v46, %v1955_v52  ;;  %2395 = vmatmul.f32.gmra.mxu1 %v2049_v34  ;;  %v1154_v62 = vmax.f32 %v1073_v0, 0.0  ;;  %v2850_v0 = vld [vmem:[%s5240_s11 + $0x98] sm:$0xff] }
 0x266   : > { %v1665_v33 = vpop.f32.mrf.mxu2 }
 0x267   : > { %6098 = vst [vmem:[#allocation19_spill] sm:$0xff] %v5349_v3  ;;  %v1666_v20 = vadd.f32 %v5331_v40, %v1665_v33  ;;  %v1883_v2 = vpop.f32.mrf.mxu3 }
 0x268   : > { %v866_v44 = vpop.f32.mrf.mxu0 }
 0x269   : > { %v1875_v31 = vadd.f32 %v1874_v42, %v1666_v20  ;;  %v867_v34 = vadd.f32 %v5331_v40, %v866_v44  ;;  %v2849_v20 = vld [vmem:[%s5240_s11 + $0x90] sm:$0xff]  ;;  %v2054_v44 = vld [vmem:[%s5198_s10 + $0xc8] sm:$0xff] }
 0x26a   : > { %v5356_v26 = vpop.f32.mrf.mxu1 }
 0x26b   : > { %v1956_v59 = vmax.f32 %v1875_v31, 0.0  ;;  %4141 = vmatmul.msk.f32.gmra.mxu2 %vm484_vm1, %v2848_v11  ;;  %3191 = vmatmul.f32.gmra.mxu0 %v2847_v58  ;;  %v1076_v46 = vadd.f32 %v5312_v27, %v867_v34  ;;  %v2053_v11 = vld [vmem:[%s5198_s10 + $0xc0] sm:$0xff] }
 0x26c   : > { %4079 = vmatmul.msk.f32.gmra.mxu3 %vm484_vm1, %v2052_v41 }
 0x26d   : > { %v5362_v39 = vmax.f32 %v1154_v62, %v1956_v59  ;;  %2398 = vmatmul.f32.gmra.mxu1 %v2051_v36  ;;  %v1155_v58 = vmax.f32 %v1076_v46, 0.0  ;;  %v2852_v46 = vld [vmem:[%s5240_s11 + $0xa8] sm:$0xff] }
 0x26e   : > { %v1668_v42 = vpop.f32.mrf.mxu2 }
 0x26f   : > { %6099 = vst [vmem:[#allocation20_spill] sm:$0xff] %v5362_v39  ;;  %v1669_v52 = vadd.f32 %v5331_v40, %v1668_v42  ;;  %v1886_v5 = vpop.f32.mrf.mxu3 }
 0x270   : > { %v869_v33 = vpop.f32.mrf.mxu0 }
 0x271   : > { %v1878_v31 = vadd.f32 %v1877_v60, %v1669_v52  ;;  %v870_v36 = vadd.f32 %v5331_v40, %v869_v33  ;;  %v2851_v52 = vld [vmem:[%s5240_s11 + $0xa0] sm:$0xff]  ;;  %v2056_v33 = vld [vmem:[%s5198_s10 + $0xd8] sm:$0xff] }
 0x272   : > { %v5369_v3 = vpop.f32.mrf.mxu1 }
 0x273   : > { %v1957_v41 = vmax.f32 %v1878_v31, 0.0  ;;  %4142 = vmatmul.msk.f32.gmra.mxu2 %vm484_vm1, %v2850_v0  ;;  %3194 = vmatmul.f32.gmra.mxu0 %v2849_v20  ;;  %v1079_v62 = vadd.f32 %v5325_v8, %v870_v36  ;;  %v2055_v0 = vld [vmem:[%s5198_s10 + $0xd0] sm:$0xff] }
 0x274   : > { %4080 = vmatmul.msk.f32.gmra.mxu3 %vm484_vm1, %v2054_v44 }
 0x275   : > { %v5375_v27 = vmax.f32 %v1155_v58, %v1957_v41  ;;  %2401 = vmatmul.f32.gmra.mxu1 %v2053_v11  ;;  %v1156_v20 = vmax.f32 %v1079_v62, 0.0  ;;  %v2854_v62 = vld [vmem:[%s5240_s11 + $0xb8] sm:$0xff] }
 0x276   : > { %v1671_v60 = vpop.f32.mrf.mxu2 }
 0x277   : > { %6100 = vst [vmem:[#allocation21_spill] sm:$0xff] %v5375_v27  ;;  %v1672_v59 = vadd.f32 %v5331_v40, %v1671_v60  ;;  %v1889_v34 = vpop.f32.mrf.mxu3 }
 0x278   : > { %v872_v42 = vpop.f32.mrf.mxu0 }
 0x279   : > { %v1881_v31 = vadd.f32 %v1880_v21, %v1672_v59  ;;  %v873_v11 = vadd.f32 %v5331_v40, %v872_v42  ;;  %v2853_v59 = vld [vmem:[%s5240_s11 + $0xb0] sm:$0xff]  ;;  %v2058_v42 = vld [vmem:[%s5198_s10 + $0xe8] sm:$0xff] }
 0x27a   : > { %v5382_v39 = vpop.f32.mrf.mxu1 }
 0x27b   : > { %v1958_v44 = vmax.f32 %v1881_v31, 0.0  ;;  %4143 = vmatmul.msk.f32.gmra.mxu2 %vm484_vm1, %v2852_v46  ;;  %3197 = vmatmul.f32.gmra.mxu0 %v2851_v52  ;;  %v1082_v58 = vadd.f32 %v5343_v38, %v873_v11  ;;  %v2057_v46 = vld [vmem:[%s5198_s10 + $0xe0] sm:$0xff] }
 0x27c   : > { %4081 = vmatmul.msk.f32.gmra.mxu3 %vm484_vm1, %v2056_v33 }
 0x27d   : > { %v5388_v8 = vmax.f32 %v1156_v20, %v1958_v44  ;;  %2404 = vmatmul.f32.gmra.mxu1 %v2055_v0  ;;  %v1157_v52 = vmax.f32 %v1082_v58, 0.0  ;;  %v2856_v58 = vld [vmem:[%s5240_s11 + $0xc8] sm:$0xff] }
 0x27e   : > { %v1674_v21 = vpop.f32.mrf.mxu2 }
 0x27f   : > { %6101 = vst [vmem:[#allocation22_spill] sm:$0xff] %v5388_v8  ;;  %v1675_v41 = vadd.f32 %v5331_v40, %v1674_v21  ;;  %v1892_v36 = vpop.f32.mrf.mxu3 }
 0x280   : > { %v875_v60 = vpop.f32.mrf.mxu0 }
 0x281   : > { %v1884_v31 = vadd.f32 %v1883_v2, %v1675_v41  ;;  %v876_v0 = vadd.f32 %v5331_v40, %v875_v60  ;;  %v2855_v41 = vld [vmem:[%s5240_s11 + $0xc0] sm:$0xff]  ;;  %v2060_v60 = vld [vmem:[%s5198_s10 + $0xf8] sm:$0xff] }
 0x282   : > { %v5395_v27 = vpop.f32.mrf.mxu1 }
 0x283   : > { %v1959_v33 = vmax.f32 %v1884_v31, 0.0  ;;  %4144 = vmatmul.msk.f32.gmra.mxu2 %vm484_vm1, %v2854_v62  ;;  %3200 = vmatmul.f32.gmra.mxu0 %v2853_v59  ;;  %v1085_v20 = vadd.f32 %v5356_v26, %v876_v0  ;;  %v2059_v62 = vld [vmem:[%s5198_s10 + $0xf0] sm:$0xff] }
 0x284   : > { %4082 = vmatmul.msk.f32.gmra.mxu3 %vm484_vm1, %v2058_v42 }
 0x285   : > { %v5401_v38 = vmax.f32 %v1157_v52, %v1959_v33  ;;  %2407 = vmatmul.f32.gmra.mxu1 %v2057_v46  ;;  %v1158_v59 = vmax.f32 %v1085_v20, 0.0  ;;  %v2858_v20 = vld [vmem:[%s5240_s11 + $0xd8] sm:$0xff] }
 0x286   : > { %v1677_v2 = vpop.f32.mrf.mxu2 }
 0x287   : > { %6102 = vst [vmem:[#allocation23_spill] sm:$0xff] %v5401_v38  ;;  %v1678_v44 = vadd.f32 %v5331_v40, %v1677_v2  ;;  %v1895_v11 = vpop.f32.mrf.mxu3 }
 0x288   : > { %v878_v21 = vpop.f32.mrf.mxu0 }
 0x289   : > { %v1887_v31 = vadd.f32 %v1886_v5, %v1678_v44  ;;  %v879_v46 = vadd.f32 %v5331_v40, %v878_v21  ;;  %v2857_v44 = vld [vmem:[%s5240_s11 + $0xd0] sm:$0xff]  ;;  %v2062_v21 = vld [vmem:[%s5198_s10 + $0x108] sm:$0xff] }
 0x28a   : > { %v5408_v8 = vpop.f32.mrf.mxu1 }
 0x28b   : > { %v1960_v42 = vmax.f32 %v1887_v31, 0.0  ;;  %4145 = vmatmul.msk.f32.gmra.mxu2 %vm484_vm1, %v2856_v58  ;;  %3203 = vmatmul.f32.gmra.mxu0 %v2855_v41  ;;  %v1088_v52 = vadd.f32 %v5369_v3, %v879_v46  ;;  %v2061_v58 = vld [vmem:[%s5198_s10 + $0x100] sm:$0xff] }
 0x28c   : > { %4083 = vmatmul.msk.f32.gmra.mxu3 %vm484_vm1, %v2060_v60 }
 0x28d   : > { %v5414_v26 = vmax.f32 %v1158_v59, %v1960_v42  ;;  %2410 = vmatmul.f32.gmra.mxu1 %v2059_v62  ;;  %v1159_v41 = vmax.f32 %v1088_v52, 0.0  ;;  %v2860_v52 = vld [vmem:[%s5240_s11 + $0xe8] sm:$0xff] }
 0x28e   : > { %v1680_v5 = vpop.f32.mrf.mxu2 }
 0x28f   : > { %6103 = vst [vmem:[#allocation24_spill] sm:$0xff] %v5414_v26  ;;  %v1681_v33 = vadd.f32 %v5331_v40, %v1680_v5  ;;  %v1898_v0 = vpop.f32.mrf.mxu3 }
 0x290   : > { %v881_v2 = vpop.f32.mrf.mxu0 }
 0x291   : > { %v1890_v31 = vadd.f32 %v1889_v34, %v1681_v33  ;;  %v882_v62 = vadd.f32 %v5331_v40, %v881_v2  ;;  %v2859_v33 = vld [vmem:[%s5240_s11 + $0xe0] sm:$0xff]  ;;  %v2064_v2 = vld [vmem:[%s5198_s10 + $0x118] sm:$0xff] }
 0x292   : > { %v2366_v38 = vpop.f32.mrf.mxu1 }
 0x293   : > { %v1961_v60 = vmax.f32 %v1890_v31, 0.0  ;;  %4146 = vmatmul.msk.f32.gmra.mxu2 %vm484_vm1, %v2858_v20  ;;  %3206 = vmatmul.f32.gmra.mxu0 %v2857_v44  ;;  %v1091_v59 = vadd.f32 %v5382_v39, %v882_v62  ;;  %v2063_v20 = vld [vmem:[%s5198_s10 + $0x110] sm:$0xff] }
 0x294   : > { %4084 = vmatmul.msk.f32.gmra.mxu3 %vm484_vm1, %v2062_v21 }
 0x295   : > { %v5425_v3 = vmax.f32 %v1159_v41, %v1961_v60  ;;  %2413 = vmatmul.f32.gmra.mxu1 %v2061_v58  ;;  %v1160_v44 = vmax.f32 %v1091_v59, 0.0  ;;  %v2862_v59 = vld [vmem:[%s5240_s11 + $0xf8] sm:$0xff] }
 0x296   : > { %v1683_v34 = vpop.f32.mrf.mxu2 }
 0x297   : > { %6104 = vst [vmem:[#allocation25_spill] sm:$0xff] %v5425_v3  ;;  %v1684_v42 = vadd.f32 %v5331_v40, %v1683_v34  ;;  %v2575_v46 = vpop.f32.mrf.mxu3 }
 0x298   : > { %v884_v5 = vpop.f32.mrf.mxu0 }
 0x299   : > { %v1893_v31 = vadd.f32 %v1892_v36, %v1684_v42  ;;  %v885_v58 = vadd.f32 %v5331_v40, %v884_v5  ;;  %v2861_v42 = vld [vmem:[%s5240_s11 + $0xf0] sm:$0xff]  ;;  %v2066_v5 = vld [vmem:[%s5198_s10 + $0x128] sm:$0xff] }
 0x29a   : > { %v2369_v26 = vpop.f32.mrf.mxu1 }
 0x29b   : > { %v1962_v21 = vmax.f32 %v1893_v31, 0.0  ;;  %4147 = vmatmul.msk.f32.gmra.mxu2 %vm484_vm1, %v2860_v52  ;;  %3209 = vmatmul.f32.gmra.mxu0 %v2859_v33  ;;  %v1094_v41 = vadd.f32 %v5395_v27, %v885_v58  ;;  %v2065_v52 = vld [vmem:[%s5198_s10 + $0x120] sm:$0xff] }
 0x29c   : > { %4085 = vmatmul.msk.f32.gmra.mxu3 %vm484_vm1, %v2064_v2 }
 0x29d   : > { %v5436_v39 = vmax.f32 %v1160_v44, %v1962_v21  ;;  %2416 = vmatmul.f32.gmra.mxu1 %v2063_v20  ;;  %v1161_v33 = vmax.f32 %v1094_v41, 0.0 }
 0x29e   : > { %v1686_v36 = vpop.f32.mrf.mxu2 }
 0x29f   : > { %6105 = vst [vmem:[#allocation26_spill] sm:$0xff] %v5436_v39  ;;  %v1687_v60 = vadd.f32 %v5331_v40, %v1686_v36  ;;  %v2578_v62 = vpop.f32.mrf.mxu3  ;;  %v2864_v36 = vld [vmem:[%s5240_s11 + $0x108] sm:$0xff] }
 0x2a0   : > { %v887_v34 = vpop.f32.mrf.mxu0  ;;  %v2070_v39 = vld [vmem:[%s5198_s10 + $0x148] sm:$0xff] }
 0x2a1   : > { %v1896_v31 = vadd.f32 %v1895_v11, %v1687_v60  ;;  %v888_v20 = vadd.f32 %v5331_v40, %v887_v34  ;;  %v2863_v60 = vld [vmem:[%s5240_s11 + $0x100] sm:$0xff]  ;;  %v2367_v34 = vadd.f32 %v5331_v40, %v2366_v38 }
 0x2a2   : > { %v2372_v3 = vpop.f32.mrf.mxu1 }
 0x2a3   : > { %v1963_v2 = vmax.f32 %v1896_v31, 0.0  ;;  %4148 = vmatmul.msk.f32.gmra.mxu2 %vm484_vm1, %v2862_v59  ;;  %3212 = vmatmul.f32.gmra.mxu0 %v2861_v42  ;;  %v1097_v44 = vadd.f32 %v5408_v8, %v888_v20  ;;  %v2068_v59 = vld [vmem:[%s5198_s10 + $0x138] sm:$0xff]  ;;  %v2576_v38 = vadd.f32 %v2575_v46, %v2367_v34 }
 0x2a4   : > { %4086 = vmatmul.msk.f32.gmra.mxu3 %vm484_vm1, %v2066_v5  ;;  %v2067_v5 = vld [vmem:[%s5198_s10 + $0x130] sm:$0xff] }
 0x2a5   : > { %v5447_v27 = vmax.f32 %v1161_v33, %v1963_v2  ;;  %2419 = vmatmul.f32.gmra.mxu1 %v2065_v52  ;;  %v1162_v33 = vmax.f32 %v1097_v44, 0.0 }
 0x2a6   : > { %v1689_v11 = vpop.f32.mrf.mxu2 }
 0x2a7   : > { %6106 = vst [vmem:[#allocation27_spill] sm:$0xff] %v5447_v27  ;;  %v1690_v21 = vadd.f32 %v5331_v40, %v1689_v11  ;;  %v2581_v58 = vpop.f32.mrf.mxu3  ;;  %v2767_v27 = vmax.f32 %v2576_v38, 0.0  ;;  %v2867_v38 = vld [vmem:[%s5240_s11 + $0x120] sm:$0xff] }
 0x2a8   : > { %v3168_v41 = vpop.f32.mrf.mxu0 }
 0x2a9   : > { %v1899_v31 = vadd.f32 %v1898_v0, %v1690_v21  ;;  %v3169_v8 = vadd.f32 %v5331_v40, %v3168_v41  ;;  %v2866_v21 = vld [vmem:[%s5240_s11 + $0x118] sm:$0xff] }
 0x2aa   : > { %v5455_v42 = vpop.f32.mrf.mxu1 }
 0x2ab   : > { %v1964_v52 = vmax.f32 %v1899_v31, 0.0  ;;  %4149 = vmatmul.msk.f32.gmra.mxu2 %vm484_vm1, %v2864_v36  ;;  %3215 = vmatmul.f32.gmra.mxu0 %v2863_v60  ;;  %v2865_v31 = vld [vmem:[%s5240_s11 + $0x110] sm:$0xff]  ;;  %v2370_v36 = vadd.f32 %v5331_v40, %v2369_v26 }
 0x2ac   : > { %4087 = vmatmul.msk.f32.gmra.mxu3 %vm484_vm1, %v2068_v59  ;;  %v2069_v59 = vld [vmem:[%s5198_s10 + $0x140] sm:$0xff] }
 0x2ad   : > { %v5461_v0 = vmax.f32 %v1162_v33, %v1964_v52  ;;  %2422 = vmatmul.f32.gmra.mxu1 %v2067_v5  ;;  %v2579_v26 = vadd.f32 %v2578_v62, %v2370_v36  ;;  %v2868_v52 = vld [vmem:[%s5240_s11 + $0x128] sm:$0xff]  ;;  %v2071_v62 = vld [vmem:[%s5198_s10 + $0x150] sm:$0xff] }
 0x2ae   : > { %v3377_v2 = vpop.f32.mrf.mxu2 }
 0x2af   : > { %v2584_v20 = vpop.f32.mrf.mxu3  ;;  %v3378_v11 = vadd.f32 %v3377_v2, %v3169_v8  ;;  %v2768_v2 = vmax.f32 %v2579_v26, 0.0 }
 0x2b0   : > { %v3171_v44 = vpop.f32.mrf.mxu0 }
 0x2b1   : > { %v3569_v41 = vmax.f32 %v3378_v11, 0.0  ;;  %v3172_v46 = vadd.f32 %v5331_v40, %v3171_v44  ;;  %v2373_v11 = vadd.f32 %v5331_v40, %v2372_v3 }
 0x2b2   : > { %v2378_v60 = vpop.f32.mrf.mxu1 }
 0x2b3   : > { %v3633_v22 = vmax.f32 %v2767_v27, %v3569_v41  ;;  %4150 = vmatmul.msk.f32.gmra.mxu2 %vm484_vm1, %v2866_v21  ;;  %3218 = vmatmul.f32.gmra.mxu0 %v2865_v31  ;;  %v2582_v31 = vadd.f32 %v2581_v58, %v2373_v11 }
 0x2b4   : > { %4088 = vmatmul.msk.f32.gmra.mxu3 %vm484_vm1, %v2070_v39  ;;  %v2072_v39 = vld [vmem:[%s5198_s10 + $0x158] sm:$0xff] }
 0x2b5   : > { %v3697_v27 = vmax.f32 %v4629_v53, %v3633_v22  ;;  %2425 = vmatmul.f32.gmra.mxu1 %v2069_v59 }
 0x2b6   : > { %v3380_v34 = vpop.f32.mrf.mxu2 }
 0x2b7   : > { %3762 = vst.msk [vmem:[%s5474_s18] sm:$0xff] %vm3761_vm2, %v3697_v27  ;;  %v2587_v5 = vpop.f32.mrf.mxu3  ;;  %v3381_v33 = vadd.f32 %v3380_v34, %v3172_v46  ;;  %v2870_v46 = vld [vmem:[%s5240_s11 + $0x138] sm:$0xff]  ;;  %v2869_v27 = vld [vmem:[%s5240_s11 + $0x130] sm:$0xff]  ;;  %v2769_v34 = vmax.f32 %v2582_v31, 0.0  ;;  %v2871_v31 = vld [vmem:[%s5240_s11 + $0x140] sm:$0xff] }
 0x2b8   : > { %v3174_v8 = vpop.f32.mrf.mxu0 }
 0x2b9   : > { %v3570_v21 = vmax.f32 %v3381_v33, 0.0  ;;  %v3175_v22 = vadd.f32 %v5331_v40, %v3174_v8  ;;  %v2376_v33 = vadd.f32 %v5331_v40, %v5455_v42  ;;  %v2074_v8 = vld [vmem:[%s5198_s10 + $0x168] sm:$0xff] }
 0x2ba   : > { %v2381_v44 = vpop.f32.mrf.mxu1 }
 0x2bb   : > { %v3634_v53 = vmax.f32 %v2768_v2, %v3570_v21  ;;  %4151 = vmatmul.msk.f32.gmra.mxu2 %vm484_vm1, %v2868_v52  ;;  %3221 = vmatmul.f32.gmra.mxu0 %v2867_v38  ;;  %v2585_v11 = vadd.f32 %v2584_v20, %v2376_v33  ;;  %v2075_v20 = vld [vmem:[%s5198_s10 + $0x170] sm:$0xff] }
 0x2bc   : > { %4089 = vmatmul.msk.f32.gmra.mxu3 %vm484_vm1, %v2072_v39 }
 0x2bd   : > { %v3698_v36 = vmax.f32 %v4641_v4, %v3634_v53  ;;  %2428 = vmatmul.f32.gmra.mxu1 %v2071_v62  ;;  %v2073_v4 = vld [vmem:[%s5198_s10 + $0x160] sm:$0xff]  ;;  %v2872_v53 = vld [vmem:[%s5240_s11 + $0x148] sm:$0xff] }
 0x2be   : > { %v3383_v3 = vpop.f32.mrf.mxu2 }
 0x2bf   : > { %3763 = vst.msk [vmem:[%s5474_s18 + $0x8] sm:$0xff] %vm3761_vm2, %v3698_v36  ;;  %v2590_v41 = vpop.f32.mrf.mxu3  ;;  %v3384_v59 = vadd.f32 %v3383_v3, %v3175_v22  ;;  %v2770_v36 = vmax.f32 %v2585_v11, 0.0  ;;  %v2379_v3 = vadd.f32 %v5331_v40, %v2378_v60 }
 0x2c0   : > { %v3177_v26 = vpop.f32.mrf.mxu0 }
 0x2c1   : > { %v3571_v52 = vmax.f32 %v3384_v59, 0.0  ;;  %v3178_v2 = vadd.f32 %v5331_v40, %v3177_v26 }
 0x2c2   : > { %v2384_v58 = vpop.f32.mrf.mxu1 }
 0x2c3   : > { %v3635_v38 = vmax.f32 %v2769_v34, %v3571_v52  ;;  %4152 = vmatmul.msk.f32.gmra.mxu2 %vm484_vm1, %v2870_v46  ;;  %3224 = vmatmul.f32.gmra.mxu0 %v2869_v27  ;;  %v2076_v46 = vld [vmem:[%s5198_s10 + $0x178] sm:$0xff]  ;;  %v2588_v34 = vadd.f32 %v2587_v5, %v2379_v3  ;;  %v2077_v5 = vld [vmem:[%s5198_s10 + $0x180] sm:$0xff] }
 0x2c4   : > { %4090 = vmatmul.msk.f32.gmra.mxu3 %vm484_vm1, %v2074_v8 }
 0x2c5   : > { %v3699_v21 = vmax.f32 %v4653_v19, %v3635_v38  ;;  %2431 = vmatmul.f32.gmra.mxu1 %v2073_v4  ;;  %v2874_v4 = vld [vmem:[%s5240_s11 + $0x158] sm:$0xff]  ;;  %v2771_v11 = vmax.f32 %v2588_v34, 0.0  ;;  %v2385_v34 = vadd.f32 %v5331_v40, %v2384_v58 }
 0x2c6   : > { %v3386_v42 = vpop.f32.mrf.mxu2 }
 0x2c7   : > { %3764 = vst.msk [vmem:[%s5474_s18 + $0x10] sm:$0xff] %vm3761_vm2, %v3699_v21  ;;  %v2593_v39 = vpop.f32.mrf.mxu3  ;;  %v3387_v62 = vadd.f32 %v3386_v42, %v3178_v2  ;;  %v2873_v2 = vld [vmem:[%s5240_s11 + $0x150] sm:$0xff]  ;;  %v2382_v21 = vadd.f32 %v5331_v40, %v2381_v44 }
 0x2c8   : > { %v3180_v22 = vpop.f32.mrf.mxu0 }
 0x2c9   : > { %v3572_v59 = vmax.f32 %v3387_v62, 0.0  ;;  %v3181_v27 = vadd.f32 %v5331_v40, %v3180_v22  ;;  %v2078_v62 = vld [vmem:[%s5198_s10 + $0x188] sm:$0xff] }
 0x2ca   : > { %v2387_v26 = vpop.f32.mrf.mxu1 }
 0x2cb   : > { %v3636_v19 = vmax.f32 %v2770_v36, %v3572_v59  ;;  %4153 = vmatmul.msk.f32.gmra.mxu2 %vm484_vm1, %v2872_v53  ;;  %3227 = vmatmul.f32.gmra.mxu0 %v2871_v31  ;;  %v2591_v31 = vadd.f32 %v2590_v41, %v2382_v21  ;;  %v2079_v41 = vld [vmem:[%s5198_s10 + $0x190] sm:$0xff] }
 0x2cc   : > { %4091 = vmatmul.msk.f32.gmra.mxu3 %vm484_vm1, %v2076_v46  ;;  %v2876_v46 = vld [vmem:[%s5240_s11 + $0x168] sm:$0xff] }
 0x2cd   : > { %v3700_v33 = vmax.f32 %v4666_v35, %v3636_v19  ;;  %2434 = vmatmul.f32.gmra.mxu1 %v2075_v20  ;;  %v2875_v19 = vld [vmem:[%s5240_s11 + $0x160] sm:$0xff] }
 0x2ce   : > { %v3389_v60 = vpop.f32.mrf.mxu2 }
 0x2cf   : > { %3765 = vst.msk [vmem:[%s5474_s18 + $0x18] sm:$0xff] %vm3761_vm2, %v3700_v33  ;;  %v2596_v52 = vpop.f32.mrf.mxu3  ;;  %v3390_v8 = vadd.f32 %v3389_v60, %v3181_v27  ;;  %v2772_v27 = vmax.f32 %v2591_v31, 0.0  ;;  %v2080_v60 = vld [vmem:[%s5198_s10 + $0x198] sm:$0xff] }
 0x2d0   : > { %v3183_v38 = vpop.f32.mrf.mxu0 }
 0x2d1   : > { %v3573_v42 = vmax.f32 %v3390_v8, 0.0  ;;  %v3184_v22 = vadd.f32 %v5331_v40, %v3183_v38  ;;  %v2594_v38 = vadd.f32 %v2593_v39, %v2385_v34  ;;  %v2081_v39 = vld [vmem:[%s5198_s10 + $0x1a0] sm:$0xff]  ;;  %v2880_v34 = vld [vmem:[%s5240_s11 + $0x188] sm:$0xff] }
 0x2d2   : > { %v2390_v53 = vpop.f32.mrf.mxu1 }
 0x2d3   : > { %v3637_v35 = vmax.f32 %v2771_v11, %v3573_v42  ;;  %4154 = vmatmul.msk.f32.gmra.mxu2 %vm484_vm1, %v2874_v4  ;;  %3230 = vmatmul.f32.gmra.mxu0 %v2873_v2  ;;  %v2878_v42 = vld [vmem:[%s5240_s11 + $0x178] sm:$0xff] }
 0x2d4   : > { %4092 = vmatmul.msk.f32.gmra.mxu3 %vm484_vm1, %v2078_v62 }
 0x2d5   : > { %v3701_v36 = vmax.f32 %v4679_v48, %v3637_v35  ;;  %2437 = vmatmul.f32.gmra.mxu1 %v2077_v5  ;;  %v2877_v5 = vld [vmem:[%s5240_s11 + $0x170] sm:$0xff]  ;;  %v2773_v35 = vmax.f32 %v2594_v38, 0.0  ;;  %v2084_v38 = vld [vmem:[%s5198_s10 + $0x1b8] sm:$0xff] }
 0x2d6   : > { %v3392_v44 = vpop.f32.mrf.mxu2 }
 0x2d7   : > { %3766 = vst.msk [vmem:[%s5474_s18 + $0x20] sm:$0xff] %vm3761_vm2, %v3701_v36  ;;  %v2599_v3 = vpop.f32.mrf.mxu3  ;;  %v3393_v59 = vadd.f32 %v3392_v44, %v3184_v22  ;;  %v2388_v22 = vadd.f32 %v5331_v40, %v2387_v26  ;;  %v2082_v36 = vld [vmem:[%s5198_s10 + $0x1a8] sm:$0xff] }
 0x2d8   : > { %v3186_v20 = vpop.f32.mrf.mxu0 }
 0x2d9   : > { %v3574_v33 = vmax.f32 %v3393_v59, 0.0  ;;  %v3187_v4 = vadd.f32 %v5331_v40, %v3186_v20 }
 0x2da   : > { %v2393_v8 = vpop.f32.mrf.mxu1 }
 0x2db   : > { %v3638_v48 = vmax.f32 %v2772_v27, %v3574_v33  ;;  %4155 = vmatmul.msk.f32.gmra.mxu2 %vm484_vm1, %v2876_v46  ;;  %3233 = vmatmul.f32.gmra.mxu0 %v2875_v19  ;;  %v2597_v46 = vadd.f32 %v2596_v52, %v2388_v22  ;;  %v2083_v52 = vld [vmem:[%s5198_s10 + $0x1b0] sm:$0xff] }
 0x2dc   : > { %4093 = vmatmul.msk.f32.gmra.mxu3 %vm484_vm1, %v2080_v60  ;;  %v2879_v60 = vld [vmem:[%s5240_s11 + $0x180] sm:$0xff] }
 0x2dd   : > { %v3702_v2 = vmax.f32 %v4692_v63, %v3638_v48  ;;  %2440 = vmatmul.f32.gmra.mxu1 %v2079_v41  ;;  %v2774_v41 = vmax.f32 %v2597_v46, 0.0  ;;  %v2391_v48 = vadd.f32 %v5331_v40, %v2390_v53 }
 0x2de   : > { %v3395_v58 = vpop.f32.mrf.mxu2 }
 0x2df   : > { %3767 = vst.msk [vmem:[%s5474_s18 + $0x28] sm:$0xff] %vm3761_vm2, %v3702_v2  ;;  %v2602_v11 = vpop.f32.mrf.mxu3  ;;  %v3396_v21 = vadd.f32 %v3395_v58, %v3187_v4 }
 0x2e0   : > { %v3189_v62 = vpop.f32.mrf.mxu0 }
 0x2e1   : > { %v3575_v31 = vmax.f32 %v3396_v21, 0.0  ;;  %v3190_v59 = vadd.f32 %v5331_v40, %v3189_v62  ;;  %v2600_v21 = vadd.f32 %v2599_v3, %v2391_v48  ;;  %v2085_v3 = vld [vmem:[%s5198_s10 + $0x1c0] sm:$0xff] }
 0x2e2   : > { %v2396_v44 = vpop.f32.mrf.mxu1  ;;  %v2883_v48 = vld [vmem:[%s5240_s11 + $0x1a0] sm:$0xff] }
 0x2e3   : > { %v3639_v63 = vmax.f32 %v2773_v35, %v3575_v31  ;;  %4156 = vmatmul.msk.f32.gmra.mxu2 %vm484_vm1, %v2878_v42  ;;  %3236 = vmatmul.f32.gmra.mxu0 %v2877_v5  ;;  %v2882_v35 = vld [vmem:[%s5240_s11 + $0x198] sm:$0xff]  ;;  %v2881_v31 = vld [vmem:[%s5240_s11 + $0x190] sm:$0xff] }
 0x2e4   : > { %4094 = vmatmul.msk.f32.gmra.mxu3 %vm484_vm1, %v2082_v36  ;;  %v2775_v36 = vmax.f32 %v2600_v21, 0.0 }
 0x2e5   : > { %v3703_v20 = vmax.f32 %v4705_v14, %v3639_v63  ;;  %2443 = vmatmul.f32.gmra.mxu1 %v2081_v39  ;;  %v2394_v39 = vadd.f32 %v5331_v40, %v2393_v8 }
 0x2e6   : > { %v3398_v26 = vpop.f32.mrf.mxu2 }
 0x2e7   : > { %3768 = vst.msk [vmem:[%s5474_s18 + $0x30] sm:$0xff] %vm3761_vm2, %v3703_v20  ;;  %v2605_v19 = vpop.f32.mrf.mxu3  ;;  %v3399_v27 = vadd.f32 %v3398_v26, %v3190_v59  ;;  %v2086_v59 = vld [vmem:[%s5198_s10 + $0x1c8] sm:$0xff]  ;;  %v2603_v26 = vadd.f32 %v2602_v11, %v2394_v39  ;;  %v2087_v11 = vld [vmem:[%s5198_s10 + $0x1d0] sm:$0xff] }
 0x2e8   : > { %v3192_v33 = vpop.f32.mrf.mxu0 }
 0x2e9   : > { %v3576_v4 = vmax.f32 %v3399_v27, 0.0  ;;  %v3193_v58 = vadd.f32 %v5331_v40, %v3192_v33 }
 0x2ea   : > { %v2399_v2 = vpop.f32.mrf.mxu1 }
 0x2eb   : > { %v3640_v14 = vmax.f32 %v2774_v41, %v3576_v4  ;;  %4157 = vmatmul.msk.f32.gmra.mxu2 %vm484_vm1, %v2880_v34  ;;  %3239 = vmatmul.f32.gmra.mxu0 %v2879_v60  ;;  %v2884_v60 = vld [vmem:[%s5240_s11 + $0x1a8] sm:$0xff]  ;;  %v2776_v4 = vmax.f32 %v2603_v26, 0.0 }
 0x2ec   : > { %4095 = vmatmul.msk.f32.gmra.mxu3 %vm484_vm1, %v2084_v38  ;;  %v2397_v38 = vadd.f32 %v5331_v40, %v2396_v44 }
 0x2ed   : > { %v3704_v42 = vmax.f32 %v4718_v29, %v3640_v14  ;;  %2446 = vmatmul.f32.gmra.mxu1 %v2083_v52  ;;  %v2088_v14 = vld [vmem:[%s5198_s10 + $0x1d8] sm:$0xff] }
 0x2ee   : > { %v3401_v53 = vpop.f32.mrf.mxu2 }
 0x2ef   : > { %3769 = vst.msk [vmem:[%s5474_s18 + $0x38] sm:$0xff] %vm3761_vm2, %v3704_v42  ;;  %v2608_v62 = vpop.f32.mrf.mxu3  ;;  %v3402_v5 = vadd.f32 %v3401_v53, %v3193_v58  ;;  %v2606_v42 = vadd.f32 %v2605_v19, %v2397_v38  ;;  %v2089_v19 = vld [vmem:[%s5198_s10 + $0x1e0] sm:$0xff] }
 0x2f0   : > { %v3195_v22 = vpop.f32.mrf.mxu0 }
 0x2f1   : > { %v3577_v63 = vmax.f32 %v3402_v5, 0.0  ;;  %v3196_v20 = vadd.f32 %v5331_v40, %v3195_v22  ;;  %v2886_v22 = vld [vmem:[%s5240_s11 + $0x1b8] sm:$0xff]  ;;  %v2777_v39 = vmax.f32 %v2606_v42, 0.0 }
 0x2f2   : > { %v2402_v46 = vpop.f32.mrf.mxu1 }
 0x2f3   : > { %v3641_v29 = vmax.f32 %v2775_v36, %v3577_v63  ;;  %4158 = vmatmul.msk.f32.gmra.mxu2 %vm484_vm1, %v2882_v35  ;;  %3242 = vmatmul.f32.gmra.mxu0 %v2881_v31  ;;  %v2885_v36 = vld [vmem:[%s5240_s11 + $0x1b0] sm:$0xff]  ;;  %v2400_v63 = vadd.f32 %v5331_v40, %v2399_v2  ;;  %v2403_v38 = vadd.f32 %v5331_v40, %v2402_v46 }
 0x2f4   : > { %4096 = vmatmul.msk.f32.gmra.mxu3 %vm484_vm1, %v2086_v59 }
 0x2f5   : > { %v3705_v27 = vmax.f32 %v4731_v45, %v3641_v29  ;;  %2449 = vmatmul.f32.gmra.mxu1 %v2085_v3  ;;  %v2090_v3 = vld [vmem:[%s5198_s10 + $0x1e8] sm:$0xff]  ;;  %v2609_v26 = vadd.f32 %v2608_v62, %v2400_v63  ;;  %v2091_v62 = vld [vmem:[%s5198_s10 + $0x1f0] sm:$0xff] }
 0x2f6   : > { %v3404_v8 = vpop.f32.mrf.mxu2 }
 0x2f7   : > { %3770 = vst.msk [vmem:[%s5474_s18 + $0x40] sm:$0xff] %vm3761_vm2, %v3705_v27  ;;  %v2611_v34 = vpop.f32.mrf.mxu3  ;;  %v3405_v33 = vadd.f32 %v3404_v8, %v3196_v20 }
 0x2f8   : > { %v3198_v41 = vpop.f32.mrf.mxu0 }
 0x2f9   : > { %v3578_v52 = vmax.f32 %v3405_v33, 0.0  ;;  %v3199_v21 = vadd.f32 %v5331_v40, %v3198_v41 }
 0x2fa   : > { %v2405_v58 = vpop.f32.mrf.mxu1 }
 0x2fb   : > { %v3642_v45 = vmax.f32 %v2776_v4, %v3578_v52  ;;  %4159 = vmatmul.msk.f32.gmra.mxu2 %vm484_vm1, %v2884_v60  ;;  %3245 = vmatmul.f32.gmra.mxu0 %v2883_v48  ;;  %v2888_v60 = vld [vmem:[%s5240_s11 + $0x1c8] sm:$0xff]  ;;  %v2887_v48 = vld [vmem:[%s5240_s11 + $0x1c0] sm:$0xff]  ;;  %v2778_v4 = vmax.f32 %v2609_v26, 0.0 }
 0x2fc   : > { %4097 = vmatmul.msk.f32.gmra.mxu3 %vm484_vm1, %v2088_v14  ;;  %v2092_v14 = vld [vmem:[%s5198_s10 + $0x1f8] sm:$0xff] }
 0x2fd   : > { %v3706_v53 = vmax.f32 %v4744_v61, %v3642_v45  ;;  %2452 = vmatmul.f32.gmra.mxu1 %v2087_v11 }
 0x2fe   : > { %v3407_v44 = vpop.f32.mrf.mxu2 }
 0x2ff   : > { %3771 = vst.msk [vmem:[%s5474_s18 + $0x48] sm:$0xff] %vm3761_vm2, %v3706_v53  ;;  %v2614_v5 = vpop.f32.mrf.mxu3  ;;  %v3408_v35 = vadd.f32 %v3407_v44, %v3199_v21  ;;  %v2612_v21 = vadd.f32 %v2611_v34, %v2403_v38  ;;  %v2093_v34 = vld [vmem:[%s5198_s10 + $0x200] sm:$0xff]  ;;  %v2096_v38 = vld [vmem:[%s5198_s10 + $0x218] sm:$0xff] }
 0x300   : > { %v3201_v31 = vpop.f32.mrf.mxu0 }
 0x301   : > { %v3579_v59 = vmax.f32 %v3408_v35, 0.0  ;;  %v3202_v20 = vadd.f32 %v5331_v40, %v3201_v31  ;;  %v2890_v35 = vld [vmem:[%s5240_s11 + $0x1d8] sm:$0xff]  ;;  %v2889_v31 = vld [vmem:[%s5240_s11 + $0x1d0] sm:$0xff] }
 0x302   : > { %v2408_v29 = vpop.f32.mrf.mxu1 }
 0x303   : > { %v3643_v61 = vmax.f32 %v2777_v39, %v3579_v59  ;;  %4160 = vmatmul.msk.f32.gmra.mxu2 %vm484_vm1, %v2886_v22  ;;  %3248 = vmatmul.f32.gmra.mxu0 %v2885_v36  ;;  %v2779_v36 = vmax.f32 %v2612_v21, 0.0  ;;  %v2406_v39 = vadd.f32 %v5331_v40, %v2405_v58  ;;  %v2094_v59 = vld [vmem:[%s5198_s10 + $0x208] sm:$0xff] }
 0x304   : > { %4098 = vmatmul.msk.f32.gmra.mxu3 %vm484_vm1, %v2090_v3 }
 0x305   : > { %v3707_v27 = vmax.f32 %v4757_v13, %v3643_v61  ;;  %2455 = vmatmul.f32.gmra.mxu1 %v2089_v19  ;;  %v2615_v61 = vadd.f32 %v2614_v5, %v2406_v39  ;;  %v2095_v5 = vld [vmem:[%s5198_s10 + $0x210] sm:$0xff] }
 0x306   : > { %v3410_v2 = vpop.f32.mrf.mxu2 }
 0x307   : > { %3772 = vst.msk [vmem:[%s5474_s18 + $0x50] sm:$0xff] %vm3761_vm2, %v3707_v27  ;;  %v2617_v8 = vpop.f32.mrf.mxu3  ;;  %v3411_v33 = vadd.f32 %v3410_v2, %v3202_v20  ;;  %v2892_v2 = vld [vmem:[%s5240_s11 + $0x1e8] sm:$0xff] }
 0x308   : > { %v3204_v41 = vpop.f32.mrf.mxu0 }
 0x309   : > { %v3580_v52 = vmax.f32 %v3411_v33, 0.0  ;;  %v3205_v45 = vadd.f32 %v5331_v40, %v3204_v41  ;;  %v2780_v41 = vmax.f32 %v2615_v61, 0.0  ;;  %v2896_v61 = vld [vmem:[%s5240_s11 + $0x208] sm:$0xff] }
 0x30a   : > { %v2411_v11 = vpop.f32.mrf.mxu1 }
 0x30b   : > { %v3644_v13 = vmax.f32 %v2778_v4, %v3580_v52  ;;  %4161 = vmatmul.msk.f32.gmra.mxu2 %vm484_vm1, %v2888_v60  ;;  %3251 = vmatmul.f32.gmra.mxu0 %v2887_v48  ;;  %v2891_v60 = vld [vmem:[%s5240_s11 + $0x1e0] sm:$0xff]  ;;  %v2409_v48 = vadd.f32 %v5331_v40, %v2408_v29 }
 0x30c   : > { %4099 = vmatmul.msk.f32.gmra.mxu3 %vm484_vm1, %v2092_v14 }
 0x30d   : > { %v3708_v42 = vmax.f32 %v4770_v30, %v3644_v13  ;;  %2458 = vmatmul.f32.gmra.mxu1 %v2091_v62  ;;  %v2618_v62 = vadd.f32 %v2617_v8, %v2409_v48  ;;  %v2097_v8 = vld [vmem:[%s5198_s10 + $0x220] sm:$0xff] }
 0x30e   : > { %v3413_v46 = vpop.f32.mrf.mxu2 }
 0x30f   : > { %3773 = vst.msk [vmem:[%s5474_s18 + $0x58] sm:$0xff] %vm3761_vm2, %v3708_v42  ;;  %v2620_v53 = vpop.f32.mrf.mxu3  ;;  %v3414_v44 = vadd.f32 %v3413_v46, %v3205_v45  ;;  %v2894_v42 = vld [vmem:[%s5240_s11 + $0x1f8] sm:$0xff] }
 0x310   : > { %v3207_v22 = vpop.f32.mrf.mxu0 }
 0x311   : > { %v3581_v63 = vmax.f32 %v3414_v44, 0.0  ;;  %v3208_v19 = vadd.f32 %v5331_v40, %v3207_v22  ;;  %v2893_v44 = vld [vmem:[%s5240_s11 + $0x1f0] sm:$0xff]  ;;  %v2412_v22 = vadd.f32 %v5331_v40, %v2411_v11 }
 0x312   : > { %v2414_v3 = vpop.f32.mrf.mxu1 }
 0x313   : > { %v3645_v30 = vmax.f32 %v2779_v36, %v3581_v63  ;;  %4162 = vmatmul.msk.f32.gmra.mxu2 %vm484_vm1, %v2890_v35  ;;  %3254 = vmatmul.f32.gmra.mxu0 %v2889_v31  ;;  %v2781_v35 = vmax.f32 %v2618_v62, 0.0  ;;  %v2098_v36 = vld [vmem:[%s5198_s10 + $0x228] sm:$0xff] }
 0x314   : > { %4100 = vmatmul.msk.f32.gmra.mxu3 %vm484_vm1, %v2094_v59  ;;  %v2621_v59 = vadd.f32 %v2620_v53, %v2412_v22 }
 0x315   : > { %v3709_v20 = vmax.f32 %v4783_v47, %v3645_v30  ;;  %2461 = vmatmul.f32.gmra.mxu1 %v2093_v34 }
 0x316   : > { %v3416_v58 = vpop.f32.mrf.mxu2 }
 0x317   : > { %3774 = vst.msk [vmem:[%s5474_s18 + $0x60] sm:$0xff] %vm3761_vm2, %v3709_v20  ;;  %v2623_v26 = vpop.f32.mrf.mxu3  ;;  %v3417_v27 = vadd.f32 %v3416_v58, %v3208_v19  ;;  %v2895_v58 = vld [vmem:[%s5240_s11 + $0x200] sm:$0xff] }
 0x318   : > { %v3210_v33 = vpop.f32.mrf.mxu0 }
 0x319   : > { %v3582_v4 = vmax.f32 %v3417_v27, 0.0  ;;  %v3211_v14 = vadd.f32 %v5331_v40, %v3210_v33  ;;  %v2782_v27 = vmax.f32 %v2621_v59, 0.0  ;;  %v2899_v59 = vld [vmem:[%s5240_s11 + $0x220] sm:$0xff] }
 0x31a   : > { %v2417_v52 = vpop.f32.mrf.mxu1 }
 0x31b   : > { %v3646_v47 = vmax.f32 %v2780_v41, %v3582_v4  ;;  %4163 = vmatmul.msk.f32.gmra.mxu2 %vm484_vm1, %v2892_v2  ;;  %3257 = vmatmul.f32.gmra.mxu0 %v2891_v60  ;;  %v2099_v60 = vld [vmem:[%s5198_s10 + $0x230] sm:$0xff] }
 0x31c   : > { %4101 = vmatmul.msk.f32.gmra.mxu3 %vm484_vm1, %v2096_v38 }
 0x31d   : > { %v3710_v13 = vmax.f32 %v4796_v1, %v3646_v47  ;;  %2464 = vmatmul.f32.gmra.mxu1 %v2095_v5 }
 0x31e   : > { %v3419_v29 = vpop.f32.mrf.mxu2 }
 0x31f   : > { %3775 = vst.msk [vmem:[%s5474_s18 + $0x68] sm:$0xff] %vm3761_vm2, %v3710_v13  ;;  %v2626_v45 = vpop.f32.mrf.mxu3  ;;  %v3420_v21 = vadd.f32 %v3419_v29, %v3211_v14  ;;  %v2898_v14 = vld [vmem:[%s5240_s11 + $0x218] sm:$0xff]  ;;  %v2897_v13 = vld [vmem:[%s5240_s11 + $0x210] sm:$0xff] }
 0x320   : > { %v3213_v46 = vpop.f32.mrf.mxu0 }
 0x321   : > { %v3583_v31 = vmax.f32 %v3420_v21, 0.0  ;;  %v3214_v63 = vadd.f32 %v5331_v40, %v3213_v46  ;;  %v5640_v40 = vld [vmem:[%s6079_s5] ss:$0 sm:$0xff]  ;;  %v2102_v46 = vld [vmem:[%s5198_s10 + $0x248] sm:$0xff] }
 0x322   : > { %v2420_v39 = vpop.f32.mrf.mxu1  ;;  %v2415_v53 = vadd.f32 %v5640_v40, %v2414_v3  ;;  %v2418_v21 = vadd.f32 %v5640_v40, %v2417_v52 }
 0x323   : > { %v3647_v1 = vmax.f32 %v2781_v35, %v3583_v31  ;;  %4164 = vmatmul.msk.f32.gmra.mxu2 %vm484_vm1, %v2894_v42  ;;  %3260 = vmatmul.f32.gmra.mxu0 %v2893_v44 }
 0x324   : > { %4102 = vmatmul.msk.f32.gmra.mxu3 %vm484_vm1, %v2098_v36  ;;  %v2624_v4 = vadd.f32 %v2623_v26, %v2415_v53  ;;  %v2101_v26 = vld [vmem:[%s5198_s10 + $0x240] sm:$0xff]  ;;  %v2627_v22 = vadd.f32 %v2626_v45, %v2418_v21  ;;  %v2103_v45 = vld [vmem:[%s5198_s10 + $0x250] sm:$0xff] }
 0x325   : > { %v3711_v34 = vmax.f32 %v4809_v18, %v3647_v1  ;;  %2467 = vmatmul.f32.gmra.mxu1 %v2097_v8  ;;  %v2100_v18 = vld [vmem:[%s5198_s10 + $0x238] sm:$0xff]  ;;  %v2900_v1 = vld [vmem:[%s5240_s11 + $0x228] sm:$0xff] }
 0x326   : > { %v3422_v11 = vpop.f32.mrf.mxu2  ;;  %v2783_v29 = vmax.f32 %v2624_v4, 0.0 }
 0x327   : > { %3776 = vst.msk [vmem:[%s5474_s18 + $0x70] sm:$0xff] %vm3761_vm2, %v3711_v34  ;;  %v2629_v30 = vpop.f32.mrf.mxu3  ;;  %v3423_v19 = vadd.f32 %v3422_v11, %v3214_v63  ;;  %v2784_v34 = vmax.f32 %v2627_v22, 0.0  ;;  %v2421_v11 = vadd.f32 %v5640_v40, %v2420_v39 }
 0x328   : > { %v3216_v20 = vpop.f32.mrf.mxu0 }
 0x329   : > { %v3584_v2 = vmax.f32 %v3423_v19, 0.0  ;;  %v3217_v48 = vadd.f32 %v5640_v40, %v3216_v20 }
 0x32a   : > { %v2423_v33 = vpop.f32.mrf.mxu1 }
 0x32b   : > { %v3648_v41 = vmax.f32 %v2782_v27, %v3584_v2  ;;  %4165 = vmatmul.msk.f32.gmra.mxu2 %vm484_vm1, %v2896_v61  ;;  %3263 = vmatmul.f32.gmra.mxu0 %v2895_v58  ;;  %v2104_v61 = vld [vmem:[%s5198_s10 + $0x258] sm:$0xff]  ;;  %v2630_v27 = vadd.f32 %v2629_v30, %v2421_v11  ;;  %v2105_v30 = vld [vmem:[%s5198_s10 + $0x260] sm:$0xff] }
 0x32c   : > { %4103 = vmatmul.msk.f32.gmra.mxu3 %vm484_vm1, %v2100_v18 }
 0x32d   : > { %v3712_v38 = vmax.f32 %v4822_v37, %v3648_v41  ;;  %2470 = vmatmul.f32.gmra.mxu1 %v2099_v60  ;;  %v2902_v60 = vld [vmem:[%s5240_s11 + $0x238] sm:$0xff]  ;;  %v2785_v4 = vmax.f32 %v2630_v27, 0.0 }
 0x32e   : > { %v3425_v3 = vpop.f32.mrf.mxu2 }
 0x32f   : > { %3777 = vst.msk [vmem:[%s5474_s18 + $0x78] sm:$0xff] %vm3761_vm2, %v3712_v38  ;;  %v2632_v5 = vpop.f32.mrf.mxu3  ;;  %v3426_v47 = vadd.f32 %v3425_v3, %v3217_v48  ;;  %v2901_v48 = vld [vmem:[%s5240_s11 + $0x230] sm:$0xff]  ;;  %v2424_v38 = vadd.f32 %v5640_v40, %v2423_v33 }
 0x330   : > { %v3219_v62 = vpop.f32.mrf.mxu0 }
 0x331   : > { %v3585_v42 = vmax.f32 %v3426_v47, 0.0  ;;  %v3220_v35 = vadd.f32 %v5640_v40, %v3219_v62  ;;  %v2106_v47 = vld [vmem:[%s5198_s10 + $0x268] sm:$0xff] }
 0x332   : > { %v2426_v44 = vpop.f32.mrf.mxu1 }
 0x333   : > { %v3649_v37 = vmax.f32 %v2783_v29, %v3585_v42  ;;  %4166 = vmatmul.msk.f32.gmra.mxu2 %vm484_vm1, %v2898_v14  ;;  %3266 = vmatmul.f32.gmra.mxu0 %v2897_v13  ;;  %v2633_v13 = vadd.f32 %v2632_v5, %v2424_v38  ;;  %v2427_v22 = vadd.f32 %v5640_v40, %v2426_v44  ;;  %v2107_v5 = vld [vmem:[%s5198_s10 + $0x270] sm:$0xff]  ;;  %v2908_v38 = vld [vmem:[%s5240_s11 + $0x268] sm:$0xff] }
 0x334   : > { %4104 = vmatmul.msk.f32.gmra.mxu3 %vm484_vm1, %v2102_v46  ;;  %v2904_v46 = vld [vmem:[%s5240_s11 + $0x248] sm:$0xff] }
 0x335   : > { %v3713_v31 = vmax.f32 %v4835_v55, %v3649_v37  ;;  %2473 = vmatmul.f32.gmra.mxu1 %v2101_v26  ;;  %v2903_v37 = vld [vmem:[%s5240_s11 + $0x240] sm:$0xff] }
 0x336   : > { %v3428_v52 = vpop.f32.mrf.mxu2 }
 0x337   : > { %3778 = vst.msk [vmem:[%s5474_s18 + $0x80] sm:$0xff] %vm3761_vm2, %v3713_v31  ;;  %v2635_v36 = vpop.f32.mrf.mxu3  ;;  %v3429_v8 = vadd.f32 %v3428_v52, %v3220_v35  ;;  %v2786_v35 = vmax.f32 %v2633_v13, 0.0  ;;  %v2108_v52 = vld [vmem:[%s5198_s10 + $0x278] sm:$0xff] }
 0x338   : > { %v3222_v63 = vpop.f32.mrf.mxu0  ;;  %v2112_v13 = vld [vmem:[%s5198_s10 + $0x298] sm:$0xff] }
 0x339   : > { %v3586_v19 = vmax.f32 %v3429_v8, 0.0  ;;  %v3223_v58 = vadd.f32 %v5640_v40, %v3222_v63  ;;  %v2636_v63 = vadd.f32 %v2635_v36, %v2427_v22  ;;  %v2109_v36 = vld [vmem:[%s5198_s10 + $0x280] sm:$0xff] }
 0x33a   : > { %v2429_v20 = vpop.f32.mrf.mxu1 }
 0x33b   : > { %v3650_v55 = vmax.f32 %v2784_v34, %v3586_v19  ;;  %4167 = vmatmul.msk.f32.gmra.mxu2 %vm484_vm1, %v2900_v1  ;;  %3269 = vmatmul.f32.gmra.mxu0 %v2899_v59  ;;  %v2906_v19 = vld [vmem:[%s5240_s11 + $0x258] sm:$0xff] }
 0x33c   : > { %4105 = vmatmul.msk.f32.gmra.mxu3 %vm484_vm1, %v2104_v61 }
 0x33d   : > { %v3714_v53 = vmax.f32 %v4848_v9, %v3650_v55  ;;  %2476 = vmatmul.f32.gmra.mxu1 %v2103_v45  ;;  %v2905_v45 = vld [vmem:[%s5240_s11 + $0x250] sm:$0xff]  ;;  %v2787_v55 = vmax.f32 %v2636_v63, 0.0 }
 0x33e   : > { %v3431_v39 = vpop.f32.mrf.mxu2 }
 0x33f   : > { %3779 = vst.msk [vmem:[%s5474_s18 + $0x88] sm:$0xff] %vm3761_vm2, %v3714_v53  ;;  %v2638_v2 = vpop.f32.mrf.mxu3  ;;  %v3432_v18 = vadd.f32 %v3431_v39, %v3223_v58  ;;  %v2430_v58 = vadd.f32 %v5640_v40, %v2429_v20  ;;  %v2110_v53 = vld [vmem:[%s5198_s10 + $0x288] sm:$0xff] }
 0x340   : > { %v3225_v41 = vpop.f32.mrf.mxu0 }
 0x341   : > { %v3587_v3 = vmax.f32 %v3432_v18, 0.0  ;;  %v3226_v62 = vadd.f32 %v5640_v40, %v3225_v41 }
 0x342   : > { %v2432_v14 = vpop.f32.mrf.mxu1 }
 0x343   : > { %v3651_v9 = vmax.f32 %v2785_v4, %v3587_v3  ;;  %4168 = vmatmul.msk.f32.gmra.mxu2 %vm484_vm1, %v2902_v60  ;;  %3272 = vmatmul.f32.gmra.mxu0 %v2901_v48  ;;  %v2639_v60 = vadd.f32 %v2638_v2, %v2430_v58  ;;  %v2111_v2 = vld [vmem:[%s5198_s10 + $0x290] sm:$0xff]  ;;  %v2911_v58 = vld [vmem:[%s5240_s11 + $0x280] sm:$0xff] }
 0x344   : > { %4106 = vmatmul.msk.f32.gmra.mxu3 %vm484_vm1, %v2106_v47  ;;  %v2907_v47 = vld [vmem:[%s5240_s11 + $0x260] sm:$0xff] }
 0x345   : > { %v3715_v29 = vmax.f32 %v4861_v28, %v3651_v9  ;;  %2479 = vmatmul.f32.gmra.mxu1 %v2105_v30  ;;  %v2788_v30 = vmax.f32 %v2639_v60, 0.0  ;;  %v2433_v9 = vadd.f32 %v5640_v40, %v2432_v14 }
 0x346   : > { %v3434_v33 = vpop.f32.mrf.mxu2 }
 0x347   : > { %3780 = vst.msk [vmem:[%s5474_s18 + $0x90] sm:$0xff] %vm3761_vm2, %v3715_v29  ;;  %v2641_v21 = vpop.f32.mrf.mxu3  ;;  %v3435_v42 = vadd.f32 %v3434_v33, %v3226_v62 }
 0x348   : > { %v3228_v26 = vpop.f32.mrf.mxu0 }
 0x349   : > { %v3588_v31 = vmax.f32 %v3435_v42, 0.0  ;;  %v3229_v1 = vadd.f32 %v5640_v40, %v3228_v26  ;;  %v2642_v42 = vadd.f32 %v2641_v21, %v2433_v9  ;;  %v2113_v21 = vld [vmem:[%s5198_s10 + $0x2a0] sm:$0xff] }
 0x34a   : > { %v2435_v8 = vpop.f32.mrf.mxu1 }
 0x34b   : > { %v3652_v28 = vmax.f32 %v2786_v35, %v3588_v31  ;;  %4169 = vmatmul.msk.f32.gmra.mxu2 %vm484_vm1, %v2904_v46  ;;  %3275 = vmatmul.f32.gmra.mxu0 %v2903_v37  ;;  %v2910_v35 = vld [vmem:[%s5240_s11 + $0x278] sm:$0xff]  ;;  %v2909_v31 = vld [vmem:[%s5240_s11 + $0x270] sm:$0xff] }
 0x34c   : > { %4107 = vmatmul.msk.f32.gmra.mxu3 %vm484_vm1, %v2108_v52  ;;  %v2789_v52 = vmax.f32 %v2642_v42, 0.0 }
 0x34d   : > { %v3716_v59 = vmax.f32 %v4874_v50, %v3652_v28  ;;  %2482 = vmatmul.f32.gmra.mxu1 %v2107_v5  ;;  %v2436_v5 = vadd.f32 %v5640_v40, %v2435_v8 }
 0x34e   : > { %v3437_v44 = vpop.f32.mrf.mxu2 }
 0x34f   : > { %3781 = vst.msk [vmem:[%s5474_s18 + $0x98] sm:$0xff] %vm3761_vm2, %v3716_v59  ;;  %v2644_v34 = vpop.f32.mrf.mxu3  ;;  %v3438_v11 = vadd.f32 %v3437_v44, %v3229_v1  ;;  %v2114_v1 = vld [vmem:[%s5198_s10 + $0x2a8] sm:$0xff] }
 0x350   : > { %v3231_v61 = vpop.f32.mrf.mxu0  ;;  %v2645_v44 = vadd.f32 %v2644_v34, %v2436_v5  ;;  %v2115_v34 = vld [vmem:[%s5198_s10 + $0x2b0] sm:$0xff] }
 0x351   : > { %v3589_v27 = vmax.f32 %v3438_v11, 0.0  ;;  %v3232_v18 = vadd.f32 %v5640_v40, %v3231_v61 }
 0x352   : > { %v2438_v39 = vpop.f32.mrf.mxu1 }
 0x353   : > { %v3653_v50 = vmax.f32 %v2787_v55, %v3589_v27  ;;  %4170 = vmatmul.msk.f32.gmra.mxu2 %vm484_vm1, %v2906_v19  ;;  %3278 = vmatmul.f32.gmra.mxu0 %v2905_v45  ;;  %v2912_v45 = vld [vmem:[%s5240_s11 + $0x288] sm:$0xff]  ;;  %v2790_v27 = vmax.f32 %v2645_v44, 0.0 }
 0x354   : > { %4108 = vmatmul.msk.f32.gmra.mxu3 %vm484_vm1, %v2110_v53  ;;  %v2439_v53 = vadd.f32 %v5640_v40, %v2438_v39 }
 0x355   : > { %v3717_v41 = vmax.f32 %v4887_v6, %v3653_v50  ;;  %2485 = vmatmul.f32.gmra.mxu1 %v2109_v36  ;;  %v2116_v50 = vld [vmem:[%s5198_s10 + $0x2b8] sm:$0xff] }
 0x356   : > { %v3440_v20 = vpop.f32.mrf.mxu2 }
 0x357   : > { %3782 = vst.msk [vmem:[%s5474_s18 + $0xa0] sm:$0xff] %vm3761_vm2, %v3717_v41  ;;  %v2647_v48 = vpop.f32.mrf.mxu3  ;;  %v3441_v4 = vadd.f32 %v3440_v20, %v3232_v18 }
 0x358   : > { %v3234_v3 = vpop.f32.mrf.mxu0  ;;  %v2648_v41 = vadd.f32 %v2647_v48, %v2439_v53  ;;  %v2117_v48 = vld [vmem:[%s5198_s10 + $0x2c0] sm:$0xff] }
 0x359   : > { %v3590_v62 = vmax.f32 %v3441_v4, 0.0  ;;  %v3235_v33 = vadd.f32 %v5640_v40, %v3234_v3  ;;  %v2914_v3 = vld [vmem:[%s5240_s11 + $0x298] sm:$0xff] }
 0x35a   : > { %v2441_v29 = vpop.f32.mrf.mxu1  ;;  %v2791_v9 = vmax.f32 %v2648_v41, 0.0 }
 0x35b   : > { %v3654_v6 = vmax.f32 %v2788_v30, %v3590_v62  ;;  %4171 = vmatmul.msk.f32.gmra.mxu2 %vm484_vm1, %v2908_v38  ;;  %3281 = vmatmul.f32.gmra.mxu0 %v2907_v47  ;;  %v2913_v30 = vld [vmem:[%s5240_s11 + $0x290] sm:$0xff]  ;;  %v2442_v62 = vadd.f32 %v5640_v40, %v2441_v29 }
 0x35c   : > { %4109 = vmatmul.msk.f32.gmra.mxu3 %vm484_vm1, %v2112_v13 }
 0x35d   : > { %v3718_v46 = vmax.f32 %v4900_v25, %v3654_v6  ;;  %2488 = vmatmul.f32.gmra.mxu1 %v2111_v2  ;;  %v2118_v2 = vld [vmem:[%s5198_s10 + $0x2c8] sm:$0xff] }
 0x35e   : > { %v3443_v14 = vpop.f32.mrf.mxu2 }
 0x35f   : > { %3783 = vst.msk [vmem:[%s5474_s18 + $0xa8] sm:$0xff] %vm3761_vm2, %v3718_v46  ;;  %v2650_v26 = vpop.f32.mrf.mxu3  ;;  %v3444_v37 = vadd.f32 %v3443_v14, %v3235_v33 }
 0x360   : > { %v3237_v22 = vpop.f32.mrf.mxu0  ;;  %v2651_v42 = vadd.f32 %v2650_v26, %v2442_v62  ;;  %v2119_v26 = vld [vmem:[%s5198_s10 + $0x2d0] sm:$0xff]  ;;  %v2124_v62 = vld [vmem:[%s5198_s10 + $0x2f8] sm:$0xff] }
 0x361   : > { %v3591_v28 = vmax.f32 %v3444_v37, 0.0  ;;  %v3238_v59 = vadd.f32 %v5640_v40, %v3237_v22 }
 0x362   : > { %v2444_v63 = vpop.f32.mrf.mxu1 }
 0x363   : > { %v3655_v25 = vmax.f32 %v2789_v52, %v3591_v28  ;;  %4172 = vmatmul.msk.f32.gmra.mxu2 %vm484_vm1, %v2910_v35  ;;  %3284 = vmatmul.f32.gmra.mxu0 %v2909_v31  ;;  %v2916_v35 = vld [vmem:[%s5240_s11 + $0x2a8] sm:$0xff]  ;;  %v2915_v31 = vld [vmem:[%s5240_s11 + $0x2a0] sm:$0xff]  ;;  %v2792_v52 = vmax.f32 %v2651_v42, 0.0  ;;  %v2445_v5 = vadd.f32 %v5640_v40, %v2444_v63 }
 0x364   : > { %4110 = vmatmul.msk.f32.gmra.mxu3 %vm484_vm1, %v2114_v1  ;;  %v2120_v1 = vld [vmem:[%s5198_s10 + $0x2d8] sm:$0xff] }
 0x365   : > { %v3719_v11 = vmax.f32 %v4913_v49, %v3655_v25  ;;  %2491 = vmatmul.f32.gmra.mxu1 %v2113_v21 }
 0x366   : > { %v3446_v8 = vpop.f32.mrf.mxu2 }
 0x367   : > { %3784 = vst.msk [vmem:[%s5474_s18 + $0xb0] sm:$0xff] %vm3761_vm2, %v3719_v11  ;;  %v2653_v19 = vpop.f32.mrf.mxu3  ;;  %v3447_v61 = vadd.f32 %v3446_v8, %v3238_v59 }
 0x368   : > { %v3240_v55 = vpop.f32.mrf.mxu0  ;;  %v2654_v59 = vadd.f32 %v2653_v19, %v2445_v5  ;;  %v2121_v19 = vld [vmem:[%s5198_s10 + $0x2e0] sm:$0xff] }
 0x369   : > { %v3592_v36 = vmax.f32 %v3447_v61, 0.0  ;;  %v3241_v60 = vadd.f32 %v5640_v40, %v3240_v55  ;;  %v2918_v61 = vld [vmem:[%s5240_s11 + $0x2b8] sm:$0xff]  ;;  %v2917_v55 = vld [vmem:[%s5240_s11 + $0x2b0] sm:$0xff] }
 0x36a   : > { %v2447_v18 = vpop.f32.mrf.mxu1 }
 0x36b   : > { %v3656_v49 = vmax.f32 %v2790_v27, %v3592_v36  ;;  %4173 = vmatmul.msk.f32.gmra.mxu2 %vm484_vm1, %v2912_v45  ;;  %3287 = vmatmul.f32.gmra.mxu0 %v2911_v58  ;;  %v2793_v58 = vmax.f32 %v2654_v59, 0.0  ;;  %v2448_v27 = vadd.f32 %v5640_v40, %v2447_v18  ;;  %v2122_v36 = vld [vmem:[%s5198_s10 + $0x2e8] sm:$0xff] }
 0x36c   : > { %4111 = vmatmul.msk.f32.gmra.mxu3 %vm484_vm1, %v2116_v50  ;;  %v2924_v59 = vld [vmem:[%s5240_s11 + $0x2e8] sm:$0xff] }
 0x36d   : > { %v3720_v20 = vmax.f32 %v4926_v7, %v3656_v49  ;;  %2494 = vmatmul.f32.gmra.mxu1 %v2115_v34 }
 0x36e   : > { %v3449_v39 = vpop.f32.mrf.mxu2 }
 0x36f   : > { %3785 = vst.msk [vmem:[%s5474_s18 + $0xb8] sm:$0xff] %vm3761_vm2, %v3720_v20  ;;  %v2656_v4 = vpop.f32.mrf.mxu3  ;;  %v3450_v38 = vadd.f32 %v3449_v39, %v3241_v60  ;;  %v2920_v39 = vld [vmem:[%s5240_s11 + $0x2c8] sm:$0xff] }
 0x370   : > { %v3243_v47 = vpop.f32.mrf.mxu0  ;;  %v2657_v49 = vadd.f32 %v2656_v4, %v2448_v27  ;;  %v2123_v4 = vld [vmem:[%s5198_s10 + $0x2f0] sm:$0xff] }
 0x371   : > { %v3593_v13 = vmax.f32 %v3450_v38, 0.0  ;;  %v3244_v33 = vadd.f32 %v5640_v40, %v3243_v47 }
 0x372   : > { %v2450_v6 = vpop.f32.mrf.mxu1  ;;  %v2794_v47 = vmax.f32 %v2657_v49, 0.0 }
 0x373   : > { %v3657_v7 = vmax.f32 %v2791_v9, %v3593_v13  ;;  %4174 = vmatmul.msk.f32.gmra.mxu2 %vm484_vm1, %v2914_v3  ;;  %3290 = vmatmul.f32.gmra.mxu0 %v2913_v30  ;;  %v2919_v3 = vld [vmem:[%s5240_s11 + $0x2c0] sm:$0xff]  ;;  %v2451_v30 = vadd.f32 %v5640_v40, %v2450_v6 }
 0x374   : > { %4112 = vmatmul.msk.f32.gmra.mxu3 %vm484_vm1, %v2118_v2 }
 0x375   : > { %v3721_v46 = vmax.f32 %v4939_v32, %v3657_v7  ;;  %2497 = vmatmul.f32.gmra.mxu1 %v2117_v48 }
 0x376   : > { %v3452_v29 = vpop.f32.mrf.mxu2 }
 0x377   : > { %3786 = vst.msk [vmem:[%s5474_s18 + $0xc0] sm:$0xff] %vm3761_vm2, %v3721_v46  ;;  %v2659_v14 = vpop.f32.mrf.mxu3  ;;  %v3453_v37 = vadd.f32 %v3452_v29, %v3244_v33  ;;  %v2922_v46 = vld [vmem:[%s5240_s11 + $0x2d8] sm:$0xff] }
 0x378   : > { %v3246_v22 = vpop.f32.mrf.mxu0  ;;  %v2660_v48 = vadd.f32 %v2659_v14, %v2451_v30  ;;  %v2125_v14 = vld [vmem:[%s5198_s10 + $0x300] sm:$0xff] }
 0x379   : > { %v3594_v28 = vmax.f32 %v3453_v37, 0.0  ;;  %v3247_v25 = vadd.f32 %v5640_v40, %v3246_v22  ;;  %v2921_v37 = vld [vmem:[%s5240_s11 + $0x2d0] sm:$0xff] }
 0x37a   : > { %v2453_v21 = vpop.f32.mrf.mxu1 }
 0x37b   : > { %v3658_v32 = vmax.f32 %v2792_v52, %v3594_v28  ;;  %4175 = vmatmul.msk.f32.gmra.mxu2 %vm484_vm1, %v2916_v35  ;;  %3293 = vmatmul.f32.gmra.mxu0 %v2915_v31  ;;  %v2795_v35 = vmax.f32 %v2660_v48, 0.0  ;;  %v2454_v22 = vadd.f32 %v5640_v40, %v2453_v21  ;;  %v2126_v52 = vld [vmem:[%s5198_s10 + $0x308] sm:$0xff]  ;;  %v2927_v48 = vld [vmem:[%s5240_s11 + $0x300] sm:$0xff] }
 0x37c   : > { %4113 = vmatmul.msk.f32.gmra.mxu3 %vm484_vm1, %v2120_v1 }
 0x37d   : > { %v3722_v44 = vmax.f32 %v4952_v54, %v3658_v32  ;;  %2500 = vmatmul.f32.gmra.mxu1 %v2119_v26 }
 0x37e   : > { %v3455_v63 = vpop.f32.mrf.mxu2 }
 0x37f   : > { %3787 = vst.msk [vmem:[%s5474_s18 + $0xc8] sm:$0xff] %vm3761_vm2, %v3722_v44  ;;  %v2662_v11 = vpop.f32.mrf.mxu3  ;;  %v3456_v8 = vadd.f32 %v3455_v63, %v3247_v25  ;;  %v2923_v63 = vld [vmem:[%s5240_s11 + $0x2e0] sm:$0xff] }
 0x380   : > { %v3249_v45 = vpop.f32.mrf.mxu0  ;;  %v2663_v1 = vadd.f32 %v2662_v11, %v2454_v22  ;;  %v2127_v11 = vld [vmem:[%s5198_s10 + $0x310] sm:$0xff] }
 0x381   : > { %v3595_v53 = vmax.f32 %v3456_v8, 0.0  ;;  %v3250_v34 = vadd.f32 %v5640_v40, %v3249_v45 }
 0x382   : > { %v2456_v50 = vpop.f32.mrf.mxu1  ;;  %v2796_v8 = vmax.f32 %v2663_v1, 0.0 }
 0x383   : > { %v3659_v54 = vmax.f32 %v2793_v58, %v3595_v53  ;;  %4176 = vmatmul.msk.f32.gmra.mxu2 %vm484_vm1, %v2918_v61  ;;  %3296 = vmatmul.f32.gmra.mxu0 %v2917_v55  ;;  %v2457_v61 = vadd.f32 %v5640_v40, %v2456_v50  ;;  %v2128_v55 = vld [vmem:[%s5198_s10 + $0x318] sm:$0xff] }
 0x384   : > { %4114 = vmatmul.msk.f32.gmra.mxu3 %vm484_vm1, %v2122_v36 }
 0x385   : > { %v3723_v60 = vmax.f32 %v4970_v23, %v3659_v54  ;;  %2503 = vmatmul.f32.gmra.mxu1 %v2121_v19 }
 0x386   : > { %v3458_v18 = vpop.f32.mrf.mxu2 }
 0x387   : > { %3788 = vst.msk [vmem:[%s5474_s18 + $0xd0] sm:$0xff] %vm3761_vm2, %v3723_v60  ;;  %v2665_v41 = vpop.f32.mrf.mxu3  ;;  %v3459_v20 = vadd.f32 %v3458_v18, %v3250_v34  ;;  %v2926_v34 = vld [vmem:[%s5240_s11 + $0x2f8] sm:$0xff]  ;;  %v2925_v60 = vld [vmem:[%s5240_s11 + $0x2f0] sm:$0xff] }
 0x388   : > { %v3252_v38 = vpop.f32.mrf.mxu0  ;;  %v2666_v53 = vadd.f32 %v2665_v41, %v2457_v61  ;;  %v2129_v41 = vld [vmem:[%s5198_s10 + $0x320] sm:$0xff] }
 0x389   : > { %v3596_v9 = vmax.f32 %v3459_v20, 0.0  ;;  %v3253_v2 = vadd.f32 %v5640_v40, %v3252_v38  ;;  %v2130_v38 = vld [vmem:[%s5198_s10 + $0x328] sm:$0xff] }
 0x38a   : > { %v2459_v13 = vpop.f32.mrf.mxu1  ;;  %v2797_v18 = vmax.f32 %v2666_v53, 0.0 }
 0x38b   : > { %v3660_v23 = vmax.f32 %v2794_v47, %v3596_v9  ;;  %4177 = vmatmul.msk.f32.gmra.mxu2 %vm484_vm1, %v2920_v39  ;;  %3299 = vmatmul.f32.gmra.mxu0 %v2919_v3  ;;  %v2460_v20 = vadd.f32 %v5640_v40, %v2459_v13 }
 0x38c   : > { %4115 = vmatmul.msk.f32.gmra.mxu3 %vm484_vm1, %v2124_v62 }
 0x38d   : > { %v3724_v7 = vmax.f32 %v4983_v10, %v3660_v23  ;;  %2506 = vmatmul.f32.gmra.mxu1 %v2123_v4  ;;  %v2928_v23 = vld [vmem:[%s5240_s11 + $0x308] sm:$0xff] }
 0x38e   : > { %v3461_v6 = vpop.f32.mrf.mxu2 }
 0x38f   : > { %3789 = vst.msk [vmem:[%s5474_s18 + $0xd8] sm:$0xff] %vm3761_vm2, %v3724_v7  ;;  %v2668_v33 = vpop.f32.mrf.mxu3  ;;  %v3462_v42 = vadd.f32 %v3461_v6, %v3253_v2 }
 0x390   : > { %v3255_v29 = vpop.f32.mrf.mxu0  ;;  %v2669_v30 = vadd.f32 %v2668_v33, %v2460_v20  ;;  %v2131_v33 = vld [vmem:[%s5198_s10 + $0x330] sm:$0xff] }
 0x391   : > { %v3597_v31 = vmax.f32 %v3462_v42, 0.0  ;;  %v3256_v28 = vadd.f32 %v5640_v40, %v3255_v29 }
 0x392   : > { %v2462_v5 = vpop.f32.mrf.mxu1  ;;  %v2798_v7 = vmax.f32 %v2669_v30, 0.0 }
 0x393   : > { %v3661_v10 = vmax.f32 %v2795_v35, %v3597_v31  ;;  %4178 = vmatmul.msk.f32.gmra.mxu2 %vm484_vm1, %v2922_v46  ;;  %3302 = vmatmul.f32.gmra.mxu0 %v2921_v37  ;;  %v2463_v6 = vadd.f32 %v5640_v40, %v2462_v5  ;;  %v2132_v46 = vld [vmem:[%s5198_s10 + $0x338] sm:$0xff] }
 0x394   : > { %4116 = vmatmul.msk.f32.gmra.mxu3 %vm484_vm1, %v2126_v52 }
 0x395   : > { %v3725_v26 = vmax.f32 %v4996_v57, %v3661_v10  ;;  %2509 = vmatmul.f32.gmra.mxu1 %v2125_v14  ;;  %v2930_v14 = vld [vmem:[%s5240_s11 + $0x318] sm:$0xff] }
 0x396   : > { %v3464_v21 = vpop.f32.mrf.mxu2 }
 0x397   : > { %3790 = vst.msk [vmem:[%s5474_s18 + $0xe0] sm:$0xff] %vm3761_vm2, %v3725_v26  ;;  %v2671_v32 = vpop.f32.mrf.mxu3  ;;  %v3465_v25 = vadd.f32 %v3464_v21, %v3256_v28  ;;  %v2929_v28 = vld [vmem:[%s5240_s11 + $0x310] sm:$0xff] }
 0x398   : > { %v3258_v44 = vpop.f32.mrf.mxu0  ;;  %v2672_v35 = vadd.f32 %v2671_v32, %v2463_v6  ;;  %v2133_v32 = vld [vmem:[%s5198_s10 + $0x340] sm:$0xff] }
 0x399   : > { %v3598_v45 = vmax.f32 %v3465_v25, 0.0  ;;  %v3259_v27 = vadd.f32 %v5640_v40, %v3258_v44  ;;  %v2134_v25 = vld [vmem:[%s5198_s10 + $0x348] sm:$0xff] }
 0x39a   : > { %v2465_v58 = vpop.f32.mrf.mxu1  ;;  %v2799_v1 = vmax.f32 %v2672_v35, 0.0  ;;  %v2140_v35 = vld [vmem:[%s5198_s10 + $0x378] sm:$0xff] }
 0x39b   : > { %v3662_v57 = vmax.f32 %v2796_v8, %v3598_v45  ;;  %4179 = vmatmul.msk.f32.gmra.mxu2 %vm484_vm1, %v2924_v59  ;;  %3305 = vmatmul.f32.gmra.mxu0 %v2923_v63  ;;  %v2466_v26 = vadd.f32 %v5640_v40, %v2465_v58  ;;  %v2932_v58 = vld [vmem:[%s5240_s11 + $0x328] sm:$0xff] }
 0x39c   : > { %4117 = vmatmul.msk.f32.gmra.mxu3 %vm484_vm1, %v2128_v55 }
 0x39d   : > { %v3726_v36 = vmax.f32 %v5009_v24, %v3662_v57  ;;  %2512 = vmatmul.f32.gmra.mxu1 %v2127_v11  ;;  %v2931_v57 = vld [vmem:[%s5240_s11 + $0x320] sm:$0xff] }
 0x39e   : > { %v3467_v50 = vpop.f32.mrf.mxu2 }
 0x39f   : > { %3791 = vst.msk [vmem:[%s5474_s18 + $0xe8] sm:$0xff] %vm3761_vm2, %v3726_v36  ;;  %v2674_v19 = vpop.f32.mrf.mxu3  ;;  %v3468_v54 = vadd.f32 %v3467_v50, %v3259_v27  ;;  %v2136_v50 = vld [vmem:[%s5198_s10 + $0x358] sm:$0xff] }
 0x3a0   : > { %v3261_v49 = vpop.f32.mrf.mxu0  ;;  %v2675_v63 = vadd.f32 %v2674_v19, %v2466_v26  ;;  %v2135_v19 = vld [vmem:[%s5198_s10 + $0x350] sm:$0xff]  ;;  %v2938_v26 = vld [vmem:[%s5240_s11 + $0x358] sm:$0xff] }
 0x3a1   : > { %v3599_v39 = vmax.f32 %v3468_v54, 0.0  ;;  %v3262_v47 = vadd.f32 %v5640_v40, %v3261_v49 }
 0x3a2   : > { %v2468_v3 = vpop.f32.mrf.mxu1  ;;  %v2800_v27 = vmax.f32 %v2675_v63, 0.0 }
 0x3a3   : > { %v3663_v24 = vmax.f32 %v2797_v18, %v3599_v39  ;;  %4180 = vmatmul.msk.f32.gmra.mxu2 %vm484_vm1, %v2926_v34  ;;  %3308 = vmatmul.f32.gmra.mxu0 %v2925_v60  ;;  %v2469_v53 = vadd.f32 %v5640_v40, %v2468_v3 }
 0x3a4   : > { %4118 = vmatmul.msk.f32.gmra.mxu3 %vm484_vm1, %v2130_v38  ;;  %v2934_v38 = vld [vmem:[%s5240_s11 + $0x338] sm:$0xff] }
 0x3a5   : > { %v3727_v9 = vmax.f32 %v5022_v56, %v3663_v24  ;;  %2515 = vmatmul.f32.gmra.mxu1 %v2129_v41  ;;  %v2933_v41 = vld [vmem:[%s5240_s11 + $0x330] sm:$0xff] }
 0x3a6   : > { %v3470_v62 = vpop.f32.mrf.mxu2 }
 0x3a7   : > { %3792 = vst.msk [vmem:[%s5474_s18 + $0xf0] sm:$0xff] %vm3761_vm2, %v3727_v9  ;;  %v2677_v13 = vpop.f32.mrf.mxu3  ;;  %v3471_v4 = vadd.f32 %v3470_v62, %v3262_v47  ;;  %v2138_v9 = vld [vmem:[%s5198_s10 + $0x368] sm:$0xff] }
 0x3a8   : > { %v3264_v2 = vpop.f32.mrf.mxu0  ;;  %v2678_v49 = vadd.f32 %v2677_v13, %v2469_v53  ;;  %v2137_v13 = vld [vmem:[%s5198_s10 + $0x360] sm:$0xff] }
 0x3a9   : > { %v3600_v42 = vmax.f32 %v3471_v4, 0.0  ;;  %v3265_v37 = vadd.f32 %v5640_v40, %v3264_v2 }
 0x3aa   : > { %v2471_v29 = vpop.f32.mrf.mxu1  ;;  %v2801_v24 = vmax.f32 %v2678_v49, 0.0  ;;  %v2143_v49 = vld [vmem:[%s5198_s10 + $0x390] sm:$0xff] }
 0x3ab   : > { %v3664_v56 = vmax.f32 %v2798_v7, %v3600_v42  ;;  %4181 = vmatmul.msk.f32.gmra.mxu2 %vm484_vm1, %v2928_v23  ;;  %3311 = vmatmul.f32.gmra.mxu0 %v2927_v48  ;;  %v2472_v47 = vadd.f32 %v5640_v40, %v2471_v29  ;;  %v2936_v42 = vld [vmem:[%s5240_s11 + $0x348] sm:$0xff]  ;;  %v2935_v29 = vld [vmem:[%s5240_s11 + $0x340] sm:$0xff] }
 0x3ac   : > { %4119 = vmatmul.msk.f32.gmra.mxu3 %vm484_vm1, %v2132_v46 }
 0x3ad   : > { %v3728_v22 = vmax.f32 %v5035_v16, %v3664_v56  ;;  %2518 = vmatmul.f32.gmra.mxu1 %v2131_v33 }
 0x3ae   : > { %v3473_v31 = vpop.f32.mrf.mxu2 }
 0x3af   : > { %3793 = vst.msk [vmem:[%s5474_s18 + $0xf8] sm:$0xff] %vm3761_vm2, %v3728_v22  ;;  %v2680_v52 = vpop.f32.mrf.mxu3  ;;  %v3474_v5 = vadd.f32 %v3473_v31, %v3265_v37  ;;  %v2139_v31 = vld [vmem:[%s5198_s10 + $0x370] sm:$0xff] }
 0x3b0   : > { %v3267_v10 = vpop.f32.mrf.mxu0  ;;  %v2681_v23 = vadd.f32 %v2680_v52, %v2472_v47 }
 0x3b1   : > { %v3601_v21 = vmax.f32 %v3474_v5, 0.0  ;;  %v3268_v44 = vadd.f32 %v5640_v40, %v3267_v10 }
 0x3b2   : > { %v2474_v59 = vpop.f32.mrf.mxu1  ;;  %v2802_v33 = vmax.f32 %v2681_v23, 0.0  ;;  %v2145_v23 = vld [vmem:[%s5198_s10 + $0x3a0] sm:$0xff] }
 0x3b3   : > { %v3665_v16 = vmax.f32 %v2799_v1, %v3601_v21  ;;  %4182 = vmatmul.msk.f32.gmra.mxu2 %vm484_vm1, %v2930_v14  ;;  %3314 = vmatmul.f32.gmra.mxu0 %v2929_v28  ;;  %v2475_v56 = vadd.f32 %v5640_v40, %v2474_v59 }
 0x3b4   : > { %4120 = vmatmul.msk.f32.gmra.mxu3 %vm484_vm1, %v2134_v25  ;;  %v2937_v25 = vld [vmem:[%s5240_s11 + $0x350] sm:$0xff] }
 0x3b5   : > { %v3729_v8 = vmax.f32 %v5048_v17, %v3665_v16  ;;  %2521 = vmatmul.f32.gmra.mxu1 %v2133_v32 }
 0x3b6   : > { %v3476_v61 = vpop.f32.mrf.mxu2 }
 0x3b7   : > { %3794 = vst.msk [vmem:[%s5474_s18 + $0x100] sm:$0xff] %vm3761_vm2, %v3729_v8  ;;  %v2683_v45 = vpop.f32.mrf.mxu3  ;;  %v3477_v55 = vadd.f32 %v3476_v61, %v3268_v44  ;;  %v2142_v44 = vld [vmem:[%s5198_s10 + $0x388] sm:$0xff]  ;;  %v2141_v8 = vld [vmem:[%s5198_s10 + $0x380] sm:$0xff] }
 0x3b8   : > { %v3270_v11 = vpop.f32.mrf.mxu0  ;;  %v2684_v5 = vadd.f32 %v2683_v45, %v2475_v56  ;;  %v2944_v56 = vld [vmem:[%s5240_s11 + $0x388] sm:$0xff] }
 0x3b9   : > { %v3602_v36 = vmax.f32 %v3477_v55, 0.0  ;;  %v3271_v34 = vadd.f32 %v5640_v40, %v3270_v11 }
 0x3ba   : > { %v2477_v54 = vpop.f32.mrf.mxu1  ;;  %v2803_v59 = vmax.f32 %v2684_v5, 0.0 }
 0x3bb   : > { %v3666_v17 = vmax.f32 %v2800_v27, %v3602_v36  ;;  %4183 = vmatmul.msk.f32.gmra.mxu2 %vm484_vm1, %v2932_v58  ;;  %3317 = vmatmul.f32.gmra.mxu0 %v2931_v57  ;;  %v2478_v32 = vadd.f32 %v5640_v40, %v2477_v54  ;;  %v2940_v27 = vld [vmem:[%s5240_s11 + $0x368] sm:$0xff]  ;;  %v2939_v36 = vld [vmem:[%s5240_s11 + $0x360] sm:$0xff] }
 0x3bc   : > { %4121 = vmatmul.msk.f32.gmra.mxu3 %vm484_vm1, %v2136_v50 }
 0x3bd   : > { %v3730_v60 = vmax.f32 %v5061_v12, %v3666_v17  ;;  %2524 = vmatmul.f32.gmra.mxu1 %v2135_v19  ;;  %v2144_v17 = vld [vmem:[%s5198_s10 + $0x398] sm:$0xff] }
 0x3be   : > { %v3479_v18 = vpop.f32.mrf.mxu2 }
 0x3bf   : > { %3795 = vst.msk [vmem:[%s5474_s18 + $0x108] sm:$0xff] %vm3761_vm2, %v3730_v60  ;;  %v2686_v20 = vpop.f32.mrf.mxu3  ;;  %v3480_v39 = vadd.f32 %v3479_v18, %v3271_v34 }
 0x3c0   : > { %v3273_v3 = vpop.f32.mrf.mxu0  ;;  %v2687_v45 = vadd.f32 %v2686_v20, %v2478_v32  ;;  %v6107_v20 = vld [vmem:[#allocation2_spill] sm:$0xff] }
 0x3c1   : > { %v3603_v30 = vmax.f32 %v3480_v39, 0.0  ;;  %v3274_v4 = vadd.f32 %v5640_v40, %v3273_v3 }
 0x3c2   : > { %v2480_v62 = vpop.f32.mrf.mxu1  ;;  %v2804_v50 = vmax.f32 %v2687_v45, 0.0  ;;  %v2150_v45 = vld [vmem:[%s5198_s10 + $0x3c8] sm:$0xff] }
 0x3c3   : > { %v3667_v12 = vmax.f32 %v2801_v24, %v3603_v30  ;;  %4184 = vmatmul.msk.f32.gmra.mxu2 %vm484_vm1, %v2934_v38  ;;  %3320 = vmatmul.f32.gmra.mxu0 %v2933_v41  ;;  %v2481_v54 = vadd.f32 %v5640_v40, %v2480_v62  ;;  %v2942_v24 = vld [vmem:[%s5240_s11 + $0x378] sm:$0xff]  ;;  %v2941_v30 = vld [vmem:[%s5240_s11 + $0x370] sm:$0xff] }
 0x3c4   : > { %4122 = vmatmul.msk.f32.gmra.mxu3 %vm484_vm1, %v2138_v9 }
 0x3c5   : > { %v3731_v2 = vmax.f32 %v5074_v43, %v3667_v12  ;;  %2527 = vmatmul.f32.gmra.mxu1 %v2137_v13  ;;  %v2146_v12 = vld [vmem:[%s5198_s10 + $0x3a8] sm:$0xff] }
 0x3c6   : > { %v3482_v48 = vpop.f32.mrf.mxu2 }
 0x3c7   : > { %3796 = vst.msk [vmem:[%s5474_s18 + $0x110] sm:$0xff] %vm3761_vm2, %v3731_v2  ;;  %v2689_v7 = vpop.f32.mrf.mxu3  ;;  %v3483_v6 = vadd.f32 %v3482_v48, %v3274_v4 }
 0x3c8   : > { %v3276_v46 = vpop.f32.mrf.mxu0  ;;  %v2690_v18 = vadd.f32 %v2689_v7, %v2481_v54 }
 0x3c9   : > { %v3604_v37 = vmax.f32 %v3483_v6, 0.0  ;;  %v3277_v52 = vadd.f32 %v5640_v40, %v3276_v46  ;;  %v6108_v6 = vld [vmem:[#allocation3_spill] sm:$0xff] }
 0x3ca   : > { %v2483_v22 = vpop.f32.mrf.mxu1  ;;  %v2805_v9 = vmax.f32 %v2690_v18, 0.0 }
 0x3cb   : > { %v3668_v43 = vmax.f32 %v2802_v33, %v3604_v37  ;;  %4185 = vmatmul.msk.f32.gmra.mxu2 %vm484_vm1, %v2936_v42  ;;  %3323 = vmatmul.f32.gmra.mxu0 %v2935_v29  ;;  %v2484_v62 = vadd.f32 %v5640_v40, %v2483_v22 }
 0x3cc   : > { %4123 = vmatmul.msk.f32.gmra.mxu3 %vm484_vm1, %v2140_v35  ;;  %v2943_v35 = vld [vmem:[%s5240_s11 + $0x380] sm:$0xff] }
 0x3cd   : > { %v3732_v14 = vmax.f32 %v5087_v15, %v3668_v43  ;;  %2530 = vmatmul.f32.gmra.mxu1 %v2139_v31 }
 0x3ce   : > { %v3485_v10 = vpop.f32.mrf.mxu2 }
 0x3cf   : > { %3797 = vst.msk [vmem:[%s5474_s18 + $0x118] sm:$0xff] %vm3761_vm2, %v3732_v14  ;;  %v2692_v28 = vpop.f32.mrf.mxu3  ;;  %v3486_v1 = vadd.f32 %v3485_v10, %v3277_v52  ;;  %v2148_v52 = vld [vmem:[%s5198_s10 + $0x3b8] sm:$0xff]  ;;  %v2147_v14 = vld [vmem:[%s5198_s10 + $0x3b0] sm:$0xff] }
 0x3d0   : > { %v3279_v21 = vpop.f32.mrf.mxu0  ;;  %v2693_v7 = vadd.f32 %v2692_v28, %v2484_v62 }
 0x3d1   : > { %v3605_v16 = vmax.f32 %v3486_v1, 0.0  ;;  %v3280_v61 = vadd.f32 %v5640_v40, %v3279_v21 }
 0x3d2   : > { %v2486_v63 = vpop.f32.mrf.mxu1  ;;  %v2806_v22 = vmax.f32 %v2693_v7, 0.0 }
 0x3d3   : > { %v3669_v15 = vmax.f32 %v2803_v59, %v3605_v16  ;;  %4186 = vmatmul.msk.f32.gmra.mxu2 %vm484_vm1, %v2938_v26  ;;  %3326 = vmatmul.f32.gmra.mxu0 %v2937_v25  ;;  %v2487_v31 = vadd.f32 %v5640_v40, %v2486_v63  ;;  %v6109_v26 = vld [vmem:[#allocation4_spill] sm:$0xff]  ;;  %v2946_v16 = vld [vmem:[%s5240_s11 + $0x398] sm:$0xff] }
 0x3d4   : > { %4124 = vmatmul.msk.f32.gmra.mxu3 %vm484_vm1, %v2142_v44  ;;  %v2945_v63 = vld [vmem:[%s5240_s11 + $0x390] sm:$0xff] }
 0x3d5   : > { %v3733_v55 = vmax.f32 %v5100_v51, %v3669_v15  ;;  %2533 = vmatmul.f32.gmra.mxu1 %v2141_v8 }
 0x3d6   : > { %v3488_v58 = vpop.f32.mrf.mxu2 }
 0x3d7   : > { %3798 = vst.msk [vmem:[%s5474_s18 + $0x120] sm:$0xff] %vm3761_vm2, %v3733_v55  ;;  %v2695_v11 = vpop.f32.mrf.mxu3  ;;  %v3489_v57 = vadd.f32 %v3488_v58, %v3280_v61  ;;  %v2149_v58 = vld [vmem:[%s5198_s10 + $0x3c0] sm:$0xff] }
 0x3d8   : > { %v3282_v53 = vpop.f32.mrf.mxu0  ;;  %v2696_v1 = vadd.f32 %v2695_v11, %v2487_v31 }
 0x3d9   : > { %v3606_v19 = vmax.f32 %v3489_v57, 0.0  ;;  %v3283_v60 = vadd.f32 %v5640_v40, %v3282_v53  ;;  %v6110_v53 = vld [vmem:[#allocation5_spill] sm:$0xff] }
 0x3da   : > { %v2489_v34 = vpop.f32.mrf.mxu1  ;;  %v2807_v8 = vmax.f32 %v2696_v1, 0.0 }
 0x3db   : > { %v3670_v51 = vmax.f32 %v2804_v50, %v3606_v19  ;;  %4187 = vmatmul.msk.f32.gmra.mxu2 %vm484_vm1, %v2940_v27  ;;  %3329 = vmatmul.f32.gmra.mxu0 %v2939_v36 }
 0x3dc   : > { %4125 = vmatmul.msk.f32.gmra.mxu3 %vm484_vm1, %v2144_v17  ;;  %v2948_v17 = vld [vmem:[%s5240_s11 + $0x3a8] sm:$0xff] }
 0x3dd   : > { %v3734_v39 = vmax.f32 %v6107_v20, %v3670_v51  ;;  %2536 = vmatmul.f32.gmra.mxu1 %v2143_v49  ;;  %v2947_v49 = vld [vmem:[%s5240_s11 + $0x3a0] sm:$0xff]  ;;  %v2152_v20 = vld [vmem:[%s5198_s10 + $0x3d8] sm:$0xff] }
 0x3de   : > { %v3491_v38 = vpop.f32.mrf.mxu2 }
 0x3df   : > { %3799 = vst.msk [vmem:[%s5474_s18 + $0x128] sm:$0xff] %vm3761_vm2, %v3734_v39  ;;  %v2698_v3 = vpop.f32.mrf.mxu3  ;;  %v3492_v41 = vadd.f32 %v3491_v38, %v3283_v60  ;;  %v2151_v38 = vld [vmem:[%s5198_s10 + $0x3d0] sm:$0xff] }
 0x3e0   : > { %v3285_v47 = vpop.f32.mrf.mxu0 }
 0x3e1   : > { %v3607_v13 = vmax.f32 %v3492_v41, 0.0  ;;  %v3286_v48 = vadd.f32 %v5640_v40, %v3285_v47  ;;  %v6111_v47 = vld [vmem:[#allocation6_spill] sm:$0xff] }
 0x3e2   : > { %v2492_v4 = vpop.f32.mrf.mxu1 }
 0x3e3   : > { %v3671_v2 = vmax.f32 %v2805_v9, %v3607_v13  ;;  %4188 = vmatmul.msk.f32.gmra.mxu2 %vm484_vm1, %v2942_v24  ;;  %3332 = vmatmul.f32.gmra.mxu0 %v2941_v30 }
 0x3e4   : > { %4126 = vmatmul.msk.f32.gmra.mxu3 %vm484_vm1, %v2146_v12  ;;  %v2950_v12 = vld [vmem:[%s5240_s11 + $0x3b8] sm:$0xff] }
 0x3e5   : > { %v3735_v42 = vmax.f32 %v6108_v6, %v3671_v2  ;;  %2539 = vmatmul.f32.gmra.mxu1 %v2145_v23  ;;  %v2949_v23 = vld [vmem:[%s5240_s11 + $0x3b0] sm:$0xff]  ;;  %v2154_v6 = vld [vmem:[%s5198_s10 + $0x3e8] sm:$0xff] }
 0x3e6   : > { %v3494_v46 = vpop.f32.mrf.mxu2 }
 0x3e7   : > { %3800 = vst.msk [vmem:[%s5474_s18 + $0x130] sm:$0xff] %vm3761_vm2, %v3735_v42  ;;  %v2701_v29 = vpop.f32.mrf.mxu3  ;;  %v3495_v33 = vadd.f32 %v3494_v46, %v3286_v48  ;;  %v2153_v46 = vld [vmem:[%s5198_s10 + $0x3e0] sm:$0xff] }
 0x3e8   : > { %v3288_v37 = vpop.f32.mrf.mxu0 }
 0x3e9   : > { %v3608_v43 = vmax.f32 %v3495_v33, 0.0  ;;  %v3289_v28 = vadd.f32 %v5640_v40, %v3288_v37  ;;  %v5920_v40 = vld [vmem:[%s6079_s5] ss:$0 sm:$0xff]  ;;  %v6112_v37 = vld [vmem:[#allocation7_spill] sm:$0xff] }
 0x3ea   : > { %v2495_v5 = vpop.f32.mrf.mxu1  ;;  %v2490_v15 = vadd.f32 %v5920_v40, %v2489_v34  ;;  %v2493_v60 = vadd.f32 %v5920_v40, %v2492_v4 }
 0x3eb   : > { %v3672_v10 = vmax.f32 %v2806_v22, %v3608_v43  ;;  %4189 = vmatmul.msk.f32.gmra.mxu2 %vm484_vm1, %v2944_v56  ;;  %3335 = vmatmul.f32.gmra.mxu0 %v2943_v35  ;;  %v2496_v48 = vadd.f32 %v5920_v40, %v2495_v5 }
 0x3ec   : > { %4127 = vmatmul.msk.f32.gmra.mxu3 %vm484_vm1, %v2148_v52  ;;  %v2699_v27 = vadd.f32 %v2698_v3, %v2490_v15  ;;  %v2702_v24 = vadd.f32 %v2701_v29, %v2493_v60  ;;  %v2952_v52 = vld [vmem:[%s5240_s11 + $0x3c8] sm:$0xff] }
 0x3ed   : > { %v3736_v21 = vmax.f32 %v6109_v26, %v3672_v10  ;;  %2542 = vmatmul.f32.gmra.mxu1 %v2147_v14  ;;  %v2951_v14 = vld [vmem:[%s5240_s11 + $0x3c0] sm:$0xff]  ;;  %v2156_v26 = vld [vmem:[%s5198_s10 + $0x3f8] sm:$0xff] }
 0x3ee   : > { %v3497_v25 = vpop.f32.mrf.mxu2  ;;  %v2808_v51 = vmax.f32 %v2699_v27, 0.0  ;;  %v2809_v2 = vmax.f32 %v2702_v24, 0.0 }
 0x3ef   : > { %3801 = vst.msk [vmem:[%s5474_s18 + $0x138] sm:$0xff] %vm3761_vm2, %v3736_v21  ;;  %v2704_v59 = vpop.f32.mrf.mxu3  ;;  %v3498_v32 = vadd.f32 %v3497_v25, %v3289_v28  ;;  %v2155_v25 = vld [vmem:[%s5198_s10 + $0x3f0] sm:$0xff] }
 0x3f0   : > { %v3291_v44 = vpop.f32.mrf.mxu0  ;;  %v2705_v56 = vadd.f32 %v2704_v59, %v2496_v48 }
 0x3f1   : > { %v3609_v61 = vmax.f32 %v3498_v32, 0.0  ;;  %v3292_v57 = vadd.f32 %v5920_v40, %v3291_v44  ;;  %v6113_v44 = vld [vmem:[#allocation8_spill] sm:$0xff] }
 0x3f2   : > { %v2498_v55 = vpop.f32.mrf.mxu1  ;;  %v2810_v10 = vmax.f32 %v2705_v56, 0.0 }
 0x3f3   : > { %v3673_v11 = vmax.f32 %v2807_v8, %v3609_v61  ;;  %4190 = vmatmul.msk.f32.gmra.mxu2 %vm484_vm1, %v2946_v16  ;;  %3338 = vmatmul.f32.gmra.mxu0 %v2945_v63  ;;  %v2499_v28 = vadd.f32 %v5920_v40, %v2498_v55 }
 0x3f4   : > { %4128 = vmatmul.msk.f32.gmra.mxu3 %vm484_vm1, %v2150_v45  ;;  %v2954_v45 = vld [vmem:[%s5240_s11 + $0x3d8] sm:$0xff] }
 0x3f5   : > { %v3737_v36 = vmax.f32 %v6110_v53, %v3673_v11  ;;  %2545 = vmatmul.f32.gmra.mxu1 %v2149_v58  ;;  %v2953_v58 = vld [vmem:[%s5240_s11 + $0x3d0] sm:$0xff]  ;;  %v2958_v53 = vld [vmem:[%s5240_s11 + $0x3f8] sm:$0xff] }
 0x3f6   : > { %v3500_v50 = vpop.f32.mrf.mxu2 }
 0x3f7   : > { %3802 = vst.msk [vmem:[%s5474_s18 + $0x140] sm:$0xff] %vm3761_vm2, %v3737_v36  ;;  %v2707_v54 = vpop.f32.mrf.mxu3  ;;  %v3501_v19 = vadd.f32 %v3500_v50, %v3292_v57  ;;  %v2957_v50 = vld [vmem:[%s5240_s11 + $0x3f0] sm:$0xff] }
 0x3f8   : > { %v3294_v34 = vpop.f32.mrf.mxu0  ;;  %v2708_v16 = vadd.f32 %v2707_v54, %v2499_v28 }
 0x3f9   : > { %v3610_v18 = vmax.f32 %v3501_v19, 0.0  ;;  %v3295_v41 = vadd.f32 %v5920_v40, %v3294_v34  ;;  %v6114_v34 = vld [vmem:[#allocation9_spill] sm:$0xff] }
 0x3fa   : > { %v2501_v39 = vpop.f32.mrf.mxu1  ;;  %v2811_v11 = vmax.f32 %v2708_v16, 0.0 }
 0x3fb   : > { %v3674_v3 = vmax.f32 %v2808_v51, %v3610_v18  ;;  %4191 = vmatmul.msk.f32.gmra.mxu2 %vm484_vm1, %v2948_v17  ;;  %3341 = vmatmul.f32.gmra.mxu0 %v2947_v49  ;;  %v2502_v57 = vadd.f32 %v5920_v40, %v2501_v39 }
 0x3fc   : > { %4129 = vmatmul.msk.f32.gmra.mxu3 %vm484_vm1, %v2152_v20  ;;  %v2956_v20 = vld [vmem:[%s5240_s11 + $0x3e8] sm:$0xff] }
 0x3fd   : > { %v3738_v30 = vmax.f32 %v6111_v47, %v3674_v3  ;;  %2548 = vmatmul.f32.gmra.mxu1 %v2151_v38  ;;  %v2955_v38 = vld [vmem:[%s5240_s11 + $0x3e0] sm:$0xff] }
 0x3fe   : > { %v3503_v9 = vpop.f32.mrf.mxu2 }
 0x3ff   : > { %3803 = vst.msk [vmem:[%s5474_s18 + $0x148] sm:$0xff] %vm3761_vm2, %v3738_v30  ;;  %v2710_v62 = vpop.f32.mrf.mxu3  ;;  %v3504_v13 = vadd.f32 %v3503_v9, %v3295_v41 }
 0x400   : > { %v3297_v4 = vpop.f32.mrf.mxu0  ;;  %v2711_v17 = vadd.f32 %v2710_v62, %v2502_v57  ;;  %v6118_v57 = vld [vmem:[#allocation13_spill] sm:$0xff] }
 0x401   : > { %v3611_v7 = vmax.f32 %v3504_v13, 0.0  ;;  %v3298_v33 = vadd.f32 %v5920_v40, %v3297_v4  ;;  %v6115_v13 = vld [vmem:[#allocation10_spill] sm:$0xff] }
 0x402   : > { %v2504_v42 = vpop.f32.mrf.mxu1  ;;  %v2812_v3 = vmax.f32 %v2711_v17, 0.0 }
 0x403   : > { %v3675_v29 = vmax.f32 %v2809_v2, %v3611_v7  ;;  %4192 = vmatmul.msk.f32.gmra.mxu2 %vm484_vm1, %v2950_v12  ;;  %3344 = vmatmul.f32.gmra.mxu0 %v2949_v23  ;;  %v2505_v41 = vadd.f32 %v5920_v40, %v2504_v42 }
 0x404   : > { %4130 = vmatmul.msk.f32.gmra.mxu3 %vm484_vm1, %v2154_v6 }
 0x405   : > { %v3739_v35 = vmax.f32 %v6112_v37, %v3675_v29  ;;  %2551 = vmatmul.f32.gmra.mxu1 %v2153_v46  ;;  %v6116_v37 = vld [vmem:[#allocation11_spill] sm:$0xff] }
 0x406   : > { %v3506_v22 = vpop.f32.mrf.mxu2 }
 0x407   : > { %3804 = vst.msk [vmem:[%s5474_s18 + $0x150] sm:$0xff] %vm3761_vm2, %v3739_v35  ;;  %v2713_v31 = vpop.f32.mrf.mxu3  ;;  %v3507_v43 = vadd.f32 %v3506_v22, %v3298_v33 }
 0x408   : > { %v3300_v5 = vpop.f32.mrf.mxu0  ;;  %v2714_v62 = vadd.f32 %v2713_v31, %v2505_v41 }
 0x409   : > { %v3612_v1 = vmax.f32 %v3507_v43, 0.0  ;;  %v3301_v32 = vadd.f32 %v5920_v40, %v3300_v5 }
 0x40a   : > { %v2507_v21 = vpop.f32.mrf.mxu1  ;;  %v2813_v7 = vmax.f32 %v2714_v62, 0.0 }
 0x40b   : > { %v3676_v59 = vmax.f32 %v2810_v10, %v3612_v1  ;;  %4193 = vmatmul.msk.f32.gmra.mxu2 %vm484_vm1, %v2952_v52  ;;  %3347 = vmatmul.f32.gmra.mxu0 %v2951_v14  ;;  %v2508_v6 = vadd.f32 %v5920_v40, %v2507_v21 }
 0x40c   : > { %4131 = vmatmul.msk.f32.gmra.mxu3 %vm484_vm1, %v2156_v26 }
 0x40d   : > { %v3740_v63 = vmax.f32 %v6113_v44, %v3676_v59  ;;  %2554 = vmatmul.f32.gmra.mxu1 %v2155_v25  ;;  %v6117_v25 = vld [vmem:[#allocation12_spill] sm:$0xff] }
 0x40e   : > { %v3509_v8 = vpop.f32.mrf.mxu2 }
 0x40f   : > { %3805 = vst.msk [vmem:[%s5474_s18 + $0x158] sm:$0xff] %vm3761_vm2, %v3740_v63  ;;  %v2716_v15 = vpop.f32.mrf.mxu3  ;;  %v3510_v61 = vadd.f32 %v3509_v8, %v3301_v32 }
 0x410   : > { %v3303_v55 = vpop.f32.mrf.mxu0  ;;  %v2717_v56 = vadd.f32 %v2716_v15, %v2508_v6 }
 0x411   : > { %v3613_v27 = vmax.f32 %v3510_v61, 0.0  ;;  %v3304_v19 = vadd.f32 %v5920_v40, %v3303_v55 }
 0x412   : > { %v2510_v36 = vpop.f32.mrf.mxu1  ;;  %v2814_v5 = vmax.f32 %v2717_v56, 0.0 }
 0x413   : > { %v3677_v54 = vmax.f32 %v2811_v11, %v3613_v27  ;;  %4194 = vmatmul.msk.f32.gmra.mxu2 %vm484_vm1, %v2954_v45  ;;  %3350 = vmatmul.f32.gmra.mxu0 %v2953_v58  ;;  %v2511_v14 = vadd.f32 %v5920_v40, %v2510_v36 }
 0x414   : > { %4196 = vmatmul.msk.f32.vlgmr.msra.gmra.mxu3 %vm484_vm1, %v2958_v53 }
 0x415   : > { %v3741_v49 = vmax.f32 %v6114_v34, %v3677_v54  ;;  %3356 = vmatmul.f32.vlgmr.msra.gmra.mxu1 %v2957_v50 }
 0x416   : > { %v3512_v51 = vpop.f32.mrf.mxu2 }
 0x417   : > { %3806 = vst.msk [vmem:[%s5474_s18 + $0x160] sm:$0xff] %vm3761_vm2, %v3741_v49  ;;  %v2719_v60 = vpop.f32.mrf.mxu3  ;;  %v3513_v18 = vadd.f32 %v3512_v51, %v3304_v19 }
 0x418   : > { %v3306_v39 = vpop.f32.mrf.mxu0  ;;  %v2720_v21 = vadd.f32 %v2719_v60, %v2511_v14 }
 0x419   : > { %v3614_v24 = vmax.f32 %v3513_v18, 0.0  ;;  %v3307_v9 = vadd.f32 %v5920_v40, %v3306_v39 }
 0x41a   : > { %v2513_v47 = vpop.f32.mrf.mxu1  ;;  %v2815_v8 = vmax.f32 %v2720_v21, 0.0 }
 0x41b   : > { %v3678_v30 = vmax.f32 %v2812_v3, %v3614_v24  ;;  %4195 = vmatmul.msk.f32.gmra.mxu2 %vm484_vm1, %v2956_v20  ;;  %3353 = vmatmul.f32.gmra.mxu0 %v2955_v38  ;;  %v2514_v15 = vadd.f32 %v5920_v40, %v2513_v47  ;;  %v6119_v20 = vld [vmem:[#allocation14_spill] sm:$0xff] }
 0x41d   : > { %v3742_v12 = vmax.f32 %v6115_v13, %v3678_v30 }
 0x41e   : > { %v3515_v4 = vpop.f32.mrf.mxu2 }
 0x41f   : > { %3807 = vst.msk [vmem:[%s5474_s18 + $0x168] sm:$0xff] %vm3761_vm2, %v3742_v12  ;;  %v2722_v23 = vpop.f32.mrf.mxu3  ;;  %v3516_v2 = vadd.f32 %v3515_v4, %v3307_v9 }
 0x420   : > { %v3309_v48 = vpop.f32.mrf.mxu0  ;;  %v2723_v11 = vadd.f32 %v2722_v23, %v2514_v15  ;;  %v6120_v23 = vld [vmem:[#allocation15_spill] sm:$0xff] }
 0x421   : > { %v3615_v42 = vmax.f32 %v3516_v2, 0.0  ;;  %v3310_v33 = vadd.f32 %v5920_v40, %v3309_v48 }
 0x422   : > { %v2516_v46 = vpop.f32.mrf.mxu1  ;;  %v2816_v19 = vmax.f32 %v2723_v11, 0.0 }
 0x423   : > { %v3679_v29 = vmax.f32 %v2813_v7, %v3615_v42  ;;  %v2517_v17 = vadd.f32 %v5920_v40, %v2516_v46 }
 0x425   : > { %v3743_v35 = vmax.f32 %v6116_v37, %v3679_v29 }
 0x426   : > { %v3518_v22 = vpop.f32.mrf.mxu2 }
 0x427   : > { %3808 = vst.msk [vmem:[%s5474_s18 + $0x170] sm:$0xff] %vm3761_vm2, %v3743_v35  ;;  %v2725_v31 = vpop.f32.mrf.mxu3  ;;  %v3519_v43 = vadd.f32 %v3518_v22, %v3310_v33 }
 0x428   : > { %v3312_v52 = vpop.f32.mrf.mxu0  ;;  %v2726_v18 = vadd.f32 %v2725_v31, %v2517_v17  ;;  %v6121_v31 = vld [vmem:[#allocation16_spill] sm:$0xff] }
 0x429   : > { %v3616_v10 = vmax.f32 %v3519_v43, 0.0  ;;  %v3313_v26 = vadd.f32 %v5920_v40, %v3312_v52 }
 0x42a   : > { %v2519_v28 = vpop.f32.mrf.mxu1  ;;  %v2817_v47 = vmax.f32 %v2726_v18, 0.0 }
 0x42b   : > { %v3680_v1 = vmax.f32 %v2814_v5, %v3616_v10  ;;  %v2520_v30 = vadd.f32 %v5920_v40, %v2519_v28 }
 0x42d   : > { %v3744_v59 = vmax.f32 %v6117_v25, %v3680_v1 }
 0x42e   : > { %v3521_v32 = vpop.f32.mrf.mxu2 }
 0x42f   : > { %3809 = vst.msk [vmem:[%s5474_s18 + $0x178] sm:$0xff] %vm3761_vm2, %v3744_v59  ;;  %v2728_v16 = vpop.f32.mrf.mxu3  ;;  %v3522_v44 = vadd.f32 %v3521_v32, %v3313_v26 }
 0x430   : > { %v3315_v63 = vpop.f32.mrf.mxu0  ;;  %v2729_v4 = vadd.f32 %v2728_v16, %v2520_v30  ;;  %v6122_v16 = vld [vmem:[#allocation17_spill] sm:$0xff] }
 0x431   : > { %v3617_v61 = vmax.f32 %v3522_v44, 0.0  ;;  %v3316_v58 = vadd.f32 %v5920_v40, %v3315_v63 }
 0x432   : > { %v2522_v45 = vpop.f32.mrf.mxu1  ;;  %v2818_v46 = vmax.f32 %v2729_v4, 0.0 }
 0x433   : > { %v3681_v55 = vmax.f32 %v2815_v8, %v3617_v61  ;;  %v2523_v29 = vadd.f32 %v5920_v40, %v2522_v45 }
 0x435   : > { %v3745_v27 = vmax.f32 %v6118_v57, %v3681_v55 }
 0x436   : > { %v3524_v53 = vpop.f32.mrf.mxu2 }
 0x437   : > { %3810 = vst.msk [vmem:[%s5474_s18 + $0x180] sm:$0xff] %vm3761_vm2, %v3745_v27  ;;  %v2731_v36 = vpop.f32.mrf.mxu3  ;;  %v3525_v50 = vadd.f32 %v3524_v53, %v3316_v58 }
 0x438   : > { %v3318_v54 = vpop.f32.mrf.mxu0  ;;  %v2732_v22 = vadd.f32 %v2731_v36, %v2523_v29  ;;  %v6123_v36 = vld [vmem:[#allocation18_spill] sm:$0xff] }
 0x439   : > { %v3618_v34 = vmax.f32 %v3525_v50, 0.0  ;;  %v3319_v60 = vadd.f32 %v5920_v40, %v3318_v54 }
 0x43a   : > { %v2525_v49 = vpop.f32.mrf.mxu1  ;;  %v2819_v28 = vmax.f32 %v2732_v22, 0.0 }
 0x43b   : > { %v3682_v51 = vmax.f32 %v2816_v19, %v3618_v34  ;;  %v2526_v1 = vadd.f32 %v5920_v40, %v2525_v49 }
 0x43d   : > { %v3746_v39 = vmax.f32 %v6119_v20, %v3682_v51 }
 0x43e   : > { %v3527_v38 = vpop.f32.mrf.mxu2 }
 0x43f   : > { %3811 = vst.msk [vmem:[%s5474_s18 + $0x188] sm:$0xff] %vm3761_vm2, %v3746_v39  ;;  %v2734_v3 = vpop.f32.mrf.mxu3  ;;  %v3528_v41 = vadd.f32 %v3527_v38, %v3319_v60 }
 0x440   : > { %v3321_v24 = vpop.f32.mrf.mxu0  ;;  %v2735_v32 = vadd.f32 %v2734_v3, %v2526_v1  ;;  %v6124_v3 = vld [vmem:[#allocation19_spill] sm:$0xff] }
 0x441   : > { %v3619_v9 = vmax.f32 %v3528_v41, 0.0  ;;  %v3322_v12 = vadd.f32 %v5920_v40, %v3321_v24 }
 0x442   : > { %v2528_v62 = vpop.f32.mrf.mxu1  ;;  %v2820_v45 = vmax.f32 %v2735_v32, 0.0 }
 0x443   : > { %v3683_v13 = vmax.f32 %v2817_v47, %v3619_v9  ;;  %v2529_v55 = vadd.f32 %v5920_v40, %v2528_v62 }
 0x445   : > { %v3747_v2 = vmax.f32 %v6120_v23, %v3683_v13 }
 0x446   : > { %v3530_v48 = vpop.f32.mrf.mxu2 }
 0x447   : > { %3812 = vst.msk [vmem:[%s5474_s18 + $0x190] sm:$0xff] %vm3761_vm2, %v3747_v2  ;;  %v2737_v7 = vpop.f32.mrf.mxu3  ;;  %v3531_v6 = vadd.f32 %v3530_v48, %v3322_v12 }
 0x448   : > { %v3324_v42 = vpop.f32.mrf.mxu0  ;;  %v2738_v53 = vadd.f32 %v2737_v7, %v2529_v55  ;;  %v6125_v7 = vld [vmem:[#allocation20_spill] sm:$0xff] }
 0x449   : > { %v3620_v33 = vmax.f32 %v3531_v6, 0.0  ;;  %v3325_v35 = vadd.f32 %v5920_v40, %v3324_v42 }
 0x44a   : > { %v2531_v56 = vpop.f32.mrf.mxu1  ;;  %v2821_v49 = vmax.f32 %v2738_v53, 0.0 }
 0x44b   : > { %v3684_v37 = vmax.f32 %v2818_v46, %v3620_v33  ;;  %v2532_v51 = vadd.f32 %v5920_v40, %v2531_v56 }
 0x44d   : > { %v3748_v43 = vmax.f32 %v6121_v31, %v3684_v37 }
 0x44e   : > { %v3533_v52 = vpop.f32.mrf.mxu2 }
 0x44f   : > { %3813 = vst.msk [vmem:[%s5474_s18 + $0x198] sm:$0xff] %vm3761_vm2, %v3748_v43  ;;  %v2740_v5 = vpop.f32.mrf.mxu3  ;;  %v3534_v14 = vadd.f32 %v3533_v52, %v3325_v35 }
 0x450   : > { %v3327_v10 = vpop.f32.mrf.mxu0  ;;  %v2741_v38 = vadd.f32 %v2740_v5, %v2532_v51  ;;  %v6126_v5 = vld [vmem:[#allocation21_spill] sm:$0xff] }
 0x451   : > { %v3621_v26 = vmax.f32 %v3534_v14, 0.0  ;;  %v3328_v59 = vadd.f32 %v5920_v40, %v3327_v10 }
 0x452   : > { %v2534_v21 = vpop.f32.mrf.mxu1  ;;  %v2822_v62 = vmax.f32 %v2741_v38, 0.0 }
 0x453   : > { %v3685_v25 = vmax.f32 %v2819_v28, %v3621_v26  ;;  %v2535_v13 = vadd.f32 %v5920_v40, %v2534_v21 }
 0x455   : > { %v3749_v44 = vmax.f32 %v6122_v16, %v3685_v25 }
 0x456   : > { %v3536_v63 = vpop.f32.mrf.mxu2 }
 0x457   : > { %3814 = vst.msk [vmem:[%s5474_s18 + $0x1a0] sm:$0xff] %vm3761_vm2, %v3749_v44  ;;  %v2743_v8 = vpop.f32.mrf.mxu3  ;;  %v3537_v15 = vadd.f32 %v3536_v63, %v3328_v59 }
 0x458   : > { %v3330_v61 = vpop.f32.mrf.mxu0  ;;  %v2744_v48 = vadd.f32 %v2743_v8, %v2535_v13  ;;  %v6127_v8 = vld [vmem:[#allocation22_spill] sm:$0xff] }
 0x459   : > { %v3622_v58 = vmax.f32 %v3537_v15, 0.0  ;;  %v3331_v27 = vadd.f32 %v5920_v40, %v3330_v61 }
 0x45a   : > { %v2537_v11 = vpop.f32.mrf.mxu1  ;;  %v2823_v56 = vmax.f32 %v2744_v48, 0.0 }
 0x45b   : > { %v3686_v57 = vmax.f32 %v2820_v45, %v3622_v58  ;;  %v2538_v37 = vadd.f32 %v5920_v40, %v2537_v11 }
 0x45d   : > { %v3750_v50 = vmax.f32 %v6123_v36, %v3686_v57 }
 0x45e   : > { %v3539_v54 = vpop.f32.mrf.mxu2 }
 0x45f   : > { %3815 = vst.msk [vmem:[%s5474_s18 + $0x1a8] sm:$0xff] %vm3761_vm2, %v3750_v50  ;;  %v2746_v19 = vpop.f32.mrf.mxu3  ;;  %v3540_v17 = vadd.f32 %v3539_v54, %v3331_v27 }
 0x460   : > { %v3333_v34 = vpop.f32.mrf.mxu0  ;;  %v2747_v52 = vadd.f32 %v2746_v19, %v2538_v37  ;;  %v6128_v19 = vld [vmem:[#allocation23_spill] sm:$0xff] }
 0x461   : > { %v3623_v60 = vmax.f32 %v3540_v17, 0.0  ;;  %v3334_v39 = vadd.f32 %v5920_v40, %v3333_v34 }
 0x462   : > { %v2540_v18 = vpop.f32.mrf.mxu1  ;;  %v2824_v21 = vmax.f32 %v2747_v52, 0.0 }
 0x463   : > { %v3687_v20 = vmax.f32 %v2821_v49, %v3623_v60  ;;  %v2541_v25 = vadd.f32 %v5920_v40, %v2540_v18 }
 0x465   : > { %v3751_v41 = vmax.f32 %v6124_v3, %v3687_v20 }
 0x466   : > { %v3542_v24 = vpop.f32.mrf.mxu2 }
 0x467   : > { %3816 = vst.msk [vmem:[%s5474_s18 + $0x1b0] sm:$0xff] %vm3761_vm2, %v3751_v41  ;;  %v2749_v47 = vpop.f32.mrf.mxu3  ;;  %v3543_v30 = vadd.f32 %v3542_v24, %v3334_v39 }
 0x468   : > { %v3336_v9 = vpop.f32.mrf.mxu0  ;;  %v2750_v63 = vadd.f32 %v2749_v47, %v2541_v25  ;;  %v6129_v47 = vld [vmem:[#allocation24_spill] sm:$0xff] }
 0x469   : > { %v3624_v12 = vmax.f32 %v3543_v30, 0.0  ;;  %v3337_v2 = vadd.f32 %v5920_v40, %v3336_v9 }
 0x46a   : > { %v2543_v4 = vpop.f32.mrf.mxu1  ;;  %v2825_v11 = vmax.f32 %v2750_v63, 0.0 }
 0x46b   : > { %v3688_v23 = vmax.f32 %v2822_v62, %v3624_v12  ;;  %v2544_v57 = vadd.f32 %v5920_v40, %v2543_v4 }
 0x46d   : > { %v3752_v6 = vmax.f32 %v6125_v7, %v3688_v23 }
 0x46e   : > { %v3545_v42 = vpop.f32.mrf.mxu2 }
 0x46f   : > { %3817 = vst.msk [vmem:[%s5474_s18 + $0x1b8] sm:$0xff] %vm3761_vm2, %v3752_v6  ;;  %v2752_v46 = vpop.f32.mrf.mxu3  ;;  %v3546_v29 = vadd.f32 %v3545_v42, %v3337_v2 }
 0x470   : > { %v3339_v33 = vpop.f32.mrf.mxu0  ;;  %v2753_v54 = vadd.f32 %v2752_v46, %v2544_v57 }
 0x471   : > { %v3625_v35 = vmax.f32 %v3546_v29, 0.0  ;;  %v3340_v43 = vadd.f32 %v5920_v40, %v3339_v33 }
 0x472   : > { %v2546_v22 = vpop.f32.mrf.mxu1  ;;  %v2826_v18 = vmax.f32 %v2753_v54, 0.0 }
 0x473   : > { %v3689_v31 = vmax.f32 %v2823_v56, %v3625_v35  ;;  %v2547_v20 = vadd.f32 %v5920_v40, %v2546_v22  ;;  %v6130_v56 = vld [vmem:[#allocation25_spill] sm:$0xff] }
 0x475   : > { %v3753_v14 = vmax.f32 %v6126_v5, %v3689_v31 }
 0x476   : > { %v3548_v10 = vpop.f32.mrf.mxu2 }
 0x477   : > { %3818 = vst.msk [vmem:[%s5474_s18 + $0x1c0] sm:$0xff] %vm3761_vm2, %v3753_v14  ;;  %v2755_v28 = vpop.f32.mrf.mxu3  ;;  %v3549_v1 = vadd.f32 %v3548_v10, %v3340_v43 }
 0x478   : > { %v3342_v26 = vpop.f32.mrf.mxu0  ;;  %v2756_v24 = vadd.f32 %v2755_v28, %v2547_v20 }
 0x479   : > { %v3626_v59 = vmax.f32 %v3549_v1, 0.0  ;;  %v3343_v44 = vadd.f32 %v5920_v40, %v3342_v26 }
 0x47a   : > { %v2549_v32 = vpop.f32.mrf.mxu1  ;;  %v2827_v23 = vmax.f32 %v2756_v24, 0.0 }
 0x47b   : > { %v3690_v16 = vmax.f32 %v2824_v21, %v3626_v59  ;;  %v2550_v2 = vadd.f32 %v5920_v40, %v2549_v32  ;;  %v6131_v32 = vld [vmem:[#allocation26_spill] sm:$0xff] }
 0x47d   : > { %v3754_v15 = vmax.f32 %v6127_v8, %v3690_v16 }
 0x47e   : > { %v3551_v61 = vpop.f32.mrf.mxu2 }
 0x47f   : > { %3819 = vst.msk [vmem:[%s5474_s18 + $0x1c8] sm:$0xff] %vm3761_vm2, %v3754_v15  ;;  %v2758_v45 = vpop.f32.mrf.mxu3  ;;  %v3552_v55 = vadd.f32 %v3551_v61, %v3343_v44 }
 0x480   : > { %v3345_v58 = vpop.f32.mrf.mxu0  ;;  %v2759_v33 = vadd.f32 %v2758_v45, %v2550_v2 }
 0x481   : > { %v3627_v27 = vmax.f32 %v3552_v55, 0.0  ;;  %v3346_v50 = vadd.f32 %v5920_v40, %v3345_v58  ;;  %v6132_v55 = vld [vmem:[#allocation27_spill] sm:$0xff] }
 0x482   : > { %v2552_v53 = vpop.f32.mrf.mxu1  ;;  %v2828_v14 = vmax.f32 %v2759_v33, 0.0 }
 0x483   : > { %v3691_v36 = vmax.f32 %v2825_v11, %v3627_v27  ;;  %v2553_v10 = vadd.f32 %v5920_v40, %v2552_v53 }
 0x485   : > { %v3755_v17 = vmax.f32 %v6128_v19, %v3691_v36 }
 0x486   : > { %v3554_v34 = vpop.f32.mrf.mxu2 }
 0x487   : > { %3820 = vst.msk [vmem:[%s5474_s18 + $0x1d0] sm:$0xff] %vm3761_vm2, %v3755_v17  ;;  %v2761_v49 = vpop.f32.mrf.mxu3  ;;  %v3555_v51 = vadd.f32 %v3554_v34, %v3346_v50 }
 0x488   : > { %v3348_v60 = vpop.f32.mrf.mxu0  ;;  %v2762_v59 = vadd.f32 %v2761_v49, %v2553_v10 }
 0x489   : > { %v3628_v39 = vmax.f32 %v3555_v51, 0.0  ;;  %v3349_v41 = vadd.f32 %v5920_v40, %v3348_v60 }
 0x48a   : > { %v2555_v38 = vpop.f32.mrf.mxu1  ;;  %v2829_v15 = vmax.f32 %v2762_v59, 0.0 }
 0x48b   : > { %v3692_v3 = vmax.f32 %v2826_v18, %v3628_v39  ;;  %v2556_v12 = vadd.f32 %v5920_v40, %v2555_v38 }
 0x48d   : > { %v3756_v30 = vmax.f32 %v6129_v47, %v3692_v3 }
 0x48e   : > { %v3557_v9 = vpop.f32.mrf.mxu2 }
 0x48f   : > { %3821 = vst.msk [vmem:[%s5474_s18 + $0x1d8] sm:$0xff] %vm3761_vm2, %v3756_v30  ;;  %v2764_v62 = vpop.f32.mrf.mxu3  ;;  %v3558_v13 = vadd.f32 %v3557_v9, %v3349_v41 }
 0x490   : > { %v3351_v4 = vpop.f32.mrf.mxu0  ;;  %v2765_v46 = vadd.f32 %v2764_v62, %v2556_v12 }
 0x491   : > { %v3629_v48 = vmax.f32 %v3558_v13, 0.0  ;;  %v3352_v42 = vadd.f32 %v5920_v40, %v3351_v4 }
 0x492   : > { %v3357_v7 = vpop.f32.mrf.mxu1  ;;  %v2830_v43 = vmax.f32 %v2765_v46, 0.0 }
 0x493   : > { %v3693_v6 = vmax.f32 %v2827_v23, %v3629_v48  ;;  %v3358_v29 = vadd.f32 %v5920_v40, %v3357_v7 }
 0x495   : > { %v3757_v37 = vmax.f32 %v6130_v56, %v3693_v6 }
 0x496   : > { %v3560_v35 = vpop.f32.mrf.mxu2 }
 0x497   : > { %3822 = vst.msk [vmem:[%s5474_s18 + $0x1e0] sm:$0xff] %vm3761_vm2, %v3757_v37  ;;  %v3561_v22 = vadd.f32 %v3560_v35, %v3352_v42  ;;  %v3566_v31 = vpop.f32.mrf.mxu3 }
 0x498   : > { %v3567_v52 = vadd.f32 %v3566_v31, %v3358_v29  ;;  %v3354_v5 = vpop.f32.mrf.mxu0 }
 0x499   : > { %v3630_v28 = vmax.f32 %v3561_v22, 0.0  ;;  %v3355_v21 = vadd.f32 %v5920_v40, %v3354_v5 }
 0x49a   : > { %v3632_v1 = vmax.f32 %v3567_v52, 0.0 }
 0x49b   : > { %v3694_v26 = vmax.f32 %v2828_v14, %v3630_v28 }
 0x49c   : > { %v3696_v25 = vmax.f32 %v2830_v43, %v3632_v1 }
 0x49d   : > { %v3758_v16 = vmax.f32 %v6131_v32, %v3694_v26 }
 0x49e   : > { %v3760_v44 = vmax.f32 %v5461_v0, %v3696_v25  ;;  %v3563_v63 = vpop.f32.mrf.mxu2 }
 0x49f   : > { %3823 = vst.msk [vmem:[%s5474_s18 + $0x1e8] sm:$0xff] %vm3761_vm2, %v3758_v16  ;;  %v3564_v8 = vadd.f32 %v3563_v63, %v3355_v21 }
 0x4a0   : > { %3825 = vst.msk [vmem:[%s5474_s18 + $0x1f8] sm:$0xff] %vm3761_vm2, %v3760_v44 }
 0x4a1   : > { %v3631_v61 = vmax.f32 %v3564_v8, 0.0 }
 0x4a3   : > { %v3695_v45 = vmax.f32 %v2829_v15, %v3631_v61 }
 0x4a5   : > { %v3759_v58 = vmax.f32 %v6132_v55, %v3695_v45 }
 0x4a7   : > { %3824 = vst.msk [vmem:[%s5474_s18 + $0x1f0] sm:$0xff] %vm3761_vm2, %v3759_v58 }
 0x4a8 PF: > { %s16_s21 = sadd.s32 1, %s4241_s21  }
 0x4a9   : > { %p13_p4 = scmp.ge.s32.totalorder %s16_s21, 6  }
 0x4ab   :  { %15 = sbr.rel (!%p13_p4) target bundleno = 1 (0x1), region = 83 }

// kernel: lenet_relu_forward.5
= control target key start
LH: loop header
LB: loop body
LE: loop exit
PB: predicated region body
PF: predicated region fallthrough
CT: control target
= control target key end

     0   :  { %s2484_s21 = smov 0   ;;  %s3502_s0 = inlined_call_operand.vmem [shape: f32[512,150], index: 0, kind: input, shape index: {}]   ;;  %s3503_s1 = inlined_call_operand.vmem [shape: f32[512,150], index: 1, kind: input, shape index: {}]   ;;  %s3504_s2 = inlined_call_operand.vmem [shape: f32[512,150], index: 2, kind: input, shape index: {}]   ;;  %s3505_s3 = inlined_call_operand.vmem [shape: f32[512,150], index: 3, kind: input, shape index: {}]   ;;  %s3506_s4 = inlined_call_operand.vmem [shape: f32[150,12], index: 4, kind: input, shape index: {}]   ;;  %s3507_s5 = inlined_call_operand.vmem [shape: f32[1,12], index: 5, kind: input, shape index: {}]   ;;  %s3508_s6 = inlined_call_operand.vmem [shape: f32[512,12], index: 6, kind: output, shape index: {}]  }
   0x1 LB: > { %s2254_s22 = sadd.s32 4294967295, %s2447_s21   ;;  %p2258_p0 = scmp.ge.s32.totalorder %s2447_s21, 1  ;;  %s2447_s21 = sphi %s2484_s21, %s16_s21  }
   0x2   : > { %p250_p1 = scmp.lt.s32.totalorder %s2447_s21, 3 }
   0x4   : > { %p251_p2 = pnand %p2258_p0, %p250_p1 }
   0x5   : > { %s2259_s29 = sshll.u32 (!%p251_p2), %s2254_s22, 5 }
   0x6   : > { %254 = sbr.rel (%p251_p2) target bundleno = 680 (0x2a8), region = 44  ;;  %p300_p3 = scmp.lt.s32.totalorder (!%p251_p2), %s2259_s29, 63 }
   0xb   : > { %v2495_v0 = vld [vmem:[%s3506_s4 + $0x78] sm:$0xff]  ;;  %v2500_v1 = vld [vmem:[%s3506_s4 + $0x70] sm:$0xff]  ;;  %vm517_vm0 = vcmask 1045504   ;;  %v2512_v3 = vld [vmem:[%s3506_s4 + $0x88] sm:$0xff]  ;;  %s3510_s29 = smov (!%p300_p3, %s2259_s29), 63  ;;  %vm420_vm1 = vcmask 179200  }
   0xc   : > { %v2505_v2 = vld [vmem:[%s3506_s4 + $0x90] sm:$0x3f]  ;;  %521 = vmatpush.msra.mxu0 %v2495_v0  ;;  %939 = vmatpush.msra.mxu2 %v2495_v0  ;;  %v2519_v4 = vld [vmem:[%s3506_s4 + $0x68] sm:$0xff]  ;;  %v2528_v5 = vld [vmem:[%s3506_s4 + $0x80] sm:$0xff]  ;;  %s2542_s14 = sshll.u32 %s3510_s29, 4  ;;  %s2272_s11 = sshll.u32 %s3510_s29, 3 }
   0xd   : > { %2306 = vmatpush.msk.msra.mxu3 %vm517_vm0, %v2505_v2  ;;  %2273 = vmatpush.msk.msra.mxu1 %vm517_vm0, %v2505_v2  ;;  %v2536_v6 = vld [vmem:[%s3506_s4 + $0x60] sm:$0xff]  ;;  %s2549_s17 = scalar_lea.vmem %s3503_s1, %s2542_s14  ;;  %v2554_v7 = vld [vmem:[%s3506_s4 + $0x58] sm:$0xff]  ;;  %s2561_s23 = scalar_lea.vmem %s3502_s0, %s2542_s14  ;;  %v2571_v10 = vld [vmem:[%s3506_s4 + $0x50] sm:$0xff]  ;;  %vm2129_vm2 = vcmask 97280  }
   0xe   : > { %522 = vmatpush.msra.mxu0 %v2500_v1  ;;  %940 = vmatpush.msra.mxu2 %v2500_v1  ;;  %v780_v8 = vld [vmem:[%s2549_s17 + $0x8] sm:$0xff]  ;;  %v2589_v12 = vld [vmem:[%s3506_s4 + $0x40] sm:$0xff]  ;;  %v782_v13 = vld [vmem:[%s2549_s17 + $0x18] sm:$0xff]  ;;  %s2983_s8 = scalar_lea.vmem %s3504_s2, %s2542_s14  ;;  %s3025_s9 = scalar_lea.vmem %s3505_s3, %s2542_s14 }
   0xf   : > { %1066 = vmatpush.msra.mxu3 %v2512_v3  ;;  %648 = vmatpush.msra.mxu1 %v2512_v3  ;;  %v354_v9 = vld [vmem:[%s2561_s23 + $0x8] sm:$0xff]  ;;  %v356_v14 = vld [vmem:[%s2561_s23 + $0x18] sm:$0xff]  ;;  %v2610_v16 = vld [vmem:[%s3506_s4 + $0x30] sm:$0xff]  ;;  %s3259_s15 = scalar_lea.vmem %s3508_s6, %s2272_s11 }
  0x10   : > { %523 = vmatpush.msra.mxu0 %v2519_v4  ;;  %941 = vmatpush.msra.mxu2 %v2519_v4  ;;  %v2579_v11 = vld [vmem:[%s3506_s4 + $0x48] sm:$0xff]  ;;  %v2600_v15 = vld [vmem:[%s3506_s4 + $0x38] sm:$0xff]  ;;  %v2628_v18 = vld [vmem:[%s3506_s4 + $0x20] sm:$0xff] }
  0x11   : > { %1067 = vmatpush.msra.mxu3 %v2528_v5  ;;  %649 = vmatpush.msra.mxu1 %v2528_v5  ;;  %v2618_v17 = vld [vmem:[%s3506_s4 + $0x28] sm:$0xff]  ;;  %v2639_v21 = vld [vmem:[%s3506_s4 + $0x18] sm:$0xff]  ;;  %v2649_v22 = vld [vmem:[%s3506_s4 + $0x10] sm:$0xff] }
  0x12   : > { %524 = vmatpush.msra.mxu0 %v2536_v6  ;;  %942 = vmatpush.msra.mxu2 %v2536_v6  ;;  %v784_v19 = vld [vmem:[%s2549_s17 + $0x28] sm:$0xff]  ;;  %v2665_v24 = vld [vmem:[%s3506_s4] sm:$0xff]  ;;  %v786_v27 = vld [vmem:[%s2549_s17 + $0x38] sm:$0xff] }
  0x13   : > { %2307 = vmatmul.msk.f32.vlgmr.msra.gmra.mxu3 %vm420_vm1, %v780_v8  ;;  %2274 = vmatmul.msk.f32.vlgmr.msra.gmra.mxu1 %vm420_vm1, %v354_v9  ;;  %v358_v20 = vld [vmem:[%s2561_s23 + $0x28] sm:$0xff]  ;;  %v353_v25 = vld [vmem:[%s2561_s23] sm:$0xff]  ;;  %v360_v28 = vld [vmem:[%s2561_s23 + $0x38] sm:$0xff] }
  0x14   : > { %525 = vmatpush.msra.mxu0 %v2554_v7  ;;  %943 = vmatpush.msra.mxu2 %v2554_v7  ;;  %v2657_v23 = vld [vmem:[%s3506_s4 + $0x8] sm:$0xff]  ;;  %v779_v26 = vld [vmem:[%s2549_s17] sm:$0xff]  ;;  %v355_v29 = vld [vmem:[%s2561_s23 + $0x10] sm:$0xff] }
  0x15   : > { %2339 = vmatpush.msk.msrb.mxu3 %vm517_vm0, %v2505_v2  ;;  %1389 = vmatpush.msrb.mxu1 %v2495_v0  ;;  %v781_v30 = vld [vmem:[%s2549_s17 + $0x10] sm:$0xff]  ;;  %v788_v31 = vld [vmem:[%s2549_s17 + $0x48] sm:$0xff]  ;;  %v357_v33 = vld [vmem:[%s2561_s23 + $0x20] sm:$0xff] }
  0x16   : > { %526 = vmatpush.msra.mxu0 %v2571_v10  ;;  %944 = vmatpush.msra.mxu2 %v2571_v10  ;;  %v362_v32 = vld [vmem:[%s2561_s23 + $0x48] sm:$0xff]  ;;  %v783_v34 = vld [vmem:[%s2549_s17 + $0x20] sm:$0xff]  ;;  %v790_v35 = vld [vmem:[%s2549_s17 + $0x58] sm:$0xff] }
  0x17   : > { %1390 = vmatpush.msrb.mxu1 %v2500_v1  ;;  %1516 = vmatpush.msrb.mxu3 %v2512_v3  ;;  %v364_v36 = vld [vmem:[%s2561_s23 + $0x58] sm:$0xff]  ;;  %v359_v37 = vld [vmem:[%s2561_s23 + $0x30] sm:$0xff]  ;;  %v792_v39 = vld [vmem:[%s2549_s17 + $0x68] sm:$0xff] }
  0x18   : > { %527 = vmatpush.msra.mxu0 %v2579_v11  ;;  %945 = vmatpush.msra.mxu2 %v2579_v11  ;;  %v785_v38 = vld [vmem:[%s2549_s17 + $0x30] sm:$0xff]  ;;  %v366_v40 = vld [vmem:[%s2561_s23 + $0x68] sm:$0xff]  ;;  %v361_v41 = vld [vmem:[%s2561_s23 + $0x40] sm:$0xff] }
  0x19   : > { %1391 = vmatpush.msrb.mxu1 %v2519_v4  ;;  %1517 = vmatpush.msrb.mxu3 %v2528_v5  ;;  %v787_v42 = vld [vmem:[%s2549_s17 + $0x40] sm:$0xff]  ;;  %v794_v43 = vld [vmem:[%s2549_s17 + $0x78] sm:$0xff]  ;;  %v363_v45 = vld [vmem:[%s2561_s23 + $0x50] sm:$0xff] }
  0x1a   : > { %528 = vmatpush.msra.mxu0 %v2589_v12  ;;  %946 = vmatpush.msra.mxu2 %v2589_v12  ;;  %v368_v44 = vld [vmem:[%s2561_s23 + $0x78] sm:$0xff]  ;;  %v789_v46 = vld [vmem:[%s2549_s17 + $0x50] sm:$0xff]  ;;  %v796_v47 = vld [vmem:[%s2549_s17 + $0x88] sm:$0xff] }
  0x1b   : > { %2308 = vmatmul.msk.f32.gmra.mxu3 %vm420_vm1, %v782_v13  ;;  %2275 = vmatmul.msk.f32.gmra.mxu1 %vm420_vm1, %v356_v14  ;;  %v370_v48 = vld [vmem:[%s2561_s23 + $0x88] sm:$0xff]  ;;  %v365_v49 = vld [vmem:[%s2561_s23 + $0x60] sm:$0xff]  ;;  %v798_v51 = vld [vmem:[%s2549_s17 + $0x98] sm:$0xff] }
  0x1c   : > { %529 = vmatpush.msra.mxu0 %v2600_v15  ;;  %947 = vmatpush.msra.mxu2 %v2600_v15  ;;  %v791_v50 = vld [vmem:[%s2549_s17 + $0x60] sm:$0xff]  ;;  %v372_v52 = vld [vmem:[%s2561_s23 + $0x98] sm:$0xff]  ;;  %v367_v53 = vld [vmem:[%s2561_s23 + $0x70] sm:$0xff] }
  0x1d   : > { %1392 = vmatpush.msrb.mxu1 %v2536_v6  ;;  %2427 = vmatpush.msk.msra.mxu3 %vm517_vm0, %v2505_v2  ;;  %v793_v54 = vld [vmem:[%s2549_s17 + $0x70] sm:$0xff]  ;;  %v800_v55 = vld [vmem:[%s2549_s17 + $0xa8] sm:$0xff]  ;;  %v369_v57 = vld [vmem:[%s2561_s23 + $0x80] sm:$0xff] }
  0x1e   : > { %530 = vmatpush.msra.mxu0 %v2610_v16  ;;  %948 = vmatpush.msra.mxu2 %v2610_v16  ;;  %v374_v56 = vld [vmem:[%s2561_s23 + $0xa8] sm:$0xff]  ;;  %v795_v58 = vld [vmem:[%s2549_s17 + $0x80] sm:$0xff]  ;;  %v802_v59 = vld [vmem:[%s2549_s17 + $0xb8] sm:$0xff] }
  0x1f   : > { %1393 = vmatpush.msrb.mxu1 %v2554_v7  ;;  %2428 = vmatpush.msra.mxu3 %v2512_v3  ;;  %v376_v60 = vld [vmem:[%s2561_s23 + $0xb8] sm:$0xff]  ;;  %v371_v61 = vld [vmem:[%s2561_s23 + $0x90] sm:$0xff]  ;;  %v804_v63 = vld [vmem:[%s2549_s17 + $0xc8] sm:$0xff] }
  0x20   : > { %531 = vmatpush.msra.mxu0 %v2618_v17  ;;  %949 = vmatpush.msra.mxu2 %v2618_v17  ;;  %v797_v62 = vld [vmem:[%s2549_s17 + $0x90] sm:$0xff]  ;;  %v382_v8 = vld [vmem:[%s2561_s23 + $0xe8] sm:$0xff]  ;;  %v377_v9 = vld [vmem:[%s2561_s23 + $0xc0] sm:$0xff] }
  0x21   : > { %1394 = vmatpush.msrb.mxu1 %v2571_v10  ;;  %2429 = vmatpush.msra.mxu3 %v2528_v5  ;;  %v379_v13 = vld [vmem:[%s2561_s23 + $0xd0] sm:$0xff] }
  0x22   : > { %532 = vmatpush.msra.mxu0 %v2628_v18  ;;  %950 = vmatpush.msra.mxu2 %v2628_v18  ;;  %v805_v14 = vld [vmem:[%s2549_s17 + $0xd0] sm:$0xff] }
  0x23   : > { %2309 = vmatmul.msk.f32.gmra.mxu3 %vm420_vm1, %v784_v19  ;;  %2276 = vmatmul.msk.f32.gmra.mxu1 %vm420_vm1, %v358_v20  ;;  %v381_v19 = vld [vmem:[%s2561_s23 + $0xe0] sm:$0xff] }
  0x24   : > { %533 = vmatpush.msra.mxu0 %v2639_v21  ;;  %951 = vmatpush.msra.mxu2 %v2639_v21  ;;  %v807_v20 = vld [vmem:[%s2549_s17 + $0xe0] sm:$0xff] }
  0x25   : > { %1395 = vmatpush.msrb.mxu1 %v2579_v11 }
  0x26   : > { %534 = vmatpush.msra.mxu0 %v2649_v22  ;;  %952 = vmatpush.msra.mxu2 %v2649_v22 }
  0x27   : > { %1396 = vmatpush.msrb.mxu1 %v2589_v12 }
  0x28   : > { %535 = vmatpush.msra.mxu0 %v2657_v23  ;;  %953 = vmatpush.msra.mxu2 %v2657_v23 }
  0x29   : > { %1397 = vmatpush.msrb.mxu1 %v2600_v15 }
  0x2a   : > { %536 = vmatpush.msra.mxu0 %v2665_v24  ;;  %954 = vmatpush.msra.mxu2 %v2665_v24 }
  0x2b   : > { %537 = vmatmul.f32.vlgmr.msra.gmra.mxu0 %v353_v25  ;;  %955 = vmatmul.f32.vlgmr.msra.gmra.mxu2 %v779_v26  ;;  %v383_v25 = vld [vmem:[%s2561_s23 + $0xf0] sm:$0xff] }
  0x2c   : > { %2310 = vmatmul.msk.f32.gmra.mxu3 %vm420_vm1, %v786_v27  ;;  %2372 = vmatpush.msk.msrb.mxu2 %vm517_vm0, %v2505_v2  ;;  %v799_v2 = vld [vmem:[%s2549_s17 + $0xa0] sm:$0xff]  ;;  %v809_v26 = vld [vmem:[%s2549_s17 + $0xf0] sm:$0xff] }
  0x2d   : > { %2277 = vmatmul.msk.f32.gmra.mxu1 %vm420_vm1, %v360_v28  ;;  %1807 = vmatpush.msrb.mxu0 %v2495_v0  ;;  %v816_v28 = vld [vmem:[%s2549_s17 + $0x128] sm:$0xff] }
  0x2e   : > { %1934 = vmatpush.msrb.mxu2 %v2512_v3  ;;  %1398 = vmatpush.msrb.mxu1 %v2610_v16  ;;  %v806_v3 = vld [vmem:[%s2549_s17 + $0xd8] sm:$0xff] }
  0x2f   : > { %1808 = vmatpush.msrb.mxu0 %v2500_v1 }
  0x30   : > { %1399 = vmatpush.msrb.mxu1 %v2618_v17  ;;  %1935 = vmatpush.msrb.mxu2 %v2528_v5  ;;  %v375_v5 = vld [vmem:[%s2561_s23 + $0xb0] sm:$0xff] }
  0x31   : > { %1809 = vmatpush.msrb.mxu0 %v2519_v4 }
  0x32   : > { %1400 = vmatpush.msrb.mxu1 %v2628_v18 }
  0x33   : > { %540 = vmatmul.f32.gmra.mxu0 %v355_v29  ;;  %958 = vmatmul.f32.gmra.mxu2 %v781_v30  ;;  %v390_v29 = vld [vmem:[%s2561_s23 + $0x128] sm:$0xff] }
  0x34   : > { %2311 = vmatmul.msk.f32.gmra.mxu3 %vm420_vm1, %v788_v31  ;;  %1810 = vmatpush.msrb.mxu0 %v2536_v6  ;;  %v2815_v31 = vld [vmem:[%s3507_s5] ss:$0 sm:$0xff] }
  0x35   : > { %2278 = vmatmul.msk.f32.gmra.mxu1 %vm420_vm1, %v362_v32 }
  0x36   : > { %1811 = vmatpush.msrb.mxu0 %v2554_v7  ;;  %1401 = vmatpush.msrb.mxu1 %v2639_v21 }
  0x38   : > { %1812 = vmatpush.msrb.mxu0 %v2571_v10  ;;  %1402 = vmatpush.msrb.mxu1 %v2649_v22 }
  0x3a   : > { %1813 = vmatpush.msrb.mxu0 %v2579_v11  ;;  %1403 = vmatpush.msrb.mxu1 %v2657_v23 }
  0x3b   : > { %543 = vmatmul.f32.gmra.mxu0 %v357_v33  ;;  %961 = vmatmul.f32.gmra.mxu2 %v783_v34  ;;  %v385_v33 = vld [vmem:[%s2561_s23 + $0x100] sm:$0xff] }
  0x3c   : > { %2312 = vmatmul.msk.f32.gmra.mxu3 %vm420_vm1, %v790_v35  ;;  %1814 = vmatpush.msrb.mxu0 %v2589_v12  ;;  %v811_v34 = vld [vmem:[%s2549_s17 + $0x100] sm:$0xff]  ;;  %v818_v35 = vld [vmem:[%s2549_s17 + $0x138] sm:$0xff] }
  0x3d   : > { %2279 = vmatmul.msk.f32.gmra.mxu1 %vm420_vm1, %v364_v36 }
  0x3e   : > { %1815 = vmatpush.msrb.mxu0 %v2600_v15  ;;  %1404 = vmatpush.msrb.mxu1 %v2665_v24 }
  0x40   : > { %2411 = vmatpush.msra.mxu1 %v2495_v0  ;;  %1816 = vmatpush.msrb.mxu0 %v2610_v16  ;;  %v378_v0 = vld [vmem:[%s2561_s23 + $0xc8] sm:$0xff] }
  0x42   : > { %2412 = vmatpush.msra.mxu1 %v2500_v1  ;;  %1817 = vmatpush.msrb.mxu0 %v2618_v17  ;;  %v373_v1 = vld [vmem:[%s2561_s23 + $0xa0] sm:$0xff] }
  0x43   : > { %546 = vmatmul.f32.gmra.mxu0 %v359_v37  ;;  %964 = vmatmul.f32.gmra.mxu2 %v785_v38  ;;  %v392_v37 = vld [vmem:[%s2561_s23 + $0x138] sm:$0xff] }
  0x44   : > { %2313 = vmatmul.msk.f32.gmra.mxu3 %vm420_vm1, %v792_v39  ;;  %1818 = vmatpush.msrb.mxu0 %v2628_v18 }
  0x45   : > { %2280 = vmatmul.msk.f32.gmra.mxu1 %vm420_vm1, %v366_v40 }
  0x46   : > { %1819 = vmatpush.msrb.mxu0 %v2639_v21  ;;  %2413 = vmatpush.msra.mxu1 %v2519_v4  ;;  %v380_v4 = vld [vmem:[%s2561_s23 + $0xd8] sm:$0xff] }
  0x48   : > { %1820 = vmatpush.msrb.mxu0 %v2649_v22  ;;  %2414 = vmatpush.msra.mxu1 %v2536_v6  ;;  %v801_v6 = vld [vmem:[%s2549_s17 + $0xb0] sm:$0xff] }
  0x4a   : > { %1821 = vmatpush.msrb.mxu0 %v2657_v23  ;;  %2415 = vmatpush.msra.mxu1 %v2554_v7  ;;  %v808_v7 = vld [vmem:[%s2549_s17 + $0xe8] sm:$0xff] }
  0x4b   : > { %549 = vmatmul.f32.gmra.mxu0 %v361_v41  ;;  %967 = vmatmul.f32.gmra.mxu2 %v787_v42 }
  0x4c   : > { %2314 = vmatmul.msk.f32.gmra.mxu3 %vm420_vm1, %v794_v43  ;;  %1822 = vmatpush.msrb.mxu0 %v2665_v24 }
  0x4d   : > { %2281 = vmatmul.msk.f32.gmra.mxu1 %vm420_vm1, %v368_v44  ;;  %v387_v44 = vld [vmem:[%s2561_s23 + $0x110] sm:$0xff] }
  0x4e   : > { %2416 = vmatpush.msra.mxu1 %v2571_v10  ;;  %v803_v10 = vld [vmem:[%s2549_s17 + $0xc0] sm:$0xff] }
  0x50   : > { %2417 = vmatpush.msra.mxu1 %v2579_v11  ;;  %v810_v11 = vld [vmem:[%s2549_s17 + $0xf8] sm:$0xff] }
  0x52   : > { %2418 = vmatpush.msra.mxu1 %v2589_v12  ;;  %v384_v12 = vld [vmem:[%s2561_s23 + $0xf8] sm:$0xff] }
  0x53   : > { %552 = vmatmul.f32.gmra.mxu0 %v363_v45  ;;  %970 = vmatmul.f32.gmra.mxu2 %v789_v46  ;;  %v813_v45 = vld [vmem:[%s2549_s17 + $0x110] sm:$0xff] }
  0x54   : > { %2315 = vmatmul.msk.f32.gmra.mxu3 %vm420_vm1, %v796_v47  ;;  %2419 = vmatpush.msra.mxu1 %v2600_v15  ;;  %v820_v47 = vld [vmem:[%s2549_s17 + $0x148] sm:$0xff] }
  0x55   : > { %2282 = vmatmul.msk.f32.gmra.mxu1 %vm420_vm1, %v370_v48 }
  0x56   : > { %2420 = vmatpush.msra.mxu1 %v2610_v16  ;;  %v812_v16 = vld [vmem:[%s2549_s17 + $0x108] sm:$0xff] }
  0x58   : > { %2421 = vmatpush.msra.mxu1 %v2618_v17  ;;  %v386_v17 = vld [vmem:[%s2561_s23 + $0x108] sm:$0xff] }
  0x5a   : > { %2422 = vmatpush.msra.mxu1 %v2628_v18 }
  0x5b   : > { %555 = vmatmul.f32.gmra.mxu0 %v365_v49  ;;  %973 = vmatmul.f32.gmra.mxu2 %v791_v50  ;;  %v394_v49 = vld [vmem:[%s2561_s23 + $0x148] sm:$0xff] }
  0x5c   : > { %2316 = vmatmul.msk.f32.gmra.mxu3 %vm420_vm1, %v798_v51  ;;  %2423 = vmatpush.msra.mxu1 %v2639_v21 }
  0x5d   : > { %2283 = vmatmul.msk.f32.gmra.mxu1 %vm420_vm1, %v372_v52 }
  0x5e   : > { %2424 = vmatpush.msra.mxu1 %v2649_v22  ;;  %v814_v22 = vld [vmem:[%s2549_s17 + $0x118] sm:$0xff] }
  0x60   : > { %2425 = vmatpush.msra.mxu1 %v2657_v23  ;;  %v388_v23 = vld [vmem:[%s2561_s23 + $0x118] sm:$0xff] }
  0x62   : > { %2426 = vmatpush.msra.mxu1 %v2665_v24 }
  0x63   : > { %558 = vmatmul.f32.gmra.mxu0 %v367_v53  ;;  %976 = vmatmul.f32.gmra.mxu2 %v793_v54 }
  0x64   : > { %2317 = vmatmul.msk.f32.gmra.mxu3 %vm420_vm1, %v800_v55 }
  0x65   : > { %2284 = vmatmul.msk.f32.gmra.mxu1 %vm420_vm1, %v374_v56 }
  0x6b   : > { %561 = vmatmul.f32.gmra.mxu0 %v369_v57  ;;  %979 = vmatmul.f32.gmra.mxu2 %v795_v58 }
  0x6c   : > { %2318 = vmatmul.msk.f32.gmra.mxu3 %vm420_vm1, %v802_v59  ;;  %v389_v59 = vld [vmem:[%s2561_s23 + $0x120] sm:$0xff] }
  0x6d   : > { %2285 = vmatmul.msk.f32.gmra.mxu1 %vm420_vm1, %v376_v60  ;;  %v815_v60 = vld [vmem:[%s2549_s17 + $0x120] sm:$0xff] }
  0x73   : > { %564 = vmatmul.f32.gmra.mxu0 %v371_v61  ;;  %982 = vmatmul.f32.gmra.mxu2 %v797_v62  ;;  %v822_v62 = vld [vmem:[%s2549_s17 + $0x158] sm:$0xff] }
  0x74   : > { %2319 = vmatmul.msk.f32.gmra.mxu3 %vm420_vm1, %v804_v63 }
  0x75   : > { %2286 = vmatmul.msk.f32.gmra.mxu1 %vm420_vm1, %v378_v0  ;;  %v396_v0 = vld [vmem:[%s2561_s23 + $0x158] sm:$0xff] }
  0x7b   : > { %567 = vmatmul.f32.gmra.mxu0 %v373_v1  ;;  %985 = vmatmul.f32.gmra.mxu2 %v799_v2 }
  0x7c   : > { %2320 = vmatmul.msk.f32.gmra.mxu3 %vm420_vm1, %v806_v3 }
  0x7d   : > { %2287 = vmatmul.msk.f32.gmra.mxu1 %vm420_vm1, %v380_v4 }
  0x83   : > { %570 = vmatmul.f32.gmra.mxu0 %v375_v5  ;;  %988 = vmatmul.f32.gmra.mxu2 %v801_v6 }
  0x84   : > { %2321 = vmatmul.msk.f32.gmra.mxu3 %vm420_vm1, %v808_v7 }
  0x85   : > { %2288 = vmatmul.msk.f32.gmra.mxu1 %vm420_vm1, %v382_v8 }
  0x8b   : > { %573 = vmatmul.f32.gmra.mxu0 %v377_v9  ;;  %991 = vmatmul.f32.gmra.mxu2 %v803_v10  ;;  %v391_v10 = vld [vmem:[%s2561_s23 + $0x130] sm:$0xff] }
  0x8c   : > { %2322 = vmatmul.msk.f32.gmra.mxu3 %vm420_vm1, %v810_v11  ;;  %v817_v11 = vld [vmem:[%s2549_s17 + $0x130] sm:$0xff] }
  0x8d   : > { %2289 = vmatmul.msk.f32.gmra.mxu1 %vm420_vm1, %v384_v12 }
  0x90   : > { %v651_v15 = vpop.f32.mrf.mxu1 }
  0x93   : > { %576 = vmatmul.f32.gmra.mxu0 %v379_v13  ;;  %994 = vmatmul.f32.gmra.mxu2 %v805_v14  ;;  %v824_v13 = vld [vmem:[%s2549_s17 + $0x168] sm:$0xff] }
  0x94   : > { %2323 = vmatmul.msk.f32.gmra.mxu3 %vm420_vm1, %v812_v16 }
  0x95   : > { %2290 = vmatmul.msk.f32.gmra.mxu1 %vm420_vm1, %v386_v17 }
  0x96   : > { %v1069_v18 = vpop.f32.mrf.mxu3 }
  0x98   : > { %v654_v21 = vpop.f32.mrf.mxu1 }
  0x9b   : > { %579 = vmatmul.f32.gmra.mxu0 %v381_v19  ;;  %997 = vmatmul.f32.gmra.mxu2 %v807_v20 }
  0x9c   : > { %2324 = vmatmul.msk.f32.gmra.mxu3 %vm420_vm1, %v814_v22 }
  0x9d   : > { %2291 = vmatmul.msk.f32.gmra.mxu1 %vm420_vm1, %v388_v23 }
  0x9e   : > { %v1072_v24 = vpop.f32.mrf.mxu3 }
  0xa0   : > { %v657_v27 = vpop.f32.mrf.mxu1 }
  0xa3   : > { %582 = vmatmul.f32.gmra.mxu0 %v383_v25  ;;  %1000 = vmatmul.f32.gmra.mxu2 %v809_v26  ;;  %v393_v25 = vld [vmem:[%s2561_s23 + $0x140] sm:$0xff] }
  0xa4   : > { %2325 = vmatmul.msk.f32.gmra.mxu3 %vm420_vm1, %v816_v28  ;;  %v819_v26 = vld [vmem:[%s2549_s17 + $0x140] sm:$0xff]  ;;  %v826_v28 = vld [vmem:[%s2549_s17 + $0x178] sm:$0xff] }
  0xa5   : > { %2292 = vmatmul.msk.f32.gmra.mxu1 %vm420_vm1, %v390_v29 }
  0xa6   : > { %v1075_v30 = vpop.f32.mrf.mxu3 }
  0xa8   : > { %v538_v32 = vpop.f32.mrf.mxu0 }
  0xa9   : > { %v539_v38 = vadd.f32 %v2815_v31, %v538_v32 }
  0xaa   : > { %v2820_v36 = vpop.f32.mrf.mxu1 }
  0xab   : > { %585 = vmatmul.f32.gmra.mxu0 %v385_v33  ;;  %1003 = vmatmul.f32.gmra.mxu2 %v811_v34  ;;  %v652_v40 = vadd.f32 %v651_v15, %v539_v38  ;;  %v398_v15 = vld [vmem:[%s2561_s23 + $0x168] sm:$0xff] }
  0xac   : > { %2326 = vmatmul.msk.f32.gmra.mxu3 %vm420_vm1, %v818_v35 }
  0xad   : > { %2293 = vmatmul.msk.f32.gmra.mxu1 %vm420_vm1, %v392_v37  ;;  %v747_v50 = vmax.f32 %v652_v40, 0.0 }
  0xae   : > { %v956_v39 = vpop.f32.mrf.mxu2 }
  0xaf   : > { %v957_v41 = vadd.f32 %v2815_v31, %v956_v39  ;;  %v1078_v42 = vpop.f32.mrf.mxu3 }
  0xb0   : > { %v541_v43 = vpop.f32.mrf.mxu0 }
  0xb1   : > { %v1070_v46 = vadd.f32 %v1069_v18, %v957_v41  ;;  %v542_v52 = vadd.f32 %v2815_v31, %v541_v43  ;;  %v395_v41 = vld [vmem:[%s2561_s23 + $0x150] sm:$0xff] }
  0xb2   : > { %v2830_v48 = vpop.f32.mrf.mxu1 }
  0xb3   : > { %v1165_v51 = vmax.f32 %v1070_v46, 0.0  ;;  %588 = vmatmul.f32.gmra.mxu0 %v387_v44  ;;  %1006 = vmatmul.f32.gmra.mxu2 %v813_v45  ;;  %v655_v55 = vadd.f32 %v654_v21, %v542_v52  ;;  %v828_v44 = vld [vmem:[%s2549_s17 + $0x188] sm:$0xff] }
  0xb4   : > { %2327 = vmatmul.msk.f32.gmra.mxu3 %vm420_vm1, %v820_v47  ;;  %v402_v46 = vld [vmem:[%s2561_s23 + $0x188] sm:$0xff] }
  0xb5   : > { %v2835_v53 = vmax.f32 %v747_v50, %v1165_v51  ;;  %2294 = vmatmul.msk.f32.gmra.mxu1 %vm420_vm1, %v394_v49  ;;  %v748_v1 = vmax.f32 %v655_v55, 0.0 }
  0xb6   : > { %v959_v54 = vpop.f32.mrf.mxu2 }
  0xb7   : > { %v960_v56 = vadd.f32 %v2815_v31, %v959_v54  ;;  %v1081_v57 = vpop.f32.mrf.mxu3 }
  0xb8   : > { %v544_v58 = vpop.f32.mrf.mxu0 }
  0xb9   : > { %v1073_v61 = vadd.f32 %v1072_v24, %v960_v56  ;;  %v545_v3 = vadd.f32 %v2815_v31, %v544_v58  ;;  %v823_v58 = vld [vmem:[%s2549_s17 + $0x160] sm:$0xff] }
  0xba   : > { %v2842_v63 = vpop.f32.mrf.mxu1 }
  0xbb   : > { %v1166_v2 = vmax.f32 %v1073_v61, 0.0  ;;  %591 = vmatmul.f32.gmra.mxu0 %v389_v59  ;;  %1009 = vmatmul.f32.gmra.mxu2 %v815_v60  ;;  %v658_v6 = vadd.f32 %v657_v27, %v545_v3  ;;  %v830_v60 = vld [vmem:[%s2549_s17 + $0x198] sm:$0xff] }
  0xbc   : > { %2328 = vmatmul.msk.f32.gmra.mxu3 %vm420_vm1, %v822_v62  ;;  %v404_v62 = vld [vmem:[%s2561_s23 + $0x198] sm:$0xff] }
  0xbd   : > { %v2847_v4 = vmax.f32 %v748_v1, %v1166_v2  ;;  %2295 = vmatmul.msk.f32.gmra.mxu1 %vm420_vm1, %v396_v0  ;;  %v749_v16 = vmax.f32 %v658_v6, 0.0 }
  0xbe   : > { %v962_v5 = vpop.f32.mrf.mxu2 }
  0xbf   : > { %v963_v7 = vadd.f32 %v2815_v31, %v962_v5  ;;  %v1084_v8 = vpop.f32.mrf.mxu3 }
  0xc0   : > { %v547_v9 = vpop.f32.mrf.mxu0 }
  0xc1   : > { %v1076_v12 = vadd.f32 %v1075_v30, %v963_v7  ;;  %v548_v18 = vadd.f32 %v2815_v31, %v547_v9  ;;  %v400_v30 = vld [vmem:[%s2561_s23 + $0x178] sm:$0xff]  ;;  %v399_v9 = vld [vmem:[%s2561_s23 + $0x170] sm:$0xff] }
  0xc2   : > { %v2854_v14 = vpop.f32.mrf.mxu1 }
  0xc3   : > { %v1167_v17 = vmax.f32 %v1076_v12, 0.0  ;;  %594 = vmatmul.f32.gmra.mxu0 %v391_v10  ;;  %1012 = vmatmul.f32.gmra.mxu2 %v817_v11  ;;  %v661_v21 = vadd.f32 %v2820_v36, %v548_v18  ;;  %v825_v10 = vld [vmem:[%s2549_s17 + $0x170] sm:$0xff]  ;;  %v832_v12 = vld [vmem:[%s2549_s17 + $0x1a8] sm:$0xff] }
  0xc4   : > { %2329 = vmatmul.msk.f32.gmra.mxu3 %vm420_vm1, %v824_v13 }
  0xc5   : > { %v2859_v19 = vmax.f32 %v749_v16, %v1167_v17  ;;  %2296 = vmatmul.msk.f32.gmra.mxu1 %vm420_vm1, %v398_v15  ;;  %v750_v32 = vmax.f32 %v661_v21, 0.0  ;;  %v406_v15 = vld [vmem:[%s2561_s23 + $0x1a8] sm:$0xff] }
  0xc6   : > { %v965_v20 = vpop.f32.mrf.mxu2 }
  0xc7   : > { %v966_v22 = vadd.f32 %v2815_v31, %v965_v20  ;;  %v1087_v23 = vpop.f32.mrf.mxu3 }
  0xc8   : > { %v550_v24 = vpop.f32.mrf.mxu0 }
  0xc9   : > { %v1079_v27 = vadd.f32 %v1078_v42, %v966_v22  ;;  %v551_v34 = vadd.f32 %v2815_v31, %v550_v24  ;;  %v821_v42 = vld [vmem:[%s2549_s17 + $0x150] sm:$0xff] }
  0xca   : > { %v2867_v29 = vpop.f32.mrf.mxu1 }
  0xcb   : > { %v1168_v33 = vmax.f32 %v1079_v27, 0.0  ;;  %597 = vmatmul.f32.gmra.mxu0 %v393_v25  ;;  %1015 = vmatmul.f32.gmra.mxu2 %v819_v26  ;;  %v664_v37 = vadd.f32 %v2830_v48, %v551_v34  ;;  %v401_v25 = vld [vmem:[%s2561_s23 + $0x180] sm:$0xff] }
  0xcc   : > { %2330 = vmatmul.msk.f32.gmra.mxu3 %vm420_vm1, %v826_v28  ;;  %v827_v26 = vld [vmem:[%s2549_s17 + $0x180] sm:$0xff]  ;;  %v834_v28 = vld [vmem:[%s2549_s17 + $0x1b8] sm:$0xff] }
  0xcd   : > { %v2872_v35 = vmax.f32 %v750_v32, %v1168_v33  ;;  %2297 = vmatmul.msk.f32.gmra.mxu1 %vm420_vm1, %v400_v30  ;;  %v751_v47 = vmax.f32 %v664_v37, 0.0  ;;  %v408_v32 = vld [vmem:[%s2561_s23 + $0x1b8] sm:$0xff] }
  0xce   : > { %v968_v36 = vpop.f32.mrf.mxu2 }
  0xcf   : > { %v969_v38 = vadd.f32 %v2815_v31, %v968_v36  ;;  %v1090_v39 = vpop.f32.mrf.mxu3 }
  0xd0   : > { %v553_v40 = vpop.f32.mrf.mxu0 }
  0xd1   : > { %v1082_v43 = vadd.f32 %v1081_v57, %v969_v38  ;;  %v554_v50 = vadd.f32 %v2815_v31, %v553_v40  ;;  %v397_v57 = vld [vmem:[%s2561_s23 + $0x160] sm:$0xff] }
  0xd2   : > { %v2880_v45 = vpop.f32.mrf.mxu1 }
  0xd3   : > { %v1169_v49 = vmax.f32 %v1082_v43, 0.0  ;;  %600 = vmatmul.f32.gmra.mxu0 %v395_v41  ;;  %1018 = vmatmul.f32.gmra.mxu2 %v821_v42  ;;  %v667_v52 = vadd.f32 %v2842_v63, %v554_v50  ;;  %v403_v42 = vld [vmem:[%s2561_s23 + $0x190] sm:$0xff] }
  0xd4   : > { %2331 = vmatmul.msk.f32.gmra.mxu3 %vm420_vm1, %v828_v44  ;;  %v829_v43 = vld [vmem:[%s2549_s17 + $0x190] sm:$0xff] }
  0xd5   : > { %v2885_v48 = vmax.f32 %v751_v47, %v1169_v49  ;;  %2298 = vmatmul.msk.f32.gmra.mxu1 %vm420_vm1, %v402_v46  ;;  %v752_v0 = vmax.f32 %v667_v52, 0.0  ;;  %v836_v46 = vld [vmem:[%s2549_s17 + $0x1c8] sm:$0xff] }
  0xd6   : > { %v971_v51 = vpop.f32.mrf.mxu2  ;;  %v410_v49 = vld [vmem:[%s2561_s23 + $0x1c8] sm:$0xff] }
  0xd7   : > { %v972_v54 = vadd.f32 %v2815_v31, %v971_v51  ;;  %v1093_v55 = vpop.f32.mrf.mxu3 }
  0xd8   : > { %v556_v56 = vpop.f32.mrf.mxu0 }
  0xd9   : > { %v1085_v59 = vadd.f32 %v1084_v8, %v972_v54  ;;  %v557_v2 = vadd.f32 %v2815_v31, %v556_v56 }
  0xda   : > { %v2893_v61 = vpop.f32.mrf.mxu1 }
  0xdb   : > { %v1170_v1 = vmax.f32 %v1085_v59, 0.0  ;;  %603 = vmatmul.f32.gmra.mxu0 %v397_v57  ;;  %1021 = vmatmul.f32.gmra.mxu2 %v823_v58  ;;  %v670_v5 = vadd.f32 %v2854_v14, %v557_v2  ;;  %v405_v59 = vld [vmem:[%s2561_s23 + $0x1a0] sm:$0xff]  ;;  %v412_v2 = vld [vmem:[%s2561_s23 + $0x1d8] sm:$0xff] }
  0xdc   : > { %2332 = vmatmul.msk.f32.gmra.mxu3 %vm420_vm1, %v830_v60  ;;  %v831_v60 = vld [vmem:[%s2549_s17 + $0x1a0] sm:$0xff] }
  0xdd   : > { %v2898_v63 = vmax.f32 %v752_v0, %v1170_v1  ;;  %2299 = vmatmul.msk.f32.gmra.mxu1 %vm420_vm1, %v404_v62  ;;  %v753_v16 = vmax.f32 %v670_v5, 0.0  ;;  %v838_v0 = vld [vmem:[%s2549_s17 + $0x1d8] sm:$0xff] }
  0xde   : > { %v974_v3 = vpop.f32.mrf.mxu2 }
  0xdf   : > { %v975_v6 = vadd.f32 %v2815_v31, %v974_v3  ;;  %v1096_v7 = vpop.f32.mrf.mxu3 }
  0xe0   : > { %v559_v8 = vpop.f32.mrf.mxu0 }
  0xe1   : > { %v1088_v11 = vadd.f32 %v1087_v23, %v975_v6  ;;  %v560_v18 = vadd.f32 %v2815_v31, %v559_v8 }
  0xe2   : > { %v2906_v13 = vpop.f32.mrf.mxu1 }
  0xe3   : > { %v1171_v17 = vmax.f32 %v1088_v11, 0.0  ;;  %606 = vmatmul.f32.gmra.mxu0 %v399_v9  ;;  %1024 = vmatmul.f32.gmra.mxu2 %v825_v10  ;;  %v673_v21 = vadd.f32 %v2867_v29, %v560_v18 }
  0xe4   : > { %2333 = vmatmul.msk.f32.gmra.mxu3 %vm420_vm1, %v832_v12  ;;  %v407_v12 = vld [vmem:[%s2561_s23 + $0x1b0] sm:$0xff] }
  0xe5   : > { %v2911_v14 = vmax.f32 %v753_v16, %v1171_v17  ;;  %2300 = vmatmul.msk.f32.gmra.mxu1 %vm420_vm1, %v406_v15  ;;  %v754_v33 = vmax.f32 %v673_v21, 0.0  ;;  %v833_v15 = vld [vmem:[%s2549_s17 + $0x1b0] sm:$0xff]  ;;  %v840_v17 = vld [vmem:[%s2549_s17 + $0x1e8] sm:$0xff] }
  0xe6   : > { %v977_v20 = vpop.f32.mrf.mxu2 }
  0xe7   : > { %v978_v22 = vadd.f32 %v2815_v31, %v977_v20  ;;  %v1099_v23 = vpop.f32.mrf.mxu3  ;;  %v414_v20 = vld [vmem:[%s2561_s23 + $0x1e8] sm:$0xff] }
  0xe8   : > { %v562_v24 = vpop.f32.mrf.mxu0 }
  0xe9   : > { %v1091_v27 = vadd.f32 %v1090_v39, %v978_v22  ;;  %v563_v36 = vadd.f32 %v2815_v31, %v562_v24 }
  0xea   : > { %v2919_v30 = vpop.f32.mrf.mxu1 }
  0xeb   : > { %v1172_v34 = vmax.f32 %v1091_v27, 0.0  ;;  %609 = vmatmul.f32.gmra.mxu0 %v401_v25  ;;  %1027 = vmatmul.f32.gmra.mxu2 %v827_v26  ;;  %v676_v38 = vadd.f32 %v2880_v45, %v563_v36  ;;  %v842_v36 = vld [vmem:[%s2549_s17 + $0x1f8] sm:$0xff] }
  0xec   : > { %2334 = vmatmul.msk.f32.gmra.mxu3 %vm420_vm1, %v834_v28 }
  0xed   : > { %v2924_v29 = vmax.f32 %v754_v33, %v1172_v34  ;;  %2301 = vmatmul.msk.f32.gmra.mxu1 %vm420_vm1, %v408_v32  ;;  %v755_v50 = vmax.f32 %v676_v38, 0.0  ;;  %v409_v32 = vld [vmem:[%s2561_s23 + $0x1c0] sm:$0xff]  ;;  %v416_v38 = vld [vmem:[%s2561_s23 + $0x1f8] sm:$0xff] }
  0xee   : > { %v980_v37 = vpop.f32.mrf.mxu2  ;;  %v835_v33 = vld [vmem:[%s2549_s17 + $0x1c0] sm:$0xff] }
  0xef   : > { %v981_v39 = vadd.f32 %v2815_v31, %v980_v37  ;;  %v1102_v40 = vpop.f32.mrf.mxu3 }
  0xf0   : > { %v565_v41 = vpop.f32.mrf.mxu0 }
  0xf1   : > { %v1094_v44 = vadd.f32 %v1093_v55, %v981_v39  ;;  %v566_v52 = vadd.f32 %v2815_v31, %v565_v41 }
  0xf2   : > { %v2932_v47 = vpop.f32.mrf.mxu1 }
  0xf3   : > { %v1173_v51 = vmax.f32 %v1094_v44, 0.0  ;;  %612 = vmatmul.f32.gmra.mxu0 %v403_v42  ;;  %1030 = vmatmul.f32.gmra.mxu2 %v829_v43  ;;  %v679_v55 = vadd.f32 %v2893_v61, %v566_v52 }
  0xf4   : > { %2335 = vmatmul.msk.f32.gmra.mxu3 %vm420_vm1, %v836_v46 }
  0xf5   : > { %v2937_v45 = vmax.f32 %v755_v50, %v1173_v51  ;;  %2302 = vmatmul.msk.f32.gmra.mxu1 %vm420_vm1, %v410_v49  ;;  %v756_v3 = vmax.f32 %v679_v55, 0.0  ;;  %v411_v50 = vld [vmem:[%s2561_s23 + $0x1d0] sm:$0xff] }
  0xf6   : > { %v983_v54 = vpop.f32.mrf.mxu2  ;;  %v837_v51 = vld [vmem:[%s2549_s17 + $0x1d0] sm:$0xff] }
  0xf7   : > { %v984_v56 = vadd.f32 %v2815_v31, %v983_v54  ;;  %v1105_v57 = vpop.f32.mrf.mxu3  ;;  %v1230_v54 = vld [vmem:[%s2983_s8 + $0x8] sm:$0xff] }
  0xf8   : > { %v568_v58 = vpop.f32.mrf.mxu0 }
  0xf9   : > { %v1097_v62 = vadd.f32 %v1096_v7, %v984_v56  ;;  %v569_v6 = vadd.f32 %v2815_v31, %v568_v58  ;;  %v1229_v56 = vld [vmem:[%s2983_s8] sm:$0xff] }
  0xfa   : > { %v2945_v1 = vpop.f32.mrf.mxu1 }
  0xfb   : > { %v1174_v5 = vmax.f32 %v1097_v62, 0.0  ;;  %615 = vmatmul.f32.gmra.mxu0 %v405_v59  ;;  %1033 = vmatmul.f32.gmra.mxu2 %v831_v60  ;;  %v682_v8 = vadd.f32 %v2906_v13, %v569_v6  ;;  %v839_v6 = vld [vmem:[%s2549_s17 + $0x1e0] sm:$0xff] }
  0xfc   : > { %2336 = vmatmul.msk.f32.gmra.mxu3 %vm420_vm1, %v838_v0 }
  0xfd   : > { %v2950_v61 = vmax.f32 %v756_v3, %v1174_v5  ;;  %2303 = vmatmul.msk.f32.gmra.mxu1 %vm420_vm1, %v412_v2  ;;  %v757_v21 = vmax.f32 %v682_v8, 0.0  ;;  %v413_v5 = vld [vmem:[%s2561_s23 + $0x1e0] sm:$0xff]  ;;  %v1232_v8 = vld [vmem:[%s2983_s8 + $0x18] sm:$0xff] }
  0xfe   : > { %v986_v7 = vpop.f32.mrf.mxu2 }
  0xff   : > { %v987_v9 = vadd.f32 %v2815_v31, %v986_v7  ;;  %v1108_v10 = vpop.f32.mrf.mxu3 }
 0x100   : > { %v571_v11 = vpop.f32.mrf.mxu0 }
 0x101   : > { %v1100_v16 = vadd.f32 %v1099_v23, %v987_v9  ;;  %v572_v24 = vadd.f32 %v2815_v31, %v571_v11  ;;  %v1231_v11 = vld [vmem:[%s2983_s8 + $0x10] sm:$0xff] }
 0x102   : > { %v2958_v18 = vpop.f32.mrf.mxu1 }
 0x103   : > { %v1175_v22 = vmax.f32 %v1100_v16, 0.0  ;;  %618 = vmatmul.f32.gmra.mxu0 %v407_v12  ;;  %1036 = vmatmul.f32.gmra.mxu2 %v833_v15  ;;  %v685_v25 = vadd.f32 %v2919_v30, %v572_v24  ;;  %v415_v24 = vld [vmem:[%s2561_s23 + $0x1f0] sm:$0xff] }
 0x104   : > { %2337 = vmatmul.msk.f32.gmra.mxu3 %vm420_vm1, %v840_v17 }
 0x105   : > { %v2963_v13 = vmax.f32 %v757_v21, %v1175_v22  ;;  %2304 = vmatmul.msk.f32.gmra.mxu1 %vm420_vm1, %v414_v20  ;;  %v758_v39 = vmax.f32 %v685_v25, 0.0 }
 0x106   : > { %v989_v23 = vpop.f32.mrf.mxu2 }
 0x107   : > { %v990_v26 = vadd.f32 %v2815_v31, %v989_v23  ;;  %v1111_v27 = vpop.f32.mrf.mxu3  ;;  %v841_v23 = vld [vmem:[%s2549_s17 + $0x1f0] sm:$0xff] }
 0x108   : > { %v574_v28 = vpop.f32.mrf.mxu0 }
 0x109   : > { %v1103_v34 = vadd.f32 %v1102_v40, %v990_v26  ;;  %v575_v42 = vadd.f32 %v2815_v31, %v574_v28  ;;  %v1234_v26 = vld [vmem:[%s2983_s8 + $0x28] sm:$0xff] }
 0x10a   : > { %v2971_v37 = vpop.f32.mrf.mxu1 }
 0x10b   : > { %v1176_v41 = vmax.f32 %v1103_v34, 0.0  ;;  %621 = vmatmul.f32.gmra.mxu0 %v409_v32  ;;  %1039 = vmatmul.f32.gmra.mxu2 %v835_v33  ;;  %v688_v40 = vadd.f32 %v2932_v47, %v575_v42  ;;  %v1233_v32 = vld [vmem:[%s2983_s8 + $0x20] sm:$0xff] }
 0x10c   : > { %2338 = vmatmul.msk.f32.gmra.mxu3 %vm420_vm1, %v842_v36 }
 0x10d   : > { %v2976_v30 = vmax.f32 %v758_v39, %v1176_v41  ;;  %2305 = vmatmul.msk.f32.gmra.mxu1 %vm420_vm1, %v416_v38  ;;  %v759_v58 = vmax.f32 %v688_v40, 0.0  ;;  %v1647_v40 = vld [vmem:[%s3025_s9] sm:$0xff] }
 0x10e   : > { %v992_v43 = vpop.f32.mrf.mxu2 }
 0x10f   : > { %v993_v44 = vadd.f32 %v2815_v31, %v992_v43  ;;  %v1114_v46 = vpop.f32.mrf.mxu3  ;;  %v1648_v43 = vld [vmem:[%s3025_s9 + $0x8] sm:$0xff] }
 0x110   : > { %v577_v49 = vpop.f32.mrf.mxu0 }
 0x111   : > { %v1106_v52 = vadd.f32 %v1105_v57, %v993_v44  ;;  %v578_v60 = vadd.f32 %v2815_v31, %v577_v49  ;;  %v1236_v49 = vld [vmem:[%s2983_s8 + $0x38] sm:$0xff] }
 0x112   : > { %v2990_v55 = vpop.f32.mrf.mxu1 }
 0x113   : > { %v1177_v59 = vmax.f32 %v1106_v52, 0.0  ;;  %624 = vmatmul.f32.gmra.mxu0 %v411_v50  ;;  %1042 = vmatmul.f32.gmra.mxu2 %v837_v51  ;;  %v691_v62 = vadd.f32 %v2945_v1, %v578_v60  ;;  %v1235_v51 = vld [vmem:[%s2983_s8 + $0x30] sm:$0xff] }
 0x114   : > { %2340 = vmatmul.msk.f32.vlgmr.msrb.gmra.mxu3 %vm420_vm1, %v1230_v54 }
 0x115   : > { %v2995_v47 = vmax.f32 %v759_v58, %v1177_v59  ;;  %1405 = vmatmul.f32.vlgmr.msrb.gmra.mxu1 %v1229_v56  ;;  %v760_v12 = vmax.f32 %v691_v62, 0.0  ;;  %v1650_v62 = vld [vmem:[%s3025_s9 + $0x18] sm:$0xff] }
 0x116   : > { %v995_v57 = vpop.f32.mrf.mxu2 }
 0x117   : > { %v996_v0 = vadd.f32 %v2815_v31, %v995_v57  ;;  %v1117_v2 = vpop.f32.mrf.mxu3 }
 0x118   : > { %v580_v3 = vpop.f32.mrf.mxu0 }
 0x119   : > { %v1109_v7 = vadd.f32 %v1108_v10, %v996_v0  ;;  %v581_v16 = vadd.f32 %v2815_v31, %v580_v3  ;;  %v1649_v0 = vld [vmem:[%s3025_s9 + $0x10] sm:$0xff] }
 0x11a   : > { %v3002_v9 = vpop.f32.mrf.mxu1 }
 0x11b   : > { %v1178_v15 = vmax.f32 %v1109_v7, 0.0  ;;  %627 = vmatmul.f32.gmra.mxu0 %v413_v5  ;;  %1045 = vmatmul.f32.gmra.mxu2 %v839_v6  ;;  %v694_v17 = vadd.f32 %v2958_v18, %v581_v16  ;;  %v1238_v5 = vld [vmem:[%s2983_s8 + $0x48] sm:$0xff]  ;;  %v1237_v7 = vld [vmem:[%s2983_s8 + $0x40] sm:$0xff] }
 0x11c   : > { %2341 = vmatmul.msk.f32.gmra.mxu3 %vm420_vm1, %v1232_v8 }
 0x11d   : > { %v3007_v1 = vmax.f32 %v760_v12, %v1178_v15  ;;  %1408 = vmatmul.f32.gmra.mxu1 %v1231_v11  ;;  %v761_v33 = vmax.f32 %v694_v17, 0.0 }
 0x11e   : > { %v998_v10 = vpop.f32.mrf.mxu2 }
 0x11f   : > { %v999_v20 = vadd.f32 %v2815_v31, %v998_v10  ;;  %v1120_v21 = vpop.f32.mrf.mxu3 }
 0x120   : > { %v583_v22 = vpop.f32.mrf.mxu0 }
 0x121   : > { %v1112_v25 = vadd.f32 %v1111_v27, %v999_v20  ;;  %v584_v36 = vadd.f32 %v2815_v31, %v583_v22  ;;  %v1652_v20 = vld [vmem:[%s3025_s9 + $0x28] sm:$0xff]  ;;  %v1651_v22 = vld [vmem:[%s3025_s9 + $0x20] sm:$0xff] }
 0x122   : > { %v3014_v28 = vpop.f32.mrf.mxu1 }
 0x123   : > { %v1179_v34 = vmax.f32 %v1112_v25, 0.0  ;;  %630 = vmatmul.f32.gmra.mxu0 %v415_v24  ;;  %1048 = vmatmul.f32.gmra.mxu2 %v841_v23  ;;  %v697_v38 = vadd.f32 %v2971_v37, %v584_v36  ;;  %v1240_v23 = vld [vmem:[%s2983_s8 + $0x58] sm:$0xff] }
 0x124   : > { %2342 = vmatmul.msk.f32.gmra.mxu3 %vm420_vm1, %v1234_v26  ;;  %v1239_v26 = vld [vmem:[%s2983_s8 + $0x50] sm:$0xff] }
 0x125   : > { %v3019_v18 = vmax.f32 %v761_v33, %v1179_v34  ;;  %1411 = vmatmul.f32.gmra.mxu1 %v1233_v32  ;;  %v762_v52 = vmax.f32 %v697_v38, 0.0 }
 0x126   : > { %v1001_v27 = vpop.f32.mrf.mxu2 }
 0x127   : > { %v1002_v39 = vadd.f32 %v2815_v31, %v1001_v27  ;;  %v1123_v41 = vpop.f32.mrf.mxu3 }
 0x128   : > { %v586_v42 = vpop.f32.mrf.mxu0 }
 0x129   : > { %v1115_v44 = vadd.f32 %v1114_v46, %v1002_v39  ;;  %v587_v56 = vadd.f32 %v2815_v31, %v586_v42  ;;  %v1654_v42 = vld [vmem:[%s3025_s9 + $0x38] sm:$0xff] }
 0x12a   : > { %v3032_v50 = vpop.f32.mrf.mxu1 }
 0x12b   : > { %v1180_v54 = vmax.f32 %v1115_v44, 0.0  ;;  %2373 = vmatmul.msk.f32.vlgmr.msrb.gmra.mxu2 %vm420_vm1, %v1648_v43  ;;  %1823 = vmatmul.f32.vlgmr.msrb.gmra.mxu0 %v1647_v40  ;;  %v700_v58 = vadd.f32 %v2990_v55, %v587_v56  ;;  %v1653_v43 = vld [vmem:[%s3025_s9 + $0x30] sm:$0xff]  ;;  %v1242_v44 = vld [vmem:[%s2983_s8 + $0x68] sm:$0xff] }
 0x12c   : > { %2343 = vmatmul.msk.f32.gmra.mxu3 %vm420_vm1, %v1236_v49 }
 0x12d   : > { %v3038_v37 = vmax.f32 %v762_v52, %v1180_v54  ;;  %1414 = vmatmul.f32.gmra.mxu1 %v1235_v51  ;;  %v763_v8 = vmax.f32 %v700_v58, 0.0  ;;  %v1241_v51 = vld [vmem:[%s2983_s8 + $0x60] sm:$0xff] }
 0x12e   : > { %v1004_v46 = vpop.f32.mrf.mxu2 }
 0x12f   : > { %v1005_v59 = vadd.f32 %v2815_v31, %v1004_v46  ;;  %v1126_v60 = vpop.f32.mrf.mxu3 }
 0x130   : > { %v589_v57 = vpop.f32.mrf.mxu0 }
 0x131   : > { %v1118_v3 = vadd.f32 %v1117_v2, %v1005_v59  ;;  %v590_v12 = vadd.f32 %v2815_v31, %v589_v57 }
 0x132   : > { %v3045_v6 = vpop.f32.mrf.mxu1 }
 0x133   : > { %v1181_v11 = vmax.f32 %v1118_v3, 0.0  ;;  %2374 = vmatmul.msk.f32.gmra.mxu2 %vm420_vm1, %v1650_v62  ;;  %1826 = vmatmul.f32.gmra.mxu0 %v1649_v0  ;;  %v703_v15 = vadd.f32 %v3002_v9, %v590_v12  ;;  %v1656_v62 = vld [vmem:[%s3025_s9 + $0x48] sm:$0xff]  ;;  %v1655_v0 = vld [vmem:[%s3025_s9 + $0x40] sm:$0xff] }
 0x134   : > { %2344 = vmatmul.msk.f32.gmra.mxu3 %vm420_vm1, %v1238_v5  ;;  %v1244_v5 = vld [vmem:[%s2983_s8 + $0x78] sm:$0xff] }
 0x135   : > { %v3051_v55 = vmax.f32 %v763_v8, %v1181_v11  ;;  %1417 = vmatmul.f32.gmra.mxu1 %v1237_v7  ;;  %v764_v32 = vmax.f32 %v703_v15, 0.0  ;;  %v1243_v8 = vld [vmem:[%s2983_s8 + $0x70] sm:$0xff] }
 0x136   : > { %v1007_v2 = vpop.f32.mrf.mxu2 }
 0x137   : > { %v1008_v16 = vadd.f32 %v2815_v31, %v1007_v2  ;;  %v1129_v10 = vpop.f32.mrf.mxu3 }
 0x138   : > { %v592_v17 = vpop.f32.mrf.mxu0 }
 0x139   : > { %v1121_v24 = vadd.f32 %v1120_v21, %v1008_v16  ;;  %v593_v34 = vadd.f32 %v2815_v31, %v592_v17 }
 0x13a   : > { %v3058_v25 = vpop.f32.mrf.mxu1 }
 0x13b   : > { %v1182_v33 = vmax.f32 %v1121_v24, 0.0  ;;  %2375 = vmatmul.msk.f32.gmra.mxu2 %vm420_vm1, %v1652_v20  ;;  %1829 = vmatmul.f32.gmra.mxu0 %v1651_v22  ;;  %v706_v36 = vadd.f32 %v3014_v28, %v593_v34  ;;  %v1658_v22 = vld [vmem:[%s3025_s9 + $0x58] sm:$0xff]  ;;  %v1657_v24 = vld [vmem:[%s3025_s9 + $0x50] sm:$0xff] }
 0x13c   : > { %2345 = vmatmul.msk.f32.gmra.mxu3 %vm420_vm1, %v1240_v23 }
 0x13d   : > { %v3064_v9 = vmax.f32 %v764_v32, %v1182_v33  ;;  %1420 = vmatmul.f32.gmra.mxu1 %v1239_v26  ;;  %v765_v52 = vmax.f32 %v706_v36, 0.0  ;;  %v1246_v26 = vld [vmem:[%s2983_s8 + $0x88] sm:$0xff]  ;;  %v1245_v33 = vld [vmem:[%s2983_s8 + $0x80] sm:$0xff] }
 0x13e   : > { %v1010_v21 = vpop.f32.mrf.mxu2 }
 0x13f   : > { %v1011_v27 = vadd.f32 %v2815_v31, %v1010_v21  ;;  %v1132_v38 = vpop.f32.mrf.mxu3 }
 0x140   : > { %v595_v39 = vpop.f32.mrf.mxu0 }
 0x141   : > { %v1124_v40 = vadd.f32 %v1123_v41, %v1011_v27  ;;  %v596_v56 = vadd.f32 %v2815_v31, %v595_v39 }
 0x142   : > { %v3071_v49 = vpop.f32.mrf.mxu1 }
 0x143   : > { %v1183_v54 = vmax.f32 %v1124_v40, 0.0  ;;  %2376 = vmatmul.msk.f32.gmra.mxu2 %vm420_vm1, %v1654_v42  ;;  %1832 = vmatmul.f32.gmra.mxu0 %v1653_v43  ;;  %v709_v46 = vadd.f32 %v3032_v50, %v596_v56  ;;  %v1660_v40 = vld [vmem:[%s3025_s9 + $0x68] sm:$0xff]  ;;  %v1247_v56 = vld [vmem:[%s2983_s8 + $0x90] sm:$0xff] }
 0x144   : > { %2346 = vmatmul.msk.f32.gmra.mxu3 %vm420_vm1, %v1242_v44  ;;  %v1659_v44 = vld [vmem:[%s3025_s9 + $0x60] sm:$0xff] }
 0x145   : > { %v3077_v28 = vmax.f32 %v765_v52, %v1183_v54  ;;  %1423 = vmatmul.f32.gmra.mxu1 %v1241_v51  ;;  %v766_v11 = vmax.f32 %v709_v46, 0.0  ;;  %v1248_v52 = vld [vmem:[%s2983_s8 + $0x98] sm:$0xff] }
 0x146   : > { %v1013_v41 = vpop.f32.mrf.mxu2 }
 0x147   : > { %v1014_v58 = vadd.f32 %v2815_v31, %v1013_v41  ;;  %v1135_v59 = vpop.f32.mrf.mxu3 }
 0x148   : > { %v598_v57 = vpop.f32.mrf.mxu0 }
 0x149   : > { %v1127_v3 = vadd.f32 %v1126_v60, %v1014_v58  ;;  %v599_v2 = vadd.f32 %v2815_v31, %v598_v57 }
 0x14a   : > { %v3084_v7 = vpop.f32.mrf.mxu1 }
 0x14b   : > { %v1184_v12 = vmax.f32 %v1127_v3, 0.0  ;;  %2377 = vmatmul.msk.f32.gmra.mxu2 %vm420_vm1, %v1656_v62  ;;  %1835 = vmatmul.f32.gmra.mxu0 %v1655_v0  ;;  %v712_v15 = vadd.f32 %v3045_v6, %v599_v2 }
 0x14c   : > { %2347 = vmatmul.msk.f32.gmra.mxu3 %vm420_vm1, %v1244_v5  ;;  %v1662_v5 = vld [vmem:[%s3025_s9 + $0x78] sm:$0xff] }
 0x14d   : > { %v3090_v50 = vmax.f32 %v766_v11, %v1184_v12  ;;  %1426 = vmatmul.f32.gmra.mxu1 %v1243_v8  ;;  %v767_v34 = vmax.f32 %v712_v15, 0.0  ;;  %v1661_v8 = vld [vmem:[%s3025_s9 + $0x70] sm:$0xff]  ;;  %v1250_v12 = vld [vmem:[%s2983_s8 + $0xa8] sm:$0xff] }
 0x14e   : > { %v1016_v60 = vpop.f32.mrf.mxu2 }
 0x14f   : > { %v1017_v16 = vadd.f32 %v2815_v31, %v1016_v60  ;;  %v1138_v17 = vpop.f32.mrf.mxu3  ;;  %v1249_v60 = vld [vmem:[%s2983_s8 + $0xa0] sm:$0xff] }
 0x150   : > { %v601_v20 = vpop.f32.mrf.mxu0 }
 0x151   : > { %v1130_v23 = vadd.f32 %v1129_v10, %v1017_v16  ;;  %v602_v36 = vadd.f32 %v2815_v31, %v601_v20 }
 0x152   : > { %v3097_v32 = vpop.f32.mrf.mxu1 }
 0x153   : > { %v1185_v21 = vmax.f32 %v1130_v23, 0.0  ;;  %2378 = vmatmul.msk.f32.gmra.mxu2 %vm420_vm1, %v1658_v22  ;;  %1838 = vmatmul.f32.gmra.mxu0 %v1657_v24  ;;  %v715_v27 = vadd.f32 %v3058_v25, %v602_v36  ;;  %v1252_v36 = vld [vmem:[%s2983_s8 + $0xb8] sm:$0xff] }
 0x154   : > { %2348 = vmatmul.msk.f32.gmra.mxu3 %vm420_vm1, %v1246_v26 }
 0x155   : > { %v3103_v6 = vmax.f32 %v767_v34, %v1185_v21  ;;  %1429 = vmatmul.f32.gmra.mxu1 %v1245_v33  ;;  %v768_v41 = vmax.f32 %v715_v27, 0.0  ;;  %v1664_v33 = vld [vmem:[%s3025_s9 + $0x88] sm:$0xff]  ;;  %v1663_v34 = vld [vmem:[%s3025_s9 + $0x80] sm:$0xff]  ;;  %v1251_v27 = vld [vmem:[%s2983_s8 + $0xb0] sm:$0xff] }
 0x156   : > { %v1019_v10 = vpop.f32.mrf.mxu2 }
 0x157   : > { %v1020_v39 = vadd.f32 %v2815_v31, %v1019_v10  ;;  %v1141_v42 = vpop.f32.mrf.mxu3 }
 0x158   : > { %v604_v43 = vpop.f32.mrf.mxu0 }
 0x159   : > { %v1133_v51 = vadd.f32 %v1132_v38, %v1020_v39  ;;  %v605_v58 = vadd.f32 %v2815_v31, %v604_v43 }
 0x15a   : > { %v3110_v54 = vpop.f32.mrf.mxu1 }
 0x15b   : > { %v1186_v46 = vmax.f32 %v1133_v51, 0.0  ;;  %2379 = vmatmul.msk.f32.gmra.mxu2 %vm420_vm1, %v1660_v40  ;;  %1841 = vmatmul.f32.gmra.mxu0 %v1659_v44  ;;  %v718_v57 = vadd.f32 %v3071_v49, %v605_v58 }
 0x15c   : > { %2349 = vmatmul.msk.f32.gmra.mxu3 %vm420_vm1, %v1248_v52 }
 0x15d   : > { %v3116_v25 = vmax.f32 %v768_v41, %v1186_v46  ;;  %1432 = vmatmul.f32.gmra.mxu1 %v1247_v56  ;;  %v769_v15 = vmax.f32 %v718_v57, 0.0  ;;  %v1666_v41 = vld [vmem:[%s3025_s9 + $0x98] sm:$0xff]  ;;  %v1665_v46 = vld [vmem:[%s3025_s9 + $0x90] sm:$0xff] }
 0x15e   : > { %v1022_v38 = vpop.f32.mrf.mxu2 }
 0x15f   : > { %v1023_v62 = vadd.f32 %v2815_v31, %v1022_v38  ;;  %v1144_v0 = vpop.f32.mrf.mxu3  ;;  %v1254_v38 = vld [vmem:[%s2983_s8 + $0xc8] sm:$0xff] }
 0x160   : > { %v607_v3 = vpop.f32.mrf.mxu0 }
 0x161   : > { %v1136_v11 = vadd.f32 %v1135_v59, %v1023_v62  ;;  %v608_v20 = vadd.f32 %v2815_v31, %v607_v3  ;;  %v1253_v62 = vld [vmem:[%s2983_s8 + $0xc0] sm:$0xff] }
 0x162   : > { %v3123_v2 = vpop.f32.mrf.mxu1 }
 0x163   : > { %v1187_v16 = vmax.f32 %v1136_v11, 0.0  ;;  %2380 = vmatmul.msk.f32.gmra.mxu2 %vm420_vm1, %v1662_v5  ;;  %1844 = vmatmul.f32.gmra.mxu0 %v1661_v8  ;;  %v721_v22 = vadd.f32 %v3084_v7, %v608_v20  ;;  %v1667_v20 = vld [vmem:[%s3025_s9 + $0xa0] sm:$0xff] }
 0x164   : > { %2350 = vmatmul.msk.f32.gmra.mxu3 %vm420_vm1, %v1250_v12 }
 0x165   : > { %v3129_v49 = vmax.f32 %v769_v15, %v1187_v16  ;;  %1435 = vmatmul.f32.gmra.mxu1 %v1249_v60  ;;  %v770_v39 = vmax.f32 %v721_v22, 0.0  ;;  %v1668_v16 = vld [vmem:[%s3025_s9 + $0xa8] sm:$0xff]  ;;  %v1256_v22 = vld [vmem:[%s2983_s8 + $0xd8] sm:$0xff] }
 0x166   : > { %v1025_v59 = vpop.f32.mrf.mxu2 }
 0x167   : > { %v1026_v24 = vadd.f32 %v2815_v31, %v1025_v59  ;;  %v1147_v23 = vpop.f32.mrf.mxu3 }
 0x168   : > { %v610_v26 = vpop.f32.mrf.mxu0 }
 0x169   : > { %v1139_v21 = vadd.f32 %v1138_v17, %v1026_v24  ;;  %v611_v40 = vadd.f32 %v2815_v31, %v610_v26  ;;  %v1255_v26 = vld [vmem:[%s2983_s8 + $0xd0] sm:$0xff] }
 0x16a   : > { %v3136_v10 = vpop.f32.mrf.mxu1 }
 0x16b   : > { %v1188_v43 = vmax.f32 %v1139_v21, 0.0  ;;  %2381 = vmatmul.msk.f32.gmra.mxu2 %vm420_vm1, %v1664_v33  ;;  %1847 = vmatmul.f32.gmra.mxu0 %v1663_v34  ;;  %v724_v44 = vadd.f32 %v3097_v32, %v611_v40  ;;  %v1670_v40 = vld [vmem:[%s3025_s9 + $0xb8] sm:$0xff] }
 0x16c   : > { %2351 = vmatmul.msk.f32.gmra.mxu3 %vm420_vm1, %v1252_v36 }
 0x16d   : > { %v3142_v7 = vmax.f32 %v770_v39, %v1188_v43  ;;  %1438 = vmatmul.f32.gmra.mxu1 %v1251_v27  ;;  %v771_v3 = vmax.f32 %v724_v44, 0.0 }
 0x16e   : > { %v1028_v17 = vpop.f32.mrf.mxu2 }
 0x16f   : > { %v1029_v51 = vadd.f32 %v2815_v31, %v1028_v17  ;;  %v1150_v52 = vpop.f32.mrf.mxu3  ;;  %v1669_v17 = vld [vmem:[%s3025_s9 + $0xb0] sm:$0xff] }
 0x170   : > { %v613_v56 = vpop.f32.mrf.mxu0 }
 0x171   : > { %v1142_v58 = vadd.f32 %v1141_v42, %v1029_v51  ;;  %v614_v8 = vadd.f32 %v2815_v31, %v613_v56  ;;  %v1258_v51 = vld [vmem:[%s2983_s8 + $0xe8] sm:$0xff] }
 0x172   : > { %v3149_v57 = vpop.f32.mrf.mxu1 }
 0x173   : > { %v1189_v5 = vmax.f32 %v1142_v58, 0.0  ;;  %2382 = vmatmul.msk.f32.gmra.mxu2 %vm420_vm1, %v1666_v41  ;;  %1850 = vmatmul.f32.gmra.mxu0 %v1665_v46  ;;  %v727_v11 = vadd.f32 %v3110_v54, %v614_v8  ;;  %v1257_v41 = vld [vmem:[%s2983_s8 + $0xe0] sm:$0xff] }
 0x174   : > { %2352 = vmatmul.msk.f32.gmra.mxu3 %vm420_vm1, %v1254_v38 }
 0x175   : > { %v3155_v32 = vmax.f32 %v771_v3, %v1189_v5  ;;  %1441 = vmatmul.f32.gmra.mxu1 %v1253_v62  ;;  %v772_v33 = vmax.f32 %v727_v11, 0.0  ;;  %v1671_v11 = vld [vmem:[%s3025_s9 + $0xc0] sm:$0xff] }
 0x176   : > { %v1031_v42 = vpop.f32.mrf.mxu2 }
 0x177   : > { %v1032_v12 = vadd.f32 %v2815_v31, %v1031_v42  ;;  %v1153_v60 = vpop.f32.mrf.mxu3  ;;  %v1672_v42 = vld [vmem:[%s3025_s9 + $0xc8] sm:$0xff] }
 0x178   : > { %v616_v15 = vpop.f32.mrf.mxu0 }
 0x179   : > { %v1145_v59 = vadd.f32 %v1144_v0, %v1032_v12  ;;  %v617_v21 = vadd.f32 %v2815_v31, %v616_v15  ;;  %v1260_v15 = vld [vmem:[%s2983_s8 + $0xf8] sm:$0xff] }
 0x17a   : > { %v3162_v24 = vpop.f32.mrf.mxu1 }
 0x17b   : > { %v1190_v34 = vmax.f32 %v1145_v59, 0.0  ;;  %2383 = vmatmul.msk.f32.gmra.mxu2 %vm420_vm1, %v1668_v16  ;;  %1853 = vmatmul.f32.gmra.mxu0 %v1667_v20  ;;  %v730_v36 = vadd.f32 %v3123_v2, %v617_v21  ;;  %v3181_v2 = vld [vmem:[%s3507_s5] ss:$0 sm:$0xff]  ;;  %v1259_v20 = vld [vmem:[%s2983_s8 + $0xf0] sm:$0xff] }
 0x17c   : > { %2353 = vmatmul.msk.f32.gmra.mxu3 %vm420_vm1, %v1256_v22 }
 0x17d   : > { %v3168_v54 = vmax.f32 %v772_v33, %v1190_v34  ;;  %1444 = vmatmul.f32.gmra.mxu1 %v1255_v26  ;;  %v773_v46 = vmax.f32 %v730_v36, 0.0  ;;  %v1674_v36 = vld [vmem:[%s3025_s9 + $0xd8] sm:$0xff] }
 0x17e   : > { %v1034_v0 = vpop.f32.mrf.mxu2 }
 0x17f   : > { %v1035_v27 = vadd.f32 %v2815_v31, %v1034_v0  ;;  %v1156_v39 = vpop.f32.mrf.mxu3 }
 0x180   : > { %v619_v43 = vpop.f32.mrf.mxu0 }
 0x181   : > { %v1148_v44 = vadd.f32 %v1147_v23, %v1035_v27  ;;  %v620_v31 = vadd.f32 %v3181_v2, %v619_v43  ;;  %v1673_v27 = vld [vmem:[%s3025_s9 + $0xd0] sm:$0xff] }
 0x182   : > { %v3175_v56 = vpop.f32.mrf.mxu1 }
 0x183   : > { %v1191_v58 = vmax.f32 %v1148_v44, 0.0  ;;  %2384 = vmatmul.msk.f32.gmra.mxu2 %vm420_vm1, %v1670_v40  ;;  %1856 = vmatmul.f32.gmra.mxu0 %v1669_v17  ;;  %v733_v62 = vadd.f32 %v3136_v10, %v620_v31  ;;  %v1262_v40 = vld [vmem:[%s2983_s8 + $0x108] sm:$0xff]  ;;  %v1261_v44 = vld [vmem:[%s2983_s8 + $0x100] sm:$0xff] }
 0x184   : > { %2354 = vmatmul.msk.f32.gmra.mxu3 %vm420_vm1, %v1258_v51 }
 0x185   : > { %v3186_v23 = vmax.f32 %v773_v46, %v1191_v58  ;;  %1447 = vmatmul.f32.gmra.mxu1 %v1257_v41  ;;  %v774_v59 = vmax.f32 %v733_v62, 0.0 }
 0x186   : > { %v1037_v38 = vpop.f32.mrf.mxu2 }
 0x187   : > { %v1038_v3 = vadd.f32 %v3181_v2, %v1037_v38  ;;  %v1159_v5 = vpop.f32.mrf.mxu3 }
 0x188   : > { %v622_v8 = vpop.f32.mrf.mxu0 }
 0x189   : > { %v1151_v12 = vadd.f32 %v1150_v52, %v1038_v3  ;;  %v623_v26 = vadd.f32 %v3181_v2, %v622_v8  ;;  %v1676_v3 = vld [vmem:[%s3025_s9 + $0xe8] sm:$0xff]  ;;  %v1675_v8 = vld [vmem:[%s3025_s9 + $0xe0] sm:$0xff] }
 0x18a   : > { %v3193_v16 = vpop.f32.mrf.mxu1 }
 0x18b   : > { %v1192_v22 = vmax.f32 %v1151_v12, 0.0  ;;  %2385 = vmatmul.msk.f32.gmra.mxu2 %vm420_vm1, %v1672_v42  ;;  %1859 = vmatmul.f32.gmra.mxu0 %v1671_v11  ;;  %v736_v33 = vadd.f32 %v3149_v57, %v623_v26  ;;  %v1264_v11 = vld [vmem:[%s2983_s8 + $0x118] sm:$0xff] }
 0x18c   : > { %2355 = vmatmul.msk.f32.gmra.mxu3 %vm420_vm1, %v1260_v15  ;;  %v1263_v15 = vld [vmem:[%s2983_s8 + $0x110] sm:$0xff] }
 0x18d   : > { %v3199_v10 = vmax.f32 %v774_v59, %v1192_v22  ;;  %1450 = vmatmul.f32.gmra.mxu1 %v1259_v20  ;;  %v775_v51 = vmax.f32 %v736_v33, 0.0 }
 0x18e   : > { %v1040_v52 = vpop.f32.mrf.mxu2 }
 0x18f   : > { %v1041_v34 = vadd.f32 %v3181_v2, %v1040_v52  ;;  %v1162_v21 = vpop.f32.mrf.mxu3 }
 0x190   : > { %v625_v0 = vpop.f32.mrf.mxu0 }
 0x191   : > { %v1154_v43 = vadd.f32 %v1153_v60, %v1041_v34  ;;  %v626_v46 = vadd.f32 %v3181_v2, %v625_v0  ;;  %v1678_v0 = vld [vmem:[%s3025_s9 + $0xf8] sm:$0xff] }
 0x192   : > { %v1406_v17 = vpop.f32.mrf.mxu1 }
 0x193   : > { %v1193_v41 = vmax.f32 %v1154_v43, 0.0  ;;  %2386 = vmatmul.msk.f32.gmra.mxu2 %vm420_vm1, %v1674_v36  ;;  %1862 = vmatmul.f32.gmra.mxu0 %v1673_v27  ;;  %v739_v58 = vadd.f32 %v3162_v24, %v626_v46  ;;  %v1677_v36 = vld [vmem:[%s3025_s9 + $0xf0] sm:$0xff]  ;;  %v1266_v43 = vld [vmem:[%s2983_s8 + $0x128] sm:$0xff] }
 0x194   : > { %2356 = vmatmul.msk.f32.gmra.mxu3 %vm420_vm1, %v1262_v40 }
 0x195   : > { %v3210_v57 = vmax.f32 %v775_v51, %v1193_v41  ;;  %1453 = vmatmul.f32.gmra.mxu1 %v1261_v44  ;;  %v776_v20 = vmax.f32 %v739_v58, 0.0  ;;  %v1265_v44 = vld [vmem:[%s2983_s8 + $0x120] sm:$0xff] }
 0x196   : > { %v1043_v60 = vpop.f32.mrf.mxu2 }
 0x197   : > { %v1044_v31 = vadd.f32 %v3181_v2, %v1043_v60  ;;  %v1519_v38 = vpop.f32.mrf.mxu3 }
 0x198   : > { %v628_v62 = vpop.f32.mrf.mxu0 }
 0x199   : > { %v1157_v42 = vadd.f32 %v1156_v39, %v1044_v31  ;;  %v629_v22 = vadd.f32 %v3181_v2, %v628_v62  ;;  %v1680_v62 = vld [vmem:[%s3025_s9 + $0x108] sm:$0xff] }
 0x19a   : > { %v1409_v12 = vpop.f32.mrf.mxu1 }
 0x19b   : > { %v1194_v59 = vmax.f32 %v1157_v42, 0.0  ;;  %2387 = vmatmul.msk.f32.gmra.mxu2 %vm420_vm1, %v1676_v3  ;;  %1865 = vmatmul.f32.gmra.mxu0 %v1675_v8  ;;  %v742_v26 = vadd.f32 %v3175_v56, %v629_v22  ;;  %v1679_v8 = vld [vmem:[%s3025_s9 + $0x100] sm:$0xff]  ;;  %v1407_v42 = vadd.f32 %v3181_v2, %v1406_v17 }
 0x19c   : > { %2357 = vmatmul.msk.f32.gmra.mxu3 %vm420_vm1, %v1264_v11 }
 0x19d   : > { %v3221_v24 = vmax.f32 %v776_v20, %v1194_v59  ;;  %1456 = vmatmul.f32.gmra.mxu1 %v1263_v15  ;;  %v777_v51 = vmax.f32 %v742_v26, 0.0  ;;  %v1268_v15 = vld [vmem:[%s2983_s8 + $0x138] sm:$0xff]  ;;  %v1267_v59 = vld [vmem:[%s2983_s8 + $0x130] sm:$0xff]  ;;  %v1520_v17 = vadd.f32 %v1519_v38, %v1407_v42  ;;  %v1684_v42 = vld [vmem:[%s3025_s9 + $0x128] sm:$0xff] }
 0x19e   : > { %v1046_v39 = vpop.f32.mrf.mxu2 }
 0x19f   : > { %v1047_v52 = vadd.f32 %v3181_v2, %v1046_v39  ;;  %v1522_v33 = vpop.f32.mrf.mxu3 }
 0x1a0   : > { %v631_v34 = vpop.f32.mrf.mxu0 }
 0x1a1   : > { %v1160_v27 = vadd.f32 %v1159_v5, %v1047_v52  ;;  %v632_v46 = vadd.f32 %v3181_v2, %v631_v34 }
 0x1a2   : > { %v1412_v40 = vpop.f32.mrf.mxu1 }
 0x1a3   : > { %v1195_v41 = vmax.f32 %v1160_v27, 0.0  ;;  %2388 = vmatmul.msk.f32.gmra.mxu2 %vm420_vm1, %v1678_v0  ;;  %1868 = vmatmul.f32.gmra.mxu0 %v1677_v36  ;;  %v745_v60 = vadd.f32 %v3193_v16, %v632_v46  ;;  %v1682_v0 = vld [vmem:[%s3025_s9 + $0x118] sm:$0xff]  ;;  %v1681_v27 = vld [vmem:[%s3025_s9 + $0x110] sm:$0xff] }
 0x1a4   : > { %2358 = vmatmul.msk.f32.gmra.mxu3 %vm420_vm1, %v1266_v43  ;;  %v1615_v43 = vmax.f32 %v1520_v17, 0.0 }
 0x1a5   : > { %v3232_v56 = vmax.f32 %v777_v51, %v1195_v41  ;;  %1459 = vmatmul.f32.gmra.mxu1 %v1265_v44  ;;  %v778_v22 = vmax.f32 %v745_v60, 0.0  ;;  %v1410_v44 = vadd.f32 %v3181_v2, %v1409_v12  ;;  %v1270_v41 = vld [vmem:[%s2983_s8 + $0x148] sm:$0xff] }
 0x1a6   : > { %v1049_v5 = vpop.f32.mrf.mxu2 }
 0x1a7   : > { %v1050_v58 = vadd.f32 %v3181_v2, %v1049_v5  ;;  %v1525_v31 = vpop.f32.mrf.mxu3  ;;  %v1269_v5 = vld [vmem:[%s2983_s8 + $0x140] sm:$0xff]  ;;  %v1523_v12 = vadd.f32 %v1522_v33, %v1410_v44  ;;  %v1271_v33 = vld [vmem:[%s2983_s8 + $0x150] sm:$0xff] }
 0x1a8   : > { %v1824_v3 = vpop.f32.mrf.mxu0 }
 0x1a9   : > { %v1163_v11 = vadd.f32 %v1162_v21, %v1050_v58  ;;  %v1825_v16 = vadd.f32 %v3181_v2, %v1824_v3 }
 0x1aa   : > { %v3240_v20 = vpop.f32.mrf.mxu1 }
 0x1ab   : > { %v1196_v39 = vmax.f32 %v1163_v11, 0.0  ;;  %2389 = vmatmul.msk.f32.gmra.mxu2 %vm420_vm1, %v1680_v62  ;;  %1871 = vmatmul.f32.gmra.mxu0 %v1679_v8 }
 0x1ac   : > { %2359 = vmatmul.msk.f32.gmra.mxu3 %vm420_vm1, %v1268_v15  ;;  %v1683_v15 = vld [vmem:[%s3025_s9 + $0x120] sm:$0xff] }
 0x1ad   : > { %v3246_v21 = vmax.f32 %v778_v22, %v1196_v39  ;;  %1462 = vmatmul.f32.gmra.mxu1 %v1267_v59  ;;  %v1616_v59 = vmax.f32 %v1523_v12, 0.0  ;;  %v1413_v22 = vadd.f32 %v3181_v2, %v1412_v40 }
 0x1ae   : > { %v1937_v26 = vpop.f32.mrf.mxu2 }
 0x1af   : > { %v1528_v52 = vpop.f32.mrf.mxu3  ;;  %v1938_v34 = vadd.f32 %v1937_v26, %v1825_v16  ;;  %v1272_v16 = vld [vmem:[%s2983_s8 + $0x158] sm:$0xff] }
 0x1b0   : > { %v1827_v36 = vpop.f32.mrf.mxu0 }
 0x1b1   : > { %v2033_v51 = vmax.f32 %v1938_v34, 0.0  ;;  %v1828_v38 = vadd.f32 %v3181_v2, %v1827_v36  ;;  %v1526_v34 = vadd.f32 %v1525_v31, %v1413_v22  ;;  %v1687_v22 = vld [vmem:[%s3025_s9 + $0x140] sm:$0xff] }
 0x1b2   : > { %v1418_v46 = vpop.f32.mrf.mxu1 }
 0x1b3   : > { %v2065_v60 = vmax.f32 %v1615_v43, %v2033_v51  ;;  %2390 = vmatmul.msk.f32.gmra.mxu2 %vm420_vm1, %v1682_v0  ;;  %1874 = vmatmul.f32.gmra.mxu0 %v1681_v27  ;;  %v1686_v43 = vld [vmem:[%s3025_s9 + $0x138] sm:$0xff]  ;;  %v1685_v51 = vld [vmem:[%s3025_s9 + $0x130] sm:$0xff] }
 0x1b4   : > { %2360 = vmatmul.msk.f32.gmra.mxu3 %vm420_vm1, %v1270_v41  ;;  %v1617_v41 = vmax.f32 %v1526_v34, 0.0 }
 0x1b5   : > { %v2097_v58 = vmax.f32 %v2835_v53, %v2065_v60  ;;  %1465 = vmatmul.f32.gmra.mxu1 %v1269_v5  ;;  %v1416_v5 = vadd.f32 %v3181_v2, %v3240_v20 }
 0x1b6   : > { %v1940_v62 = vpop.f32.mrf.mxu2 }
 0x1b7   : > { %2130 = vst.msk [vmem:[%s3259_s15] sm:$0xff] %vm2129_vm2, %v2097_v58  ;;  %v1531_v3 = vpop.f32.mrf.mxu3  ;;  %v1941_v8 = vadd.f32 %v1940_v62, %v1828_v38  ;;  %v1274_v38 = vld [vmem:[%s2983_s8 + $0x168] sm:$0xff]  ;;  %v1529_v62 = vadd.f32 %v1528_v52, %v1416_v5  ;;  %v1275_v52 = vld [vmem:[%s2983_s8 + $0x170] sm:$0xff] }
 0x1b8   : > { %v1830_v11 = vpop.f32.mrf.mxu0 }
 0x1b9   : > { %v2034_v39 = vmax.f32 %v1941_v8, 0.0  ;;  %v1831_v26 = vadd.f32 %v3181_v2, %v1830_v11 }
 0x1ba   : > { %v1421_v17 = vpop.f32.mrf.mxu1 }
 0x1bb   : > { %v2066_v53 = vmax.f32 %v1616_v59, %v2034_v39  ;;  %2391 = vmatmul.msk.f32.gmra.mxu2 %vm420_vm1, %v1684_v42  ;;  %1877 = vmatmul.f32.gmra.mxu0 %v1683_v15  ;;  %v1688_v15 = vld [vmem:[%s3025_s9 + $0x148] sm:$0xff]  ;;  %v1618_v39 = vmax.f32 %v1529_v62, 0.0 }
 0x1bc   : > { %2361 = vmatmul.msk.f32.gmra.mxu3 %vm420_vm1, %v1272_v16  ;;  %v1419_v16 = vadd.f32 %v3181_v2, %v1418_v46 }
 0x1bd   : > { %v2098_v0 = vmax.f32 %v2847_v4, %v2066_v53  ;;  %1468 = vmatmul.f32.gmra.mxu1 %v1271_v33  ;;  %v1273_v4 = vld [vmem:[%s2983_s8 + $0x160] sm:$0xff]  ;;  %v1276_v53 = vld [vmem:[%s2983_s8 + $0x178] sm:$0xff] }
 0x1be   : > { %v1943_v40 = vpop.f32.mrf.mxu2 }
 0x1bf   : > { %2131 = vst.msk [vmem:[%s3259_s15 + $0x8] sm:$0xff] %vm2129_vm2, %v2098_v0  ;;  %v1534_v36 = vpop.f32.mrf.mxu3  ;;  %v1944_v27 = vadd.f32 %v1943_v40, %v1831_v26  ;;  %v1532_v0 = vadd.f32 %v1531_v3, %v1419_v16  ;;  %v1277_v3 = vld [vmem:[%s2983_s8 + $0x180] sm:$0xff] }
 0x1c0   : > { %v1833_v44 = vpop.f32.mrf.mxu0 }
 0x1c1   : > { %v2035_v60 = vmax.f32 %v1944_v27, 0.0  ;;  %v1834_v58 = vadd.f32 %v3181_v2, %v1833_v44  ;;  %v1690_v44 = vld [vmem:[%s3025_s9 + $0x158] sm:$0xff]  ;;  %v1619_v5 = vmax.f32 %v1532_v0, 0.0 }
 0x1c2   : > { %v1424_v31 = vpop.f32.mrf.mxu1 }
 0x1c3   : > { %v2067_v12 = vmax.f32 %v1617_v41, %v2035_v60  ;;  %2392 = vmatmul.msk.f32.gmra.mxu2 %vm420_vm1, %v1686_v43  ;;  %1880 = vmatmul.f32.gmra.mxu0 %v1685_v51  ;;  %v1689_v41 = vld [vmem:[%s3025_s9 + $0x150] sm:$0xff]  ;;  %v1422_v60 = vadd.f32 %v3181_v2, %v1421_v17  ;;  %v1425_v16 = vadd.f32 %v3181_v2, %v1424_v31 }
 0x1c4   : > { %2362 = vmatmul.msk.f32.gmra.mxu3 %vm420_vm1, %v1274_v38 }
 0x1c5   : > { %v2099_v8 = vmax.f32 %v2859_v19, %v2067_v12  ;;  %1471 = vmatmul.f32.gmra.mxu1 %v1273_v4  ;;  %v1278_v4 = vld [vmem:[%s2983_s8 + $0x188] sm:$0xff]  ;;  %v1535_v62 = vadd.f32 %v1534_v36, %v1422_v60  ;;  %v1279_v36 = vld [vmem:[%s2983_s8 + $0x190] sm:$0xff] }
 0x1c6   : > { %v1946_v20 = vpop.f32.mrf.mxu2 }
 0x1c7   : > { %2132 = vst.msk [vmem:[%s3259_s15 + $0x10] sm:$0xff] %vm2129_vm2, %v2099_v8  ;;  %v1537_v42 = vpop.f32.mrf.mxu3  ;;  %v1947_v11 = vadd.f32 %v1946_v20, %v1834_v58 }
 0x1c8   : > { %v1836_v59 = vpop.f32.mrf.mxu0 }
 0x1c9   : > { %v2036_v33 = vmax.f32 %v1947_v11, 0.0  ;;  %v1837_v34 = vadd.f32 %v3181_v2, %v1836_v59 }
 0x1ca   : > { %v1427_v26 = vpop.f32.mrf.mxu1 }
 0x1cb   : > { %v2068_v19 = vmax.f32 %v1618_v39, %v2036_v33  ;;  %2393 = vmatmul.msk.f32.gmra.mxu2 %vm420_vm1, %v1688_v15  ;;  %1883 = vmatmul.f32.gmra.mxu0 %v1687_v22  ;;  %v1692_v15 = vld [vmem:[%s3025_s9 + $0x168] sm:$0xff]  ;;  %v1691_v22 = vld [vmem:[%s3025_s9 + $0x160] sm:$0xff]  ;;  %v1620_v39 = vmax.f32 %v1535_v62, 0.0 }
 0x1cc   : > { %2363 = vmatmul.msk.f32.gmra.mxu3 %vm420_vm1, %v1276_v53  ;;  %v1280_v53 = vld [vmem:[%s2983_s8 + $0x198] sm:$0xff] }
 0x1cd   : > { %v2100_v40 = vmax.f32 %v2872_v35, %v2068_v19  ;;  %1474 = vmatmul.f32.gmra.mxu1 %v1275_v52 }
 0x1ce   : > { %v1949_v46 = vpop.f32.mrf.mxu2 }
 0x1cf   : > { %2133 = vst.msk [vmem:[%s3259_s15 + $0x18] sm:$0xff] %vm2129_vm2, %v2100_v40  ;;  %v1540_v27 = vpop.f32.mrf.mxu3  ;;  %v1950_v43 = vadd.f32 %v1949_v46, %v1837_v34  ;;  %v1538_v34 = vadd.f32 %v1537_v42, %v1425_v16  ;;  %v1281_v42 = vld [vmem:[%s2983_s8 + $0x1a0] sm:$0xff]  ;;  %v1284_v16 = vld [vmem:[%s2983_s8 + $0x1b8] sm:$0xff] }
 0x1d0   : > { %v1839_v51 = vpop.f32.mrf.mxu0 }
 0x1d1   : > { %v2037_v38 = vmax.f32 %v1950_v43, 0.0  ;;  %v1840_v58 = vadd.f32 %v3181_v2, %v1839_v51  ;;  %v1694_v43 = vld [vmem:[%s3025_s9 + $0x178] sm:$0xff]  ;;  %v1693_v51 = vld [vmem:[%s3025_s9 + $0x170] sm:$0xff] }
 0x1d2   : > { %v1430_v12 = vpop.f32.mrf.mxu1 }
 0x1d3   : > { %v2069_v35 = vmax.f32 %v1619_v5, %v2037_v38  ;;  %2394 = vmatmul.msk.f32.gmra.mxu2 %vm420_vm1, %v1690_v44  ;;  %1886 = vmatmul.f32.gmra.mxu0 %v1689_v41  ;;  %v1621_v41 = vmax.f32 %v1538_v34, 0.0  ;;  %v1428_v5 = vadd.f32 %v3181_v2, %v1427_v26  ;;  %v1282_v38 = vld [vmem:[%s2983_s8 + $0x1a8] sm:$0xff] }
 0x1d4   : > { %2364 = vmatmul.msk.f32.gmra.mxu3 %vm420_vm1, %v1278_v4 }
 0x1d5   : > { %v2101_v8 = vmax.f32 %v2885_v48, %v2069_v35  ;;  %1477 = vmatmul.f32.gmra.mxu1 %v1277_v3  ;;  %v1541_v35 = vadd.f32 %v1540_v27, %v1428_v5  ;;  %v1283_v27 = vld [vmem:[%s2983_s8 + $0x1b0] sm:$0xff] }
 0x1d6   : > { %v1952_v17 = vpop.f32.mrf.mxu2 }
 0x1d7   : > { %2134 = vst.msk [vmem:[%s3259_s15 + $0x20] sm:$0xff] %vm2129_vm2, %v2101_v8  ;;  %v1543_v20 = vpop.f32.mrf.mxu3  ;;  %v1953_v11 = vadd.f32 %v1952_v17, %v1840_v58  ;;  %v1696_v17 = vld [vmem:[%s3025_s9 + $0x188] sm:$0xff] }
 0x1d8   : > { %v1842_v59 = vpop.f32.mrf.mxu0 }
 0x1d9   : > { %v2038_v33 = vmax.f32 %v1953_v11, 0.0  ;;  %v1843_v19 = vadd.f32 %v3181_v2, %v1842_v59  ;;  %v1622_v59 = vmax.f32 %v1541_v35, 0.0  ;;  %v1700_v35 = vld [vmem:[%s3025_s9 + $0x1a8] sm:$0xff] }
 0x1da   : > { %v1433_v52 = vpop.f32.mrf.mxu1 }
 0x1db   : > { %v2070_v48 = vmax.f32 %v1620_v39, %v2038_v33  ;;  %2395 = vmatmul.msk.f32.gmra.mxu2 %vm420_vm1, %v1692_v15  ;;  %1889 = vmatmul.f32.gmra.mxu0 %v1691_v22  ;;  %v1695_v15 = vld [vmem:[%s3025_s9 + $0x180] sm:$0xff]  ;;  %v1431_v22 = vadd.f32 %v3181_v2, %v1430_v12 }
 0x1dc   : > { %2365 = vmatmul.msk.f32.gmra.mxu3 %vm420_vm1, %v1280_v53 }
 0x1dd   : > { %v2102_v0 = vmax.f32 %v2898_v63, %v2070_v48  ;;  %1480 = vmatmul.f32.gmra.mxu1 %v1279_v36  ;;  %v1544_v36 = vadd.f32 %v1543_v20, %v1431_v22  ;;  %v1285_v20 = vld [vmem:[%s2983_s8 + $0x1c0] sm:$0xff] }
 0x1de   : > { %v1955_v31 = vpop.f32.mrf.mxu2 }
 0x1df   : > { %2135 = vst.msk [vmem:[%s3259_s15 + $0x28] sm:$0xff] %vm2129_vm2, %v2102_v0  ;;  %v1546_v40 = vpop.f32.mrf.mxu3  ;;  %v1956_v46 = vadd.f32 %v1955_v31, %v1843_v19  ;;  %v1698_v0 = vld [vmem:[%s3025_s9 + $0x198] sm:$0xff] }
 0x1e0   : > { %v1845_v44 = vpop.f32.mrf.mxu0 }
 0x1e1   : > { %v2039_v60 = vmax.f32 %v1956_v46, 0.0  ;;  %v1846_v3 = vadd.f32 %v3181_v2, %v1845_v44  ;;  %v1697_v46 = vld [vmem:[%s3025_s9 + $0x190] sm:$0xff]  ;;  %v1434_v44 = vadd.f32 %v3181_v2, %v1433_v52 }
 0x1e2   : > { %v1436_v4 = vpop.f32.mrf.mxu1 }
 0x1e3   : > { %v2071_v63 = vmax.f32 %v1621_v41, %v2039_v60  ;;  %2396 = vmatmul.msk.f32.gmra.mxu2 %vm420_vm1, %v1694_v43  ;;  %1892 = vmatmul.f32.gmra.mxu0 %v1693_v51  ;;  %v1623_v43 = vmax.f32 %v1544_v36, 0.0  ;;  %v1286_v41 = vld [vmem:[%s2983_s8 + $0x1c8] sm:$0xff] }
 0x1e4   : > { %2366 = vmatmul.msk.f32.gmra.mxu3 %vm420_vm1, %v1282_v38  ;;  %v1547_v38 = vadd.f32 %v1546_v40, %v1434_v44  ;;  %v1287_v40 = vld [vmem:[%s2983_s8 + $0x1d0] sm:$0xff] }
 0x1e5   : > { %v2103_v58 = vmax.f32 %v2911_v14, %v2071_v63  ;;  %1483 = vmatmul.f32.gmra.mxu1 %v1281_v42 }
 0x1e6   : > { %v1958_v26 = vpop.f32.mrf.mxu2 }
 0x1e7   : > { %2136 = vst.msk [vmem:[%s3259_s15 + $0x30] sm:$0xff] %vm2129_vm2, %v2103_v58  ;;  %v1549_v62 = vpop.f32.mrf.mxu3  ;;  %v1959_v8 = vadd.f32 %v1958_v26, %v1846_v3  ;;  %v1699_v26 = vld [vmem:[%s3025_s9 + $0x1a0] sm:$0xff] }
 0x1e8   : > { %v1848_v11 = vpop.f32.mrf.mxu0 }
 0x1e9   : > { %v2040_v39 = vmax.f32 %v1959_v8, 0.0  ;;  %v1849_v53 = vadd.f32 %v3181_v2, %v1848_v11  ;;  %v1624_v8 = vmax.f32 %v1547_v38, 0.0  ;;  %v1703_v38 = vld [vmem:[%s3025_s9 + $0x1c0] sm:$0xff] }
 0x1ea   : > { %v1439_v33 = vpop.f32.mrf.mxu1 }
 0x1eb   : > { %v2072_v14 = vmax.f32 %v1622_v59, %v2040_v39  ;;  %2397 = vmatmul.msk.f32.gmra.mxu2 %vm420_vm1, %v1696_v17  ;;  %1895 = vmatmul.f32.gmra.mxu0 %v1695_v15  ;;  %v1437_v17 = vadd.f32 %v3181_v2, %v1436_v4  ;;  %v1288_v15 = vld [vmem:[%s2983_s8 + $0x1d8] sm:$0xff] }
 0x1ec   : > { %2367 = vmatmul.msk.f32.gmra.mxu3 %vm420_vm1, %v1284_v16 }
 0x1ed   : > { %v2104_v48 = vmax.f32 %v2924_v29, %v2072_v14  ;;  %1486 = vmatmul.f32.gmra.mxu1 %v1283_v27  ;;  %v1550_v39 = vadd.f32 %v1549_v62, %v1437_v17  ;;  %v1289_v62 = vld [vmem:[%s2983_s8 + $0x1e0] sm:$0xff] }
 0x1ee   : > { %v1961_v12 = vpop.f32.mrf.mxu2 }
 0x1ef   : > { %2137 = vst.msk [vmem:[%s3259_s15 + $0x38] sm:$0xff] %vm2129_vm2, %v2104_v48  ;;  %v1552_v19 = vpop.f32.mrf.mxu3  ;;  %v1962_v34 = vadd.f32 %v1961_v12, %v1849_v53  ;;  %v1702_v53 = vld [vmem:[%s3025_s9 + $0x1b8] sm:$0xff]  ;;  %v1701_v48 = vld [vmem:[%s3025_s9 + $0x1b0] sm:$0xff]  ;;  %v1625_v12 = vmax.f32 %v1550_v39, 0.0 }
 0x1f0   : > { %v1851_v31 = vpop.f32.mrf.mxu0 }
 0x1f1   : > { %v2041_v51 = vmax.f32 %v1962_v34, 0.0  ;;  %v1852_v60 = vadd.f32 %v3181_v2, %v1851_v31  ;;  %v1440_v34 = vadd.f32 %v3181_v2, %v1439_v33  ;;  %v1290_v31 = vld [vmem:[%s2983_s8 + $0x1e8] sm:$0xff] }
 0x1f2   : > { %v1442_v5 = vpop.f32.mrf.mxu1 }
 0x1f3   : > { %v2073_v29 = vmax.f32 %v1623_v43, %v2041_v51  ;;  %2398 = vmatmul.msk.f32.gmra.mxu2 %vm420_vm1, %v1698_v0  ;;  %1898 = vmatmul.f32.gmra.mxu0 %v1697_v46  ;;  %v1553_v44 = vadd.f32 %v1552_v19, %v1440_v34  ;;  %v1291_v19 = vld [vmem:[%s2983_s8 + $0x1f0] sm:$0xff] }
 0x1f4   : > { %2368 = vmatmul.msk.f32.gmra.mxu3 %vm420_vm1, %v1286_v41 }
 0x1f5   : > { %v2105_v42 = vmax.f32 %v2937_v45, %v2073_v29  ;;  %1489 = vmatmul.f32.gmra.mxu1 %v1285_v20  ;;  %v1704_v29 = vld [vmem:[%s3025_s9 + $0x1c8] sm:$0xff] }
 0x1f6   : > { %v1964_v52 = vpop.f32.mrf.mxu2 }
 0x1f7   : > { %2138 = vst.msk [vmem:[%s3259_s15 + $0x40] sm:$0xff] %vm2129_vm2, %v2105_v42  ;;  %v1555_v63 = vpop.f32.mrf.mxu3  ;;  %v1965_v3 = vadd.f32 %v1964_v52, %v1852_v60  ;;  %v1626_v42 = vmax.f32 %v1553_v44, 0.0  ;;  %v1443_v52 = vadd.f32 %v3181_v2, %v1442_v5 }
 0x1f8   : > { %v1854_v58 = vpop.f32.mrf.mxu0 }
 0x1f9   : > { %v2042_v11 = vmax.f32 %v1965_v3, 0.0  ;;  %v1855_v22 = vadd.f32 %v3181_v2, %v1854_v58 }
 0x1fa   : > { %v1445_v59 = vpop.f32.mrf.mxu1 }
 0x1fb   : > { %v2074_v45 = vmax.f32 %v1624_v8, %v2042_v11  ;;  %2399 = vmatmul.msk.f32.gmra.mxu2 %vm420_vm1, %v1700_v35  ;;  %1901 = vmatmul.f32.gmra.mxu0 %v1699_v26  ;;  %v1292_v35 = vld [vmem:[%s2983_s8 + $0x1f8] sm:$0xff]  ;;  %v1556_v8 = vadd.f32 %v1555_v63, %v1443_v52  ;;  %v1709_v63 = vld [vmem:[%s3025_s9 + $0x1f0] sm:$0xff] }
 0x1fc   : > { %2369 = vmatmul.msk.f32.gmra.mxu3 %vm420_vm1, %v1288_v15 }
 0x1fd   : > { %v2106_v16 = vmax.f32 %v2950_v61, %v2074_v45  ;;  %1492 = vmatmul.f32.gmra.mxu1 %v1287_v40  ;;  %v1706_v40 = vld [vmem:[%s3025_s9 + $0x1d8] sm:$0xff]  ;;  %v1627_v39 = vmax.f32 %v1556_v8, 0.0 }
 0x1fe   : > { %v1967_v4 = vpop.f32.mrf.mxu2 }
 0x1ff   : > { %2139 = vst.msk [vmem:[%s3259_s15 + $0x48] sm:$0xff] %vm2129_vm2, %v2106_v16  ;;  %v1558_v27 = vpop.f32.mrf.mxu3  ;;  %v1968_v14 = vadd.f32 %v1967_v4, %v1855_v22  ;;  %v1705_v22 = vld [vmem:[%s3025_s9 + $0x1d0] sm:$0xff]  ;;  %v1446_v16 = vadd.f32 %v3181_v2, %v1445_v59 }
 0x200   : > { %v1857_v36 = vpop.f32.mrf.mxu0 }
 0x201   : > { %v2043_v0 = vmax.f32 %v1968_v14, 0.0  ;;  %v1858_v43 = vadd.f32 %v3181_v2, %v1857_v36  ;;  %v1710_v14 = vld [vmem:[%s3025_s9 + $0x1f8] sm:$0xff] }
 0x202   : > { %v1448_v46 = vpop.f32.mrf.mxu1 }
 0x203   : > { %v2075_v61 = vmax.f32 %v1625_v12, %v2043_v0  ;;  %2400 = vmatmul.msk.f32.gmra.mxu2 %vm420_vm1, %v1702_v53  ;;  %1904 = vmatmul.f32.gmra.mxu0 %v1701_v48  ;;  %v1559_v48 = vadd.f32 %v1558_v27, %v1446_v16  ;;  %v1449_v44 = vadd.f32 %v3181_v2, %v1448_v46 }
 0x204   : > { %2370 = vmatmul.msk.f32.gmra.mxu3 %vm420_vm1, %v1290_v31  ;;  %v1708_v31 = vld [vmem:[%s3025_s9 + $0x1e8] sm:$0xff] }
 0x205   : > { %v2107_v51 = vmax.f32 %v2963_v13, %v2075_v61  ;;  %1495 = vmatmul.f32.gmra.mxu1 %v1289_v62  ;;  %v1707_v61 = vld [vmem:[%s3025_s9 + $0x1e0] sm:$0xff] }
 0x206   : > { %v1970_v33 = vpop.f32.mrf.mxu2 }
 0x207   : > { %2140 = vst.msk [vmem:[%s3259_s15 + $0x50] sm:$0xff] %vm2129_vm2, %v2107_v51  ;;  %v1561_v41 = vpop.f32.mrf.mxu3  ;;  %v1971_v20 = vadd.f32 %v1970_v33, %v1858_v43  ;;  %v1628_v43 = vmax.f32 %v1559_v48, 0.0 }
 0x208   : > { %v1860_v60 = vpop.f32.mrf.mxu0  ;;  %v1562_v27 = vadd.f32 %v1561_v41, %v1449_v44 }
 0x209   : > { %v2044_v3 = vmax.f32 %v1971_v20, 0.0  ;;  %v1861_v26 = vadd.f32 %v3181_v2, %v1860_v60 }
 0x20a   : > { %v1451_v58 = vpop.f32.mrf.mxu1 }
 0x20b   : > { %v2076_v13 = vmax.f32 %v1626_v42, %v2044_v3  ;;  %2401 = vmatmul.msk.f32.gmra.mxu2 %vm420_vm1, %v1704_v29  ;;  %1907 = vmatmul.f32.gmra.mxu0 %v1703_v38  ;;  %v1629_v3 = vmax.f32 %v1562_v27, 0.0  ;;  %v1452_v46 = vadd.f32 %v3181_v2, %v1451_v58 }
 0x20c   : > { %2371 = vmatmul.msk.f32.gmra.mxu3 %vm420_vm1, %v1292_v35 }
 0x20d   : > { %v2108_v17 = vmax.f32 %v2976_v30, %v2076_v13  ;;  %1498 = vmatmul.f32.gmra.mxu1 %v1291_v19 }
 0x20e   : > { %v1973_v5 = vpop.f32.mrf.mxu2 }
 0x20f   : > { %2141 = vst.msk [vmem:[%s3259_s15 + $0x58] sm:$0xff] %vm2129_vm2, %v2108_v17  ;;  %v1564_v11 = vpop.f32.mrf.mxu3  ;;  %v1974_v15 = vadd.f32 %v1973_v5, %v1861_v26 }
 0x210   : > { %v1863_v45 = vpop.f32.mrf.mxu0  ;;  %v1565_v8 = vadd.f32 %v1564_v11, %v1452_v46 }
 0x211   : > { %v2045_v4 = vmax.f32 %v1974_v15, 0.0  ;;  %v1864_v36 = vadd.f32 %v3181_v2, %v1863_v45 }
 0x212   : > { %v1454_v53 = vpop.f32.mrf.mxu1 }
 0x213   : > { %v2077_v30 = vmax.f32 %v1627_v39, %v2045_v4  ;;  %2402 = vmatmul.msk.f32.gmra.mxu2 %vm420_vm1, %v1706_v40  ;;  %1910 = vmatmul.f32.gmra.mxu0 %v1705_v22  ;;  %v1630_v40 = vmax.f32 %v1565_v8, 0.0  ;;  %v1455_v45 = vadd.f32 %v3181_v2, %v1454_v53 }
 0x214   : > { %2404 = vmatmul.msk.f32.vlgmr.msra.gmra.mxu3 %vm420_vm1, %v1710_v14 }
 0x215   : > { %v2109_v12 = vmax.f32 %v2995_v47, %v2077_v30  ;;  %1916 = vmatmul.f32.vlgmr.msra.gmra.mxu1 %v1709_v63 }
 0x216   : > { %v1976_v34 = vpop.f32.mrf.mxu2 }
 0x217   : > { %2142 = vst.msk [vmem:[%s3259_s15 + $0x60] sm:$0xff] %vm2129_vm2, %v2109_v12  ;;  %v1567_v59 = vpop.f32.mrf.mxu3  ;;  %v1977_v0 = vadd.f32 %v1976_v34, %v1864_v36 }
 0x218   : > { %v1866_v62 = vpop.f32.mrf.mxu0  ;;  %v1568_v4 = vadd.f32 %v1567_v59, %v1455_v45 }
 0x219   : > { %v2046_v51 = vmax.f32 %v1977_v0, 0.0  ;;  %v1867_v47 = vadd.f32 %v3181_v2, %v1866_v62 }
 0x21a   : > { %v1457_v33 = vpop.f32.mrf.mxu1  ;;  %v1631_v36 = vmax.f32 %v1568_v4, 0.0 }
 0x21b   : > { %v2078_v20 = vmax.f32 %v1628_v43, %v2046_v51  ;;  %2403 = vmatmul.msk.f32.gmra.mxu2 %vm420_vm1, %v1708_v31  ;;  %1913 = vmatmul.f32.gmra.mxu0 %v1707_v61  ;;  %v1458_v48 = vadd.f32 %v3181_v2, %v1457_v33 }
 0x21d   : > { %v2110_v29 = vmax.f32 %v3007_v1, %v2078_v20 }
 0x21e   : > { %v1979_v60 = vpop.f32.mrf.mxu2 }
 0x21f   : > { %2143 = vst.msk [vmem:[%s3259_s15 + $0x68] sm:$0xff] %vm2129_vm2, %v2110_v29  ;;  %v1570_v38 = vpop.f32.mrf.mxu3  ;;  %v1980_v42 = vadd.f32 %v1979_v60, %v1867_v47 }
 0x220   : > { %v1869_v52 = vpop.f32.mrf.mxu0  ;;  %v1571_v31 = vadd.f32 %v1570_v38, %v1458_v48 }
 0x221   : > { %v2047_v35 = vmax.f32 %v1980_v42, 0.0  ;;  %v1870_v26 = vadd.f32 %v3181_v2, %v1869_v52 }
 0x222   : > { %v1460_v19 = vpop.f32.mrf.mxu1  ;;  %v1632_v44 = vmax.f32 %v1571_v31, 0.0 }
 0x223   : > { %v2079_v13 = vmax.f32 %v1629_v3, %v2047_v35  ;;  %v1461_v51 = vadd.f32 %v3181_v2, %v1460_v19 }
 0x225   : > { %v2111_v41 = vmax.f32 %v3019_v18, %v2079_v13 }
 0x226   : > { %v1982_v17 = vpop.f32.mrf.mxu2 }
 0x227   : > { %2144 = vst.msk [vmem:[%s3259_s15 + $0x70] sm:$0xff] %vm2129_vm2, %v2111_v41  ;;  %v1573_v1 = vpop.f32.mrf.mxu3  ;;  %v1983_v5 = vadd.f32 %v1982_v17, %v1870_v26 }
 0x228   : > { %v1872_v15 = vpop.f32.mrf.mxu0  ;;  %v1574_v29 = vadd.f32 %v1573_v1, %v1461_v51 }
 0x229   : > { %v2048_v22 = vmax.f32 %v1983_v5, 0.0  ;;  %v1873_v16 = vadd.f32 %v3181_v2, %v1872_v15 }
 0x22a   : > { %v1463_v58 = vpop.f32.mrf.mxu1  ;;  %v1633_v3 = vmax.f32 %v1574_v29, 0.0 }
 0x22b   : > { %v2080_v39 = vmax.f32 %v1630_v40, %v2048_v22  ;;  %v1464_v46 = vadd.f32 %v3181_v2, %v1463_v58 }
 0x22d   : > { %v2112_v11 = vmax.f32 %v3038_v37, %v2080_v39 }
 0x22e   : > { %v1985_v14 = vpop.f32.mrf.mxu2 }
 0x22f   : > { %2145 = vst.msk [vmem:[%s3259_s15 + $0x78] sm:$0xff] %vm2129_vm2, %v2112_v11  ;;  %v1576_v18 = vpop.f32.mrf.mxu3  ;;  %v1986_v63 = vadd.f32 %v1985_v14, %v1873_v16 }
 0x230   : > { %v1875_v30 = vpop.f32.mrf.mxu0  ;;  %v1577_v8 = vadd.f32 %v1576_v18, %v1464_v46 }
 0x231   : > { %v2049_v12 = vmax.f32 %v1986_v63, 0.0  ;;  %v1876_v0 = vadd.f32 %v3181_v2, %v1875_v30 }
 0x232   : > { %v1466_v53 = vpop.f32.mrf.mxu1  ;;  %v1634_v15 = vmax.f32 %v1577_v8, 0.0 }
 0x233   : > { %v2081_v34 = vmax.f32 %v1631_v36, %v2049_v12  ;;  %v1467_v40 = vadd.f32 %v3181_v2, %v1466_v53 }
 0x235   : > { %v2113_v59 = vmax.f32 %v3051_v55, %v2081_v34 }
 0x236   : > { %v1988_v62 = vpop.f32.mrf.mxu2 }
 0x237   : > { %2146 = vst.msk [vmem:[%s3259_s15 + $0x80] sm:$0xff] %vm2129_vm2, %v2113_v59  ;;  %v1579_v37 = vpop.f32.mrf.mxu3  ;;  %v1989_v61 = vadd.f32 %v1988_v62, %v1876_v0 }
 0x238   : > { %v1878_v43 = vpop.f32.mrf.mxu0  ;;  %v1580_v16 = vadd.f32 %v1579_v37, %v1467_v40 }
 0x239   : > { %v2050_v20 = vmax.f32 %v1989_v61, 0.0  ;;  %v1879_v27 = vadd.f32 %v3181_v2, %v1878_v43 }
 0x23a   : > { %v1469_v33 = vpop.f32.mrf.mxu1  ;;  %v1635_v63 = vmax.f32 %v1580_v16, 0.0 }
 0x23b   : > { %v2082_v47 = vmax.f32 %v1632_v44, %v2050_v20  ;;  %v1470_v30 = vadd.f32 %v3181_v2, %v1469_v33 }
 0x23d   : > { %v2114_v60 = vmax.f32 %v3064_v9, %v2082_v47 }
 0x23e   : > { %v1991_v38 = vpop.f32.mrf.mxu2 }
 0x23f   : > { %2147 = vst.msk [vmem:[%s3259_s15 + $0x88] sm:$0xff] %vm2129_vm2, %v2114_v60  ;;  %v1582_v55 = vpop.f32.mrf.mxu3  ;;  %v1992_v42 = vadd.f32 %v1991_v38, %v1879_v27 }
 0x240   : > { %v1881_v52 = vpop.f32.mrf.mxu0  ;;  %v1583_v34 = vadd.f32 %v1582_v55, %v1470_v30 }
 0x241   : > { %v2051_v35 = vmax.f32 %v1992_v42, 0.0  ;;  %v1882_v26 = vadd.f32 %v3181_v2, %v1881_v52 }
 0x242   : > { %v1472_v19 = vpop.f32.mrf.mxu1  ;;  %v1636_v37 = vmax.f32 %v1583_v34, 0.0 }
 0x243   : > { %v2083_v13 = vmax.f32 %v1633_v3, %v2051_v35  ;;  %v1473_v61 = vadd.f32 %v3181_v2, %v1472_v19 }
 0x245   : > { %v2115_v41 = vmax.f32 %v3077_v28, %v2083_v13 }
 0x246   : > { %v1994_v17 = vpop.f32.mrf.mxu2 }
 0x247   : > { %2148 = vst.msk [vmem:[%s3259_s15 + $0x90] sm:$0xff] %vm2129_vm2, %v2115_v41  ;;  %v1585_v9 = vpop.f32.mrf.mxu3  ;;  %v1995_v1 = vadd.f32 %v1994_v17, %v1882_v26  ;;  %v3454_v17 = vld [vmem:[%s3507_s5] ss:$0 sm:$0xff] }
 0x248   : > { %v1884_v5 = vpop.f32.mrf.mxu0  ;;  %v1586_v33 = vadd.f32 %v1585_v9, %v1473_v61 }
 0x249   : > { %v2052_v45 = vmax.f32 %v1995_v1, 0.0  ;;  %v1885_v39 = vadd.f32 %v3181_v2, %v1884_v5 }
 0x24a   : > { %v1475_v22 = vpop.f32.mrf.mxu1  ;;  %v1637_v38 = vmax.f32 %v1586_v33, 0.0 }
 0x24b   : > { %v2084_v58 = vmax.f32 %v1634_v15, %v2052_v45  ;;  %v1476_v55 = vadd.f32 %v3181_v2, %v1475_v22 }
 0x24d   : > { %v2116_v4 = vmax.f32 %v3090_v50, %v2084_v58 }
 0x24e   : > { %v1997_v11 = vpop.f32.mrf.mxu2 }
 0x24f   : > { %2149 = vst.msk [vmem:[%s3259_s15 + $0x98] sm:$0xff] %vm2129_vm2, %v2116_v4  ;;  %v1588_v28 = vpop.f32.mrf.mxu3  ;;  %v1998_v14 = vadd.f32 %v1997_v11, %v1885_v39 }
 0x250   : > { %v1887_v18 = vpop.f32.mrf.mxu0  ;;  %v1589_v35 = vadd.f32 %v1588_v28, %v1476_v55 }
 0x251   : > { %v2053_v36 = vmax.f32 %v1998_v14, 0.0  ;;  %v1888_v53 = vadd.f32 %v3181_v2, %v1887_v18 }
 0x252   : > { %v1478_v48 = vpop.f32.mrf.mxu1  ;;  %v1638_v41 = vmax.f32 %v1589_v35, 0.0 }
 0x253   : > { %v2085_v12 = vmax.f32 %v1635_v63, %v2053_v36  ;;  %v1479_v9 = vadd.f32 %v3454_v17, %v1478_v48 }
 0x255   : > { %v2117_v0 = vmax.f32 %v3103_v6, %v2085_v12 }
 0x256   : > { %v2000_v31 = vpop.f32.mrf.mxu2 }
 0x257   : > { %2150 = vst.msk [vmem:[%s3259_s15 + $0xa0] sm:$0xff] %vm2129_vm2, %v2117_v0  ;;  %v1591_v50 = vpop.f32.mrf.mxu3  ;;  %v2001_v59 = vadd.f32 %v2000_v31, %v1888_v53 }
 0x258   : > { %v1890_v62 = vpop.f32.mrf.mxu0  ;;  %v1592_v15 = vadd.f32 %v1591_v50, %v1479_v9 }
 0x259   : > { %v2054_v43 = vmax.f32 %v2001_v59, 0.0  ;;  %v1891_v20 = vadd.f32 %v3181_v2, %v1890_v62 }
 0x25a   : > { %v1481_v44 = vpop.f32.mrf.mxu1  ;;  %v1639_v16 = vmax.f32 %v1592_v15, 0.0 }
 0x25b   : > { %v2086_v51 = vmax.f32 %v1636_v37, %v2054_v43  ;;  %v1482_v4 = vadd.f32 %v3454_v17, %v1481_v44 }
 0x25d   : > { %v2118_v47 = vmax.f32 %v3116_v25, %v2086_v51 }
 0x25e   : > { %v2003_v27 = vpop.f32.mrf.mxu2 }
 0x25f   : > { %2151 = vst.msk [vmem:[%s3259_s15 + $0xa8] sm:$0xff] %vm2129_vm2, %v2118_v47  ;;  %v1594_v6 = vpop.f32.mrf.mxu3  ;;  %v2004_v29 = vadd.f32 %v2003_v27, %v1891_v20 }
 0x260   : > { %v1893_v60 = vpop.f32.mrf.mxu0  ;;  %v1595_v63 = vadd.f32 %v1594_v6, %v1482_v4 }
 0x261   : > { %v2055_v42 = vmax.f32 %v2004_v29, 0.0  ;;  %v1894_v46 = vadd.f32 %v3181_v2, %v1893_v60 }
 0x262   : > { %v1484_v52 = vpop.f32.mrf.mxu1  ;;  %v1640_v53 = vmax.f32 %v1595_v63, 0.0 }
 0x263   : > { %v2087_v3 = vmax.f32 %v1637_v38, %v2055_v42  ;;  %v1485_v34 = vadd.f32 %v3454_v17, %v1484_v52 }
 0x265   : > { %v2119_v19 = vmax.f32 %v3129_v49, %v2087_v3 }
 0x266   : > { %v2006_v13 = vpop.f32.mrf.mxu2 }
 0x267   : > { %2152 = vst.msk [vmem:[%s3259_s15 + $0xb0] sm:$0xff] %vm2129_vm2, %v2119_v19  ;;  %v1597_v25 = vpop.f32.mrf.mxu3  ;;  %v2007_v26 = vadd.f32 %v2006_v13, %v1894_v46 }
 0x268   : > { %v1896_v8 = vpop.f32.mrf.mxu0  ;;  %v1598_v62 = vadd.f32 %v1597_v25, %v1485_v34 }
 0x269   : > { %v2056_v1 = vmax.f32 %v2007_v26, 0.0  ;;  %v1897_v49 = vadd.f32 %v3454_v17, %v1896_v8 }
 0x26a   : > { %v1487_v2 = vpop.f32.mrf.mxu1  ;;  %v1641_v51 = vmax.f32 %v1598_v62, 0.0 }
 0x26b   : > { %v2088_v5 = vmax.f32 %v1638_v41, %v2056_v1  ;;  %v1488_v20 = vadd.f32 %v3454_v17, %v1487_v2 }
 0x26d   : > { %v2120_v40 = vmax.f32 %v3142_v7, %v2088_v5 }
 0x26e   : > { %v2009_v45 = vpop.f32.mrf.mxu2 }
 0x26f   : > { %2153 = vst.msk [vmem:[%s3259_s15 + $0xb8] sm:$0xff] %vm2129_vm2, %v2120_v40  ;;  %v1600_v22 = vpop.f32.mrf.mxu3  ;;  %v2010_v58 = vadd.f32 %v2009_v45, %v1897_v49 }
 0x270   : > { %v1899_v39 = vpop.f32.mrf.mxu0  ;;  %v1601_v29 = vadd.f32 %v1600_v22, %v1488_v20 }
 0x271   : > { %v2057_v11 = vmax.f32 %v2010_v58, 0.0  ;;  %v1900_v18 = vadd.f32 %v3454_v17, %v1899_v39 }
 0x272   : > { %v1490_v28 = vpop.f32.mrf.mxu1  ;;  %v1642_v52 = vmax.f32 %v1601_v29, 0.0 }
 0x273   : > { %v2089_v14 = vmax.f32 %v1639_v16, %v2057_v11  ;;  %v1491_v3 = vadd.f32 %v3454_v17, %v1490_v28 }
 0x275   : > { %v2121_v30 = vmax.f32 %v3155_v32, %v2089_v14 }
 0x276   : > { %v2012_v36 = vpop.f32.mrf.mxu2 }
 0x277   : > { %2154 = vst.msk [vmem:[%s3259_s15 + $0xc0] sm:$0xff] %vm2129_vm2, %v2121_v30  ;;  %v1603_v7 = vpop.f32.mrf.mxu3  ;;  %v2013_v48 = vadd.f32 %v2012_v36, %v1900_v18 }
 0x278   : > { %v1902_v12 = vpop.f32.mrf.mxu0  ;;  %v1604_v25 = vadd.f32 %v1603_v7, %v1491_v3 }
 0x279   : > { %v2058_v0 = vmax.f32 %v2013_v48, 0.0  ;;  %v1903_v59 = vadd.f32 %v3454_v17, %v1902_v12 }
 0x27a   : > { %v1493_v31 = vpop.f32.mrf.mxu1  ;;  %v1643_v2 = vmax.f32 %v1604_v25, 0.0 }
 0x27b   : > { %v2090_v50 = vmax.f32 %v1640_v53, %v2058_v0  ;;  %v1494_v5 = vadd.f32 %v3454_v17, %v1493_v31 }
 0x27d   : > { %v2122_v37 = vmax.f32 %v3168_v54, %v2090_v50 }
 0x27e   : > { %v2015_v61 = vpop.f32.mrf.mxu2 }
 0x27f   : > { %2155 = vst.msk [vmem:[%s3259_s15 + $0xc8] sm:$0xff] %vm2129_vm2, %v2122_v37  ;;  %v1606_v32 = vpop.f32.mrf.mxu3  ;;  %v2016_v43 = vadd.f32 %v2015_v61, %v1903_v59 }
 0x280   : > { %v1905_v44 = vpop.f32.mrf.mxu0  ;;  %v1607_v58 = vadd.f32 %v1606_v32, %v1494_v5 }
 0x281   : > { %v2059_v33 = vmax.f32 %v2016_v43, 0.0  ;;  %v1906_v6 = vadd.f32 %v3454_v17, %v1905_v44 }
 0x282   : > { %v1496_v47 = vpop.f32.mrf.mxu1  ;;  %v1644_v63 = vmax.f32 %v1607_v58, 0.0 }
 0x283   : > { %v2091_v27 = vmax.f32 %v1641_v51, %v2059_v33  ;;  %v1497_v30 = vadd.f32 %v3454_v17, %v1496_v47 }
 0x285   : > { %v2123_v60 = vmax.f32 %v3186_v23, %v2091_v27 }
 0x286   : > { %v2018_v38 = vpop.f32.mrf.mxu2 }
 0x287   : > { %2156 = vst.msk [vmem:[%s3259_s15 + $0xd0] sm:$0xff] %vm2129_vm2, %v2123_v60  ;;  %v1609_v54 = vpop.f32.mrf.mxu3  ;;  %v2019_v55 = vadd.f32 %v2018_v38, %v1906_v6 }
 0x288   : > { %v1908_v42 = vpop.f32.mrf.mxu0  ;;  %v1610_v53 = vadd.f32 %v1609_v54, %v1497_v30 }
 0x289   : > { %v2060_v46 = vmax.f32 %v2019_v55, 0.0  ;;  %v1909_v13 = vadd.f32 %v3454_v17, %v1908_v42 }
 0x28a   : > { %v1499_v35 = vpop.f32.mrf.mxu1  ;;  %v1645_v59 = vmax.f32 %v1610_v53, 0.0 }
 0x28b   : > { %v2092_v19 = vmax.f32 %v1642_v52, %v2060_v46  ;;  %v1500_v9 = vadd.f32 %v3454_v17, %v1499_v35 }
 0x28d   : > { %v2124_v26 = vmax.f32 %v3199_v10, %v2092_v19 }
 0x28e   : > { %v2021_v8 = vpop.f32.mrf.mxu2 }
 0x28f   : > { %2157 = vst.msk [vmem:[%s3259_s15 + $0xd8] sm:$0xff] %vm2129_vm2, %v2124_v26  ;;  %v1612_v23 = vpop.f32.mrf.mxu3  ;;  %v2022_v41 = vadd.f32 %v2021_v8, %v1909_v13 }
 0x290   : > { %v1911_v1 = vpop.f32.mrf.mxu0  ;;  %v1613_v22 = vadd.f32 %v1612_v23, %v1500_v9 }
 0x291   : > { %v2061_v49 = vmax.f32 %v2022_v41, 0.0  ;;  %v1912_v45 = vadd.f32 %v3454_v17, %v1911_v1 }
 0x292   : > { %v1917_v15 = vpop.f32.mrf.mxu1  ;;  %v1646_v28 = vmax.f32 %v1613_v22, 0.0 }
 0x293   : > { %v2093_v40 = vmax.f32 %v1643_v2, %v2061_v49  ;;  %v1918_v10 = vadd.f32 %v3454_v17, %v1917_v15 }
 0x295   : > { %v2125_v39 = vmax.f32 %v3210_v57, %v2093_v40 }
 0x296   : > { %v2024_v16 = vpop.f32.mrf.mxu2 }
 0x297   : > { %2158 = vst.msk [vmem:[%s3259_s15 + $0xe0] sm:$0xff] %vm2129_vm2, %v2125_v39  ;;  %v2025_v4 = vadd.f32 %v2024_v16, %v1912_v45  ;;  %v2030_v11 = vpop.f32.mrf.mxu3 }
 0x298   : > { %v2031_v14 = vadd.f32 %v2030_v11, %v1918_v10  ;;  %v1914_v18 = vpop.f32.mrf.mxu0 }
 0x299   : > { %v2062_v36 = vmax.f32 %v2025_v4, 0.0  ;;  %v1915_v12 = vadd.f32 %v3454_v17, %v1914_v18 }
 0x29a   : > { %v2064_v7 = vmax.f32 %v2031_v14, 0.0 }
 0x29b   : > { %v2094_v48 = vmax.f32 %v1644_v63, %v2062_v36 }
 0x29c   : > { %v2096_v57 = vmax.f32 %v1646_v28, %v2064_v7 }
 0x29d   : > { %v2126_v34 = vmax.f32 %v3221_v24, %v2094_v48 }
 0x29e   : > { %v2128_v0 = vmax.f32 %v3246_v21, %v2096_v57  ;;  %v2027_v31 = vpop.f32.mrf.mxu2 }
 0x29f   : > { %2159 = vst.msk [vmem:[%s3259_s15 + $0xe8] sm:$0xff] %vm2129_vm2, %v2126_v34  ;;  %v2028_v50 = vadd.f32 %v2027_v31, %v1915_v12 }
 0x2a0   : > { %2161 = vst.msk [vmem:[%s3259_s15 + $0xf8] sm:$0xff] %vm2129_vm2, %v2128_v0 }
 0x2a1   : > { %v2063_v62 = vmax.f32 %v2028_v50, 0.0 }
 0x2a3   : > { %v2095_v37 = vmax.f32 %v1645_v59, %v2063_v62 }
 0x2a5   : > { %v2127_v61 = vmax.f32 %v3232_v56, %v2095_v37 }
 0x2a7   : > { %2160 = vst.msk [vmem:[%s3259_s15 + $0xf0] sm:$0xff] %vm2129_vm2, %v2127_v61 }
 0x2a8 PF: > { %s16_s21 = sadd.s32 1, %s2447_s21  }
 0x2a9   : > { %p13_p4 = scmp.ge.s32.totalorder %s16_s21, 4  }
 0x2ab   :  { %15 = sbr.rel (!%p13_p4) target bundleno = 1 (0x1), region = 83 }

// kernel: lenet_relu_forward.6
= control target key start
LH: loop header
LB: loop body
LE: loop exit
PB: predicated region body
PF: predicated region fallthrough
CT: control target
= control target key end

     0   :  { %s898_s21 = smov 0   ;;  %s1100_s0 = inlined_call_operand.vmem [shape: f32[128,108], index: 0, kind: input, shape index: {}]   ;;  %s1101_s1 = inlined_call_operand.vmem [shape: f32[128,108], index: 1, kind: input, shape index: {}]   ;;  %s1102_s2 = inlined_call_operand.vmem [shape: f32[128,108], index: 2, kind: input, shape index: {}]   ;;  %s1103_s3 = inlined_call_operand.vmem [shape: f32[128,108], index: 3, kind: input, shape index: {}]   ;;  %s1104_s4 = inlined_call_operand.vmem [shape: f32[108,24], index: 4, kind: input, shape index: {}]   ;;  %s1105_s5 = inlined_call_operand.vmem [shape: f32[1,24], index: 5, kind: input, shape index: {}]   ;;  %s1106_s6 = inlined_call_operand.vmem [shape: f32[128,24], index: 6, kind: output, shape index: {}]  }
   0x1 LB: > { %s793_s22 = sadd.s32 4294967295, %s861_s21   ;;  %p797_p0 = scmp.ge.s32.totalorder %s861_s21, 1  ;;  %s861_s21 = sphi %s898_s21, %s16_s21  }
   0x2   : > { %p246_p1 = scmp.lt.s32.totalorder %s861_s21, 3 }
   0x4   : > { %p247_p2 = pnand %p797_p0, %p246_p1 }
   0x5   : > { %s798_s11 = sshll.u32 (!%p247_p2), %s793_s22, 3 }
   0x6   : > { %250 = sbr.rel (%p247_p2) target bundleno = 236 (0xec), region = 44  ;;  %p292_p3 = scmp.lt.s32.totalorder (!%p247_p2), %s798_s11, 15 }
   0xb   : > { %v334_v0 = vld [vmem:[%s1104_s4 + $0x68] sm:$0xf]  ;;  %vm372_vm0 = vcmask 1043456   ;;  %v333_v1 = vld [vmem:[%s1104_s4 + $0x60] sm:$0xff]  ;;  %v332_v2 = vld [vmem:[%s1104_s4 + $0x58] sm:$0xff]  ;;  %s1108_s11 = smov (!%p292_p3, %s798_s11), 15 }
   0xc   : > { %826 = vmatpush.msk.msra.mxu2 %vm372_vm0, %v334_v0  ;;  %835 = vmatpush.msk.msra.mxu3 %vm372_vm0, %v334_v0  ;;  %v331_v3 = vld [vmem:[%s1104_s4 + $0x50] sm:$0xff]  ;;  %v330_v4 = vld [vmem:[%s1104_s4 + $0x48] sm:$0xff]  ;;  %v329_v5 = vld [vmem:[%s1104_s4 + $0x40] sm:$0xff]  ;;  %s939_s23 = sshll.u32 %s1108_s11, 3  ;;  %vm347_vm1 = vcmask 883712   ;;  %vm692_vm2 = vcmask 195584  }
   0xd   : > { %808 = vmatpush.msk.msra.mxu0 %vm372_vm0, %v334_v0  ;;  %817 = vmatpush.msk.msra.mxu1 %vm372_vm0, %v334_v0  ;;  %v328_v6 = vld [vmem:[%s1104_s4 + $0x38] sm:$0xff]  ;;  %v327_v7 = vld [vmem:[%s1104_s4 + $0x30] sm:$0xff]  ;;  %v326_v8 = vld [vmem:[%s1104_s4 + $0x28] sm:$0xff]  ;;  %s951_s30 = scalar_lea.vmem %s1102_s2, %s939_s23  ;;  %s957_s9 = scalar_lea.vmem %s1103_s3, %s939_s23 }
   0xe   : > { %549 = vmatpush.msra.mxu2 %v333_v1  ;;  %630 = vmatpush.msra.mxu3 %v333_v1  ;;  %v325_v9 = vld [vmem:[%s1104_s4 + $0x20] sm:$0xff]  ;;  %v324_v10 = vld [vmem:[%s1104_s4 + $0x18] sm:$0xff]  ;;  %v323_v11 = vld [vmem:[%s1104_s4 + $0x10] sm:$0xff]  ;;  %s966_s14 = scalar_lea.vmem %s1100_s0, %s939_s23  ;;  %s972_s17 = scalar_lea.vmem %s1101_s1, %s939_s23 }
   0xf   : > { %379 = vmatpush.msra.mxu0 %v333_v1  ;;  %460 = vmatpush.msra.mxu1 %v333_v1  ;;  %v322_v12 = vld [vmem:[%s1104_s4 + $0x8] sm:$0xff]  ;;  %v321_v13 = vld [vmem:[%s1104_s4] sm:$0xff]  ;;  %v516_v22 = vld [vmem:[%s951_s30 + $0x10] sm:$0xff]  ;;  %s1053_s24 = scalar_lea.vmem %s1106_s6, %s939_s23 }
  0x10   : > { %550 = vmatpush.msra.mxu2 %v332_v2  ;;  %631 = vmatpush.msra.mxu3 %v332_v2  ;;  %v514_v14 = vld [vmem:[%s951_s30] sm:$0xff]  ;;  %v515_v18 = vld [vmem:[%s951_s30 + $0x8] sm:$0xff]  ;;  %v597_v23 = vld [vmem:[%s957_s9 + $0x10] sm:$0xff] }
  0x11   : > { %380 = vmatpush.msra.mxu0 %v332_v2  ;;  %461 = vmatpush.msra.mxu1 %v332_v2  ;;  %v595_v15 = vld [vmem:[%s957_s9] sm:$0xff]  ;;  %v596_v19 = vld [vmem:[%s957_s9 + $0x8] sm:$0xff]  ;;  %v338_v24 = vld [vmem:[%s966_s14 + $0x10] sm:$0xff] }
  0x12   : > { %551 = vmatpush.msra.mxu2 %v331_v3  ;;  %632 = vmatpush.msra.mxu3 %v331_v3  ;;  %v336_v16 = vld [vmem:[%s966_s14] sm:$0xff]  ;;  %v337_v20 = vld [vmem:[%s966_s14 + $0x8] sm:$0xff]  ;;  %v427_v25 = vld [vmem:[%s972_s17 + $0x10] sm:$0xff] }
  0x13   : > { %381 = vmatpush.msra.mxu0 %v331_v3  ;;  %462 = vmatpush.msra.mxu1 %v331_v3  ;;  %v425_v17 = vld [vmem:[%s972_s17] sm:$0xff]  ;;  %v426_v21 = vld [vmem:[%s972_s17 + $0x8] sm:$0xff]  ;;  %v517_v26 = vld [vmem:[%s951_s30 + $0x18] sm:$0xff] }
  0x14   : > { %552 = vmatpush.msra.mxu2 %v330_v4  ;;  %633 = vmatpush.msra.mxu3 %v330_v4  ;;  %v598_v27 = vld [vmem:[%s957_s9 + $0x18] sm:$0xff]  ;;  %v518_v30 = vld [vmem:[%s951_s30 + $0x20] sm:$0xff]  ;;  %v519_v34 = vld [vmem:[%s951_s30 + $0x28] sm:$0xff] }
  0x15   : > { %382 = vmatpush.msra.mxu0 %v330_v4  ;;  %463 = vmatpush.msra.mxu1 %v330_v4  ;;  %v339_v28 = vld [vmem:[%s966_s14 + $0x18] sm:$0xff]  ;;  %v599_v31 = vld [vmem:[%s957_s9 + $0x20] sm:$0xff]  ;;  %v600_v35 = vld [vmem:[%s957_s9 + $0x28] sm:$0xff] }
  0x16   : > { %553 = vmatpush.msra.mxu2 %v329_v5  ;;  %634 = vmatpush.msra.mxu3 %v329_v5  ;;  %v428_v29 = vld [vmem:[%s972_s17 + $0x18] sm:$0xff]  ;;  %v340_v32 = vld [vmem:[%s966_s14 + $0x20] sm:$0xff]  ;;  %v341_v36 = vld [vmem:[%s966_s14 + $0x28] sm:$0xff] }
  0x17   : > { %383 = vmatpush.msra.mxu0 %v329_v5  ;;  %464 = vmatpush.msra.mxu1 %v329_v5  ;;  %v429_v33 = vld [vmem:[%s972_s17 + $0x20] sm:$0xff]  ;;  %v430_v37 = vld [vmem:[%s972_s17 + $0x28] sm:$0xff]  ;;  %v520_v38 = vld [vmem:[%s951_s30 + $0x30] sm:$0xff] }
  0x18   : > { %554 = vmatpush.msra.mxu2 %v328_v6  ;;  %635 = vmatpush.msra.mxu3 %v328_v6  ;;  %v601_v39 = vld [vmem:[%s957_s9 + $0x30] sm:$0xff]  ;;  %v521_v42 = vld [vmem:[%s951_s30 + $0x38] sm:$0xff]  ;;  %v1041_v46 = vld [vmem:[%s1105_s5] ss:$0 sm:$0xff] }
  0x19   : > { %384 = vmatpush.msra.mxu0 %v328_v6  ;;  %465 = vmatpush.msra.mxu1 %v328_v6  ;;  %v342_v40 = vld [vmem:[%s966_s14 + $0x30] sm:$0xff]  ;;  %v602_v43 = vld [vmem:[%s957_s9 + $0x38] sm:$0xff] }
  0x1a   : > { %555 = vmatpush.msra.mxu2 %v327_v7  ;;  %636 = vmatpush.msra.mxu3 %v327_v7  ;;  %v431_v41 = vld [vmem:[%s972_s17 + $0x30] sm:$0xff]  ;;  %v343_v44 = vld [vmem:[%s966_s14 + $0x38] sm:$0xff] }
  0x1b   : > { %385 = vmatpush.msra.mxu0 %v327_v7  ;;  %466 = vmatpush.msra.mxu1 %v327_v7  ;;  %v432_v45 = vld [vmem:[%s972_s17 + $0x38] sm:$0xff] }
  0x1c   : > { %556 = vmatpush.msra.mxu2 %v326_v8  ;;  %637 = vmatpush.msra.mxu3 %v326_v8 }
  0x1d   : > { %386 = vmatpush.msra.mxu0 %v326_v8  ;;  %467 = vmatpush.msra.mxu1 %v326_v8 }
  0x1e   : > { %557 = vmatpush.msra.mxu2 %v325_v9  ;;  %638 = vmatpush.msra.mxu3 %v325_v9 }
  0x1f   : > { %387 = vmatpush.msra.mxu0 %v325_v9  ;;  %468 = vmatpush.msra.mxu1 %v325_v9 }
  0x20   : > { %558 = vmatpush.msra.mxu2 %v324_v10  ;;  %639 = vmatpush.msra.mxu3 %v324_v10 }
  0x21   : > { %388 = vmatpush.msra.mxu0 %v324_v10  ;;  %469 = vmatpush.msra.mxu1 %v324_v10 }
  0x22   : > { %559 = vmatpush.msra.mxu2 %v323_v11  ;;  %640 = vmatpush.msra.mxu3 %v323_v11 }
  0x23   : > { %389 = vmatpush.msra.mxu0 %v323_v11  ;;  %470 = vmatpush.msra.mxu1 %v323_v11 }
  0x24   : > { %560 = vmatpush.msra.mxu2 %v322_v12  ;;  %641 = vmatpush.msra.mxu3 %v322_v12 }
  0x25   : > { %390 = vmatpush.msra.mxu0 %v322_v12  ;;  %471 = vmatpush.msra.mxu1 %v322_v12 }
  0x26   : > { %561 = vmatpush.msra.mxu2 %v321_v13  ;;  %642 = vmatpush.msra.mxu3 %v321_v13 }
  0x27   : > { %827 = vmatmul.msk.f32.vlgmr.msra.gmra.mxu2 %vm347_vm1, %v514_v14  ;;  %836 = vmatmul.msk.f32.vlgmr.msra.gmra.mxu3 %vm347_vm1, %v595_v15 }
  0x28   : > { %391 = vmatpush.msra.mxu0 %v321_v13  ;;  %472 = vmatpush.msra.mxu1 %v321_v13 }
  0x29   : > { %809 = vmatmul.msk.f32.vlgmr.msra.gmra.mxu0 %vm347_vm1, %v336_v16  ;;  %818 = vmatmul.msk.f32.vlgmr.msra.gmra.mxu1 %vm347_vm1, %v425_v17 }
  0x2f   : > { %828 = vmatmul.msk.f32.gmra.mxu2 %vm347_vm1, %v515_v18  ;;  %837 = vmatmul.msk.f32.gmra.mxu3 %vm347_vm1, %v596_v19 }
  0x31   : > { %810 = vmatmul.msk.f32.gmra.mxu0 %vm347_vm1, %v337_v20  ;;  %819 = vmatmul.msk.f32.gmra.mxu1 %vm347_vm1, %v426_v21 }
  0x37   : > { %829 = vmatmul.msk.f32.gmra.mxu2 %vm347_vm1, %v516_v22  ;;  %838 = vmatmul.msk.f32.gmra.mxu3 %vm347_vm1, %v597_v23 }
  0x39   : > { %811 = vmatmul.msk.f32.gmra.mxu0 %vm347_vm1, %v338_v24  ;;  %820 = vmatmul.msk.f32.gmra.mxu1 %vm347_vm1, %v427_v25 }
  0x3f   : > { %830 = vmatmul.msk.f32.gmra.mxu2 %vm347_vm1, %v517_v26  ;;  %839 = vmatmul.msk.f32.gmra.mxu3 %vm347_vm1, %v598_v27 }
  0x41   : > { %812 = vmatmul.msk.f32.gmra.mxu0 %vm347_vm1, %v339_v28  ;;  %821 = vmatmul.msk.f32.gmra.mxu1 %vm347_vm1, %v428_v29 }
  0x47   : > { %831 = vmatmul.msk.f32.gmra.mxu2 %vm347_vm1, %v518_v30  ;;  %840 = vmatmul.msk.f32.gmra.mxu3 %vm347_vm1, %v599_v31 }
  0x49   : > { %813 = vmatmul.msk.f32.gmra.mxu0 %vm347_vm1, %v340_v32  ;;  %822 = vmatmul.msk.f32.gmra.mxu1 %vm347_vm1, %v429_v33 }
  0x4f   : > { %832 = vmatmul.msk.f32.gmra.mxu2 %vm347_vm1, %v519_v34  ;;  %841 = vmatmul.msk.f32.gmra.mxu3 %vm347_vm1, %v600_v35 }
  0x51   : > { %814 = vmatmul.msk.f32.gmra.mxu0 %vm347_vm1, %v341_v36  ;;  %823 = vmatmul.msk.f32.gmra.mxu1 %vm347_vm1, %v430_v37 }
  0x57   : > { %833 = vmatmul.msk.f32.gmra.mxu2 %vm347_vm1, %v520_v38  ;;  %842 = vmatmul.msk.f32.gmra.mxu3 %vm347_vm1, %v601_v39 }
  0x59   : > { %815 = vmatmul.msk.f32.gmra.mxu0 %vm347_vm1, %v342_v40  ;;  %824 = vmatmul.msk.f32.gmra.mxu1 %vm347_vm1, %v431_v41 }
  0x5f   : > { %834 = vmatmul.msk.f32.gmra.mxu2 %vm347_vm1, %v521_v42  ;;  %843 = vmatmul.msk.f32.gmra.mxu3 %vm347_vm1, %v602_v43 }
  0x61   : > { %816 = vmatmul.msk.f32.gmra.mxu0 %vm347_vm1, %v343_v44  ;;  %825 = vmatmul.msk.f32.gmra.mxu1 %vm347_vm1, %v432_v45 }
  0xa6   : > { %v393_v47 = vpop.f32.mrf.mxu0  ;;  %v474_v48 = vpop.f32.mrf.mxu1 }
  0xa7   : > { %v394_v49 = vadd.f32 %v1041_v46, %v393_v47  ;;  %v475_v50 = vadd.f32 %v1041_v46, %v474_v48 }
  0xa9   : > { %v417_v51 = vmax.f32 %v394_v49, 0.0  ;;  %v498_v52 = vmax.f32 %v475_v50, 0.0 }
  0xaa   : > { %v563_v53 = vpop.f32.mrf.mxu2  ;;  %v644_v54 = vpop.f32.mrf.mxu3 }
  0xab   : > { %v564_v55 = vadd.f32 %v1041_v46, %v563_v53  ;;  %v645_v56 = vadd.f32 %v1041_v46, %v644_v54  ;;  %v506_v57 = vmax.f32 %v417_v51, %v498_v52 }
  0xad   : > { %v587_v58 = vmax.f32 %v564_v55, 0.0  ;;  %v668_v59 = vmax.f32 %v645_v56, 0.0 }
  0xae   : > { %v396_v60 = vpop.f32.mrf.mxu0  ;;  %v477_v61 = vpop.f32.mrf.mxu1 }
  0xaf   : > { %v676_v62 = vmax.f32 %v587_v58, %v668_v59  ;;  %v397_v63 = vadd.f32 %v1041_v46, %v396_v60  ;;  %v478_v0 = vadd.f32 %v1041_v46, %v477_v61 }
  0xb1   : > { %v684_v1 = vmax.f32 %v506_v57, %v676_v62  ;;  %v418_v2 = vmax.f32 %v397_v63, 0.0  ;;  %v499_v3 = vmax.f32 %v478_v0, 0.0 }
  0xb2   : > { %v566_v4 = vpop.f32.mrf.mxu2  ;;  %v647_v5 = vpop.f32.mrf.mxu3 }
  0xb3   : > { %693 = vst.msk [vmem:[%s1053_s24] sm:$0xff] %vm692_vm2, %v684_v1  ;;  %v567_v6 = vadd.f32 %v1041_v46, %v566_v4  ;;  %v648_v7 = vadd.f32 %v1041_v46, %v647_v5  ;;  %v507_v8 = vmax.f32 %v418_v2, %v499_v3 }
  0xb5   : > { %v588_v9 = vmax.f32 %v567_v6, 0.0  ;;  %v669_v10 = vmax.f32 %v648_v7, 0.0 }
  0xb6   : > { %v399_v11 = vpop.f32.mrf.mxu0  ;;  %v480_v12 = vpop.f32.mrf.mxu1 }
  0xb7   : > { %v677_v13 = vmax.f32 %v588_v9, %v669_v10  ;;  %v400_v14 = vadd.f32 %v1041_v46, %v399_v11  ;;  %v481_v15 = vadd.f32 %v1041_v46, %v480_v12 }
  0xb9   : > { %v685_v16 = vmax.f32 %v507_v8, %v677_v13  ;;  %v419_v17 = vmax.f32 %v400_v14, 0.0  ;;  %v500_v18 = vmax.f32 %v481_v15, 0.0 }
  0xba   : > { %v569_v19 = vpop.f32.mrf.mxu2  ;;  %v650_v20 = vpop.f32.mrf.mxu3 }
  0xbb   : > { %694 = vst.msk [vmem:[%s1053_s24 + $0x8] sm:$0xff] %vm692_vm2, %v685_v16  ;;  %v570_v21 = vadd.f32 %v1041_v46, %v569_v19  ;;  %v651_v22 = vadd.f32 %v1041_v46, %v650_v20  ;;  %v508_v23 = vmax.f32 %v419_v17, %v500_v18 }
  0xbd   : > { %v589_v24 = vmax.f32 %v570_v21, 0.0  ;;  %v670_v25 = vmax.f32 %v651_v22, 0.0 }
  0xbe   : > { %v402_v26 = vpop.f32.mrf.mxu0  ;;  %v483_v27 = vpop.f32.mrf.mxu1 }
  0xbf   : > { %v678_v28 = vmax.f32 %v589_v24, %v670_v25  ;;  %v403_v29 = vadd.f32 %v1041_v46, %v402_v26  ;;  %v484_v30 = vadd.f32 %v1041_v46, %v483_v27 }
  0xc1   : > { %v686_v31 = vmax.f32 %v508_v23, %v678_v28  ;;  %v420_v32 = vmax.f32 %v403_v29, 0.0  ;;  %v501_v33 = vmax.f32 %v484_v30, 0.0 }
  0xc2   : > { %v572_v34 = vpop.f32.mrf.mxu2  ;;  %v653_v35 = vpop.f32.mrf.mxu3 }
  0xc3   : > { %695 = vst.msk [vmem:[%s1053_s24 + $0x10] sm:$0xff] %vm692_vm2, %v686_v31  ;;  %v573_v36 = vadd.f32 %v1041_v46, %v572_v34  ;;  %v654_v37 = vadd.f32 %v1041_v46, %v653_v35  ;;  %v509_v38 = vmax.f32 %v420_v32, %v501_v33 }
  0xc5   : > { %v590_v39 = vmax.f32 %v573_v36, 0.0  ;;  %v671_v40 = vmax.f32 %v654_v37, 0.0 }
  0xc6   : > { %v405_v41 = vpop.f32.mrf.mxu0  ;;  %v486_v42 = vpop.f32.mrf.mxu1 }
  0xc7   : > { %v679_v43 = vmax.f32 %v590_v39, %v671_v40  ;;  %v406_v44 = vadd.f32 %v1041_v46, %v405_v41  ;;  %v487_v45 = vadd.f32 %v1041_v46, %v486_v42 }
  0xc9   : > { %v687_v47 = vmax.f32 %v509_v38, %v679_v43  ;;  %v421_v48 = vmax.f32 %v406_v44, 0.0  ;;  %v502_v49 = vmax.f32 %v487_v45, 0.0 }
  0xca   : > { %v575_v50 = vpop.f32.mrf.mxu2  ;;  %v656_v51 = vpop.f32.mrf.mxu3 }
  0xcb   : > { %696 = vst.msk [vmem:[%s1053_s24 + $0x18] sm:$0xff] %vm692_vm2, %v687_v47  ;;  %v576_v52 = vadd.f32 %v1041_v46, %v575_v50  ;;  %v657_v53 = vadd.f32 %v1041_v46, %v656_v51  ;;  %v510_v54 = vmax.f32 %v421_v48, %v502_v49 }
  0xcd   : > { %v591_v55 = vmax.f32 %v576_v52, 0.0  ;;  %v672_v56 = vmax.f32 %v657_v53, 0.0 }
  0xce   : > { %v408_v57 = vpop.f32.mrf.mxu0  ;;  %v489_v58 = vpop.f32.mrf.mxu1 }
  0xcf   : > { %v680_v59 = vmax.f32 %v591_v55, %v672_v56  ;;  %v409_v60 = vadd.f32 %v1041_v46, %v408_v57  ;;  %v490_v61 = vadd.f32 %v1041_v46, %v489_v58 }
  0xd1   : > { %v688_v62 = vmax.f32 %v510_v54, %v680_v59  ;;  %v422_v63 = vmax.f32 %v409_v60, 0.0  ;;  %v503_v0 = vmax.f32 %v490_v61, 0.0 }
  0xd2   : > { %v578_v1 = vpop.f32.mrf.mxu2  ;;  %v659_v2 = vpop.f32.mrf.mxu3 }
  0xd3   : > { %697 = vst.msk [vmem:[%s1053_s24 + $0x20] sm:$0xff] %vm692_vm2, %v688_v62  ;;  %v579_v3 = vadd.f32 %v1041_v46, %v578_v1  ;;  %v660_v4 = vadd.f32 %v1041_v46, %v659_v2  ;;  %v511_v5 = vmax.f32 %v422_v63, %v503_v0 }
  0xd5   : > { %v592_v6 = vmax.f32 %v579_v3, 0.0  ;;  %v673_v7 = vmax.f32 %v660_v4, 0.0 }
  0xd6   : > { %v411_v8 = vpop.f32.mrf.mxu0  ;;  %v492_v9 = vpop.f32.mrf.mxu1 }
  0xd7   : > { %v681_v10 = vmax.f32 %v592_v6, %v673_v7  ;;  %v412_v11 = vadd.f32 %v1041_v46, %v411_v8  ;;  %v493_v12 = vadd.f32 %v1041_v46, %v492_v9 }
  0xd9   : > { %v689_v13 = vmax.f32 %v511_v5, %v681_v10  ;;  %v423_v14 = vmax.f32 %v412_v11, 0.0  ;;  %v504_v15 = vmax.f32 %v493_v12, 0.0 }
  0xda   : > { %v581_v16 = vpop.f32.mrf.mxu2  ;;  %v662_v17 = vpop.f32.mrf.mxu3 }
  0xdb   : > { %698 = vst.msk [vmem:[%s1053_s24 + $0x28] sm:$0xff] %vm692_vm2, %v689_v13  ;;  %v582_v18 = vadd.f32 %v1041_v46, %v581_v16  ;;  %v663_v19 = vadd.f32 %v1041_v46, %v662_v17  ;;  %v512_v20 = vmax.f32 %v423_v14, %v504_v15 }
  0xdd   : > { %v593_v21 = vmax.f32 %v582_v18, 0.0  ;;  %v674_v22 = vmax.f32 %v663_v19, 0.0 }
  0xde   : > { %v414_v23 = vpop.f32.mrf.mxu0  ;;  %v495_v24 = vpop.f32.mrf.mxu1 }
  0xdf   : > { %v682_v25 = vmax.f32 %v593_v21, %v674_v22  ;;  %v415_v26 = vadd.f32 %v1041_v46, %v414_v23  ;;  %v496_v27 = vadd.f32 %v1041_v46, %v495_v24 }
  0xe1   : > { %v690_v28 = vmax.f32 %v512_v20, %v682_v25  ;;  %v424_v29 = vmax.f32 %v415_v26, 0.0  ;;  %v505_v30 = vmax.f32 %v496_v27, 0.0 }
  0xe2   : > { %v584_v31 = vpop.f32.mrf.mxu2  ;;  %v665_v32 = vpop.f32.mrf.mxu3 }
  0xe3   : > { %699 = vst.msk [vmem:[%s1053_s24 + $0x30] sm:$0xff] %vm692_vm2, %v690_v28  ;;  %v585_v33 = vadd.f32 %v1041_v46, %v584_v31  ;;  %v666_v34 = vadd.f32 %v1041_v46, %v665_v32  ;;  %v513_v35 = vmax.f32 %v424_v29, %v505_v30 }
  0xe5   : > { %v594_v36 = vmax.f32 %v585_v33, 0.0  ;;  %v675_v37 = vmax.f32 %v666_v34, 0.0 }
  0xe7   : > { %v683_v38 = vmax.f32 %v594_v36, %v675_v37 }
  0xe9   : > { %v691_v39 = vmax.f32 %v513_v35, %v683_v38 }
  0xeb   : > { %700 = vst.msk [vmem:[%s1053_s24 + $0x38] sm:$0xff] %vm692_vm2, %v691_v39 }
  0xec PF: > { %s16_s21 = sadd.s32 1, %s861_s21  }
  0xed   : > { %p13_p4 = scmp.ge.s32.totalorder %s16_s21, 4  }
  0xef   :  { %15 = sbr.rel (!%p13_p4) target bundleno = 1 (0x1), region = 83 }

// kernel: lenet_relu_forward.7
= control target key start
LH: loop header
LB: loop body
LE: loop exit
PB: predicated region body
PF: predicated region fallthrough
CT: control target
= control target key end

     0   :  { %s3542_s0 = inlined_call_operand.vmem [shape: f32[2,1536], index: 0, kind: input, shape index: {}]   ;;  %s3543_s1 = inlined_call_operand.vmem [shape: f32[1536,384], index: 1, kind: input, shape index: {}]   ;;  %s3544_s2 = inlined_call_operand.vmem [shape: f32[1,384], index: 2, kind: input, shape index: {}]   ;;  %s3545_s3 = inlined_call_operand.vmem [shape: f32[384,23], index: 3, kind: input, shape index: {}]   ;;  %s3546_s4 = inlined_call_operand.vmem [shape: f32[1,23], index: 4, kind: input, shape index: {}]   ;;  %s3547_s5 = inlined_call_operand.hbm [shape: f32[2,23], index: 5, kind: output, shape index: {}]  }
   0x1   :  { %v69_v0 = vld [vmem:[%s3543_s1 + $0x168] sm:$0xff]  ;;  %v66_v2 = vld [vmem:[%s3543_s1 + $0x150] sm:$0xff]  ;;  %v63_v6 = vld [vmem:[%s3543_s1 + $0x138] sm:$0xff] }
   0x2   :  { %v165_v1 = vld [vmem:[%s3543_s1 + $0x468] sm:$0xff]  ;;  %639 = vmatpush.msra.mxu0 %v69_v0  ;;  %v162_v4 = vld [vmem:[%s3543_s1 + $0x450] sm:$0xff]  ;;  %v159_v8 = vld [vmem:[%s3543_s1 + $0x438] sm:$0xff] }
   0x3   :  { %679 = vmatpush.msra.mxu2 %v165_v1  ;;  %v117_v3 = vld [vmem:[%s3543_s1 + $0x2e8] sm:$0xff]  ;;  %v114_v7 = vld [vmem:[%s3543_s1 + $0x2d0] sm:$0xff]  ;;  %v111_v10 = vld [vmem:[%s3543_s1 + $0x2b8] sm:$0xff] }
   0x4   :  { %v213_v5 = vld [vmem:[%s3543_s1 + $0x5e8] sm:$0xff]  ;;  %659 = vmatpush.msra.mxu1 %v117_v3  ;;  %640 = vmatpush.msra.mxu0 %v66_v2  ;;  %v210_v9 = vld [vmem:[%s3543_s1 + $0x5d0] sm:$0xff]  ;;  %v60_v11 = vld [vmem:[%s3543_s1 + $0x120] sm:$0xff] }
   0x5   :  { %699 = vmatpush.msra.mxu3 %v213_v5  ;;  %680 = vmatpush.msra.mxu2 %v162_v4  ;;  %v156_v12 = vld [vmem:[%s3543_s1 + $0x420] sm:$0xff]  ;;  %v207_v13 = vld [vmem:[%s3543_s1 + $0x5b8] sm:$0xff]  ;;  %v57_v16 = vld [vmem:[%s3543_s1 + $0x108] sm:$0xff] }
   0x6   :  { %660 = vmatpush.msra.mxu1 %v114_v7  ;;  %641 = vmatpush.msra.mxu0 %v63_v6  ;;  %v108_v14 = vld [vmem:[%s3543_s1 + $0x2a0] sm:$0xff]  ;;  %v153_v17 = vld [vmem:[%s3543_s1 + $0x408] sm:$0xff]  ;;  %v54_v20 = vld [vmem:[%s3543_s1 + $0xf0] sm:$0xff] }
   0x7   :  { %700 = vmatpush.msra.mxu3 %v210_v9  ;;  %681 = vmatpush.msra.mxu2 %v159_v8  ;;  %v204_v15 = vld [vmem:[%s3543_s1 + $0x5a0] sm:$0xff]  ;;  %v105_v18 = vld [vmem:[%s3543_s1 + $0x288] sm:$0xff]  ;;  %v150_v21 = vld [vmem:[%s3543_s1 + $0x3f0] sm:$0xff] }
   0x8   :  { %661 = vmatpush.msra.mxu1 %v111_v10  ;;  %642 = vmatpush.msra.mxu0 %v60_v11  ;;  %v201_v19 = vld [vmem:[%s3543_s1 + $0x588] sm:$0xff]  ;;  %v102_v22 = vld [vmem:[%s3543_s1 + $0x270] sm:$0xff]  ;;  %v51_v24 = vld [vmem:[%s3543_s1 + $0xd8] sm:$0xff] }
   0x9   :  { %701 = vmatpush.msra.mxu3 %v207_v13  ;;  %682 = vmatpush.msra.mxu2 %v156_v12  ;;  %v198_v23 = vld [vmem:[%s3543_s1 + $0x570] sm:$0xff]  ;;  %v147_v25 = vld [vmem:[%s3543_s1 + $0x3d8] sm:$0xff]  ;;  %v48_v28 = vld [vmem:[%s3543_s1 + $0xc0] sm:$0xff] }
   0xa   :  { %662 = vmatpush.msra.mxu1 %v108_v14  ;;  %643 = vmatpush.msra.mxu0 %v57_v16  ;;  %v99_v26 = vld [vmem:[%s3543_s1 + $0x258] sm:$0xff]  ;;  %v144_v29 = vld [vmem:[%s3543_s1 + $0x3c0] sm:$0xff]  ;;  %v45_v32 = vld [vmem:[%s3543_s1 + $0xa8] sm:$0xff] }
   0xb   :  { %702 = vmatpush.msra.mxu3 %v204_v15  ;;  %683 = vmatpush.msra.mxu2 %v153_v17  ;;  %v195_v27 = vld [vmem:[%s3543_s1 + $0x558] sm:$0xff]  ;;  %v96_v30 = vld [vmem:[%s3543_s1 + $0x240] sm:$0xff]  ;;  %v141_v33 = vld [vmem:[%s3543_s1 + $0x3a8] sm:$0xff] }
   0xc   :  { %663 = vmatpush.msra.mxu1 %v105_v18  ;;  %644 = vmatpush.msra.mxu0 %v54_v20  ;;  %v192_v31 = vld [vmem:[%s3543_s1 + $0x540] sm:$0xff]  ;;  %v93_v34 = vld [vmem:[%s3543_s1 + $0x228] sm:$0xff]  ;;  %v42_v36 = vld [vmem:[%s3543_s1 + $0x90] sm:$0xff] }
   0xd   :  { %703 = vmatpush.msra.mxu3 %v201_v19  ;;  %684 = vmatpush.msra.mxu2 %v150_v21  ;;  %v189_v35 = vld [vmem:[%s3543_s1 + $0x528] sm:$0xff]  ;;  %v138_v37 = vld [vmem:[%s3543_s1 + $0x390] sm:$0xff]  ;;  %v39_v40 = vld [vmem:[%s3543_s1 + $0x78] sm:$0xff] }
   0xe   :  { %664 = vmatpush.msra.mxu1 %v102_v22  ;;  %645 = vmatpush.msra.mxu0 %v51_v24  ;;  %v90_v38 = vld [vmem:[%s3543_s1 + $0x210] sm:$0xff]  ;;  %v135_v41 = vld [vmem:[%s3543_s1 + $0x378] sm:$0xff]  ;;  %v36_v44 = vld [vmem:[%s3543_s1 + $0x60] sm:$0xff] }
   0xf   :  { %704 = vmatpush.msra.mxu3 %v198_v23  ;;  %685 = vmatpush.msra.mxu2 %v147_v25  ;;  %v186_v39 = vld [vmem:[%s3543_s1 + $0x510] sm:$0xff]  ;;  %v87_v42 = vld [vmem:[%s3543_s1 + $0x1f8] sm:$0xff]  ;;  %v132_v45 = vld [vmem:[%s3543_s1 + $0x360] sm:$0xff] }
  0x10   :  { %665 = vmatpush.msra.mxu1 %v99_v26  ;;  %646 = vmatpush.msra.mxu0 %v48_v28  ;;  %v183_v43 = vld [vmem:[%s3543_s1 + $0x4f8] sm:$0xff]  ;;  %v84_v46 = vld [vmem:[%s3543_s1 + $0x1e0] sm:$0xff]  ;;  %v33_v48 = vld [vmem:[%s3543_s1 + $0x48] sm:$0xff] }
  0x11   :  { %705 = vmatpush.msra.mxu3 %v195_v27  ;;  %686 = vmatpush.msra.mxu2 %v144_v29  ;;  %v180_v47 = vld [vmem:[%s3543_s1 + $0x4e0] sm:$0xff]  ;;  %v129_v49 = vld [vmem:[%s3543_s1 + $0x348] sm:$0xff]  ;;  %v30_v52 = vld [vmem:[%s3543_s1 + $0x30] sm:$0xff] }
  0x12   :  { %666 = vmatpush.msra.mxu1 %v96_v30  ;;  %647 = vmatpush.msra.mxu0 %v45_v32  ;;  %v81_v50 = vld [vmem:[%s3543_s1 + $0x1c8] sm:$0xff]  ;;  %v126_v53 = vld [vmem:[%s3543_s1 + $0x330] sm:$0xff]  ;;  %v27_v56 = vld [vmem:[%s3543_s1 + $0x18] sm:$0xff] }
  0x13   :  { %706 = vmatpush.msra.mxu3 %v192_v31  ;;  %687 = vmatpush.msra.mxu2 %v141_v33  ;;  %v177_v51 = vld [vmem:[%s3543_s1 + $0x4c8] sm:$0xff]  ;;  %v78_v54 = vld [vmem:[%s3543_s1 + $0x1b0] sm:$0xff]  ;;  %v123_v57 = vld [vmem:[%s3543_s1 + $0x318] sm:$0xff] }
  0x14   :  { %667 = vmatpush.msra.mxu1 %v93_v34  ;;  %648 = vmatpush.msra.mxu0 %v42_v36  ;;  %v174_v55 = vld [vmem:[%s3543_s1 + $0x4b0] sm:$0xff]  ;;  %v75_v58 = vld [vmem:[%s3543_s1 + $0x198] sm:$0xff]  ;;  %v24_v60 = vld [vmem:[%s3543_s1] sm:$0xff] }
  0x15   :  { %707 = vmatpush.msra.mxu3 %v189_v35  ;;  %688 = vmatpush.msra.mxu2 %v138_v37  ;;  %v171_v59 = vld [vmem:[%s3543_s1 + $0x498] sm:$0xff]  ;;  %v120_v61 = vld [vmem:[%s3543_s1 + $0x300] sm:$0xff]  ;;  %v261_v62 = vld [vmem:[%s3543_s1 + $0x768] sm:$0xff] }
  0x16   :  { %668 = vmatpush.msra.mxu1 %v90_v38  ;;  %649 = vmatpush.msra.mxu0 %v39_v40  ;;  %v357_v63 = vld [vmem:[%s3543_s1 + $0xa68] sm:$0xff]  ;;  %v72_v0 = vld [vmem:[%s3543_s1 + $0x180] sm:$0xff]  ;;  %v258_v2 = vld [vmem:[%s3543_s1 + $0x750] sm:$0xff] }
  0x17   :  { %708 = vmatpush.msra.mxu3 %v186_v39  ;;  %689 = vmatpush.msra.mxu2 %v135_v41  ;;  %v168_v1 = vld [vmem:[%s3543_s1 + $0x480] sm:$0xff]  ;;  %v309_v3 = vld [vmem:[%s3543_s1 + $0x8e8] sm:$0xff]  ;;  %v354_v4 = vld [vmem:[%s3543_s1 + $0xa50] sm:$0xff] }
  0x18   :  { %669 = vmatpush.msra.mxu1 %v87_v42  ;;  %650 = vmatpush.msra.mxu0 %v36_v44  ;;  %v405_v5 = vld [vmem:[%s3543_s1 + $0xbe8] sm:$0xff]  ;;  %v255_v6 = vld [vmem:[%s3543_s1 + $0x738] sm:$0xff]  ;;  %v306_v7 = vld [vmem:[%s3543_s1 + $0x8d0] sm:$0xff] }
  0x19   :  { %709 = vmatpush.msra.mxu3 %v183_v43  ;;  %690 = vmatpush.msra.mxu2 %v132_v45  ;;  %v351_v8 = vld [vmem:[%s3543_s1 + $0xa38] sm:$0xff]  ;;  %v402_v9 = vld [vmem:[%s3543_s1 + $0xbd0] sm:$0xff]  ;;  %v252_v10 = vld [vmem:[%s3543_s1 + $0x720] sm:$0xff] }
  0x1a   :  { %670 = vmatpush.msra.mxu1 %v84_v46  ;;  %651 = vmatpush.msra.mxu0 %v33_v48  ;;  %v303_v11 = vld [vmem:[%s3543_s1 + $0x8b8] sm:$0xff]  ;;  %v348_v12 = vld [vmem:[%s3543_s1 + $0xa20] sm:$0xff]  ;;  %v249_v14 = vld [vmem:[%s3543_s1 + $0x708] sm:$0xff] }
  0x1b   :  { %710 = vmatpush.msra.mxu3 %v180_v47  ;;  %691 = vmatpush.msra.mxu2 %v129_v49  ;;  %v399_v13 = vld [vmem:[%s3543_s1 + $0xbb8] sm:$0xff]  ;;  %v300_v15 = vld [vmem:[%s3543_s1 + $0x8a0] sm:$0xff]  ;;  %v345_v16 = vld [vmem:[%s3543_s1 + $0xa08] sm:$0xff] }
  0x1c   :  { %671 = vmatpush.msra.mxu1 %v81_v50  ;;  %652 = vmatpush.msra.mxu0 %v30_v52  ;;  %v396_v17 = vld [vmem:[%s3543_s1 + $0xba0] sm:$0xff]  ;;  %v246_v18 = vld [vmem:[%s3543_s1 + $0x6f0] sm:$0xff]  ;;  %v297_v19 = vld [vmem:[%s3543_s1 + $0x888] sm:$0xff] }
  0x1d   :  { %711 = vmatpush.msra.mxu3 %v177_v51  ;;  %692 = vmatpush.msra.mxu2 %v126_v53  ;;  %v342_v20 = vld [vmem:[%s3543_s1 + $0x9f0] sm:$0xff]  ;;  %v393_v21 = vld [vmem:[%s3543_s1 + $0xb88] sm:$0xff]  ;;  %v243_v22 = vld [vmem:[%s3543_s1 + $0x6d8] sm:$0xff] }
  0x1e   :  { %672 = vmatpush.msra.mxu1 %v78_v54  ;;  %653 = vmatpush.msra.mxu0 %v27_v56  ;;  %v294_v23 = vld [vmem:[%s3543_s1 + $0x870] sm:$0xff]  ;;  %v339_v24 = vld [vmem:[%s3543_s1 + $0x9d8] sm:$0xff]  ;;  %v21_v26 = vld [vmem:[%s3542_s0] sm:$0xff] }
  0x1f   :  { %712 = vmatpush.msra.mxu3 %v174_v55  ;;  %693 = vmatpush.msra.mxu2 %v123_v57  ;;  %v390_v25 = vld [vmem:[%s3543_s1 + $0xb70] sm:$0xff]  ;;  %v240_v27 = vld [vmem:[%s3543_s1 + $0x6c0] sm:$0xff]  ;;  %v291_v28 = vld [vmem:[%s3543_s1 + $0x858] sm:$0xff]  ;;  %611 = vst [vmem:[#allocation1] ss:$4 sm:$0xff] %v21_v26 }
  0x20   :  { %673 = vmatpush.msra.mxu1 %v75_v58  ;;  %654 = vmatpush.msra.mxu0 %v24_v60  ;;  %v336_v29 = vld [vmem:[%s3543_s1 + $0x9c0] sm:$0xff]  ;;  %v387_v30 = vld [vmem:[%s3543_s1 + $0xb58] sm:$0xff]  ;;  %v237_v31 = vld [vmem:[%s3543_s1 + $0x6a8] sm:$0xff] }
  0x21   :  { %713 = vmatpush.msra.mxu3 %v171_v59  ;;  %694 = vmatpush.msra.mxu2 %v120_v61  ;;  %v288_v32 = vld [vmem:[%s3543_s1 + $0x840] sm:$0xff]  ;;  %v333_v33 = vld [vmem:[%s3543_s1 + $0x9a8] sm:$0xff]  ;;  %v234_v35 = vld [vmem:[%s3543_s1 + $0x690] sm:$0xff] }
  0x22   :  { %719 = vmatpush.msrb.mxu0 %v261_v62  ;;  %674 = vmatpush.msra.mxu1 %v72_v0  ;;  %v384_v34 = vld [vmem:[%s3543_s1 + $0xb40] sm:$0xff]  ;;  %v285_v36 = vld [vmem:[%s3543_s1 + $0x828] sm:$0xff]  ;;  %v330_v37 = vld [vmem:[%s3543_s1 + $0x990] sm:$0xff] }
  0x23   :  { %759 = vmatpush.msrb.mxu2 %v357_v63  ;;  %714 = vmatpush.msra.mxu3 %v168_v1  ;;  %v381_v38 = vld [vmem:[%s3543_s1 + $0xb28] sm:$0xff]  ;;  %v231_v39 = vld [vmem:[%s3543_s1 + $0x678] sm:$0xff]  ;;  %v282_v40 = vld [vmem:[%s3543_s1 + $0x810] sm:$0xff] }
  0x24   :  { %720 = vmatpush.msrb.mxu0 %v258_v2  ;;  %739 = vmatpush.msrb.mxu1 %v309_v3  ;;  %v327_v41 = vld [vmem:[%s3543_s1 + $0x978] sm:$0xff]  ;;  %v378_v42 = vld [vmem:[%s3543_s1 + $0xb10] sm:$0xff]  ;;  %v22_v43 = vld [vmem:[%s3542_s0 + $0x8] sm:$0xff] }
  0x25   :  { %760 = vmatpush.msrb.mxu2 %v354_v4  ;;  %779 = vmatpush.msrb.mxu3 %v405_v5  ;;  %v228_v44 = vld [vmem:[%s3543_s1 + $0x660] sm:$0xff]  ;;  %v279_v45 = vld [vmem:[%s3543_s1 + $0x7f8] sm:$0xff]  ;;  %v23_v46 = vld [vmem:[%s3542_s0 + $0x10] sm:$0xff]  ;;  %613 = vst [vmem:[#allocation1 + $0x20] ss:$4 sm:$0xff] %v22_v43 }
  0x26   :  { %721 = vmatpush.msrb.mxu0 %v255_v6  ;;  %740 = vmatpush.msrb.mxu1 %v306_v7  ;;  %v1892_v47 = vld.sshfl [vmem:[#allocation1] sm:$0xff pattern:$0x73625140]  ;;  %v1894_v48 = vld.sshfl [vmem:[#allocation1 + $0x10] sm:$0xff pattern:$0x73625140] }
  0x27   :  { %761 = vmatpush.msrb.mxu2 %v351_v8  ;;  %780 = vmatpush.msrb.mxu3 %v402_v9  ;;  %v1896_v49 = vld.sshfl [vmem:[#allocation1 + $0x8] sm:$0xff pattern:$0x73625140]  ;;  %v1898_v50 = vld.sshfl [vmem:[#allocation1 + $0x18] sm:$0xff pattern:$0x73625140] }
  0x28   :  { %722 = vmatpush.msrb.mxu0 %v252_v10  ;;  %741 = vmatpush.msrb.mxu1 %v303_v11  ;;  %v324_v51 = vld [vmem:[%s3543_s1 + $0x960] sm:$0xff]  ;;  %v375_v52 = vld [vmem:[%s3543_s1 + $0xaf8] sm:$0xff]  ;;  %622 = vst [vmem:[#allocation1] ss:$4 sm:$0xff] %v23_v46  ;;  %v225_v53 = vld [vmem:[%s3543_s1 + $0x648] sm:$0xff] }
  0x29   :  { %762 = vmatpush.msrb.mxu2 %v348_v12  ;;  %781 = vmatpush.msrb.mxu3 %v399_v13  ;;  %v276_v54 = vld [vmem:[%s3543_s1 + $0x7e0] sm:$0xff]  ;;  %v321_v55 = vld [vmem:[%s3543_s1 + $0x948] sm:$0xff]  ;;  %v222_v57 = vld [vmem:[%s3543_s1 + $0x630] sm:$0xff] }
  0x2a   :  { %723 = vmatpush.msrb.mxu0 %v249_v14  ;;  %742 = vmatpush.msrb.mxu1 %v300_v15  ;;  %v372_v56 = vld [vmem:[%s3543_s1 + $0xae0] sm:$0xff]  ;;  %v273_v58 = vld [vmem:[%s3543_s1 + $0x7c8] sm:$0xff]  ;;  %v318_v59 = vld [vmem:[%s3543_s1 + $0x930] sm:$0xff] }
  0x2b   :  { %763 = vmatpush.msrb.mxu2 %v345_v16  ;;  %782 = vmatpush.msrb.mxu3 %v396_v17  ;;  %v369_v60 = vld [vmem:[%s3543_s1 + $0xac8] sm:$0xff]  ;;  %v219_v61 = vld [vmem:[%s3543_s1 + $0x618] sm:$0xff]  ;;  %v270_v62 = vld [vmem:[%s3543_s1 + $0x7b0] sm:$0xff] }
  0x2c   :  { %724 = vmatpush.msrb.mxu0 %v246_v18  ;;  %743 = vmatpush.msrb.mxu1 %v297_v19  ;;  %v315_v63 = vld [vmem:[%s3543_s1 + $0x918] sm:$0xff]  ;;  %v366_v0 = vld [vmem:[%s3543_s1 + $0xab0] sm:$0xff]  ;;  %v216_v1 = vld [vmem:[%s3543_s1 + $0x600] sm:$0xff] }
  0x2d   :  { %764 = vmatpush.msrb.mxu2 %v342_v20  ;;  %783 = vmatpush.msrb.mxu3 %v393_v21  ;;  %v267_v2 = vld [vmem:[%s3543_s1 + $0x798] sm:$0xff]  ;;  %v312_v3 = vld [vmem:[%s3543_s1 + $0x900] sm:$0xff]  ;;  %v453_v5 = vld [vmem:[%s3543_s1 + $0xd68] sm:$0xff] }
  0x2e   :  { %725 = vmatpush.msrb.mxu0 %v243_v22  ;;  %744 = vmatpush.msrb.mxu1 %v294_v23  ;;  %v363_v4 = vld [vmem:[%s3543_s1 + $0xa98] sm:$0xff]  ;;  %v549_v6 = vld [vmem:[%s3543_s1 + $0x1068] sm:$0xff]  ;;  %v264_v7 = vld [vmem:[%s3543_s1 + $0x780] sm:$0xff] }
  0x2f   :  { %765 = vmatpush.msrb.mxu2 %v339_v24  ;;  %784 = vmatpush.msrb.mxu3 %v390_v25  ;;  %v360_v8 = vld [vmem:[%s3543_s1 + $0xa80] sm:$0xff]  ;;  %v450_v9 = vld [vmem:[%s3543_s1 + $0xd50] sm:$0xff]  ;;  %v501_v10 = vld [vmem:[%s3543_s1 + $0xee8] sm:$0xff] }
  0x30   :  { %726 = vmatpush.msrb.mxu0 %v240_v27  ;;  %745 = vmatpush.msrb.mxu1 %v291_v28  ;;  %v546_v11 = vld [vmem:[%s3543_s1 + $0x1050] sm:$0xff]  ;;  %v597_v12 = vld [vmem:[%s3543_s1 + $0x11e8] sm:$0xff]  ;;  %v447_v13 = vld [vmem:[%s3543_s1 + $0xd38] sm:$0xff] }
  0x31   :  { %766 = vmatpush.msrb.mxu2 %v336_v29  ;;  %785 = vmatpush.msrb.mxu3 %v387_v30  ;;  %v498_v14 = vld [vmem:[%s3543_s1 + $0xed0] sm:$0xff]  ;;  %v543_v15 = vld [vmem:[%s3543_s1 + $0x1038] sm:$0xff]  ;;  %v444_v17 = vld [vmem:[%s3543_s1 + $0xd20] sm:$0xff] }
  0x32   :  { %727 = vmatpush.msrb.mxu0 %v237_v31  ;;  %746 = vmatpush.msrb.mxu1 %v288_v32  ;;  %v594_v16 = vld [vmem:[%s3543_s1 + $0x11d0] sm:$0xff]  ;;  %v495_v18 = vld [vmem:[%s3543_s1 + $0xeb8] sm:$0xff]  ;;  %v540_v19 = vld [vmem:[%s3543_s1 + $0x1020] sm:$0xff] }
  0x33   :  { %767 = vmatpush.msrb.mxu2 %v333_v33  ;;  %786 = vmatpush.msrb.mxu3 %v384_v34  ;;  %v591_v20 = vld [vmem:[%s3543_s1 + $0x11b8] sm:$0xff]  ;;  %v2006_v21 = vld.sshfl [vmem:[#allocation1 + $0x30] sm:$0xff pattern:$0x73625140]  ;;  %v441_v22 = vld [vmem:[%s3543_s1 + $0xd08] sm:$0xff] }
  0x34   :  { %728 = vmatpush.msrb.mxu0 %v234_v35  ;;  %747 = vmatpush.msrb.mxu1 %v285_v36  ;;  %v492_v23 = vld [vmem:[%s3543_s1 + $0xea0] sm:$0xff]  ;;  %v537_v24 = vld [vmem:[%s3543_s1 + $0x1008] sm:$0xff] }
  0x35   :  { %768 = vmatpush.msrb.mxu2 %v330_v37  ;;  %787 = vmatpush.msrb.mxu3 %v381_v38 }
  0x36   :  { %729 = vmatpush.msrb.mxu0 %v231_v39  ;;  %748 = vmatpush.msrb.mxu1 %v282_v40 }
  0x37   :  { %769 = vmatpush.msrb.mxu2 %v327_v41  ;;  %788 = vmatpush.msrb.mxu3 %v378_v42 }
  0x38   :  { %730 = vmatpush.msrb.mxu0 %v228_v44  ;;  %749 = vmatpush.msrb.mxu1 %v279_v45 }
  0x39   :  { %770 = vmatpush.msrb.mxu2 %v324_v51  ;;  %789 = vmatpush.msrb.mxu3 %v375_v52 }
  0x3a   :  { %731 = vmatpush.msrb.mxu0 %v225_v53  ;;  %750 = vmatpush.msrb.mxu1 %v276_v54 }
  0x3b   :  { %771 = vmatpush.msrb.mxu2 %v321_v55  ;;  %790 = vmatpush.msrb.mxu3 %v372_v56 }
  0x3c   :  { %732 = vmatpush.msrb.mxu0 %v222_v57  ;;  %751 = vmatpush.msrb.mxu1 %v273_v58 }
  0x3d   :  { %772 = vmatpush.msrb.mxu2 %v318_v59  ;;  %791 = vmatpush.msrb.mxu3 %v369_v60 }
  0x3e   :  { %733 = vmatpush.msrb.mxu0 %v219_v61  ;;  %752 = vmatpush.msrb.mxu1 %v270_v62 }
  0x3f   :  { %773 = vmatpush.msrb.mxu2 %v315_v63  ;;  %792 = vmatpush.msrb.mxu3 %v366_v0 }
  0x40   :  { %734 = vmatpush.msrb.mxu0 %v216_v1  ;;  %753 = vmatpush.msrb.mxu1 %v267_v2 }
  0x41   :  { %774 = vmatpush.msrb.mxu2 %v312_v3  ;;  %793 = vmatpush.msrb.mxu3 %v363_v4 }
  0x42   :  { %655 = vmatmul.f32.vlgmr.msra.gmra.mxu0 %v1892_v47  ;;  %695 = vmatmul.f32.vlgmr.msra.gmra.mxu2 %v1894_v48 }
  0x43   :  { %799 = vmatpush.msra.mxu0 %v453_v5  ;;  %839 = vmatpush.msra.mxu2 %v549_v6 }
  0x44   :  { %754 = vmatpush.msrb.mxu1 %v264_v7  ;;  %794 = vmatpush.msrb.mxu3 %v360_v8 }
  0x45   :  { %675 = vmatmul.f32.vlgmr.msra.gmra.mxu1 %v1896_v49  ;;  %715 = vmatmul.f32.vlgmr.msra.gmra.mxu3 %v1898_v50 }
  0x46   :  { %800 = vmatpush.msra.mxu0 %v450_v9  ;;  %819 = vmatpush.msra.mxu1 %v501_v10 }
  0x47   :  { %840 = vmatpush.msra.mxu2 %v546_v11  ;;  %859 = vmatpush.msra.mxu3 %v597_v12 }
  0x48   :  { %801 = vmatpush.msra.mxu0 %v447_v13  ;;  %820 = vmatpush.msra.mxu1 %v498_v14 }
  0x49   :  { %841 = vmatpush.msra.mxu2 %v543_v15  ;;  %860 = vmatpush.msra.mxu3 %v594_v16 }
  0x4a   :  { %802 = vmatpush.msra.mxu0 %v444_v17  ;;  %821 = vmatpush.msra.mxu1 %v495_v18 }
  0x4b   :  { %10 = vsyncpa [#allocation3], 0  ;;  %842 = vmatpush.msra.mxu2 %v540_v19  ;;  %861 = vmatpush.msra.mxu3 %v591_v20  ;;  %v588_v25 = vld [vmem:[%s3543_s1 + $0x11a0] sm:$0xff]  ;;  %v2023_v27 = vld.sshfl [vmem:[#allocation1 + $0x38] sm:$0xff pattern:$0x73625140] }
  0x4c   :  { %v2020_v26 = vld.sshfl [vmem:[#allocation1 + $0x20] sm:$0xff pattern:$0x73625140]  ;;  %775 = vmatmul.f32.vlgmr.msrb.gmra.mxu2 %v2006_v21  ;;  %803 = vmatpush.msra.mxu0 %v441_v22  ;;  %v438_v28 = vld [vmem:[%s3543_s1 + $0xcf0] sm:$0xff]  ;;  %v489_v29 = vld [vmem:[%s3543_s1 + $0xe88] sm:$0xff]  ;;  %s1528_s24 = smov [#allocation2]  }
  0x4d   :  { %822 = vmatpush.msra.mxu1 %v492_v23  ;;  %843 = vmatpush.msra.mxu2 %v537_v24  ;;  %v534_v30 = vld [vmem:[%s3543_s1 + $0xff0] sm:$0xff]  ;;  %v585_v31 = vld [vmem:[%s3543_s1 + $0x1188] sm:$0xff]  ;;  %v435_v33 = vld [vmem:[%s3543_s1 + $0xcd8] sm:$0xff]  ;;  %s1481_s25 = sshll.u32 %s1528_s24, 4  ;;  %s1483_s28 = sshll.u32 %s3547_s5, 4  ;;  %vm1474_vm0 = vcmask 181248   ;;  %s1482_s25 = int_to_ptr.vmem [resolvable:$true] %s1481_s25  ;;  %s1484_s28 = int_to_ptr.hbm [resolvable:$true] %s1483_s28 }
  0x4e   :  { %862 = vmatpush.msra.mxu3 %v588_v25  ;;  %735 = vmatmul.f32.vlgmr.msrb.gmra.mxu0 %v2020_v26  ;;  %v2038_v32 = vld.sshfl [vmem:[#allocation1 + $0x28] sm:$0xff pattern:$0x73625140]  ;;  %v486_v34 = vld [vmem:[%s3543_s1 + $0xe70] sm:$0xff]  ;;  %v531_v35 = vld [vmem:[%s3543_s1 + $0xfd8] sm:$0xff] }
  0x4f   :  { %795 = vmatmul.f32.vlgmr.msrb.gmra.mxu3 %v2023_v27  ;;  %804 = vmatpush.msra.mxu0 %v438_v28  ;;  %v582_v36 = vld [vmem:[%s3543_s1 + $0x1170] sm:$0xff]  ;;  %v432_v37 = vld [vmem:[%s3543_s1 + $0xcc0] sm:$0xff]  ;;  %v483_v38 = vld [vmem:[%s3543_s1 + $0xe58] sm:$0xff] }
  0x50   :  { %823 = vmatpush.msra.mxu1 %v489_v29  ;;  %844 = vmatpush.msra.mxu2 %v534_v30  ;;  %v528_v39 = vld [vmem:[%s3543_s1 + $0xfc0] sm:$0xff]  ;;  %v579_v40 = vld [vmem:[%s3543_s1 + $0x1158] sm:$0xff]  ;;  %v429_v41 = vld [vmem:[%s3543_s1 + $0xca8] sm:$0xff] }
  0x51   :  { %863 = vmatpush.msra.mxu3 %v585_v31  ;;  %755 = vmatmul.f32.vlgmr.msrb.gmra.mxu1 %v2038_v32  ;;  %v480_v42 = vld [vmem:[%s3543_s1 + $0xe40] sm:$0xff]  ;;  %v525_v43 = vld [vmem:[%s3543_s1 + $0xfa8] sm:$0xff]  ;;  %v426_v45 = vld [vmem:[%s3543_s1 + $0xc90] sm:$0xff] }
  0x52   :  { %805 = vmatpush.msra.mxu0 %v435_v33  ;;  %824 = vmatpush.msra.mxu1 %v486_v34  ;;  %v576_v44 = vld [vmem:[%s3543_s1 + $0x1140] sm:$0xff]  ;;  %v477_v46 = vld [vmem:[%s3543_s1 + $0xe28] sm:$0xff]  ;;  %v522_v51 = vld [vmem:[%s3543_s1 + $0xf90] sm:$0xff] }
  0x53   :  { %845 = vmatpush.msra.mxu2 %v531_v35  ;;  %864 = vmatpush.msra.mxu3 %v582_v36  ;;  %v573_v52 = vld [vmem:[%s3543_s1 + $0x1128] sm:$0xff]  ;;  %v423_v53 = vld [vmem:[%s3543_s1 + $0xc78] sm:$0xff]  ;;  %v474_v54 = vld [vmem:[%s3543_s1 + $0xe10] sm:$0xff] }
  0x54   :  { %806 = vmatpush.msra.mxu0 %v432_v37  ;;  %825 = vmatpush.msra.mxu1 %v483_v38  ;;  %v519_v55 = vld [vmem:[%s3543_s1 + $0xf78] sm:$0xff]  ;;  %v570_v56 = vld [vmem:[%s3543_s1 + $0x1110] sm:$0xff]  ;;  %v420_v57 = vld [vmem:[%s3543_s1 + $0xc60] sm:$0xff] }
  0x55   :  { %846 = vmatpush.msra.mxu2 %v528_v39  ;;  %865 = vmatpush.msra.mxu3 %v579_v40  ;;  %v471_v58 = vld [vmem:[%s3543_s1 + $0xdf8] sm:$0xff]  ;;  %v516_v59 = vld [vmem:[%s3543_s1 + $0xf60] sm:$0xff]  ;;  %v417_v61 = vld [vmem:[%s3543_s1 + $0xc48] sm:$0xff] }
  0x56   :  { %807 = vmatpush.msra.mxu0 %v429_v41  ;;  %826 = vmatpush.msra.mxu1 %v480_v42  ;;  %v567_v60 = vld [vmem:[%s3543_s1 + $0x10f8] sm:$0xff]  ;;  %v468_v62 = vld [vmem:[%s3543_s1 + $0xde0] sm:$0xff]  ;;  %v513_v63 = vld [vmem:[%s3543_s1 + $0xf48] sm:$0xff] }
  0x57   :  { %847 = vmatpush.msra.mxu2 %v525_v43  ;;  %866 = vmatpush.msra.mxu3 %v576_v44  ;;  %v564_v0 = vld [vmem:[%s3543_s1 + $0x10e0] sm:$0xff]  ;;  %v414_v1 = vld [vmem:[%s3543_s1 + $0xc30] sm:$0xff]  ;;  %v465_v2 = vld [vmem:[%s3543_s1 + $0xdc8] sm:$0xff] }
  0x58   :  { %808 = vmatpush.msra.mxu0 %v426_v45  ;;  %827 = vmatpush.msra.mxu1 %v477_v46  ;;  %v510_v3 = vld [vmem:[%s3543_s1 + $0xf30] sm:$0xff]  ;;  %v561_v4 = vld [vmem:[%s3543_s1 + $0x10c8] sm:$0xff]  ;;  %v411_v5 = vld [vmem:[%s3543_s1 + $0xc18] sm:$0xff] }
  0x59   :  { %848 = vmatpush.msra.mxu2 %v522_v51  ;;  %867 = vmatpush.msra.mxu3 %v573_v52  ;;  %v462_v6 = vld [vmem:[%s3543_s1 + $0xdb0] sm:$0xff]  ;;  %v507_v7 = vld [vmem:[%s3543_s1 + $0xf18] sm:$0xff]  ;;  %v408_v9 = vld [vmem:[%s3543_s1 + $0xc00] sm:$0xff] }
  0x5a   :  { %809 = vmatpush.msra.mxu0 %v423_v53  ;;  %828 = vmatpush.msra.mxu1 %v474_v54  ;;  %v558_v8 = vld [vmem:[%s3543_s1 + $0x10b0] sm:$0xff]  ;;  %v459_v10 = vld [vmem:[%s3543_s1 + $0xd98] sm:$0xff]  ;;  %v504_v11 = vld [vmem:[%s3543_s1 + $0xf00] sm:$0xff] }
  0x5b   :  { %849 = vmatpush.msra.mxu2 %v519_v55  ;;  %868 = vmatpush.msra.mxu3 %v570_v56  ;;  %v555_v12 = vld [vmem:[%s3543_s1 + $0x1098] sm:$0xff]  ;;  %v2162_v13 = vld.sshfl [vmem:[#allocation1] sm:$0xff pattern:$0x73625140]  ;;  %v70_v15 = vld [vmem:[%s3543_s1 + $0x170] sm:$0xff] }
  0x5c   :  { %810 = vmatpush.msra.mxu0 %v420_v57  ;;  %829 = vmatpush.msra.mxu1 %v471_v58  ;;  %v2164_v14 = vld.sshfl [vmem:[#allocation1 + $0x10] sm:$0xff pattern:$0x73625140]  ;;  %v456_v17 = vld [vmem:[%s3543_s1 + $0xd80] sm:$0xff]  ;;  %v67_v22 = vld [vmem:[%s3543_s1 + $0x158] sm:$0xff] }
  0x5d   :  { %850 = vmatpush.msra.mxu2 %v516_v59  ;;  %869 = vmatpush.msra.mxu3 %v567_v60  ;;  %v166_v16 = vld [vmem:[%s3543_s1 + $0x470] sm:$0xff]  ;;  %v552_v18 = vld [vmem:[%s3543_s1 + $0x1080] sm:$0xff]  ;;  %v2180_v19 = vld.sshfl [vmem:[#allocation1 + $0x8] sm:$0xff pattern:$0x73625140] }
  0x5e   :  { %811 = vmatpush.msra.mxu0 %v417_v61  ;;  %830 = vmatpush.msra.mxu1 %v468_v62  ;;  %v2182_v20 = vld.sshfl [vmem:[#allocation1 + $0x18] sm:$0xff pattern:$0x73625140]  ;;  %v118_v23 = vld [vmem:[%s3543_s1 + $0x2f0] sm:$0xff]  ;;  %v64_v28 = vld [vmem:[%s3543_s1 + $0x140] sm:$0xff] }
  0x5f   :  { %851 = vmatpush.msra.mxu2 %v513_v63  ;;  %870 = vmatpush.msra.mxu3 %v564_v0  ;;  %v163_v24 = vld [vmem:[%s3543_s1 + $0x458] sm:$0xff]  ;;  %v214_v25 = vld [vmem:[%s3543_s1 + $0x5f0] sm:$0xff]  ;;  %v160_v30 = vld [vmem:[%s3543_s1 + $0x440] sm:$0xff] }
  0x60   :  { %812 = vmatpush.msra.mxu0 %v414_v1  ;;  %831 = vmatpush.msra.mxu1 %v465_v2  ;;  %v115_v29 = vld [vmem:[%s3543_s1 + $0x2d8] sm:$0xff]  ;;  %v61_v33 = vld [vmem:[%s3543_s1 + $0x128] sm:$0xff]  ;;  %v112_v34 = vld [vmem:[%s3543_s1 + $0x2c0] sm:$0xff] }
  0x61   :  { %852 = vmatpush.msra.mxu2 %v510_v3  ;;  %871 = vmatpush.msra.mxu3 %v561_v4  ;;  %v211_v31 = vld [vmem:[%s3543_s1 + $0x5d8] sm:$0xff]  ;;  %v157_v35 = vld [vmem:[%s3543_s1 + $0x428] sm:$0xff]  ;;  %v208_v36 = vld [vmem:[%s3543_s1 + $0x5c0] sm:$0xff] }
  0x62   :  { %813 = vmatpush.msra.mxu0 %v411_v5  ;;  %832 = vmatpush.msra.mxu1 %v462_v6  ;;  %v58_v37 = vld [vmem:[%s3543_s1 + $0x110] sm:$0xff]  ;;  %v109_v38 = vld [vmem:[%s3543_s1 + $0x2a8] sm:$0xff]  ;;  %v55_v41 = vld [vmem:[%s3543_s1 + $0xf8] sm:$0xff] }
  0x63   :  { %853 = vmatpush.msra.mxu2 %v507_v7  ;;  %872 = vmatpush.msra.mxu3 %v558_v8  ;;  %v154_v39 = vld [vmem:[%s3543_s1 + $0x410] sm:$0xff]  ;;  %v205_v40 = vld [vmem:[%s3543_s1 + $0x5a8] sm:$0xff]  ;;  %v151_v43 = vld [vmem:[%s3543_s1 + $0x3f8] sm:$0xff] }
  0x64   :  { %814 = vmatpush.msra.mxu0 %v408_v9  ;;  %833 = vmatpush.msra.mxu1 %v459_v10  ;;  %v106_v42 = vld [vmem:[%s3543_s1 + $0x290] sm:$0xff]  ;;  %v52_v45 = vld [vmem:[%s3543_s1 + $0xe0] sm:$0xff]  ;;  %v103_v46 = vld [vmem:[%s3543_s1 + $0x278] sm:$0xff] }
  0x65   :  { %854 = vmatpush.msra.mxu2 %v504_v11  ;;  %873 = vmatpush.msra.mxu3 %v555_v12  ;;  %v202_v44 = vld [vmem:[%s3543_s1 + $0x590] sm:$0xff]  ;;  %v148_v51 = vld [vmem:[%s3543_s1 + $0x3e0] sm:$0xff]  ;;  %v199_v52 = vld [vmem:[%s3543_s1 + $0x578] sm:$0xff] }
  0x66   :  { %815 = vmatmul.f32.vlgmr.msra.gmra.mxu0 %v2162_v13  ;;  %855 = vmatmul.f32.vlgmr.msra.gmra.mxu2 %v2164_v14  ;;  %v49_v53 = vld [vmem:[%s3543_s1 + $0xc8] sm:$0xff]  ;;  %v100_v54 = vld [vmem:[%s3543_s1 + $0x260] sm:$0xff]  ;;  %v46_v57 = vld [vmem:[%s3543_s1 + $0xb0] sm:$0xff] }
  0x67   :  { %879 = vmatpush.msrb.mxu0 %v70_v15  ;;  %919 = vmatpush.msrb.mxu2 %v166_v16  ;;  %v145_v55 = vld [vmem:[%s3543_s1 + $0x3c8] sm:$0xff]  ;;  %v196_v56 = vld [vmem:[%s3543_s1 + $0x560] sm:$0xff]  ;;  %v142_v59 = vld [vmem:[%s3543_s1 + $0x3b0] sm:$0xff] }
  0x68   :  { %834 = vmatpush.msra.mxu1 %v456_v17  ;;  %874 = vmatpush.msra.mxu3 %v552_v18  ;;  %v97_v58 = vld [vmem:[%s3543_s1 + $0x248] sm:$0xff]  ;;  %v43_v61 = vld [vmem:[%s3543_s1 + $0x98] sm:$0xff]  ;;  %v94_v62 = vld [vmem:[%s3543_s1 + $0x230] sm:$0xff] }
  0x69   :  { %835 = vmatmul.f32.vlgmr.msra.gmra.mxu1 %v2180_v19  ;;  %875 = vmatmul.f32.vlgmr.msra.gmra.mxu3 %v2182_v20  ;;  %v193_v60 = vld [vmem:[%s3543_s1 + $0x548] sm:$0xff]  ;;  %v139_v63 = vld [vmem:[%s3543_s1 + $0x398] sm:$0xff]  ;;  %v190_v0 = vld [vmem:[%s3543_s1 + $0x530] sm:$0xff] }
  0x6a   :  { %880 = vmatpush.msrb.mxu0 %v67_v22  ;;  %899 = vmatpush.msrb.mxu1 %v118_v23  ;;  %v40_v1 = vld [vmem:[%s3543_s1 + $0x80] sm:$0xff]  ;;  %v91_v2 = vld [vmem:[%s3543_s1 + $0x218] sm:$0xff]  ;;  %v37_v5 = vld [vmem:[%s3543_s1 + $0x68] sm:$0xff] }
  0x6b   :  { %920 = vmatpush.msrb.mxu2 %v163_v24  ;;  %939 = vmatpush.msrb.mxu3 %v214_v25  ;;  %v136_v3 = vld [vmem:[%s3543_s1 + $0x380] sm:$0xff]  ;;  %v187_v4 = vld [vmem:[%s3543_s1 + $0x518] sm:$0xff]  ;;  %v133_v7 = vld [vmem:[%s3543_s1 + $0x368] sm:$0xff] }
  0x6c   :  { %881 = vmatpush.msrb.mxu0 %v64_v28  ;;  %900 = vmatpush.msrb.mxu1 %v115_v29  ;;  %v88_v6 = vld [vmem:[%s3543_s1 + $0x200] sm:$0xff]  ;;  %v34_v9 = vld [vmem:[%s3543_s1 + $0x50] sm:$0xff]  ;;  %v85_v10 = vld [vmem:[%s3543_s1 + $0x1e8] sm:$0xff] }
  0x6d   :  { %921 = vmatpush.msrb.mxu2 %v160_v30  ;;  %940 = vmatpush.msrb.mxu3 %v211_v31  ;;  %v184_v8 = vld [vmem:[%s3543_s1 + $0x500] sm:$0xff]  ;;  %v130_v11 = vld [vmem:[%s3543_s1 + $0x350] sm:$0xff]  ;;  %v181_v12 = vld [vmem:[%s3543_s1 + $0x4e8] sm:$0xff] }
  0x6e   :  { %882 = vmatpush.msrb.mxu0 %v61_v33  ;;  %901 = vmatpush.msrb.mxu1 %v112_v34  ;;  %v31_v15 = vld [vmem:[%s3543_s1 + $0x38] sm:$0xff]  ;;  %v82_v16 = vld [vmem:[%s3543_s1 + $0x1d0] sm:$0xff]  ;;  %v28_v22 = vld [vmem:[%s3543_s1 + $0x20] sm:$0xff] }
  0x6f   :  { %922 = vmatpush.msrb.mxu2 %v157_v35  ;;  %941 = vmatpush.msrb.mxu3 %v208_v36  ;;  %v127_v17 = vld [vmem:[%s3543_s1 + $0x338] sm:$0xff]  ;;  %v178_v18 = vld [vmem:[%s3543_s1 + $0x4d0] sm:$0xff]  ;;  %v124_v24 = vld [vmem:[%s3543_s1 + $0x320] sm:$0xff] }
  0x70   :  { %883 = vmatpush.msrb.mxu0 %v58_v37  ;;  %902 = vmatpush.msrb.mxu1 %v109_v38  ;;  %v79_v23 = vld [vmem:[%s3543_s1 + $0x1b8] sm:$0xff]  ;;  %v25_v28 = vld [vmem:[%s3543_s1 + $0x8] sm:$0xff]  ;;  %v76_v29 = vld [vmem:[%s3543_s1 + $0x1a0] sm:$0xff] }
  0x71   :  { %923 = vmatpush.msrb.mxu2 %v154_v39  ;;  %942 = vmatpush.msrb.mxu3 %v205_v40  ;;  %v175_v25 = vld [vmem:[%s3543_s1 + $0x4b8] sm:$0xff]  ;;  %v121_v30 = vld [vmem:[%s3543_s1 + $0x308] sm:$0xff]  ;;  %v172_v31 = vld [vmem:[%s3543_s1 + $0x4a0] sm:$0xff] }
  0x72   :  { %884 = vmatpush.msrb.mxu0 %v55_v41  ;;  %903 = vmatpush.msrb.mxu1 %v106_v42  ;;  %v262_v33 = vld [vmem:[%s3543_s1 + $0x770] sm:$0xff]  ;;  %v73_v35 = vld [vmem:[%s3543_s1 + $0x188] sm:$0xff]  ;;  %v259_v37 = vld [vmem:[%s3543_s1 + $0x758] sm:$0xff] }
  0x73   :  { %924 = vmatpush.msrb.mxu2 %v151_v43  ;;  %943 = vmatpush.msrb.mxu3 %v202_v44  ;;  %v358_v34 = vld [vmem:[%s3543_s1 + $0xa70] sm:$0xff]  ;;  %v169_v36 = vld [vmem:[%s3543_s1 + $0x488] sm:$0xff]  ;;  %v355_v39 = vld [vmem:[%s3543_s1 + $0xa58] sm:$0xff] }
  0x74   :  { %885 = vmatpush.msrb.mxu0 %v52_v45  ;;  %904 = vmatpush.msrb.mxu1 %v103_v46  ;;  %v310_v38 = vld [vmem:[%s3543_s1 + $0x8f0] sm:$0xff]  ;;  %v256_v41 = vld [vmem:[%s3543_s1 + $0x740] sm:$0xff]  ;;  %v307_v42 = vld [vmem:[%s3543_s1 + $0x8d8] sm:$0xff] }
  0x75   :  { %925 = vmatpush.msrb.mxu2 %v148_v51  ;;  %944 = vmatpush.msrb.mxu3 %v199_v52  ;;  %v406_v40 = vld [vmem:[%s3543_s1 + $0xbf0] sm:$0xff]  ;;  %v352_v43 = vld [vmem:[%s3543_s1 + $0xa40] sm:$0xff]  ;;  %v403_v44 = vld [vmem:[%s3543_s1 + $0xbd8] sm:$0xff] }
  0x76   :  { %886 = vmatpush.msrb.mxu0 %v49_v53  ;;  %905 = vmatpush.msrb.mxu1 %v100_v54  ;;  %v253_v45 = vld [vmem:[%s3543_s1 + $0x728] sm:$0xff]  ;;  %v304_v46 = vld [vmem:[%s3543_s1 + $0x8c0] sm:$0xff]  ;;  %v250_v53 = vld [vmem:[%s3543_s1 + $0x710] sm:$0xff] }
  0x77   :  { %926 = vmatpush.msrb.mxu2 %v145_v55  ;;  %945 = vmatpush.msrb.mxu3 %v196_v56  ;;  %v349_v51 = vld [vmem:[%s3543_s1 + $0xa28] sm:$0xff]  ;;  %v400_v52 = vld [vmem:[%s3543_s1 + $0xbc0] sm:$0xff]  ;;  %v346_v55 = vld [vmem:[%s3543_s1 + $0xa10] sm:$0xff] }
  0x78   :  { %887 = vmatpush.msrb.mxu0 %v46_v57  ;;  %906 = vmatpush.msrb.mxu1 %v97_v58  ;;  %v301_v54 = vld [vmem:[%s3543_s1 + $0x8a8] sm:$0xff]  ;;  %v247_v57 = vld [vmem:[%s3543_s1 + $0x6f8] sm:$0xff]  ;;  %v298_v58 = vld [vmem:[%s3543_s1 + $0x890] sm:$0xff] }
  0x79   :  { %927 = vmatpush.msrb.mxu2 %v142_v59  ;;  %946 = vmatpush.msrb.mxu3 %v193_v60  ;;  %v397_v56 = vld [vmem:[%s3543_s1 + $0xba8] sm:$0xff]  ;;  %v343_v59 = vld [vmem:[%s3543_s1 + $0x9f8] sm:$0xff]  ;;  %v394_v60 = vld [vmem:[%s3543_s1 + $0xb90] sm:$0xff] }
  0x7a   :  { %888 = vmatpush.msrb.mxu0 %v43_v61  ;;  %907 = vmatpush.msrb.mxu1 %v94_v62  ;;  %v244_v61 = vld [vmem:[%s3543_s1 + $0x6e0] sm:$0xff]  ;;  %v295_v62 = vld [vmem:[%s3543_s1 + $0x878] sm:$0xff] }
  0x7b   :  { %928 = vmatpush.msrb.mxu2 %v139_v63  ;;  %947 = vmatpush.msrb.mxu3 %v190_v0  ;;  %v340_v63 = vld [vmem:[%s3543_s1 + $0x9e0] sm:$0xff]  ;;  %v391_v0 = vld [vmem:[%s3543_s1 + $0xb78] sm:$0xff] }
  0x7c   :  { %889 = vmatpush.msrb.mxu0 %v40_v1  ;;  %908 = vmatpush.msrb.mxu1 %v91_v2  ;;  %v241_v1 = vld [vmem:[%s3543_s1 + $0x6c8] sm:$0xff]  ;;  %v292_v2 = vld [vmem:[%s3543_s1 + $0x860] sm:$0xff] }
  0x7d   :  { %929 = vmatpush.msrb.mxu2 %v136_v3  ;;  %948 = vmatpush.msrb.mxu3 %v187_v4  ;;  %v337_v3 = vld [vmem:[%s3543_s1 + $0x9c8] sm:$0xff]  ;;  %v388_v4 = vld [vmem:[%s3543_s1 + $0xb60] sm:$0xff] }
  0x7e   :  { %890 = vmatpush.msrb.mxu0 %v37_v5  ;;  %909 = vmatpush.msrb.mxu1 %v88_v6  ;;  %v238_v5 = vld [vmem:[%s3543_s1 + $0x6b0] sm:$0xff]  ;;  %v289_v6 = vld [vmem:[%s3543_s1 + $0x848] sm:$0xff] }
  0x7f   :  { %930 = vmatpush.msrb.mxu2 %v133_v7  ;;  %949 = vmatpush.msrb.mxu3 %v184_v8  ;;  %v334_v7 = vld [vmem:[%s3543_s1 + $0x9b0] sm:$0xff]  ;;  %v385_v8 = vld [vmem:[%s3543_s1 + $0xb48] sm:$0xff] }
  0x80   :  { %891 = vmatpush.msrb.mxu0 %v34_v9  ;;  %910 = vmatpush.msrb.mxu1 %v85_v10  ;;  %v235_v9 = vld [vmem:[%s3543_s1 + $0x698] sm:$0xff]  ;;  %v286_v10 = vld [vmem:[%s3543_s1 + $0x830] sm:$0xff] }
  0x81   :  { %931 = vmatpush.msrb.mxu2 %v130_v11  ;;  %950 = vmatpush.msrb.mxu3 %v181_v12  ;;  %v331_v11 = vld [vmem:[%s3543_s1 + $0x998] sm:$0xff]  ;;  %v382_v12 = vld [vmem:[%s3543_s1 + $0xb30] sm:$0xff] }
  0x82   :  { %892 = vmatpush.msrb.mxu0 %v31_v15  ;;  %911 = vmatpush.msrb.mxu1 %v82_v16  ;;  %v232_v15 = vld [vmem:[%s3543_s1 + $0x680] sm:$0xff]  ;;  %v283_v16 = vld [vmem:[%s3543_s1 + $0x818] sm:$0xff] }
  0x83   :  { %932 = vmatpush.msrb.mxu2 %v127_v17  ;;  %951 = vmatpush.msrb.mxu3 %v178_v18  ;;  %v328_v17 = vld [vmem:[%s3543_s1 + $0x980] sm:$0xff]  ;;  %v379_v18 = vld [vmem:[%s3543_s1 + $0xb18] sm:$0xff] }
  0x84   :  { %893 = vmatpush.msrb.mxu0 %v28_v22  ;;  %912 = vmatpush.msrb.mxu1 %v79_v23  ;;  %v229_v22 = vld [vmem:[%s3543_s1 + $0x668] sm:$0xff]  ;;  %v280_v23 = vld [vmem:[%s3543_s1 + $0x800] sm:$0xff] }
  0x85   :  { %933 = vmatpush.msrb.mxu2 %v124_v24  ;;  %952 = vmatpush.msrb.mxu3 %v175_v25  ;;  %v325_v24 = vld [vmem:[%s3543_s1 + $0x968] sm:$0xff]  ;;  %v376_v25 = vld [vmem:[%s3543_s1 + $0xb00] sm:$0xff] }
  0x86   :  { %894 = vmatpush.msrb.mxu0 %v25_v28  ;;  %913 = vmatpush.msrb.mxu1 %v76_v29  ;;  %v226_v28 = vld [vmem:[%s3543_s1 + $0x650] sm:$0xff]  ;;  %v277_v29 = vld [vmem:[%s3543_s1 + $0x7e8] sm:$0xff] }
  0x87   :  { %934 = vmatpush.msrb.mxu2 %v121_v30  ;;  %953 = vmatpush.msrb.mxu3 %v172_v31  ;;  %v322_v30 = vld [vmem:[%s3543_s1 + $0x950] sm:$0xff]  ;;  %v373_v31 = vld [vmem:[%s3543_s1 + $0xae8] sm:$0xff] }
  0x88   :  { %959 = vmatpush.msra.mxu0 %v262_v33  ;;  %914 = vmatpush.msrb.mxu1 %v73_v35  ;;  %v223_v33 = vld [vmem:[%s3543_s1 + $0x638] sm:$0xff] }
  0x89   :  { %999 = vmatpush.msra.mxu2 %v358_v34  ;;  %954 = vmatpush.msrb.mxu3 %v169_v36  ;;  %v274_v34 = vld [vmem:[%s3543_s1 + $0x7d0] sm:$0xff]  ;;  %v319_v35 = vld [vmem:[%s3543_s1 + $0x938] sm:$0xff] }
  0x8a   :  { %960 = vmatpush.msra.mxu0 %v259_v37  ;;  %979 = vmatpush.msra.mxu1 %v310_v38  ;;  %v370_v36 = vld [vmem:[%s3543_s1 + $0xad0] sm:$0xff]  ;;  %v220_v37 = vld [vmem:[%s3543_s1 + $0x620] sm:$0xff]  ;;  %v271_v38 = vld [vmem:[%s3543_s1 + $0x7b8] sm:$0xff] }
  0x8b   :  { %1000 = vmatpush.msra.mxu2 %v355_v39  ;;  %1019 = vmatpush.msra.mxu3 %v406_v40  ;;  %v316_v39 = vld [vmem:[%s3543_s1 + $0x920] sm:$0xff]  ;;  %v367_v40 = vld [vmem:[%s3543_s1 + $0xab8] sm:$0xff] }
  0x8c   :  { %961 = vmatpush.msra.mxu0 %v256_v41  ;;  %980 = vmatpush.msra.mxu1 %v307_v42  ;;  %v217_v41 = vld [vmem:[%s3543_s1 + $0x608] sm:$0xff]  ;;  %v268_v42 = vld [vmem:[%s3543_s1 + $0x7a0] sm:$0xff] }
  0x8d   :  { %1001 = vmatpush.msra.mxu2 %v352_v43  ;;  %1020 = vmatpush.msra.mxu3 %v403_v44  ;;  %v313_v43 = vld [vmem:[%s3543_s1 + $0x908] sm:$0xff]  ;;  %v364_v44 = vld [vmem:[%s3543_s1 + $0xaa0] sm:$0xff] }
  0x8e   :  { %962 = vmatpush.msra.mxu0 %v253_v45  ;;  %981 = vmatpush.msra.mxu1 %v304_v46  ;;  %v454_v45 = vld [vmem:[%s3543_s1 + $0xd70] sm:$0xff] }
  0x8f   :  { %1002 = vmatpush.msra.mxu2 %v349_v51  ;;  %1021 = vmatpush.msra.mxu3 %v400_v52  ;;  %v550_v46 = vld [vmem:[%s3543_s1 + $0x1070] sm:$0xff]  ;;  %v265_v51 = vld [vmem:[%s3543_s1 + $0x788] sm:$0xff] }
  0x90   :  { %963 = vmatpush.msra.mxu0 %v250_v53  ;;  %982 = vmatpush.msra.mxu1 %v301_v54  ;;  %v361_v52 = vld [vmem:[%s3543_s1 + $0xa88] sm:$0xff]  ;;  %v451_v53 = vld [vmem:[%s3543_s1 + $0xd58] sm:$0xff]  ;;  %v502_v54 = vld [vmem:[%s3543_s1 + $0xef0] sm:$0xff] }
  0x91   :  { %1003 = vmatpush.msra.mxu2 %v346_v55  ;;  %1022 = vmatpush.msra.mxu3 %v397_v56  ;;  %v547_v55 = vld [vmem:[%s3543_s1 + $0x1058] sm:$0xff]  ;;  %v598_v56 = vld [vmem:[%s3543_s1 + $0x11f0] sm:$0xff] }
  0x92   :  { %964 = vmatpush.msra.mxu0 %v247_v57  ;;  %983 = vmatpush.msra.mxu1 %v298_v58  ;;  %v448_v57 = vld [vmem:[%s3543_s1 + $0xd40] sm:$0xff]  ;;  %v499_v58 = vld [vmem:[%s3543_s1 + $0xed8] sm:$0xff] }
  0x93   :  { %1004 = vmatpush.msra.mxu2 %v343_v59  ;;  %1023 = vmatpush.msra.mxu3 %v394_v60  ;;  %v544_v59 = vld [vmem:[%s3543_s1 + $0x1040] sm:$0xff]  ;;  %v595_v60 = vld [vmem:[%s3543_s1 + $0x11d8] sm:$0xff] }
  0x94   :  { %965 = vmatpush.msra.mxu0 %v244_v61  ;;  %984 = vmatpush.msra.mxu1 %v295_v62  ;;  %v445_v61 = vld [vmem:[%s3543_s1 + $0xd28] sm:$0xff]  ;;  %v496_v62 = vld [vmem:[%s3543_s1 + $0xec0] sm:$0xff] }
  0x95   :  { %1005 = vmatpush.msra.mxu2 %v340_v63  ;;  %1024 = vmatpush.msra.mxu3 %v391_v0  ;;  %v541_v63 = vld [vmem:[%s3543_s1 + $0x1028] sm:$0xff]  ;;  %v592_v0 = vld [vmem:[%s3543_s1 + $0x11c0] sm:$0xff] }
  0x96   :  { %966 = vmatpush.msra.mxu0 %v241_v1  ;;  %985 = vmatpush.msra.mxu1 %v292_v2  ;;  %v442_v1 = vld [vmem:[%s3543_s1 + $0xd10] sm:$0xff]  ;;  %v493_v2 = vld [vmem:[%s3543_s1 + $0xea8] sm:$0xff] }
  0x97   :  { %1006 = vmatpush.msra.mxu2 %v337_v3  ;;  %1025 = vmatpush.msra.mxu3 %v388_v4  ;;  %v538_v3 = vld [vmem:[%s3543_s1 + $0x1010] sm:$0xff]  ;;  %v589_v4 = vld [vmem:[%s3543_s1 + $0x11a8] sm:$0xff] }
  0x98   :  { %967 = vmatpush.msra.mxu0 %v238_v5  ;;  %986 = vmatpush.msra.mxu1 %v289_v6  ;;  %v439_v5 = vld [vmem:[%s3543_s1 + $0xcf8] sm:$0xff]  ;;  %v490_v6 = vld [vmem:[%s3543_s1 + $0xe90] sm:$0xff] }
  0x99   :  { %1007 = vmatpush.msra.mxu2 %v334_v7  ;;  %1026 = vmatpush.msra.mxu3 %v385_v8  ;;  %v535_v7 = vld [vmem:[%s3543_s1 + $0xff8] sm:$0xff]  ;;  %v436_v8 = vld [vmem:[%s3543_s1 + $0xce0] sm:$0xff] }
  0x9a   :  { %968 = vmatpush.msra.mxu0 %v235_v9  ;;  %987 = vmatpush.msra.mxu1 %v286_v10  ;;  %v487_v9 = vld [vmem:[%s3543_s1 + $0xe78] sm:$0xff] }
  0x9b   :  { %1008 = vmatpush.msra.mxu2 %v331_v11  ;;  %1027 = vmatpush.msra.mxu3 %v382_v12  ;;  %v583_v10 = vld [vmem:[%s3543_s1 + $0x1178] sm:$0xff]  ;;  %v484_v11 = vld [vmem:[%s3543_s1 + $0xe60] sm:$0xff]  ;;  %v529_v12 = vld [vmem:[%s3543_s1 + $0xfc8] sm:$0xff] }
  0x9c   :  { %969 = vmatpush.msra.mxu0 %v232_v15  ;;  %988 = vmatpush.msra.mxu1 %v283_v16  ;;  %v580_v15 = vld [vmem:[%s3543_s1 + $0x1160] sm:$0xff]  ;;  %v481_v16 = vld [vmem:[%s3543_s1 + $0xe48] sm:$0xff] }
  0x9d   :  { %1009 = vmatpush.msra.mxu2 %v328_v17  ;;  %1028 = vmatpush.msra.mxu3 %v379_v18  ;;  %v526_v17 = vld [vmem:[%s3543_s1 + $0xfb0] sm:$0xff]  ;;  %v577_v18 = vld [vmem:[%s3543_s1 + $0x1148] sm:$0xff] }
  0x9e   :  { %970 = vmatpush.msra.mxu0 %v229_v22  ;;  %989 = vmatpush.msra.mxu1 %v280_v23  ;;  %v427_v22 = vld [vmem:[%s3543_s1 + $0xc98] sm:$0xff]  ;;  %v478_v23 = vld [vmem:[%s3543_s1 + $0xe30] sm:$0xff] }
  0x9f   :  { %1010 = vmatpush.msra.mxu2 %v325_v24  ;;  %1029 = vmatpush.msra.mxu3 %v376_v25  ;;  %v523_v24 = vld [vmem:[%s3543_s1 + $0xf98] sm:$0xff]  ;;  %v574_v25 = vld [vmem:[%s3543_s1 + $0x1130] sm:$0xff] }
  0xa0   :  { %971 = vmatpush.msra.mxu0 %v226_v28  ;;  %990 = vmatpush.msra.mxu1 %v277_v29  ;;  %v424_v28 = vld [vmem:[%s3543_s1 + $0xc80] sm:$0xff]  ;;  %v475_v29 = vld [vmem:[%s3543_s1 + $0xe18] sm:$0xff] }
  0xa1   :  { %1011 = vmatpush.msra.mxu2 %v322_v30  ;;  %1030 = vmatpush.msra.mxu3 %v373_v31  ;;  %v520_v30 = vld [vmem:[%s3543_s1 + $0xf80] sm:$0xff]  ;;  %v571_v31 = vld [vmem:[%s3543_s1 + $0x1118] sm:$0xff] }
  0xa2   :  { %972 = vmatpush.msra.mxu0 %v223_v33  ;;  %991 = vmatpush.msra.mxu1 %v274_v34  ;;  %v421_v33 = vld [vmem:[%s3543_s1 + $0xc68] sm:$0xff]  ;;  %v472_v34 = vld [vmem:[%s3543_s1 + $0xe00] sm:$0xff] }
  0xa3   :  { %1012 = vmatpush.msra.mxu2 %v319_v35  ;;  %1031 = vmatpush.msra.mxu3 %v370_v36  ;;  %v517_v35 = vld [vmem:[%s3543_s1 + $0xf68] sm:$0xff]  ;;  %v568_v36 = vld [vmem:[%s3543_s1 + $0x1100] sm:$0xff] }
  0xa4   :  { %973 = vmatpush.msra.mxu0 %v220_v37  ;;  %992 = vmatpush.msra.mxu1 %v271_v38  ;;  %v418_v37 = vld [vmem:[%s3543_s1 + $0xc50] sm:$0xff]  ;;  %v469_v38 = vld [vmem:[%s3543_s1 + $0xde8] sm:$0xff] }
  0xa5   :  { %1013 = vmatpush.msra.mxu2 %v316_v39  ;;  %1032 = vmatpush.msra.mxu3 %v367_v40  ;;  %v514_v39 = vld [vmem:[%s3543_s1 + $0xf50] sm:$0xff]  ;;  %v565_v40 = vld [vmem:[%s3543_s1 + $0x10e8] sm:$0xff] }
  0xa6   :  { %974 = vmatpush.msra.mxu0 %v217_v41  ;;  %993 = vmatpush.msra.mxu1 %v268_v42  ;;  %v415_v41 = vld [vmem:[%s3543_s1 + $0xc38] sm:$0xff]  ;;  %v466_v42 = vld [vmem:[%s3543_s1 + $0xdd0] sm:$0xff] }
  0xa7   :  { %1014 = vmatpush.msra.mxu2 %v313_v43  ;;  %1033 = vmatpush.msra.mxu3 %v364_v44  ;;  %v511_v43 = vld [vmem:[%s3543_s1 + $0xf38] sm:$0xff]  ;;  %v562_v44 = vld [vmem:[%s3543_s1 + $0x10d0] sm:$0xff] }
  0xa8   :  { %895 = vmatmul.f32.vlgmr.msrb.gmra.mxu0 %v1892_v47  ;;  %935 = vmatmul.f32.vlgmr.msrb.gmra.mxu2 %v1894_v48 }
  0xa9   :  { %1039 = vmatpush.msrb.mxu0 %v454_v45  ;;  %1079 = vmatpush.msrb.mxu2 %v550_v46  ;;  %v412_v45 = vld [vmem:[%s3543_s1 + $0xc20] sm:$0xff]  ;;  %v463_v46 = vld [vmem:[%s3543_s1 + $0xdb8] sm:$0xff] }
  0xaa   :  { %994 = vmatpush.msra.mxu1 %v265_v51  ;;  %1034 = vmatpush.msra.mxu3 %v361_v52  ;;  %v508_v51 = vld [vmem:[%s3543_s1 + $0xf20] sm:$0xff]  ;;  %v559_v52 = vld [vmem:[%s3543_s1 + $0x10b8] sm:$0xff] }
  0xab   :  { %915 = vmatmul.f32.vlgmr.msrb.gmra.mxu1 %v1896_v49  ;;  %955 = vmatmul.f32.vlgmr.msrb.gmra.mxu3 %v1898_v50 }
  0xac   :  { %1040 = vmatpush.msrb.mxu0 %v451_v53  ;;  %1059 = vmatpush.msrb.mxu1 %v502_v54  ;;  %v409_v53 = vld [vmem:[%s3543_s1 + $0xc08] sm:$0xff]  ;;  %v460_v54 = vld [vmem:[%s3543_s1 + $0xda0] sm:$0xff] }
  0xad   :  { %1080 = vmatpush.msrb.mxu2 %v547_v55  ;;  %1099 = vmatpush.msrb.mxu3 %v598_v56  ;;  %v505_v55 = vld [vmem:[%s3543_s1 + $0xf08] sm:$0xff]  ;;  %v556_v56 = vld [vmem:[%s3543_s1 + $0x10a0] sm:$0xff] }
  0xae   :  { %1041 = vmatpush.msrb.mxu0 %v448_v57  ;;  %1060 = vmatpush.msrb.mxu1 %v499_v58  ;;  %v71_v57 = vld [vmem:[%s3543_s1 + $0x178] sm:$0xff] }
  0xaf   :  { %1081 = vmatpush.msrb.mxu2 %v544_v59  ;;  %1100 = vmatpush.msrb.mxu3 %v595_v60  ;;  %v167_v58 = vld [vmem:[%s3543_s1 + $0x478] sm:$0xff]  ;;  %v457_v59 = vld [vmem:[%s3543_s1 + $0xd88] sm:$0xff] }
  0xb0   :  { %1042 = vmatpush.msrb.mxu0 %v445_v61  ;;  %1061 = vmatpush.msrb.mxu1 %v496_v62  ;;  %v553_v60 = vld [vmem:[%s3543_s1 + $0x1088] sm:$0xff]  ;;  %v68_v61 = vld [vmem:[%s3543_s1 + $0x160] sm:$0xff]  ;;  %v119_v62 = vld [vmem:[%s3543_s1 + $0x2f8] sm:$0xff] }
  0xb1   :  { %1082 = vmatpush.msrb.mxu2 %v541_v63  ;;  %1101 = vmatpush.msrb.mxu3 %v592_v0  ;;  %v164_v63 = vld [vmem:[%s3543_s1 + $0x460] sm:$0xff] }
  0xb2   :  { %1015 = vmatmul.f32.vlgmr.msra.gmra.mxu2 %v2006_v21  ;;  %1043 = vmatpush.msrb.mxu0 %v442_v1  ;;  %v586_v21 = vld [vmem:[%s3543_s1 + $0x1190] sm:$0xff]  ;;  %v116_v0 = vld [vmem:[%s3543_s1 + $0x2e0] sm:$0xff]  ;;  %v161_v1 = vld [vmem:[%s3543_s1 + $0x448] sm:$0xff] }
  0xb3   :  { %1062 = vmatpush.msrb.mxu1 %v493_v2  ;;  %1083 = vmatpush.msrb.mxu2 %v538_v3  ;;  %v113_v2 = vld [vmem:[%s3543_s1 + $0x2c8] sm:$0xff]  ;;  %v158_v3 = vld [vmem:[%s3543_s1 + $0x430] sm:$0xff] }
  0xb4   :  { %1102 = vmatpush.msrb.mxu3 %v589_v4  ;;  %975 = vmatmul.f32.vlgmr.msra.gmra.mxu0 %v2020_v26  ;;  %v532_v26 = vld [vmem:[%s3543_s1 + $0xfe0] sm:$0xff]  ;;  %v209_v4 = vld [vmem:[%s3543_s1 + $0x5c8] sm:$0xff] }
  0xb5   :  { %1035 = vmatmul.f32.vlgmr.msra.gmra.mxu3 %v2023_v27  ;;  %1044 = vmatpush.msrb.mxu0 %v439_v5  ;;  %v433_v27 = vld [vmem:[%s3543_s1 + $0xcc8] sm:$0xff]  ;;  %v59_v5 = vld [vmem:[%s3543_s1 + $0x118] sm:$0xff] }
  0xb6   :  { %1063 = vmatpush.msrb.mxu1 %v490_v6  ;;  %1084 = vmatpush.msrb.mxu2 %v535_v7  ;;  %v110_v6 = vld [vmem:[%s3543_s1 + $0x2b0] sm:$0xff]  ;;  %v155_v7 = vld [vmem:[%s3543_s1 + $0x418] sm:$0xff] }
  0xb7   :  { %1103 = vmatpush.msrb.mxu3 %v586_v21  ;;  %995 = vmatmul.f32.vlgmr.msra.gmra.mxu1 %v2038_v32  ;;  %v430_v32 = vld [vmem:[%s3543_s1 + $0xcb0] sm:$0xff] }
  0xb8   :  { %1045 = vmatpush.msrb.mxu0 %v436_v8  ;;  %1064 = vmatpush.msrb.mxu1 %v487_v9  ;;  %v206_v21 = vld [vmem:[%s3543_s1 + $0x5b0] sm:$0xff]  ;;  %v56_v8 = vld [vmem:[%s3543_s1 + $0x100] sm:$0xff]  ;;  %v107_v9 = vld [vmem:[%s3543_s1 + $0x298] sm:$0xff] }
  0xb9   :  { %1085 = vmatpush.msrb.mxu2 %v532_v26  ;;  %1104 = vmatpush.msrb.mxu3 %v583_v10  ;;  %v152_v26 = vld [vmem:[%s3543_s1 + $0x400] sm:$0xff]  ;;  %v203_v10 = vld [vmem:[%s3543_s1 + $0x598] sm:$0xff] }
  0xba   :  { %1046 = vmatpush.msrb.mxu0 %v433_v27  ;;  %1065 = vmatpush.msrb.mxu1 %v484_v11  ;;  %v53_v27 = vld [vmem:[%s3543_s1 + $0xe8] sm:$0xff]  ;;  %v104_v11 = vld [vmem:[%s3543_s1 + $0x280] sm:$0xff] }
  0xbb   :  { %1086 = vmatpush.msrb.mxu2 %v529_v12  ;;  %1105 = vmatpush.msrb.mxu3 %v580_v15  ;;  %v149_v12 = vld [vmem:[%s3543_s1 + $0x3e8] sm:$0xff]  ;;  %v200_v15 = vld [vmem:[%s3543_s1 + $0x580] sm:$0xff] }
  0xbc   :  { %1047 = vmatpush.msrb.mxu0 %v430_v32  ;;  %1066 = vmatpush.msrb.mxu1 %v481_v16  ;;  %v50_v32 = vld [vmem:[%s3543_s1 + $0xd0] sm:$0xff]  ;;  %v101_v16 = vld [vmem:[%s3543_s1 + $0x268] sm:$0xff] }
  0xbd   :  { %1087 = vmatpush.msrb.mxu2 %v526_v17  ;;  %1106 = vmatpush.msrb.mxu3 %v577_v18  ;;  %v146_v17 = vld [vmem:[%s3543_s1 + $0x3d0] sm:$0xff]  ;;  %v197_v18 = vld [vmem:[%s3543_s1 + $0x568] sm:$0xff] }
  0xbe   :  { %1048 = vmatpush.msrb.mxu0 %v427_v22  ;;  %1067 = vmatpush.msrb.mxu1 %v478_v23  ;;  %v47_v22 = vld [vmem:[%s3543_s1 + $0xb8] sm:$0xff]  ;;  %v98_v23 = vld [vmem:[%s3543_s1 + $0x250] sm:$0xff] }
  0xbf   :  { %1088 = vmatpush.msrb.mxu2 %v523_v24  ;;  %1107 = vmatpush.msrb.mxu3 %v574_v25  ;;  %v143_v24 = vld [vmem:[%s3543_s1 + $0x3b8] sm:$0xff]  ;;  %v194_v25 = vld [vmem:[%s3543_s1 + $0x550] sm:$0xff] }
  0xc0   :  { %1049 = vmatpush.msrb.mxu0 %v424_v28  ;;  %1068 = vmatpush.msrb.mxu1 %v475_v29  ;;  %v44_v28 = vld [vmem:[%s3543_s1 + $0xa0] sm:$0xff]  ;;  %v95_v29 = vld [vmem:[%s3543_s1 + $0x238] sm:$0xff] }
  0xc1   :  { %1089 = vmatpush.msrb.mxu2 %v520_v30  ;;  %1108 = vmatpush.msrb.mxu3 %v571_v31  ;;  %v140_v30 = vld [vmem:[%s3543_s1 + $0x3a0] sm:$0xff]  ;;  %v191_v31 = vld [vmem:[%s3543_s1 + $0x538] sm:$0xff] }
  0xc2   :  { %1050 = vmatpush.msrb.mxu0 %v421_v33  ;;  %1069 = vmatpush.msrb.mxu1 %v472_v34  ;;  %v41_v33 = vld [vmem:[%s3543_s1 + $0x88] sm:$0xff]  ;;  %v92_v34 = vld [vmem:[%s3543_s1 + $0x220] sm:$0xff] }
  0xc3   :  { %1090 = vmatpush.msrb.mxu2 %v517_v35  ;;  %1109 = vmatpush.msrb.mxu3 %v568_v36  ;;  %v137_v35 = vld [vmem:[%s3543_s1 + $0x388] sm:$0xff]  ;;  %v188_v36 = vld [vmem:[%s3543_s1 + $0x520] sm:$0xff] }
  0xc4   :  { %1051 = vmatpush.msrb.mxu0 %v418_v37  ;;  %1070 = vmatpush.msrb.mxu1 %v469_v38  ;;  %v38_v37 = vld [vmem:[%s3543_s1 + $0x70] sm:$0xff]  ;;  %v89_v38 = vld [vmem:[%s3543_s1 + $0x208] sm:$0xff] }
  0xc5   :  { %1091 = vmatpush.msrb.mxu2 %v514_v39  ;;  %1110 = vmatpush.msrb.mxu3 %v565_v40  ;;  %v134_v39 = vld [vmem:[%s3543_s1 + $0x370] sm:$0xff]  ;;  %v185_v40 = vld [vmem:[%s3543_s1 + $0x508] sm:$0xff] }
  0xc6   :  { %1052 = vmatpush.msrb.mxu0 %v415_v41  ;;  %1071 = vmatpush.msrb.mxu1 %v466_v42  ;;  %v35_v41 = vld [vmem:[%s3543_s1 + $0x58] sm:$0xff]  ;;  %v86_v42 = vld [vmem:[%s3543_s1 + $0x1f0] sm:$0xff] }
  0xc7   :  { %1092 = vmatpush.msrb.mxu2 %v511_v43  ;;  %1111 = vmatpush.msrb.mxu3 %v562_v44  ;;  %v131_v43 = vld [vmem:[%s3543_s1 + $0x358] sm:$0xff]  ;;  %v182_v44 = vld [vmem:[%s3543_s1 + $0x4f0] sm:$0xff] }
  0xc8   :  { %1053 = vmatpush.msrb.mxu0 %v412_v45  ;;  %1072 = vmatpush.msrb.mxu1 %v463_v46  ;;  %v32_v45 = vld [vmem:[%s3543_s1 + $0x40] sm:$0xff]  ;;  %v83_v46 = vld [vmem:[%s3543_s1 + $0x1d8] sm:$0xff] }
  0xc9   :  { %1093 = vmatpush.msrb.mxu2 %v508_v51  ;;  %1112 = vmatpush.msrb.mxu3 %v559_v52  ;;  %v128_v51 = vld [vmem:[%s3543_s1 + $0x340] sm:$0xff]  ;;  %v179_v52 = vld [vmem:[%s3543_s1 + $0x4d8] sm:$0xff] }
  0xca   :  { %1054 = vmatpush.msrb.mxu0 %v409_v53  ;;  %1073 = vmatpush.msrb.mxu1 %v460_v54  ;;  %v29_v53 = vld [vmem:[%s3543_s1 + $0x28] sm:$0xff]  ;;  %v80_v54 = vld [vmem:[%s3543_s1 + $0x1c0] sm:$0xff] }
  0xcb   :  { %1094 = vmatpush.msrb.mxu2 %v505_v55  ;;  %1113 = vmatpush.msrb.mxu3 %v556_v56  ;;  %v125_v55 = vld [vmem:[%s3543_s1 + $0x328] sm:$0xff]  ;;  %v176_v56 = vld [vmem:[%s3543_s1 + $0x4c0] sm:$0xff] }
  0xcc   :  { %1055 = vmatmul.f32.vlgmr.msrb.gmra.mxu0 %v2162_v13  ;;  %1095 = vmatmul.f32.vlgmr.msrb.gmra.mxu2 %v2164_v14  ;;  %v215_v13 = vld [vmem:[%s3543_s1 + $0x5f8] sm:$0xff]  ;;  %v65_v14 = vld [vmem:[%s3543_s1 + $0x148] sm:$0xff] }
  0xcd   :  { %1119 = vmatpush.msra.mxu0 %v71_v57  ;;  %1159 = vmatpush.msra.mxu2 %v167_v58  ;;  %v26_v57 = vld [vmem:[%s3543_s1 + $0x10] sm:$0xff]  ;;  %v77_v58 = vld [vmem:[%s3543_s1 + $0x1a8] sm:$0xff] }
  0xce   :  { %1074 = vmatpush.msrb.mxu1 %v457_v59  ;;  %1114 = vmatpush.msrb.mxu3 %v553_v60  ;;  %v122_v59 = vld [vmem:[%s3543_s1 + $0x310] sm:$0xff]  ;;  %v173_v60 = vld [vmem:[%s3543_s1 + $0x4a8] sm:$0xff] }
  0xcf   :  { %1075 = vmatmul.f32.vlgmr.msrb.gmra.mxu1 %v2180_v19  ;;  %1115 = vmatmul.f32.vlgmr.msrb.gmra.mxu3 %v2182_v20  ;;  %v212_v19 = vld [vmem:[%s3543_s1 + $0x5e0] sm:$0xff]  ;;  %v62_v20 = vld [vmem:[%s3543_s1 + $0x130] sm:$0xff] }
  0xd0   :  { %1120 = vmatpush.msra.mxu0 %v68_v61  ;;  %1139 = vmatpush.msra.mxu1 %v119_v62  ;;  %v263_v61 = vld [vmem:[%s3543_s1 + $0x778] sm:$0xff] }
  0xd1   :  { %1160 = vmatpush.msra.mxu2 %v164_v63  ;;  %1179 = vmatpush.msra.mxu3 %v215_v13  ;;  %v359_v62 = vld [vmem:[%s3543_s1 + $0xa78] sm:$0xff]  ;;  %v74_v63 = vld [vmem:[%s3543_s1 + $0x190] sm:$0xff] }
  0xd2   :  { %1121 = vmatpush.msra.mxu0 %v65_v14  ;;  %1140 = vmatpush.msra.mxu1 %v116_v0  ;;  %v170_v13 = vld [vmem:[%s3543_s1 + $0x490] sm:$0xff]  ;;  %v260_v14 = vld [vmem:[%s3543_s1 + $0x760] sm:$0xff]  ;;  %v311_v0 = vld [vmem:[%s3543_s1 + $0x8f8] sm:$0xff] }
  0xd3   :  { %1161 = vmatpush.msra.mxu2 %v161_v1  ;;  %1180 = vmatpush.msra.mxu3 %v212_v19  ;;  %v356_v1 = vld [vmem:[%s3543_s1 + $0xa60] sm:$0xff]  ;;  %v407_v19 = vld [vmem:[%s3543_s1 + $0xbf8] sm:$0xff] }
  0xd4   :  { %1122 = vmatpush.msra.mxu0 %v62_v20  ;;  %1141 = vmatpush.msra.mxu1 %v113_v2  ;;  %v257_v20 = vld [vmem:[%s3543_s1 + $0x748] sm:$0xff]  ;;  %v308_v2 = vld [vmem:[%s3543_s1 + $0x8e0] sm:$0xff] }
  0xd5   :  { %1162 = vmatpush.msra.mxu2 %v158_v3  ;;  %1181 = vmatpush.msra.mxu3 %v209_v4  ;;  %v353_v3 = vld [vmem:[%s3543_s1 + $0xa48] sm:$0xff]  ;;  %v404_v4 = vld [vmem:[%s3543_s1 + $0xbe0] sm:$0xff] }
  0xd6   :  { %1123 = vmatpush.msra.mxu0 %v59_v5  ;;  %1142 = vmatpush.msra.mxu1 %v110_v6  ;;  %v254_v5 = vld [vmem:[%s3543_s1 + $0x730] sm:$0xff]  ;;  %v305_v6 = vld [vmem:[%s3543_s1 + $0x8c8] sm:$0xff] }
  0xd7   :  { %1163 = vmatpush.msra.mxu2 %v155_v7  ;;  %1182 = vmatpush.msra.mxu3 %v206_v21  ;;  %v350_v7 = vld [vmem:[%s3543_s1 + $0xa30] sm:$0xff]  ;;  %v401_v21 = vld [vmem:[%s3543_s1 + $0xbc8] sm:$0xff] }
  0xd8   :  { %1124 = vmatpush.msra.mxu0 %v56_v8  ;;  %1143 = vmatpush.msra.mxu1 %v107_v9  ;;  %v251_v8 = vld [vmem:[%s3543_s1 + $0x718] sm:$0xff]  ;;  %v302_v9 = vld [vmem:[%s3543_s1 + $0x8b0] sm:$0xff] }
  0xd9   :  { %1164 = vmatpush.msra.mxu2 %v152_v26  ;;  %1183 = vmatpush.msra.mxu3 %v203_v10  ;;  %v347_v26 = vld [vmem:[%s3543_s1 + $0xa18] sm:$0xff]  ;;  %v398_v10 = vld [vmem:[%s3543_s1 + $0xbb0] sm:$0xff] }
  0xda   :  { %1125 = vmatpush.msra.mxu0 %v53_v27  ;;  %1144 = vmatpush.msra.mxu1 %v104_v11  ;;  %v248_v27 = vld [vmem:[%s3543_s1 + $0x700] sm:$0xff]  ;;  %v299_v11 = vld [vmem:[%s3543_s1 + $0x898] sm:$0xff] }
  0xdb   :  { %1165 = vmatpush.msra.mxu2 %v149_v12  ;;  %1184 = vmatpush.msra.mxu3 %v200_v15  ;;  %v344_v12 = vld [vmem:[%s3543_s1 + $0xa00] sm:$0xff]  ;;  %v395_v15 = vld [vmem:[%s3543_s1 + $0xb98] sm:$0xff] }
  0xdc   :  { %1126 = vmatpush.msra.mxu0 %v50_v32  ;;  %1145 = vmatpush.msra.mxu1 %v101_v16  ;;  %v245_v32 = vld [vmem:[%s3543_s1 + $0x6e8] sm:$0xff]  ;;  %v296_v16 = vld [vmem:[%s3543_s1 + $0x880] sm:$0xff] }
  0xdd   :  { %1166 = vmatpush.msra.mxu2 %v146_v17  ;;  %1185 = vmatpush.msra.mxu3 %v197_v18  ;;  %v341_v17 = vld [vmem:[%s3543_s1 + $0x9e8] sm:$0xff]  ;;  %v392_v18 = vld [vmem:[%s3543_s1 + $0xb80] sm:$0xff] }
  0xde   :  { %1127 = vmatpush.msra.mxu0 %v47_v22  ;;  %1146 = vmatpush.msra.mxu1 %v98_v23  ;;  %v242_v22 = vld [vmem:[%s3543_s1 + $0x6d0] sm:$0xff]  ;;  %v293_v23 = vld [vmem:[%s3543_s1 + $0x868] sm:$0xff] }
  0xdf   :  { %1167 = vmatpush.msra.mxu2 %v143_v24  ;;  %1186 = vmatpush.msra.mxu3 %v194_v25  ;;  %v338_v24 = vld [vmem:[%s3543_s1 + $0x9d0] sm:$0xff]  ;;  %v389_v25 = vld [vmem:[%s3543_s1 + $0xb68] sm:$0xff] }
  0xe0   :  { %1128 = vmatpush.msra.mxu0 %v44_v28  ;;  %1147 = vmatpush.msra.mxu1 %v95_v29  ;;  %v239_v28 = vld [vmem:[%s3543_s1 + $0x6b8] sm:$0xff]  ;;  %v290_v29 = vld [vmem:[%s3543_s1 + $0x850] sm:$0xff] }
  0xe1   :  { %1168 = vmatpush.msra.mxu2 %v140_v30  ;;  %1187 = vmatpush.msra.mxu3 %v191_v31  ;;  %v335_v30 = vld [vmem:[%s3543_s1 + $0x9b8] sm:$0xff]  ;;  %v386_v31 = vld [vmem:[%s3543_s1 + $0xb50] sm:$0xff] }
  0xe2   :  { %1129 = vmatpush.msra.mxu0 %v41_v33  ;;  %1148 = vmatpush.msra.mxu1 %v92_v34  ;;  %v236_v33 = vld [vmem:[%s3543_s1 + $0x6a0] sm:$0xff]  ;;  %v287_v34 = vld [vmem:[%s3543_s1 + $0x838] sm:$0xff] }
  0xe3   :  { %1169 = vmatpush.msra.mxu2 %v137_v35  ;;  %1188 = vmatpush.msra.mxu3 %v188_v36  ;;  %v332_v35 = vld [vmem:[%s3543_s1 + $0x9a0] sm:$0xff]  ;;  %v383_v36 = vld [vmem:[%s3543_s1 + $0xb38] sm:$0xff] }
  0xe4   :  { %1130 = vmatpush.msra.mxu0 %v38_v37  ;;  %1149 = vmatpush.msra.mxu1 %v89_v38  ;;  %v233_v37 = vld [vmem:[%s3543_s1 + $0x688] sm:$0xff]  ;;  %v284_v38 = vld [vmem:[%s3543_s1 + $0x820] sm:$0xff] }
  0xe5   :  { %1170 = vmatpush.msra.mxu2 %v134_v39  ;;  %1189 = vmatpush.msra.mxu3 %v185_v40  ;;  %v329_v39 = vld [vmem:[%s3543_s1 + $0x988] sm:$0xff]  ;;  %v380_v40 = vld [vmem:[%s3543_s1 + $0xb20] sm:$0xff] }
  0xe6   :  { %1131 = vmatpush.msra.mxu0 %v35_v41  ;;  %1150 = vmatpush.msra.mxu1 %v86_v42  ;;  %v230_v41 = vld [vmem:[%s3543_s1 + $0x670] sm:$0xff]  ;;  %v281_v42 = vld [vmem:[%s3543_s1 + $0x808] sm:$0xff] }
  0xe7   :  { %1171 = vmatpush.msra.mxu2 %v131_v43  ;;  %1190 = vmatpush.msra.mxu3 %v182_v44  ;;  %v326_v43 = vld [vmem:[%s3543_s1 + $0x970] sm:$0xff]  ;;  %v377_v44 = vld [vmem:[%s3543_s1 + $0xb08] sm:$0xff] }
  0xe8   :  { %1132 = vmatpush.msra.mxu0 %v32_v45  ;;  %1151 = vmatpush.msra.mxu1 %v83_v46  ;;  %v227_v45 = vld [vmem:[%s3543_s1 + $0x658] sm:$0xff]  ;;  %v278_v46 = vld [vmem:[%s3543_s1 + $0x7f0] sm:$0xff] }
  0xe9   :  { %1172 = vmatpush.msra.mxu2 %v128_v51  ;;  %1191 = vmatpush.msra.mxu3 %v179_v52  ;;  %v323_v51 = vld [vmem:[%s3543_s1 + $0x958] sm:$0xff]  ;;  %v374_v52 = vld [vmem:[%s3543_s1 + $0xaf0] sm:$0xff] }
  0xea   :  { %1133 = vmatpush.msra.mxu0 %v29_v53  ;;  %1152 = vmatpush.msra.mxu1 %v80_v54  ;;  %v224_v53 = vld [vmem:[%s3543_s1 + $0x640] sm:$0xff]  ;;  %v275_v54 = vld [vmem:[%s3543_s1 + $0x7d8] sm:$0xff] }
  0xeb   :  { %1173 = vmatpush.msra.mxu2 %v125_v55  ;;  %1192 = vmatpush.msra.mxu3 %v176_v56  ;;  %v320_v55 = vld [vmem:[%s3543_s1 + $0x940] sm:$0xff]  ;;  %v371_v56 = vld [vmem:[%s3543_s1 + $0xad8] sm:$0xff] }
  0xec   :  { %1134 = vmatpush.msra.mxu0 %v26_v57  ;;  %1153 = vmatpush.msra.mxu1 %v77_v58  ;;  %v221_v57 = vld [vmem:[%s3543_s1 + $0x628] sm:$0xff]  ;;  %v272_v58 = vld [vmem:[%s3543_s1 + $0x7c0] sm:$0xff] }
  0xed   :  { %1174 = vmatpush.msra.mxu2 %v122_v59  ;;  %1193 = vmatpush.msra.mxu3 %v173_v60  ;;  %v317_v59 = vld [vmem:[%s3543_s1 + $0x928] sm:$0xff]  ;;  %v368_v60 = vld [vmem:[%s3543_s1 + $0xac0] sm:$0xff] }
  0xee   :  { %1199 = vmatpush.msrb.mxu0 %v263_v61  ;;  %1154 = vmatpush.msra.mxu1 %v74_v63  ;;  %v218_v61 = vld [vmem:[%s3543_s1 + $0x610] sm:$0xff] }
  0xef   :  { %1239 = vmatpush.msrb.mxu2 %v359_v62  ;;  %1194 = vmatpush.msra.mxu3 %v170_v13  ;;  %v269_v62 = vld [vmem:[%s3543_s1 + $0x7a8] sm:$0xff]  ;;  %v314_v63 = vld [vmem:[%s3543_s1 + $0x910] sm:$0xff] }
  0xf0   :  { %1200 = vmatpush.msrb.mxu0 %v260_v14  ;;  %1219 = vmatpush.msrb.mxu1 %v311_v0  ;;  %v365_v13 = vld [vmem:[%s3543_s1 + $0xaa8] sm:$0xff]  ;;  %v455_v14 = vld [vmem:[%s3543_s1 + $0xd78] sm:$0xff] }
  0xf1   :  { %1240 = vmatpush.msrb.mxu2 %v356_v1  ;;  %1259 = vmatpush.msrb.mxu3 %v407_v19  ;;  %v551_v0 = vld [vmem:[%s3543_s1 + $0x1078] sm:$0xff]  ;;  %v266_v1 = vld [vmem:[%s3543_s1 + $0x790] sm:$0xff] }
  0xf2   :  { %1201 = vmatpush.msrb.mxu0 %v257_v20  ;;  %1220 = vmatpush.msrb.mxu1 %v308_v2  ;;  %v362_v19 = vld [vmem:[%s3543_s1 + $0xa90] sm:$0xff]  ;;  %v3160_v20 = vpop.f32.mrf.mxu0  ;;  %v452_v2 = vld [vmem:[%s3543_s1 + $0xd60] sm:$0xff] }
  0xf3   :  { %1241 = vmatpush.msrb.mxu2 %v353_v3  ;;  %1260 = vmatpush.msrb.mxu3 %v404_v4  ;;  %v503_v3 = vld [vmem:[%s3543_s1 + $0xef8] sm:$0xff]  ;;  %v449_v4 = vld [vmem:[%s3543_s1 + $0xd48] sm:$0xff] }
  0xf4   :  { %1202 = vmatpush.msrb.mxu0 %v254_v5  ;;  %1221 = vmatpush.msrb.mxu1 %v305_v6  ;;  %v500_v5 = vld [vmem:[%s3543_s1 + $0xee0] sm:$0xff]  ;;  %v545_v6 = vld [vmem:[%s3543_s1 + $0x1048] sm:$0xff] }
  0xf5   :  { %1242 = vmatpush.msrb.mxu2 %v350_v7  ;;  %1261 = vmatpush.msrb.mxu3 %v401_v21  ;;  %v3188_v7 = vpop.f32.mrf.mxu1  ;;  %v497_v21 = vld [vmem:[%s3543_s1 + $0xec8] sm:$0xff] }
  0xf6   :  { %1203 = vmatpush.msrb.mxu0 %v251_v8  ;;  %1222 = vmatpush.msrb.mxu1 %v302_v9  ;;  %v542_v8 = vld [vmem:[%s3543_s1 + $0x1030] sm:$0xff]  ;;  %v593_v9 = vld [vmem:[%s3543_s1 + $0x11c8] sm:$0xff] }
  0xf7   :  { %1243 = vmatpush.msrb.mxu2 %v347_v26  ;;  %1262 = vmatpush.msrb.mxu3 %v398_v10  ;;  %v443_v26 = vld [vmem:[%s3543_s1 + $0xd18] sm:$0xff]  ;;  %v494_v10 = vld [vmem:[%s3543_s1 + $0xeb0] sm:$0xff] }
  0xf8   :  { %1204 = vmatpush.msrb.mxu0 %v248_v27  ;;  %1223 = vmatpush.msrb.mxu1 %v299_v11  ;;  %v539_v27 = vld [vmem:[%s3543_s1 + $0x1018] sm:$0xff]  ;;  %v3211_v11 = vpop.f32.mrf.mxu2 }
  0xf9   :  { %1244 = vmatpush.msrb.mxu2 %v344_v12  ;;  %1263 = vmatpush.msrb.mxu3 %v395_v15  ;;  %v590_v12 = vld [vmem:[%s3543_s1 + $0x11b0] sm:$0xff] }
  0xfa   :  { %1205 = vmatpush.msrb.mxu0 %v245_v32  ;;  %1224 = vmatpush.msrb.mxu1 %v296_v16  ;;  %v1494_v15 = vld.sshfl [vmem:[#allocation1 + $0x30] sm:$0xff pattern:$0x73625140]  ;;  %v440_v32 = vld [vmem:[%s3543_s1 + $0xd00] sm:$0xff]  ;;  %v3219_v16 = vpop.f32.mrf.mxu0 }
  0xfb   :  { %1245 = vmatpush.msrb.mxu2 %v341_v17  ;;  %1264 = vmatpush.msrb.mxu3 %v392_v18  ;;  %v491_v17 = vld [vmem:[%s3543_s1 + $0xe98] sm:$0xff]  ;;  %v536_v18 = vld [vmem:[%s3543_s1 + $0x1000] sm:$0xff] }
  0xfc   :  { %1206 = vmatpush.msrb.mxu0 %v242_v22  ;;  %1225 = vmatpush.msrb.mxu1 %v293_v23  ;;  %v1495_v22 = vld.sshfl [vmem:[#allocation1 + $0x20] sm:$0xff pattern:$0x73625140]  ;;  %v587_v23 = vld [vmem:[%s3543_s1 + $0x1198] sm:$0xff] }
  0xfd   :  { %1246 = vmatpush.msrb.mxu2 %v338_v24  ;;  %1265 = vmatpush.msrb.mxu3 %v389_v25  ;;  %v3230_v24 = vpop.f32.mrf.mxu3  ;;  %v1496_v25 = vld.sshfl [vmem:[#allocation1 + $0x38] sm:$0xff pattern:$0x73625140] }
  0xfe   :  { %1207 = vmatpush.msrb.mxu0 %v239_v28  ;;  %1226 = vmatpush.msrb.mxu1 %v290_v29  ;;  %v437_v28 = vld [vmem:[%s3543_s1 + $0xce8] sm:$0xff]  ;;  %v488_v29 = vld [vmem:[%s3543_s1 + $0xe80] sm:$0xff] }
  0xff   :  { %1247 = vmatpush.msrb.mxu2 %v335_v30  ;;  %1266 = vmatpush.msrb.mxu3 %v386_v31  ;;  %v533_v30 = vld [vmem:[%s3543_s1 + $0xfe8] sm:$0xff]  ;;  %v584_v31 = vld [vmem:[%s3543_s1 + $0x1180] sm:$0xff] }
 0x100   :  { %1208 = vmatpush.msrb.mxu0 %v236_v33  ;;  %1227 = vmatpush.msrb.mxu1 %v287_v34  ;;  %v3247_v33 = vld [vmem:[%s3544_s2] sm:$0x7]  ;;  %v3249_v34 = vpop.f32.mrf.mxu1 }
 0x101   :  { %1248 = vmatpush.msrb.mxu2 %v332_v35  ;;  %1267 = vmatpush.msrb.mxu3 %v383_v36  ;;  %v1497_v35 = vld.sshfl [vmem:[#allocation1 + $0x28] sm:$0xff pattern:$0x73625140]  ;;  %v434_v36 = vld [vmem:[%s3543_s1 + $0xcd0] sm:$0xff] }
 0x102   :  { %1209 = vmatpush.msrb.mxu0 %v233_v37  ;;  %1228 = vmatpush.msrb.mxu1 %v284_v38  ;;  %v485_v37 = vld [vmem:[%s3543_s1 + $0xe68] sm:$0xff]  ;;  %v530_v38 = vld [vmem:[%s3543_s1 + $0xfd0] sm:$0xff] }
 0x103   :  { %1249 = vmatpush.msrb.mxu2 %v329_v39  ;;  %1268 = vmatpush.msrb.mxu3 %v380_v40  ;;  %v581_v39 = vld [vmem:[%s3543_s1 + $0x1168] sm:$0xff]  ;;  %v431_v40 = vld [vmem:[%s3543_s1 + $0xcb8] sm:$0xff] }
 0x104   :  { %1210 = vmatpush.msrb.mxu0 %v230_v41  ;;  %1229 = vmatpush.msrb.mxu1 %v281_v42  ;;  %v482_v41 = vld [vmem:[%s3543_s1 + $0xe50] sm:$0xff]  ;;  %v602_v42 = vperm.slane %v3247_v33, 0 }
 0x105   :  { %1250 = vmatpush.msrb.mxu2 %v326_v43  ;;  %1269 = vmatpush.msrb.mxu3 %v377_v44  ;;  %v527_v43 = vld [vmem:[%s3543_s1 + $0xfb8] sm:$0xff]  ;;  %v578_v44 = vld [vmem:[%s3543_s1 + $0x1150] sm:$0xff] }
 0x106   :  { %1211 = vmatpush.msrb.mxu0 %v227_v45  ;;  %1230 = vmatpush.msrb.mxu1 %v278_v46  ;;  %v3276_v45 = vpop.f32.mrf.mxu2  ;;  %v3278_v46 = vpop.f32.mrf.mxu0 }
 0x107   :  { %1251 = vmatpush.msrb.mxu2 %v323_v51  ;;  %1270 = vmatpush.msrb.mxu3 %v374_v52  ;;  %v428_v51 = vld [vmem:[%s3543_s1 + $0xca0] sm:$0xff]  ;;  %v479_v52 = vld [vmem:[%s3543_s1 + $0xe38] sm:$0xff] }
 0x108   :  { %1212 = vmatpush.msrb.mxu0 %v224_v53  ;;  %1231 = vmatpush.msrb.mxu1 %v275_v54  ;;  %v524_v53 = vld [vmem:[%s3543_s1 + $0xfa0] sm:$0xff]  ;;  %v575_v54 = vld [vmem:[%s3543_s1 + $0x1138] sm:$0xff] }
 0x109   :  { %1252 = vmatpush.msrb.mxu2 %v320_v55  ;;  %1271 = vmatpush.msrb.mxu3 %v371_v56  ;;  %v425_v55 = vld [vmem:[%s3543_s1 + $0xc88] sm:$0xff]  ;;  %v476_v56 = vld [vmem:[%s3543_s1 + $0xe20] sm:$0xff] }
 0x10a   :  { %1213 = vmatpush.msrb.mxu0 %v221_v57  ;;  %1232 = vmatpush.msrb.mxu1 %v272_v58  ;;  %v657_v57 = vadd.f32 %v3160_v20, %v602_v42  ;;  %v521_v58 = vld [vmem:[%s3543_s1 + $0xf88] sm:$0xff]  ;;  %v515_v20 = vld [vmem:[%s3543_s1 + $0xf58] sm:$0xff] }
 0x10b   :  { %1253 = vmatpush.msrb.mxu2 %v317_v59  ;;  %1272 = vmatpush.msrb.mxu3 %v368_v60  ;;  %v572_v59 = vld [vmem:[%s3543_s1 + $0x1120] sm:$0xff]  ;;  %v3305_v60 = vpop.f32.mrf.mxu3  ;;  %v1391_v42 = vld [vmem:[%s3545_s3 + $0xe8] sm:$0xff] }
 0x10c   :  { %1214 = vmatpush.msrb.mxu0 %v218_v61  ;;  %1233 = vmatpush.msrb.mxu1 %v269_v62  ;;  %v3307_v61 = vpop.f32.mrf.mxu1  ;;  %v422_v62 = vld [vmem:[%s3543_s1 + $0xc70] sm:$0xff] }
 0x10d   :  { %1254 = vmatpush.msrb.mxu2 %v314_v63  ;;  %1273 = vmatpush.msrb.mxu3 %v365_v13  ;;  %v473_v63 = vld [vmem:[%s3543_s1 + $0xe08] sm:$0xff]  ;;  %v518_v13 = vld [vmem:[%s3543_s1 + $0xf70] sm:$0xff] }
 0x10e   :  { %1135 = vmatmul.f32.vlgmr.msra.gmra.mxu0 %v1892_v47  ;;  %1175 = vmatmul.f32.vlgmr.msra.gmra.mxu2 %v1894_v48  ;;  %v548_v47 = vld [vmem:[%s3543_s1 + $0x1060] sm:$0xff]  ;;  %v599_v48 = vld [vmem:[%s3543_s1 + $0x11f8] sm:$0xff] }
 0x10f   :  { %1279 = vmatpush.msra.mxu0 %v455_v14  ;;  %1319 = vmatpush.msra.mxu2 %v551_v0  ;;  %v569_v14 = vld [vmem:[%s3543_s1 + $0x1108] sm:$0xff]  ;;  %v419_v0 = vld [vmem:[%s3543_s1 + $0xc58] sm:$0xff] }
 0x110   :  { %1234 = vmatpush.msrb.mxu1 %v266_v1  ;;  %1274 = vmatpush.msrb.mxu3 %v362_v19  ;;  %v470_v1 = vld [vmem:[%s3543_s1 + $0xdf0] sm:$0xff]  ;;  %v677_v19 = vadd.f32 %v3188_v7, %v657_v57  ;;  %v413_v7 = vld [vmem:[%s3543_s1 + $0xc28] sm:$0xff] }
 0x111   :  { %1155 = vmatmul.f32.vlgmr.msra.gmra.mxu1 %v1896_v49  ;;  %1195 = vmatmul.f32.vlgmr.msra.gmra.mxu3 %v1898_v50  ;;  %v596_v49 = vld [vmem:[%s3543_s1 + $0x11e0] sm:$0xff]  ;;  %v446_v50 = vld [vmem:[%s3543_s1 + $0xd30] sm:$0xff]  ;;  %v1371_v57 = vld [vmem:[%s3545_s3 + $0x48] sm:$0xff] }
 0x112   :  { %1280 = vmatpush.msra.mxu0 %v452_v2  ;;  %1299 = vmatpush.msra.mxu1 %v503_v3  ;;  %v566_v2 = vld [vmem:[%s3543_s1 + $0x10f0] sm:$0xff]  ;;  %v603_v3 = vperm.slane %v3247_v33, 1 }
 0x113   :  { %1320 = vmatpush.msra.mxu2 %v548_v47  ;;  %1339 = vmatpush.msra.mxu3 %v599_v48  ;;  %v3335_v47 = vpop.f32.mrf.mxu2  ;;  %v416_v48 = vld [vmem:[%s3543_s1 + $0xc40] sm:$0xff] }
 0x114   :  { %1281 = vmatpush.msra.mxu0 %v449_v4  ;;  %1300 = vmatpush.msra.mxu1 %v500_v5  ;;  %v467_v4 = vld [vmem:[%s3543_s1 + $0xdd8] sm:$0xff] }
 0x115   :  { %1321 = vmatpush.msra.mxu2 %v545_v6  ;;  %1340 = vmatpush.msra.mxu3 %v596_v49  ;;  %v512_v6 = vld [vmem:[%s3543_s1 + $0xf40] sm:$0xff]  ;;  %v563_v49 = vld [vmem:[%s3543_s1 + $0x10d8] sm:$0xff] }
 0x116   :  { %1282 = vmatpush.msra.mxu0 %v446_v50  ;;  %1301 = vmatpush.msra.mxu1 %v497_v21  ;;  %v464_v50 = vld [vmem:[%s3543_s1 + $0xdc0] sm:$0xff]  ;;  %v697_v21 = vadd.f32 %v3211_v11, %v677_v19  ;;  %v461_v11 = vld [vmem:[%s3543_s1 + $0xda8] sm:$0xff] }
 0x117   :  { %1322 = vmatpush.msra.mxu2 %v542_v8  ;;  %1341 = vmatpush.msra.mxu3 %v593_v9  ;;  %v509_v8 = vld [vmem:[%s3543_s1 + $0xf28] sm:$0xff]  ;;  %v560_v9 = vld [vmem:[%s3543_s1 + $0x10c0] sm:$0xff] }
 0x118   :  { %1255 = vmatmul.f32.vlgmr.msrb.gmra.mxu2 %v1494_v15  ;;  %1283 = vmatpush.msra.mxu0 %v443_v26  ;;  %v506_v15 = vld [vmem:[%s3543_s1 + $0xf10] sm:$0xff] }
 0x119   :  { %1302 = vmatpush.msra.mxu1 %v494_v10  ;;  %1323 = vmatpush.msra.mxu2 %v539_v27  ;;  %v3362_v10 = vpop.f32.mrf.mxu3  ;;  %v410_v27 = vld [vmem:[%s3543_s1 + $0xc10] sm:$0xff] }
 0x11a   :  { %1342 = vmatpush.msra.mxu3 %v590_v12  ;;  %1215 = vmatmul.f32.vlgmr.msrb.gmra.mxu0 %v1495_v22  ;;  %v458_v22 = vld [vmem:[%s3543_s1 + $0xd90] sm:$0xff] }
 0x11b   :  { %1275 = vmatmul.f32.vlgmr.msrb.gmra.mxu3 %v1496_v25  ;;  %1284 = vmatpush.msra.mxu0 %v440_v32  ;;  %v557_v32 = vld [vmem:[%s3543_s1 + $0x10a8] sm:$0xff]  ;;  %v554_v25 = vld [vmem:[%s3543_s1 + $0x1090] sm:$0xff] }
 0x11c   :  { %1303 = vmatpush.msra.mxu1 %v491_v17  ;;  %1324 = vmatpush.msra.mxu2 %v536_v18  ;;  %v717_v17 = vadd.f32 %v3230_v24, %v697_v21  ;;  %v1377_v18 = vld [vmem:[%s3545_s3 + $0x78] sm:$0xff]  ;;  %v1499_v24 = vld.sshfl [vmem:[#allocation1 + $0x10] sm:$0xff pattern:$0x73625140]  ;;  %v1382_v21 = vld [vmem:[%s3545_s3 + $0xa0] sm:$0xff] }
 0x11d   :  { %1343 = vmatpush.msra.mxu3 %v587_v23  ;;  %1235 = vmatmul.f32.vlgmr.msrb.gmra.mxu1 %v1497_v35 }
 0x11e   :  { %1285 = vmatpush.msra.mxu0 %v437_v28  ;;  %1304 = vmatpush.msra.mxu1 %v488_v29  ;;  %v1498_v29 = vld.sshfl [vmem:[#allocation1] sm:$0xff pattern:$0x73625140]  ;;  %v737_v35 = vadd.f32 %v3219_v16, %v717_v17 }
 0x11f   :  { %1325 = vmatpush.msra.mxu2 %v533_v30  ;;  %1344 = vmatpush.msra.mxu3 %v584_v31  ;;  %v1376_v30 = vld [vmem:[%s3545_s3 + $0x70] sm:$0xff]  ;;  %v1393_v31 = vld [vmem:[%s3545_s3 + $0xf8] sm:$0xff]  ;;  %v1374_v16 = vld [vmem:[%s3545_s3 + $0x60] sm:$0xff] }
 0x120   :  { %1286 = vmatpush.msra.mxu0 %v434_v36  ;;  %1305 = vmatpush.msra.mxu1 %v485_v37  ;;  %v1500_v36 = vld.sshfl [vmem:[#allocation1 + $0x8] sm:$0xff pattern:$0x73625140] }
 0x121   :  { %1326 = vmatpush.msra.mxu2 %v530_v38  ;;  %1345 = vmatpush.msra.mxu3 %v581_v39  ;;  %v1375_v37 = vld [vmem:[%s3545_s3 + $0x68] sm:$0xff]  ;;  %v1501_v39 = vld.sshfl [vmem:[#allocation1 + $0x18] sm:$0xff pattern:$0x73625140] }
 0x122   :  { %1287 = vmatpush.msra.mxu0 %v431_v40  ;;  %1306 = vmatpush.msra.mxu1 %v482_v41  ;;  %v1392_v41 = vld [vmem:[%s3545_s3 + $0xf0] sm:$0xff] }
 0x123   :  { %1327 = vmatpush.msra.mxu2 %v527_v43  ;;  %1346 = vmatpush.msra.mxu3 %v578_v44  ;;  %v757_v43 = vadd.f32 %v3249_v34, %v737_v35  ;;  %v1373_v44 = vld [vmem:[%s3545_s3 + $0x58] sm:$0xff]  ;;  %v1406_v35 = vld [vmem:[%s3545_s3 + $0x160] sm:$0xff] }
 0x124   :  { %1288 = vmatpush.msra.mxu0 %v428_v51  ;;  %1307 = vmatpush.msra.mxu1 %v479_v52  ;;  %v1389_v34 = vld [vmem:[%s3545_s3 + $0xd8] sm:$0xff] }
 0x125   :  { %1328 = vmatpush.msra.mxu2 %v524_v53  ;;  %1347 = vmatpush.msra.mxu3 %v575_v54  ;;  %v896_v5 = vpop.f32.mrf.mxu0  ;;  %v1390_v53 = vld [vmem:[%s3545_s3 + $0xe0] sm:$0xff]  ;;  %v1372_v54 = vld [vmem:[%s3545_s3 + $0x50] sm:$0xff] }
 0x126   :  { %1289 = vmatpush.msra.mxu0 %v425_v55  ;;  %1308 = vmatpush.msra.mxu1 %v476_v56  ;;  %v897_v26 = vadd.f32 %v896_v5, %v603_v3  ;;  %v777_v55 = vadd.f32 %v3276_v45, %v757_v43  ;;  %v1387_v45 = vld [vmem:[%s3545_s3 + $0xc8] sm:$0xff]  ;;  %v1366_v5 = vld [vmem:[%s3545_s3 + $0x20] sm:$0xff] }
 0x127   :  { %1329 = vmatpush.msra.mxu2 %v521_v58  ;;  %1348 = vmatpush.msra.mxu3 %v572_v59  ;;  %v1388_v59 = vld [vmem:[%s3545_s3 + $0xd0] sm:$0xff]  ;;  %v1367_v3 = vld [vmem:[%s3545_s3 + $0x28] sm:$0xff] }
 0x128   :  { %1290 = vmatpush.msra.mxu0 %v422_v62  ;;  %1309 = vmatpush.msra.mxu1 %v473_v63  ;;  %v916_v12 = vpop.f32.mrf.mxu1  ;;  %v1370_v62 = vld [vmem:[%s3545_s3 + $0x40] sm:$0xff]  ;;  %v797_v63 = vadd.f32 %v3305_v60, %v777_v55  ;;  %v1385_v60 = vld [vmem:[%s3545_s3 + $0xb8] sm:$0xff]  ;;  %v1399_v43 = vld [vmem:[%s3545_s3 + $0x128] sm:$0xff] }
 0x129   :  { %1330 = vmatpush.msra.mxu2 %v518_v13  ;;  %1349 = vmatpush.msra.mxu3 %v569_v14  ;;  %v917_v23 = vadd.f32 %v916_v12, %v897_v26  ;;  %v1369_v14 = vld [vmem:[%s3545_s3 + $0x38] sm:$0xff]  ;;  %v1380_v12 = vld [vmem:[%s3545_s3 + $0x90] sm:$0xff]  ;;  %v1395_v55 = vld [vmem:[%s3545_s3 + $0x108] sm:$0xff] }
 0x12a   :  { %1291 = vmatpush.msra.mxu0 %v419_v0  ;;  %1310 = vmatpush.msra.mxu1 %v470_v1  ;;  %v1386_v1 = vld [vmem:[%s3545_s3 + $0xc0] sm:$0xff]  ;;  %v817_v19 = vadd.f32 %v3278_v46, %v797_v63  ;;  %v1384_v46 = vld [vmem:[%s3545_s3 + $0xb0] sm:$0xff] }
 0x12b   :  { %1331 = vmatpush.msra.mxu2 %v515_v20  ;;  %1350 = vmatpush.msra.mxu3 %v566_v2  ;;  %v936_v28 = vpop.f32.mrf.mxu2  ;;  %v1368_v20 = vld [vmem:[%s3545_s3 + $0x30] sm:$0xff] }
 0x12c   :  { %1292 = vmatpush.msra.mxu0 %v416_v48  ;;  %1311 = vmatpush.msra.mxu1 %v467_v4  ;;  %v937_v38 = vadd.f32 %v936_v28, %v917_v23  ;;  %v837_v4 = vadd.f32 %v3307_v61, %v817_v19  ;;  %v1378_v23 = vld [vmem:[%s3545_s3 + $0x80] sm:$0xff] }
 0x12d   :  { %1332 = vmatpush.msra.mxu2 %v512_v6  ;;  %1351 = vmatpush.msra.mxu3 %v563_v49  ;;  %v1383_v6 = vld [vmem:[%s3545_s3 + $0xa8] sm:$0xff] }
 0x12e   :  { %1293 = vmatpush.msra.mxu0 %v413_v7  ;;  %1312 = vmatpush.msra.mxu1 %v464_v50  ;;  %v956_v40 = vpop.f32.mrf.mxu3  ;;  %v857_v49 = vadd.f32 %v3335_v47, %v837_v4  ;;  %v1365_v50 = vld [vmem:[%s3545_s3 + $0x18] sm:$0xff] }
 0x12f   :  { %1333 = vmatpush.msra.mxu2 %v509_v8  ;;  %1352 = vmatpush.msra.mxu3 %v560_v9  ;;  %v957_v51 = vadd.f32 %v956_v40, %v937_v38  ;;  %v1364_v8 = vld [vmem:[%s3545_s3 + $0x10] sm:$0xff]  ;;  %v1381_v47 = vld [vmem:[%s3545_s3 + $0x98] sm:$0xff]  ;;  %v1403_v38 = vld [vmem:[%s3545_s3 + $0x148] sm:$0xff] }
 0x130   :  { %1294 = vmatpush.msra.mxu0 %v410_v27  ;;  %1313 = vmatpush.msra.mxu1 %v461_v11  ;;  %v877_v26 = vadd.f32 %v3362_v10, %v857_v49  ;;  %v1363_v27 = vld [vmem:[%s3545_s3 + $0x8] sm:$0xff]  ;;  %v1401_v40 = vld [vmem:[%s3545_s3 + $0x138] sm:$0xff]  ;;  %v1493_v49 = vld [vmem:[%s3546_s4] ss:$0 sm:$0xff] }
 0x131   :  { %1334 = vmatpush.msra.mxu2 %v506_v15  ;;  %1353 = vmatpush.msra.mxu3 %v557_v32  ;;  %v976_v52 = vpop.f32.mrf.mxu0  ;;  %v1362_v15 = vld [vmem:[%s3545_s3] sm:$0xff]  ;;  %v1379_v10 = vld [vmem:[%s3545_s3 + $0x88] sm:$0xff] }
 0x132   :  { %1295 = vmatmul.f32.vlgmr.msra.gmra.mxu0 %v1498_v29  ;;  %1335 = vmatmul.f32.vlgmr.msra.gmra.mxu2 %v1499_v24  ;;  %v977_v56 = vadd.f32 %v976_v52, %v957_v51  ;;  %v1409_v24 = vld [vmem:[%s3545_s3 + $0x178] sm:$0xff]  ;;  %v1398_v51 = vld [vmem:[%s3545_s3 + $0x120] sm:$0xff] }
 0x133   :  { %1414 = vmatpush.msrb.mxu0 %v1377_v18  ;;  %1314 = vmatpush.msra.mxu1 %v458_v22  ;;  %v1359_v18 = vmax.f32 %v877_v26, 0.0 }
 0x134   :  { %1354 = vmatpush.msra.mxu3 %v554_v25  ;;  %1315 = vmatmul.f32.vlgmr.msra.gmra.mxu1 %v1500_v36  ;;  %v996_v58 = vpop.f32.mrf.mxu1  ;;  %v1405_v36 = vld [vmem:[%s3545_s3 + $0x158] sm:$0xff] }
 0x135   :  { %1355 = vmatmul.f32.vlgmr.msra.gmra.mxu3 %v1501_v39  ;;  %1415 = vmatpush.msrb.mxu0 %v1376_v30  ;;  %v997_v13 = vadd.f32 %v996_v58, %v977_v56  ;;  %v1016_v0 = vpop.f32.mrf.mxu2  ;;  %v1408_v30 = vld [vmem:[%s3545_s3 + $0x170] sm:$0xff]  ;;  %v1402_v39 = vld [vmem:[%s3545_s3 + $0x140] sm:$0xff] }
 0x136   :  { %1434 = vmatpush.msrb.mxu1 %v1393_v31  ;;  %1454 = vmatpush.msrb.mxu2 %v1409_v24  ;;  %v1407_v31 = vld [vmem:[%s3545_s3 + $0x168] sm:$0xff]  ;;  %v1394_v58 = vld [vmem:[%s3545_s3 + $0x100] sm:$0xff] }
 0x137   :  { %1416 = vmatpush.msrb.mxu0 %v1375_v37  ;;  %v1017_v2 = vadd.f32 %v1016_v0, %v997_v13  ;;  %v1404_v37 = vld [vmem:[%s3545_s3 + $0x150] sm:$0xff] }
 0x138   :  { %1435 = vmatpush.msrb.mxu1 %v1392_v41  ;;  %v1036_v48 = vpop.f32.mrf.mxu3  ;;  %1455 = vmatpush.msrb.mxu2 %v1408_v30  ;;  %v604_v41 = vperm.slane %v3247_v33, 2  ;;  %v1397_v33 = vld [vmem:[%s3545_s3 + $0x118] sm:$0xff] }
 0x139   :  { %1417 = vmatpush.msrb.mxu0 %v1374_v16  ;;  %v1037_v7 = vadd.f32 %v1036_v48, %v1017_v2 }
 0x13a   :  { %1436 = vmatpush.msrb.mxu1 %v1391_v42  ;;  %1456 = vmatpush.msrb.mxu2 %v1407_v31  ;;  %v1400_v42 = vld [vmem:[%s3545_s3 + $0x130] sm:$0xff] }
 0x13b   :  { %1418 = vmatpush.msrb.mxu0 %v1373_v44 }
 0x13c   :  { %1437 = vmatpush.msrb.mxu1 %v1390_v53  ;;  %1457 = vmatpush.msrb.mxu2 %v1406_v35 }
 0x13d   :  { %1419 = vmatpush.msrb.mxu0 %v1372_v54 }
 0x13e   :  { %1438 = vmatpush.msrb.mxu1 %v1389_v34  ;;  %1458 = vmatpush.msrb.mxu2 %v1405_v36  ;;  %v1396_v34 = vld [vmem:[%s3545_s3 + $0x110] sm:$0xff] }
 0x13f   :  { %1420 = vmatpush.msrb.mxu0 %v1371_v57 }
 0x140   :  { %1439 = vmatpush.msrb.mxu1 %v1388_v59  ;;  %1459 = vmatpush.msrb.mxu2 %v1404_v37 }
 0x141   :  { %1421 = vmatpush.msrb.mxu0 %v1370_v62 }
 0x142   :  { %1440 = vmatpush.msrb.mxu1 %v1387_v45  ;;  %1460 = vmatpush.msrb.mxu2 %v1403_v38 }
 0x143   :  { %1422 = vmatpush.msrb.mxu0 %v1369_v14 }
 0x144   :  { %1441 = vmatpush.msrb.mxu1 %v1386_v1  ;;  %1461 = vmatpush.msrb.mxu2 %v1402_v39 }
 0x145   :  { %1423 = vmatpush.msrb.mxu0 %v1368_v20 }
 0x146   :  { %1442 = vmatpush.msrb.mxu1 %v1385_v60  ;;  %1462 = vmatpush.msrb.mxu2 %v1401_v40 }
 0x147   :  { %1424 = vmatpush.msrb.mxu0 %v1367_v3 }
 0x148   :  { %1443 = vmatpush.msrb.mxu1 %v1384_v46  ;;  %1463 = vmatpush.msrb.mxu2 %v1400_v42 }
 0x149   :  { %1425 = vmatpush.msrb.mxu0 %v1366_v5  ;;  %v1056_v61 = vpop.f32.mrf.mxu0 }
 0x14a   :  { %v1057_v9 = vadd.f32 %v1056_v61, %v1037_v7  ;;  %1444 = vmatpush.msrb.mxu1 %v1383_v6  ;;  %1464 = vmatpush.msrb.mxu2 %v1399_v43 }
 0x14b   :  { %1426 = vmatpush.msrb.mxu0 %v1365_v50 }
 0x14c   :  { %v1076_v11 = vpop.f32.mrf.mxu1  ;;  %1445 = vmatpush.msrb.mxu1 %v1382_v21  ;;  %1465 = vmatpush.msrb.mxu2 %v1398_v51 }
 0x14d   :  { %1427 = vmatpush.msrb.mxu0 %v1364_v8  ;;  %v1077_v32 = vadd.f32 %v1076_v11, %v1057_v9 }
 0x14e   :  { %1446 = vmatpush.msrb.mxu1 %v1381_v47  ;;  %1466 = vmatpush.msrb.mxu2 %v1397_v33 }
 0x14f   :  { %1428 = vmatpush.msrb.mxu0 %v1363_v27  ;;  %v1096_v17 = vpop.f32.mrf.mxu2 }
 0x150   :  { %v1097_v22 = vadd.f32 %v1096_v17, %v1077_v32  ;;  %1447 = vmatpush.msrb.mxu1 %v1380_v12  ;;  %1467 = vmatpush.msrb.mxu2 %v1396_v34 }
 0x151   :  { %1429 = vmatpush.msrb.mxu0 %v1362_v15 }
 0x152   :  { %1430 = vmatmul.f32.vlgmr.msrb.gmra.mxu0 %v1359_v18  ;;  %v1116_v25 = vpop.f32.mrf.mxu3  ;;  %1448 = vmatpush.msrb.mxu1 %v1379_v10 }
 0x153   :  { %v1117_v28 = vadd.f32 %v1116_v25, %v1097_v22  ;;  %1468 = vmatpush.msrb.mxu2 %v1395_v55 }
 0x154   :  { %1449 = vmatpush.msrb.mxu1 %v1378_v23 }
 0x155   :  { %v1360_v29 = vmax.f32 %v1117_v28, 0.0  ;;  %1469 = vmatpush.msrb.mxu2 %v1394_v58 }
 0x157   :  { %1450 = vmatmul.f32.vlgmr.msrb.gmra.mxu1 %v1360_v29 }
 0x18b   :  { %v1136_v16 = vpop.f32.mrf.mxu0 }
 0x18c   :  { %v1137_v44 = vadd.f32 %v1136_v16, %v604_v41 }
 0x18e   :  { %v1156_v52 = vpop.f32.mrf.mxu1 }
 0x18f   :  { %v1157_v53 = vadd.f32 %v1156_v52, %v1137_v44 }
 0x191   :  { %v1176_v54 = vpop.f32.mrf.mxu2 }
 0x192   :  { %v1177_v56 = vadd.f32 %v1176_v54, %v1157_v53 }
 0x194   :  { %v1196_v57 = vpop.f32.mrf.mxu3 }
 0x195   :  { %v1197_v59 = vadd.f32 %v1196_v57, %v1177_v56 }
 0x197   :  { %v1216_v62 = vpop.f32.mrf.mxu0 }
 0x198   :  { %v1217_v45 = vadd.f32 %v1216_v62, %v1197_v59 }
 0x19a   :  { %v1236_v63 = vpop.f32.mrf.mxu1 }
 0x19b   :  { %v1237_v13 = vadd.f32 %v1236_v63, %v1217_v45  ;;  %v1256_v14 = vpop.f32.mrf.mxu2 }
 0x19d   :  { %v1257_v0 = vadd.f32 %v1256_v14, %v1237_v13 }
 0x19e   :  { %v1276_v1 = vpop.f32.mrf.mxu3 }
 0x19f   :  { %v1277_v19 = vadd.f32 %v1276_v1, %v1257_v0 }
 0x1af   :  { %v1296_v20 = vpop.f32.mrf.mxu0 }
 0x1b0   :  { %v1297_v60 = vadd.f32 %v1296_v20, %v1277_v19 }
 0x1b1   :  { %v1316_v2 = vpop.f32.mrf.mxu1 }
 0x1b2   :  { %v1317_v3 = vadd.f32 %v1316_v2, %v1297_v60 }
 0x1b5   :  { %v1336_v48 = vpop.f32.mrf.mxu2 }
 0x1b6   :  { %v1337_v46 = vadd.f32 %v1336_v48, %v1317_v3 }
 0x1b8   :  { %v1356_v4 = vpop.f32.mrf.mxu3 }
 0x1b9   :  { %v1357_v5 = vadd.f32 %v1356_v4, %v1337_v46 }
 0x1bb   :  { %v1361_v6 = vmax.f32 %v1357_v5, 0.0 }
 0x1bd   :  { %1470 = vmatmul.f32.vlgmr.msrb.gmra.mxu2 %v1361_v6 }
 0x1cf   :  { %v1431_v7 = vpop.f32.mrf.mxu0 }
 0x1d0   :  { %v1432_v61 = vadd.f32 %v1493_v49, %v1431_v7 }
 0x1d4   :  { %v1451_v50 = vpop.f32.mrf.mxu1 }
 0x1d5   :  { %v1452_v21 = vadd.f32 %v1451_v50, %v1432_v61 }
 0x240   :  { %v1471_v8 = vpop.f32.mrf.mxu2 }
 0x241   :  { %v1472_v9 = vadd.f32 %v1471_v8, %v1452_v21 }
 0x243   :  { %1475 = vst.msk [vmem:[#allocation2] sm:$0x3] %vm1474_vm0, %v1472_v9 }
 0x244   :  { %1486 = dma.vmem_to_hbm [thread:$0]  %s1482_s25, 32, %s1484_s28, [#allocation3]  }
 0x245   :  { %1526 = dma.done.wait [#allocation3], 32  }
 0x246   :  { %1527 = vsyncadd [#allocation3], 4294967264 }
 0x247   :  { %1491 = vsyncpa [#allocation3], 1 }

</bundles_post_ra>
